<compile_context>
chip_gen: v5e
topology: v5e:2x2
jax: 0.10.0
libtpu: 0.0.40
codegen_flags: <defaults>
</compile_context>

<pallas_src>
import functools

import jax
import jax.numpy as jnp
from jax.experimental import pallas as pl
from jax.experimental.pallas import tpu as pltpu


VMEM_LIMIT = 32 << 20  # conservative: fine on v5e/v6e (128 MiB) and v7x (64 MiB)

# ---------------------------------------------------------------------------
# Static geometry of the 1x28x28 MNIST net
# ---------------------------------------------------------------------------
H_IN = 28                      # input spatial size
H1 = H_IN - 2                  # 26: conv1 output height/width
R = 32                         # padded row stride of the flattened conv grids
H2 = H1 - 2                    # 24: conv2 output height/width
N2 = H2 * R                    # 768: flat conv2 rows / image (incl. junk cols)
S1 = 840                       # padded flat conv1 rows / image
P = (H2 - 3) // 2 + 1          # 11: pooled height/width
POOL_FLAT = P * P              # 121
C1, C2 = 32, 64                # conv channel counts
K2_PAD = 384                   # conv2 slab K: 9*32=288 padded to 3 lane-tiles
K_FC = POOL_FLAT * C2          # 7744
K_FC_PAD = 7808                # fc1 K padded to a multiple of 128
TAP_OFFS = tuple(di * R + dj for di in range(3) for dj in range(3))

# conv2's shifted reads must stay inside each image's conv1 slab (no runtime
# bounds checks on VMEM refs), and the slab must hold the whole 26x32 grid.
assert S1 % 8 == 0 and N2 % 8 == 0
assert S1 >= N2 + 2 * R + 2            # 840 >= 834
assert S1 >= H1 * R                    # 840 >= 832
assert K_FC_PAD % 128 == 0 and K_FC_PAD >= K_FC


def _pick_group(batch):
    # Images per conv grid step; keep >= 2 grid steps so v7x megacore splits.
    for g in (8, 4, 2):
        if batch % g == 0 and batch // g >= 2:
            return g
    return 1


def _row_tile(m):
    for t in (256, 128, 64, 32, 16, 8):
        if m >= t and m % t == 0:
            return t
    return m


# ---------------------------------------------------------------------------
# Kernel 1: conv1 + ReLU + conv2 + ReLU + maxpool(3,2) + flatten
#           (G images per grid step, everything stays in VMEM)
# ---------------------------------------------------------------------------
def _conv_pool_kernel(p1_ref, w1_ref, b1_ref, w2_ref, b2_ref, o_ref,
                      y1_ref, slab_ref, y2_ref, wmax_ref, pool_ref, *, G):
    T = G * N2            # total flat conv2 rows in this block
    T2 = T // 2           # even-column (w) subsampled rows
    HALF = N2 // 2        # per-image stride in the subsampled index space

    # ---- conv1 (+bias, ReLU) for the whole G-image block: one MXU matmul ---
    y1 = jnp.dot(p1_ref[...], w1_ref[...], preferred_element_type=jnp.float32)
    y1_ref[...] = jnp.maximum(y1 + b1_ref[...], 0.0).astype(y1_ref.dtype)

    # ---- build conv2 im2col slab (lanes = tap*32 + cin) with lane-dense
    #      128-wide stores; lanes 288..383 are zero (zero weight rows too) ----
    for g in range(G):
        base = g * S1
        taps = [y1_ref[pl.ds(base + off, N2), :] for off in TAP_OFFS]
        v0 = jnp.concatenate(taps[0:4], axis=1)                    # (N2, 128)
        v1 = jnp.concatenate(taps[4:8], axis=1)                    # (N2, 128)
        v2 = jnp.concatenate(
            [taps[8], jnp.zeros((N2, K2_PAD - 9 * C1), jnp.bfloat16)], axis=1)
        slab_ref[pl.ds(g * N2, N2), 0:128] = v0
        slab_ref[pl.ds(g * N2, N2), 128:256] = v1
        slab_ref[pl.ds(g * N2, N2), 256:K2_PAD] = v2

    # ---- conv2 (+bias, ReLU) as ONE (T, 384) @ (384, 64) MXU matmul --------
    y2 = jnp.dot(slab_ref[...], w2_ref[...], preferred_element_type=jnp.float32)
    y2_ref[pl.ds(0, T), :] = jnp.maximum(y2 + b2_ref[...], 0.0)
    y2_ref[pl.ds(T, 8), :] = jnp.zeros((8, C2), jnp.float32)   # safe overread pad

    # ---- fused 3x3 / stride-2 max-pool (junk columns w>=24 never selected) -
    # (a) 3-wide window max along w (flat row shifts 0, 1, 2)
    wmax_ref[...] = jnp.maximum(
        jnp.maximum(y2_ref[pl.ds(0, T), :], y2_ref[pl.ds(1, T), :]),
        y2_ref[pl.ds(2, T), :])
    # (b) decimate w by 2 and take the 3-wide window max along h
    #     (row shifts 0, R, 2R become 0, 16, 32 in the decimated index space)
    a0 = wmax_ref[pl.ds(0, T2 - R, stride=2), :]
    a1 = wmax_ref[pl.ds(R, T2 - R, stride=2), :]
    a2 = wmax_ref[pl.ds(2 * R, T2 - R, stride=2), :]
    pool_ref[...] = jnp.maximum(jnp.maximum(a0, a1), a2)

    # ---- per-image (h, w, c) flatten and store ------------------------------
    # pooled(g, ph, pw) lives at pool_ref[HALF*g + R*ph + pw] for pw < 11.
    for g in range(G):
        rows = [pool_ref[pl.ds(HALF * g + R * ph, P), :] for ph in range(P)]
        o_ref[g] = jnp.concatenate(rows, axis=0).astype(o_ref.dtype)


def conv_pool(p1, w1, b1, w2, b2, *, batch, group):
    return pl.pallas_call(
        functools.partial(_conv_pool_kernel, G=group),
        out_shape=jax.ShapeDtypeStruct((batch, POOL_FLAT, C2), jnp.bfloat16),
        grid=(batch // group,),
        in_specs=[
            pl.BlockSpec((group * S1, 9), lambda i: (i, 0)),     # conv1 patches
            pl.BlockSpec((9, C1), lambda i: (0, 0)),             # w1
            pl.BlockSpec((1, C1), lambda i: (0, 0)),             # b1
            pl.BlockSpec((K2_PAD, C2), lambda i: (0, 0)),        # w2 (taps, cin)
            pl.BlockSpec((1, C2), lambda i: (0, 0)),             # b2
        ],
        out_specs=pl.BlockSpec((group, POOL_FLAT, C2), lambda i: (i, 0, 0)),
        scratch_shapes=[
            pltpu.VMEM((group * S1, C1), jnp.bfloat16),          # conv1 acts
            pltpu.VMEM((group * N2, K2_PAD), jnp.bfloat16),      # conv2 slab
            pltpu.VMEM((group * N2 + 8, C2), jnp.float32),       # conv2 acts
            pltpu.VMEM((group * N2, C2), jnp.float32),           # w-window max
            pltpu.VMEM((group * N2 // 2 - R, C2), jnp.float32),  # pooled (padded)
        ],
        compiler_params=pltpu.CompilerParams(
            dimension_semantics=("parallel",),
            vmem_limit_bytes=VMEM_LIMIT),
    )(p1, w1, b1, w2, b2)


# ---------------------------------------------------------------------------
# Kernel 2: fc1 + ReLU + fc2 + log_softmax (whole-K, one launch)
# ---------------------------------------------------------------------------
def _mlp_head_kernel(a_ref, wf1_ref, bf1_ref, wf2_ref, bf2_ref, o_ref):
    h = jnp.dot(a_ref[...], wf1_ref[...], preferred_element_type=jnp.float32)
    h = jnp.maximum(h + bf1_ref[...], 0.0)
    z = jnp.dot(h.astype(jnp.bfloat16), wf2_ref[...],
                preferred_element_type=jnp.float32) + bf2_ref[...]
    s = z - jnp.max(z, axis=1, keepdims=True)
    lse = jnp.log(jnp.sum(jnp.exp(s), axis=1, keepdims=True))
    o_ref[...] = (s - lse).astype(o_ref.dtype)


def mlp_head(a, wf1, bf1, wf2, bf2, *, tm):
    m, k = a.shape
    hid = wf1.shape[1]
    n = wf2.shape[1]
    return pl.pallas_call(
        _mlp_head_kernel,
        out_shape=jax.ShapeDtypeStruct((m, n), jnp.float32),
        grid=(m // tm,),
        in_specs=[
            pl.BlockSpec((tm, k), lambda i: (i, 0)),
            pl.BlockSpec((k, hid), lambda i: (0, 0)),
            pl.BlockSpec((1, hid), lambda i: (0, 0)),
            pl.BlockSpec((hid, n), lambda i: (0, 0)),
            pl.BlockSpec((1, n), lambda i: (0, 0)),
        ],
        out_specs=pl.BlockSpec((tm, n), lambda i: (i, 0)),
        compiler_params=pltpu.CompilerParams(
            dimension_semantics=("parallel",),
            vmem_limit_bytes=VMEM_LIMIT),
    )(a, wf1, bf1, wf2, bf2)


# ---------------------------------------------------------------------------
# JAX glue (layout plumbing only)
# ---------------------------------------------------------------------------
def net_forward(x_nchw, params):
    B = x_nchw.shape[0]
    assert x_nchw.shape[1:] == (1, H_IN, H_IN), "Net is hard-wired to 1x28x28"
    x = jnp.transpose(x_nchw, (0, 2, 3, 1)).astype(jnp.bfloat16)   # NHWC

    # conv1 im2col patches on an R(=32)-strided flat grid, zero padded so the
    # conv2 shifted reads in the kernel stay inside each image's slab.
    taps = [x[:, i:i + H1, j:j + H1, :] for i in range(3) for j in range(3)]
    p1 = jnp.stack(taps, axis=-1).reshape(B, H1, H1, 9)
    p1 = jnp.pad(p1, ((0, 0), (0, 0), (0, R - H1), (0, 0)))        # (B,26,32,9)
    p1 = p1.reshape(B, H1 * R, 9)
    p1 = jnp.pad(p1, ((0, 0), (0, S1 - H1 * R), (0, 0)))           # (B,840,9)
    p1 = p1.reshape(B * S1, 9)
    # TODO(synk): build the conv1 patches inside the kernel from the raw image
    # (the 9-lane patch rows are lane-inefficient to DMA); negligible at small B.

    group = _pick_group(B)
    pooled = conv_pool(p1, params["w1"], params["b1"], params["w2"],
                       params["b2"], batch=B, group=group)         # (B,121,64)

    # dropout1 / dropout2: identity at inference.
    flat = pooled.reshape(B, K_FC)                                 # (h, w, c) order
    flat = jnp.pad(flat, ((0, 0), (0, K_FC_PAD - K_FC)))
    return mlp_head(flat, params["wf1"], params["bf1"],
                    params["wf2"], params["bf2"], tm=_row_tile(B))


def init_params(key):
    ks = jax.random.split(key, 8)
    # PyTorch-layout weights first, then repack for the kernels.
    w1 = jax.random.normal(ks[0], (32, 1, 3, 3), jnp.float32) * 0.1
    b1 = jax.random.normal(ks[1], (32,), jnp.float32) * 0.01
    w2 = jax.random.normal(ks[2], (64, 32, 3, 3), jnp.float32) * 0.05
    b2 = jax.random.normal(ks[3], (64,), jnp.float32) * 0.01
    wf1 = jax.random.normal(ks[4], (128, K_FC), jnp.float32) * 0.01
    bf1 = jax.random.normal(ks[5], (128,), jnp.float32) * 0.01
    wf2 = jax.random.normal(ks[6], (10, 128), jnp.float32) * 0.05
    bf2 = jax.random.normal(ks[7], (10,), jnp.float32) * 0.01

    bf16 = jnp.bfloat16
    # conv1: (Cout, 1, 3, 3) -> (9, 32), tap order (kh, kw)
    w1p = w1.reshape(32, 9).T
    # conv2: (Cout, Cin, 3, 3) -> rows = tap*32 + cin, zero-padded 288 -> 384
    w2p = jnp.transpose(w2, (2, 3, 1, 0)).reshape(9 * C1, C2)
    w2p = jnp.pad(w2p, ((0, K2_PAD - 9 * C1), (0, 0)))
    # fc1: PyTorch flatten order is (c, h, w); ours is (h, w, c); permute the
    # weight rows at init (zero runtime cost) and zero-pad K 7744 -> 7808.
    wf1p = jnp.transpose(wf1.reshape(128, C2, P, P), (2, 3, 1, 0)).reshape(K_FC, 128)
    wf1p = jnp.pad(wf1p, ((0, K_FC_PAD - K_FC), (0, 0)))
    wf2p = wf2.T

    return dict(
        w1=w1p.astype(bf16), b1=b1.reshape(1, C1),
        w2=w2p.astype(bf16), b2=b2.reshape(1, C2),
        wf1=wf1p.astype(bf16), bf1=bf1.reshape(1, 128),
        wf2=wf2p.astype(bf16), bf2=bf2.reshape(1, 10),
    )


if __name__ == "__main__":
    key = jax.random.PRNGKey(0)
    kp, kx = jax.random.split(key)
    params = init_params(kp)
    # Spatial size must be 28x28 so the flatten yields fc1's 7744 features.
    x = jax.random.normal(kx, (2, 1, 28, 28), jnp.float32)

    fwd = jax.jit(net_forward)
    out = fwd(x, params)
    jax.block_until_ready(out)

    assert out.shape == (2, 10)
    assert bool(jnp.all(jnp.isfinite(out)))
    # log_softmax rows must exponentiate-and-sum to ~1
    assert bool(jnp.all(jnp.abs(jnp.sum(jnp.exp(out), axis=1) - 1.0) < 1e-3))
    print("KERNEL_OK")
</pallas_src>

<mosaic_0001>
module attributes {stable_mosaic.version = 11 : i64} {
  func.func @_conv_pool_kernel(%arg0: i32, %arg1: memref<840x9xbf16, #tpu.memory_space<vmem>>, %arg2: memref<9x32xbf16, #tpu.memory_space<vmem>>, %arg3: memref<1x32xf32, #tpu.memory_space<vmem>>, %arg4: memref<384x64xbf16, #tpu.memory_space<vmem>>, %arg5: memref<1x64xf32, #tpu.memory_space<vmem>>, %arg6: memref<1x121x64xbf16, #tpu.memory_space<vmem>>, %arg7: memref<840x32xbf16, #tpu.memory_space<vmem>>, %arg8: memref<768x384xbf16, #tpu.memory_space<vmem>>, %arg9: memref<776x64xf32, #tpu.memory_space<vmem>>, %arg10: memref<768x64xf32, #tpu.memory_space<vmem>>, %arg11: memref<352x64xf32, #tpu.memory_space<vmem>>) attributes {dimension_semantics = [#tpu.dimension_semantics<parallel>], iteration_bounds = array<i64: 2>, scalar_prefetch = 0 : i64, scratch_operands = 5 : i64, tpu.core_type = #tpu.core_type<tc>, window_params = [{transform_indices = @transform_0, window_bounds = array<i64: 840, 9>}, {pipeline_mode = #tpu.pipeline_mode<synchronous>, transform_indices = @transform_1, window_bounds = array<i64: 9, 32>}, {pipeline_mode = #tpu.pipeline_mode<synchronous>, transform_indices = @transform_2, window_bounds = array<i64: 1, 32>}, {pipeline_mode = #tpu.pipeline_mode<synchronous>, transform_indices = @transform_3, window_bounds = array<i64: 384, 64>}, {pipeline_mode = #tpu.pipeline_mode<synchronous>, transform_indices = @transform_4, window_bounds = array<i64: 1, 64>}, {transform_indices = @transform_5, window_bounds = array<i64: 1, 121, 64>}]} {
    %c0 = arith.constant 0 : index
    %c0_0 = arith.constant 0 : index
    %0 = vector.load %arg1[%c0, %c0_0] : memref<840x9xbf16, #tpu.memory_space<vmem>>, vector<840x9xbf16>
    %c0_1 = arith.constant 0 : index
    %c0_2 = arith.constant 0 : index
    %1 = vector.load %arg2[%c0_1, %c0_2] : memref<9x32xbf16, #tpu.memory_space<vmem>>, vector<9x32xbf16>
    %cst = arith.constant dense<0.000000e+00> : vector<840x32xf32>
    %2 = tpu.matmul %0, %1, %cst {dimension_numbers = #tpu.dot_dimension_numbers<[1], [0], [0], [1], [0, 0, 1, 1], [], []>} : vector<840x9xbf16>, vector<9x32xbf16>, vector<840x32xf32> -> vector<840x32xf32>
    %c0_3 = arith.constant 0 : index
    %c0_4 = arith.constant 0 : index
    %3 = vector.load %arg3[%c0_3, %c0_4] : memref<1x32xf32, #tpu.memory_space<vmem>>, vector<1x32xf32>
    %4 = vector.broadcast %3 : vector<1x32xf32> to vector<840x32xf32>
    %5 = arith.addf %2, %4 : vector<840x32xf32>
    %cst_5 = arith.constant 0.000000e+00 : f32
    %6 = vector.broadcast %cst_5 : f32 to vector<840x32xf32>
    %7 = arith.maximumf %5, %6 : vector<840x32xf32>
    %8 = arith.truncf %7 : vector<840x32xf32> to vector<840x32xbf16>
    %c0_6 = arith.constant 0 : index
    %c0_7 = arith.constant 0 : index
    %9 = vector.load %arg7[%c0_6, %c0_7] : memref<840x32xbf16, #tpu.memory_space<vmem>>, vector<840x32xbf16>
    tpu.vector_store %arg7[%c0_6, %c0_7], %8 {strides = array<i32>} : memref<840x32xbf16, #tpu.memory_space<vmem>>, vector<840x32xbf16>,
    %c0_8 = arith.constant 0 : index
    %c0_9 = arith.constant 0 : index
    %10 = vector.load %arg7[%c0_8, %c0_9] : memref<840x32xbf16, #tpu.memory_space<vmem>>, vector<768x32xbf16>
    %c1 = arith.constant 1 : index
    %c0_10 = arith.constant 0 : index
    %11 = vector.load %arg7[%c1, %c0_10] : memref<840x32xbf16, #tpu.memory_space<vmem>>, vector<768x32xbf16>
    %c2 = arith.constant 2 : index
    %c0_11 = arith.constant 0 : index
    %12 = vector.load %arg7[%c2, %c0_11] : memref<840x32xbf16, #tpu.memory_space<vmem>>, vector<768x32xbf16>
    %c32 = arith.constant 32 : index
    %c0_12 = arith.constant 0 : index
    %13 = vector.load %arg7[%c32, %c0_12] : memref<840x32xbf16, #tpu.memory_space<vmem>>, vector<768x32xbf16>
    %c33 = arith.constant 33 : index
    %c0_13 = arith.constant 0 : index
    %14 = vector.load %arg7[%c33, %c0_13] : memref<840x32xbf16, #tpu.memory_space<vmem>>, vector<768x32xbf16>
    %c34 = arith.constant 34 : index
    %c0_14 = arith.constant 0 : index
    %15 = vector.load %arg7[%c34, %c0_14] : memref<840x32xbf16, #tpu.memory_space<vmem>>, vector<768x32xbf16>
    %c64 = arith.constant 64 : index
    %c0_15 = arith.constant 0 : index
    %16 = vector.load %arg7[%c64, %c0_15] : memref<840x32xbf16, #tpu.memory_space<vmem>>, vector<768x32xbf16>
    %c65 = arith.constant 65 : index
    %c0_16 = arith.constant 0 : index
    %17 = vector.load %arg7[%c65, %c0_16] : memref<840x32xbf16, #tpu.memory_space<vmem>>, vector<768x32xbf16>
    %c66 = arith.constant 66 : index
    %c0_17 = arith.constant 0 : index
    %18 = vector.load %arg7[%c66, %c0_17] : memref<840x32xbf16, #tpu.memory_space<vmem>>, vector<768x32xbf16>
    %19 = tpu.concatenate %10, %11, %12, %13 in 1 : vector<768x32xbf16>, vector<768x32xbf16>, vector<768x32xbf16>, vector<768x32xbf16> -> vector<768x128xbf16>
    %20 = tpu.concatenate %14, %15, %16, %17 in 1 : vector<768x32xbf16>, vector<768x32xbf16>, vector<768x32xbf16>, vector<768x32xbf16> -> vector<768x128xbf16>
    %cst_18 = arith.constant 0.000000e+00 : bf16
    %21 = vector.broadcast %cst_18 : bf16 to vector<768x96xbf16>
    %22 = tpu.concatenate %18, %21 in 1 : vector<768x32xbf16>, vector<768x96xbf16> -> vector<768x128xbf16>
    %c0_19 = arith.constant 0 : index
    %c0_20 = arith.constant 0 : index
    %23 = vector.load %arg8[%c0_19, %c0_20] : memref<768x384xbf16, #tpu.memory_space<vmem>>, vector<768x128xbf16>
    tpu.vector_store %arg8[%c0_19, %c0_20], %19 {strides = array<i32>} : memref<768x384xbf16, #tpu.memory_space<vmem>>, vector<768x128xbf16>,
    %c0_21 = arith.constant 0 : index
    %c128 = arith.constant 128 : index
    %24 = vector.load %arg8[%c0_21, %c128] : memref<768x384xbf16, #tpu.memory_space<vmem>>, vector<768x128xbf16>
    tpu.vector_store %arg8[%c0_21, %c128], %20 {strides = array<i32>} : memref<768x384xbf16, #tpu.memory_space<vmem>>, vector<768x128xbf16>,
    %c0_22 = arith.constant 0 : index
    %c256 = arith.constant 256 : index
    %25 = vector.load %arg8[%c0_22, %c256] : memref<768x384xbf16, #tpu.memory_space<vmem>>, vector<768x128xbf16>
    tpu.vector_store %arg8[%c0_22, %c256], %22 {strides = array<i32>} : memref<768x384xbf16, #tpu.memory_space<vmem>>, vector<768x128xbf16>,
    %c0_23 = arith.constant 0 : index
    %c0_24 = arith.constant 0 : index
    %26 = vector.load %arg8[%c0_23, %c0_24] : memref<768x384xbf16, #tpu.memory_space<vmem>>, vector<768x384xbf16>
    %c0_25 = arith.constant 0 : index
    %c0_26 = arith.constant 0 : index
    %27 = vector.load %arg4[%c0_25, %c0_26] : memref<384x64xbf16, #tpu.memory_space<vmem>>, vector<384x64xbf16>
    %cst_27 = arith.constant dense<0.000000e+00> : vector<768x64xf32>
    %28 = tpu.matmul %26, %27, %cst_27 {dimension_numbers = #tpu.dot_dimension_numbers<[1], [0], [0], [1], [0, 0, 1, 1], [], []>} : vector<768x384xbf16>, vector<384x64xbf16>, vector<768x64xf32> -> vector<768x64xf32>
    %c0_28 = arith.constant 0 : index
    %c0_29 = arith.constant 0 : index
    %29 = vector.load %arg5[%c0_28, %c0_29] : memref<1x64xf32, #tpu.memory_space<vmem>>, vector<1x64xf32>
    %30 = vector.broadcast %29 : vector<1x64xf32> to vector<768x64xf32>
    %31 = arith.addf %28, %30 : vector<768x64xf32>
    %cst_30 = arith.constant 0.000000e+00 : f32
    %32 = vector.broadcast %cst_30 : f32 to vector<768x64xf32>
    %33 = arith.maximumf %31, %32 : vector<768x64xf32>
    %c0_31 = arith.constant 0 : index
    %c0_32 = arith.constant 0 : index
    %34 = vector.load %arg9[%c0_31, %c0_32] : memref<776x64xf32, #tpu.memory_space<vmem>>, vector<768x64xf32>
    tpu.vector_store %arg9[%c0_31, %c0_32], %33 {strides = array<i32>} : memref<776x64xf32, #tpu.memory_space<vmem>>, vector<768x64xf32>,
    %cst_33 = arith.constant 0.000000e+00 : f32
    %35 = vector.broadcast %cst_33 : f32 to vector<8x64xf32>
    %c768 = arith.constant 768 : index
    %c0_34 = arith.constant 0 : index
    %36 = vector.load %arg9[%c768, %c0_34] : memref<776x64xf32, #tpu.memory_space<vmem>>, vector<8x64xf32>
    tpu.vector_store %arg9[%c768, %c0_34], %35 {strides = array<i32>} : memref<776x64xf32, #tpu.memory_space<vmem>>, vector<8x64xf32>,
    %c0_35 = arith.constant 0 : index
    %c0_36 = arith.constant 0 : index
    %37 = vector.load %arg9[%c0_35, %c0_36] : memref<776x64xf32, #tpu.memory_space<vmem>>, vector<768x64xf32>
    %c1_37 = arith.constant 1 : index
    %c0_38 = arith.constant 0 : index
    %38 = vector.load %arg9[%c1_37, %c0_38] : memref<776x64xf32, #tpu.memory_space<vmem>>, vector<768x64xf32>
    %39 = arith.maximumf %37, %38 : vector<768x64xf32>
    %c2_39 = arith.constant 2 : index
    %c0_40 = arith.constant 0 : index
    %40 = vector.load %arg9[%c2_39, %c0_40] : memref<776x64xf32, #tpu.memory_space<vmem>>, vector<768x64xf32>
    %41 = arith.maximumf %39, %40 : vector<768x64xf32>
    %c0_41 = arith.constant 0 : index
    %c0_42 = arith.constant 0 : index
    %42 = vector.load %arg10[%c0_41, %c0_42] : memref<768x64xf32, #tpu.memory_space<vmem>>, vector<768x64xf32>
    tpu.vector_store %arg10[%c0_41, %c0_42], %41 {strides = array<i32>} : memref<768x64xf32, #tpu.memory_space<vmem>>, vector<768x64xf32>,
    %c0_43 = arith.constant 0 : index
    %c0_44 = arith.constant 0 : index
    %43 = tpu.strided_load %arg10[%c0_43, %c0_44] {strides = array<i32: 2, 1>} : memref<768x64xf32, #tpu.memory_space<vmem>>, vector<352x64xf32>
    %c32_45 = arith.constant 32 : index
    %c0_46 = arith.constant 0 : index
    %44 = tpu.strided_load %arg10[%c32_45, %c0_46] {strides = array<i32: 2, 1>} : memref<768x64xf32, #tpu.memory_space<vmem>>, vector<352x64xf32>
    %c64_47 = arith.constant 64 : index
    %c0_48 = arith.constant 0 : index
    %45 = tpu.strided_load %arg10[%c64_47, %c0_48] {strides = array<i32: 2, 1>} : memref<768x64xf32, #tpu.memory_space<vmem>>, vector<352x64xf32>
    %46 = arith.maximumf %43, %44 : vector<352x64xf32>
    %47 = arith.maximumf %46, %45 : vector<352x64xf32>
    %c0_49 = arith.constant 0 : index
    %c0_50 = arith.constant 0 : index
    %48 = vector.load %arg11[%c0_49, %c0_50] : memref<352x64xf32, #tpu.memory_space<vmem>>, vector<352x64xf32>
    tpu.vector_store %arg11[%c0_49, %c0_50], %47 {strides = array<i32>} : memref<352x64xf32, #tpu.memory_space<vmem>>, vector<352x64xf32>,
    %c0_51 = arith.constant 0 : index
    %c0_52 = arith.constant 0 : index
    %49 = vector.load %arg11[%c0_51, %c0_52] : memref<352x64xf32, #tpu.memory_space<vmem>>, vector<11x64xf32>
    %c32_53 = arith.constant 32 : index
    %c0_54 = arith.constant 0 : index
    %50 = vector.load %arg11[%c32_53, %c0_54] : memref<352x64xf32, #tpu.memory_space<vmem>>, vector<11x64xf32>
    %c64_55 = arith.constant 64 : index
    %c0_56 = arith.constant 0 : index
    %51 = vector.load %arg11[%c64_55, %c0_56] : memref<352x64xf32, #tpu.memory_space<vmem>>, vector<11x64xf32>
    %c96 = arith.constant 96 : index
    %c0_57 = arith.constant 0 : index
    %52 = vector.load %arg11[%c96, %c0_57] : memref<352x64xf32, #tpu.memory_space<vmem>>, vector<11x64xf32>
    %c128_58 = arith.constant 128 : index
    %c0_59 = arith.constant 0 : index
    %53 = vector.load %arg11[%c128_58, %c0_59] : memref<352x64xf32, #tpu.memory_space<vmem>>, vector<11x64xf32>
    %c160 = arith.constant 160 : index
    %c0_60 = arith.constant 0 : index
    %54 = vector.load %arg11[%c160, %c0_60] : memref<352x64xf32, #tpu.memory_space<vmem>>, vector<11x64xf32>
    %c192 = arith.constant 192 : index
    %c0_61 = arith.constant 0 : index
    %55 = vector.load %arg11[%c192, %c0_61] : memref<352x64xf32, #tpu.memory_space<vmem>>, vector<11x64xf32>
    %c224 = arith.constant 224 : index
    %c0_62 = arith.constant 0 : index
    %56 = vector.load %arg11[%c224, %c0_62] : memref<352x64xf32, #tpu.memory_space<vmem>>, vector<11x64xf32>
    %c256_63 = arith.constant 256 : index
    %c0_64 = arith.constant 0 : index
    %57 = vector.load %arg11[%c256_63, %c0_64] : memref<352x64xf32, #tpu.memory_space<vmem>>, vector<11x64xf32>
    %c288 = arith.constant 288 : index
    %c0_65 = arith.constant 0 : index
    %58 = vector.load %arg11[%c288, %c0_65] : memref<352x64xf32, #tpu.memory_space<vmem>>, vector<11x64xf32>
    %c320 = arith.constant 320 : index
    %c0_66 = arith.constant 0 : index
    %59 = vector.load %arg11[%c320, %c0_66] : memref<352x64xf32, #tpu.memory_space<vmem>>, vector<11x64xf32>
    %60 = tpu.concatenate %49, %50, %51, %52, %53, %54, %55, %56, %57, %58, %59 in 0 : vector<11x64xf32>, vector<11x64xf32>, vector<11x64xf32>, vector<11x64xf32>, vector<11x64xf32>, vector<11x64xf32>, vector<11x64xf32>, vector<11x64xf32>, vector<11x64xf32>, vector<11x64xf32>, vector<11x64xf32> -> vector<121x64xf32>
    %61 = arith.truncf %60 : vector<121x64xf32> to vector<121x64xbf16>
    %c0_67 = arith.constant 0 : index
    %c0_68 = arith.constant 0 : index
    %c0_69 = arith.constant 0 : index
    %62 = vector.load %arg6[%c0_67, %c0_68, %c0_69] : memref<1x121x64xbf16, #tpu.memory_space<vmem>>, vector<1x121x64xbf16>
    %63 = vector.shape_cast %62 : vector<1x121x64xbf16> to vector<121x64xbf16>
    %64 = vector.shape_cast %61 : vector<121x64xbf16> to vector<1x121x64xbf16>
    tpu.vector_store %arg6[%c0_67, %c0_68, %c0_69], %64 {strides = array<i32>} : memref<1x121x64xbf16, #tpu.memory_space<vmem>>, vector<1x121x64xbf16>,
    return
  }
  func.func @transform_0(%arg0: i32) -> (i32, i32) {
    %c0_i32 = arith.constant 0 : i32
    %c0_i32_0 = arith.constant 0 : i32
    return %arg0, %c0_i32 : i32, i32
  }
  func.func @transform_1(%arg0: i32) -> (i32, i32) {
    %c0_i32 = arith.constant 0 : i32
    %c0_i32_0 = arith.constant 0 : i32
    %c0_i32_1 = arith.constant 0 : i32
    return %c0_i32, %c0_i32_0 : i32, i32
  }
  func.func @transform_2(%arg0: i32) -> (i32, i32) {
    %c0_i32 = arith.constant 0 : i32
    %c0_i32_0 = arith.constant 0 : i32
    %c0_i32_1 = arith.constant 0 : i32
    return %c0_i32, %c0_i32_0 : i32, i32
  }
  func.func @transform_3(%arg0: i32) -> (i32, i32) {
    %c0_i32 = arith.constant 0 : i32
    %c0_i32_0 = arith.constant 0 : i32
    %c0_i32_1 = arith.constant 0 : i32
    return %c0_i32, %c0_i32_0 : i32, i32
  }
  func.func @transform_4(%arg0: i32) -> (i32, i32) {
    %c0_i32 = arith.constant 0 : i32
    %c0_i32_0 = arith.constant 0 : i32
    %c0_i32_1 = arith.constant 0 : i32
    return %c0_i32, %c0_i32_0 : i32, i32
  }
  func.func @transform_5(%arg0: i32) -> (i32, i32, i32) {
    %c0_i32 = arith.constant 0 : i32
    %c0_i32_0 = arith.constant 0 : i32
    %c0_i32_1 = arith.constant 0 : i32
    return %arg0, %c0_i32, %c0_i32_0 : i32, i32, i32
  }
}

module attributes {stable_mosaic.version = 11 : i64} {
  func.func @_mlp_head_kernel(%arg0: i32, %arg1: memref<2x7808xbf16, #tpu.memory_space<vmem>>, %arg2: memref<7808x128xbf16, #tpu.memory_space<vmem>>, %arg3: memref<1x128xf32, #tpu.memory_space<vmem>>, %arg4: memref<128x10xbf16, #tpu.memory_space<vmem>>, %arg5: memref<1x10xf32, #tpu.memory_space<vmem>>, %arg6: memref<2x10xf32, #tpu.memory_space<vmem>>) attributes {dimension_semantics = [#tpu.dimension_semantics<parallel>], iteration_bounds = array<i64: 1>, scalar_prefetch = 0 : i64, scratch_operands = 0 : i64, tpu.core_type = #tpu.core_type<tc>, window_params = [{transform_indices = @transform_0, window_bounds = array<i64: 2, 7808>}, {pipeline_mode = #tpu.pipeline_mode<synchronous>, transform_indices = @transform_1, window_bounds = array<i64: 7808, 128>}, {pipeline_mode = #tpu.pipeline_mode<synchronous>, transform_indices = @transform_2, window_bounds = array<i64: 1, 128>}, {pipeline_mode = #tpu.pipeline_mode<synchronous>, transform_indices = @transform_3, window_bounds = array<i64: 128, 10>}, {pipeline_mode = #tpu.pipeline_mode<synchronous>, transform_indices = @transform_4, window_bounds = array<i64: 1, 10>}, {transform_indices = @transform_5, window_bounds = array<i64: 2, 10>}]} {
    %c0 = arith.constant 0 : index
    %c0_0 = arith.constant 0 : index
    %0 = vector.load %arg1[%c0, %c0_0] : memref<2x7808xbf16, #tpu.memory_space<vmem>>, vector<2x7808xbf16>
    %c0_1 = arith.constant 0 : index
    %c0_2 = arith.constant 0 : index
    %1 = vector.load %arg2[%c0_1, %c0_2] : memref<7808x128xbf16, #tpu.memory_space<vmem>>, vector<7808x128xbf16>
    %cst = arith.constant dense<0.000000e+00> : vector<2x128xf32>
    %2 = tpu.matmul %0, %1, %cst {dimension_numbers = #tpu.dot_dimension_numbers<[1], [0], [0], [1], [0, 0, 1, 1], [], []>} : vector<2x7808xbf16>, vector<7808x128xbf16>, vector<2x128xf32> -> vector<2x128xf32>
    %c0_3 = arith.constant 0 : index
    %c0_4 = arith.constant 0 : index
    %3 = vector.load %arg3[%c0_3, %c0_4] : memref<1x128xf32, #tpu.memory_space<vmem>>, vector<1x128xf32>
    %4 = vector.broadcast %3 : vector<1x128xf32> to vector<2x128xf32>
    %5 = arith.addf %2, %4 : vector<2x128xf32>
    %cst_5 = arith.constant 0.000000e+00 : f32
    %6 = vector.broadcast %cst_5 : f32 to vector<2x128xf32>
    %7 = arith.maximumf %5, %6 : vector<2x128xf32>
    %8 = arith.truncf %7 : vector<2x128xf32> to vector<2x128xbf16>
    %c0_6 = arith.constant 0 : index
    %c0_7 = arith.constant 0 : index
    %9 = vector.load %arg4[%c0_6, %c0_7] : memref<128x10xbf16, #tpu.memory_space<vmem>>, vector<128x10xbf16>
    %cst_8 = arith.constant dense<0.000000e+00> : vector<2x10xf32>
    %10 = tpu.matmul %8, %9, %cst_8 {dimension_numbers = #tpu.dot_dimension_numbers<[1], [0], [0], [1], [0, 0, 1, 1], [], []>} : vector<2x128xbf16>, vector<128x10xbf16>, vector<2x10xf32> -> vector<2x10xf32>
    %c0_9 = arith.constant 0 : index
    %c0_10 = arith.constant 0 : index
    %11 = vector.load %arg5[%c0_9, %c0_10] : memref<1x10xf32, #tpu.memory_space<vmem>>, vector<1x10xf32>
    %12 = vector.broadcast %11 : vector<1x10xf32> to vector<2x10xf32>
    %13 = arith.addf %10, %12 : vector<2x10xf32>
    %cst_11 = arith.constant dense<0xFF800000> : vector<2xf32>
    %14 = vector.multi_reduction <maximumf>, %13, %cst_11 [1] : vector<2x10xf32> to vector<2xf32>
    %15 = vector.shape_cast %14 : vector<2xf32> to vector<2x1xf32>
    %16 = vector.broadcast %15 : vector<2x1xf32> to vector<2x10xf32>
    %17 = arith.subf %13, %16 : vector<2x10xf32>
    %18 = math.exp %17 : vector<2x10xf32>
    %cst_12 = arith.constant dense<0.000000e+00> : vector<2xf32>
    %19 = vector.multi_reduction <add>, %18, %cst_12 [1] : vector<2x10xf32> to vector<2xf32>
    %20 = vector.shape_cast %19 : vector<2xf32> to vector<2x1xf32>
    %21 = math.log %20 : vector<2x1xf32>
    %22 = vector.broadcast %21 : vector<2x1xf32> to vector<2x10xf32>
    %23 = arith.subf %17, %22 : vector<2x10xf32>
    %c0_13 = arith.constant 0 : index
    %c0_14 = arith.constant 0 : index
    %24 = vector.load %arg6[%c0_13, %c0_14] : memref<2x10xf32, #tpu.memory_space<vmem>>, vector<2x10xf32>
    tpu.vector_store %arg6[%c0_13, %c0_14], %23 {strides = array<i32>} : memref<2x10xf32, #tpu.memory_space<vmem>>, vector<2x10xf32>,
    return
  }
  func.func @transform_0(%arg0: i32) -> (i32, i32) {
    %c0_i32 = arith.constant 0 : i32
    %c0_i32_0 = arith.constant 0 : i32
    return %arg0, %c0_i32 : i32, i32
  }
  func.func @transform_1(%arg0: i32) -> (i32, i32) {
    %c0_i32 = arith.constant 0 : i32
    %c0_i32_0 = arith.constant 0 : i32
    %c0_i32_1 = arith.constant 0 : i32
    return %c0_i32, %c0_i32_0 : i32, i32
  }
  func.func @transform_2(%arg0: i32) -> (i32, i32) {
    %c0_i32 = arith.constant 0 : i32
    %c0_i32_0 = arith.constant 0 : i32
    %c0_i32_1 = arith.constant 0 : i32
    return %c0_i32, %c0_i32_0 : i32, i32
  }
  func.func @transform_3(%arg0: i32) -> (i32, i32) {
    %c0_i32 = arith.constant 0 : i32
    %c0_i32_0 = arith.constant 0 : i32
    %c0_i32_1 = arith.constant 0 : i32
    return %c0_i32, %c0_i32_0 : i32, i32
  }
  func.func @transform_4(%arg0: i32) -> (i32, i32) {
    %c0_i32 = arith.constant 0 : i32
    %c0_i32_0 = arith.constant 0 : i32
    %c0_i32_1 = arith.constant 0 : i32
    return %c0_i32, %c0_i32_0 : i32, i32
  }
  func.func @transform_5(%arg0: i32) -> (i32, i32) {
    %c0_i32 = arith.constant 0 : i32
    %c0_i32_0 = arith.constant 0 : i32
    return %arg0, %c0_i32 : i32, i32
  }
}

</mosaic_0001>

<bundles_post_ra>
// kernel: net_forward.3
= control target key start
LH: loop header
LB: loop body
LE: loop exit
PB: predicated region body
PF: predicated region fallthrough
CT: control target
= control target key end

     0   :  { %s9073_s0 = inlined_call_operand.vmem [shape: bf16[2,7808], index: 0, kind: input, shape index: {}]   ;;  %s9074_s1 = inlined_call_operand.vmem [shape: bf16[7808,128], index: 1, kind: input, shape index: {}]   ;;  %s9075_s2 = inlined_call_operand.vmem [shape: f32[1,128], index: 2, kind: input, shape index: {}]   ;;  %s9076_s3 = inlined_call_operand.vmem [shape: bf16[128,10], index: 3, kind: input, shape index: {}]   ;;  %s9077_s4 = inlined_call_operand.vmem [shape: f32[1,10], index: 4, kind: input, shape index: {}]   ;;  %s9078_s5 = inlined_call_operand.hbm [shape: f32[2,10], index: 5, kind: output, shape index: {}]  }
   0x1   :  { %v6972_v0 = vld [vmem:[%s9074_s1 + $0x38] sm:$0xff]  ;;  %v6971_v4 = vld [vmem:[%s9074_s1 + $0x30] sm:$0xff]  ;;  %v6970_v8 = vld [vmem:[%s9074_s1 + $0x28] sm:$0xff] }
   0x2   :  { %v6988_v1 = vld [vmem:[%s9074_s1 + $0xb8] sm:$0xff]  ;;  %4075 = vmatpush.bf16.msra.mxu0 %v6972_v0  ;;  %v6987_v5 = vld [vmem:[%s9074_s1 + $0xb0] sm:$0xff]  ;;  %v6986_v9 = vld [vmem:[%s9074_s1 + $0xa8] sm:$0xff] }
   0x3   :  { %v6980_v2 = vld [vmem:[%s9074_s1 + $0x78] sm:$0xff]  ;;  %4101 = vmatpush.bf16.msra.mxu2 %v6988_v1  ;;  %v6979_v6 = vld [vmem:[%s9074_s1 + $0x70] sm:$0xff]  ;;  %v6978_v10 = vld [vmem:[%s9074_s1 + $0x68] sm:$0xff] }
   0x4   :  { %v6996_v3 = vld [vmem:[%s9074_s1 + $0xf8] sm:$0xff]  ;;  %4088 = vmatpush.bf16.msra.mxu1 %v6980_v2  ;;  %v6995_v7 = vld [vmem:[%s9074_s1 + $0xf0] sm:$0xff]  ;;  %v6994_v11 = vld [vmem:[%s9074_s1 + $0xe8] sm:$0xff] }
   0x5   :  { %4114 = vmatpush.bf16.msra.mxu3 %v6996_v3  ;;  %v6969_v12 = vld [vmem:[%s9074_s1 + $0x20] sm:$0xff]  ;;  %v6968_v16 = vld [vmem:[%s9074_s1 + $0x18] sm:$0xff]  ;;  %v6967_v21 = vld [vmem:[%s9074_s1 + $0x10] sm:$0xff] }
   0x6   :  { %4076 = vmatpush.bf16.msra.mxu0 %v6971_v4  ;;  %v6985_v13 = vld [vmem:[%s9074_s1 + $0xa0] sm:$0xff]  ;;  %v6984_v17 = vld [vmem:[%s9074_s1 + $0x98] sm:$0xff]  ;;  %v6983_v22 = vld [vmem:[%s9074_s1 + $0x90] sm:$0xff] }
   0x7   :  { %4102 = vmatpush.bf16.msra.mxu2 %v6987_v5  ;;  %v6977_v14 = vld [vmem:[%s9074_s1 + $0x60] sm:$0xff]  ;;  %v6976_v18 = vld [vmem:[%s9074_s1 + $0x58] sm:$0xff]  ;;  %v6975_v23 = vld [vmem:[%s9074_s1 + $0x50] sm:$0xff] }
   0x8   :  { %4089 = vmatpush.bf16.msra.mxu1 %v6979_v6  ;;  %v6993_v15 = vld [vmem:[%s9074_s1 + $0xe0] sm:$0xff]  ;;  %v6992_v19 = vld [vmem:[%s9074_s1 + $0xd8] sm:$0xff]  ;;  %v6991_v24 = vld [vmem:[%s9074_s1 + $0xd0] sm:$0xff] }
   0x9   :  { %4115 = vmatpush.bf16.msra.mxu3 %v6995_v7  ;;  %v21_v20 = vld [vmem:[%s9073_s0] sm:$0xff] }
   0xa   :  { %4077 = vmatpush.bf16.msra.mxu0 %v6970_v8  ;;  %1010 = vst [vmem:[#allocation1] ss:$9 sm:$0xff] %v21_v20 }
   0xb   :  { %4103 = vmatpush.bf16.msra.mxu2 %v6986_v9 }
   0xc   :  { %4090 = vmatpush.bf16.msra.mxu1 %v6978_v10 }
   0xd   :  { %4116 = vmatpush.bf16.msra.mxu3 %v6994_v11 }
   0xe   :  { %4078 = vmatpush.bf16.msra.mxu0 %v6969_v12 }
   0xf   :  { %4104 = vmatpush.bf16.msra.mxu2 %v6985_v13 }
  0x10   :  { %4091 = vmatpush.bf16.msra.mxu1 %v6977_v14 }
  0x11   :  { %4117 = vmatpush.bf16.msra.mxu3 %v6993_v15 }
  0x12   :  { %4079 = vmatpush.bf16.msra.mxu0 %v6968_v16 }
  0x13   :  { %4105 = vmatpush.bf16.msra.mxu2 %v6984_v17 }
  0x14   :  { %4092 = vmatpush.bf16.msra.mxu1 %v6976_v18 }
  0x15   :  { %4118 = vmatpush.bf16.msra.mxu3 %v6992_v19 }
  0x16   :  { %10 = vsyncpa [#allocation3], 0  ;;  %4080 = vmatpush.bf16.msra.mxu0 %v6967_v21  ;;  %v6966_v25 = vld [vmem:[%s9074_s1 + $0x8] sm:$0xff]  ;;  %v6965_v29 = vld [vmem:[%s9074_s1] sm:$0xff]  ;;  %vm4951_vm0 = vcmask 74752   ;;  %s7494_s24 = smov [#allocation2]  }
  0x17   :  { %4106 = vmatpush.bf16.msra.mxu2 %v6983_v22  ;;  %v6982_v26 = vld [vmem:[%s9074_s1 + $0x88] sm:$0xff]  ;;  %v6981_v30 = vld [vmem:[%s9074_s1 + $0x80] sm:$0xff]  ;;  %v7004_v31 = vld [vmem:[%s9074_s1 + $0x138] sm:$0xff]  ;;  %s4972_s27 = sshll.u32 %s9078_s5, 4  ;;  %s4973_s27 = int_to_ptr.hbm [resolvable:$true] %s4972_s27 }
  0x18   :  { %4093 = vmatpush.bf16.msra.mxu1 %v6975_v23  ;;  %v6974_v27 = vld [vmem:[%s9074_s1 + $0x48] sm:$0xff]  ;;  %v7020_v32 = vld [vmem:[%s9074_s1 + $0x1b8] sm:$0xff]  ;;  %v6973_v33 = vld [vmem:[%s9074_s1 + $0x40] sm:$0xff] }
  0x19   :  { %4119 = vmatpush.bf16.msra.mxu3 %v6991_v24  ;;  %v6990_v28 = vld [vmem:[%s9074_s1 + $0xc8] sm:$0xff]  ;;  %v6989_v34 = vld [vmem:[%s9074_s1 + $0xc0] sm:$0xff]  ;;  %v7012_v35 = vld [vmem:[%s9074_s1 + $0x178] sm:$0xff] }
  0x1a   :  { %4081 = vmatpush.bf16.msra.mxu0 %v6966_v25  ;;  %v7028_v36 = vld [vmem:[%s9074_s1 + $0x1f8] sm:$0xff]  ;;  %v7003_v37 = vld [vmem:[%s9074_s1 + $0x130] sm:$0xff]  ;;  %v1011_v40 = vld [vmem:[#allocation1] sm:$0xff] }
  0x1b   :  { %4107 = vmatpush.bf16.msra.mxu2 %v6982_v26  ;;  %v7019_v38 = vld [vmem:[%s9074_s1 + $0x1b0] sm:$0xff]  ;;  %v1014_v43 = vld [vmem:[#allocation1 + $0x1b] sm:$0xff]  ;;  %v7002_v45 = vld [vmem:[%s9074_s1 + $0x128] sm:$0xff] }
  0x1c   :  { %4094 = vmatpush.bf16.msra.mxu1 %v6974_v27  ;;  %v1013_v39 = vld [vmem:[#allocation1 + $0x12] sm:$0xff]  ;;  %v1012_v44 = vld [vmem:[#allocation1 + $0x9] sm:$0xff]  ;;  %v7658_v49 = vld [vmem:[#allocation1 + $0x3f] sm:$0xff] }
  0x1d   :  { %4120 = vmatpush.bf16.msra.mxu3 %v6990_v28  ;;  %v7011_v41 = vld [vmem:[%s9074_s1 + $0x170] sm:$0xff]  ;;  %v7018_v46 = vld [vmem:[%s9074_s1 + $0x1a8] sm:$0xff]  ;;  %v7001_v54 = vld [vmem:[%s9074_s1 + $0x120] sm:$0xff] }
  0x1e   :  { %4082 = vmatpush.bf16.msra.mxu0 %v6965_v29  ;;  %v7027_v42 = vld [vmem:[%s9074_s1 + $0x1f0] sm:$0xff]  ;;  %v7656_v48 = vld [vmem:[#allocation1 + $0x24] sm:$0xff]  ;;  %v7000_v58 = vld [vmem:[%s9074_s1 + $0x118] sm:$0xff] }
  0x1f   :  { %4108 = vmatpush.bf16.msra.mxu2 %v6981_v30  ;;  %v7654_v47 = vld [vmem:[#allocation1 + $0x36] sm:$0xff]  ;;  %v22_v50 = vld [vmem:[%s9073_s0 + $0x8] sm:$0xff]  ;;  %v7017_v55 = vld [vmem:[%s9074_s1 + $0x1a0] sm:$0xff] }
  0x20   :  { %4095 = vmatpush.bf16.msra.mxu1 %v6973_v33  ;;  %v7663_v51 = vld [vmem:[#allocation1 + $0x2d] sm:$0xff]  ;;  %v7009_v56 = vld [vmem:[%s9074_s1 + $0x160] sm:$0xff]  ;;  %v7016_v59 = vld [vmem:[%s9074_s1 + $0x198] sm:$0xff] }
  0x21   :  { %4121 = vmatpush.bf16.msra.mxu3 %v6989_v34  ;;  %4083 = vmatmul.bf16.vlgmr.msra.gmra.mxu0 %v1011_v40  ;;  %v7010_v52 = vld [vmem:[%s9074_s1 + $0x168] sm:$0xff]  ;;  %1020 = vst [vmem:[#allocation1] ss:$9 sm:$0xff] %v22_v50  ;;  %v7025_v57 = vld [vmem:[%s9074_s1 + $0x1e0] sm:$0xff]  ;;  %v7008_v60 = vld [vmem:[%s9074_s1 + $0x158] sm:$0xff] }
  0x22   :  { %4127 = vmatpush.bf16.msrb.mxu0 %v7004_v31  ;;  %4109 = vmatmul.bf16.vlgmr.msra.gmra.mxu2 %v1013_v39  ;;  %v7026_v53 = vld [vmem:[%s9074_s1 + $0x1e8] sm:$0xff]  ;;  %v7024_v61 = vld [vmem:[%s9074_s1 + $0x1d8] sm:$0xff]  ;;  %v6999_v62 = vld [vmem:[%s9074_s1 + $0x110] sm:$0xff] }
  0x23   :  { %4153 = vmatpush.bf16.msrb.mxu2 %v7020_v32  ;;  %4096 = vmatmul.bf16.vlgmr.msra.gmra.mxu1 %v1012_v44  ;;  %v7015_v63 = vld [vmem:[%s9074_s1 + $0x190] sm:$0xff]  ;;  %v6998_v2 = vld [vmem:[%s9074_s1 + $0x108] sm:$0xff]  ;;  %v6997_v6 = vld [vmem:[%s9074_s1 + $0x100] sm:$0xff] }
  0x24   :  { %4140 = vmatpush.bf16.msrb.mxu1 %v7012_v35  ;;  %4122 = vmatmul.bf16.vlgmr.msra.gmra.mxu3 %v1014_v43  ;;  %v7007_v0 = vld [vmem:[%s9074_s1 + $0x150] sm:$0xff]  ;;  %v7014_v3 = vld [vmem:[%s9074_s1 + $0x188] sm:$0xff]  ;;  %v7013_v7 = vld [vmem:[%s9074_s1 + $0x180] sm:$0xff] }
  0x25   :  { %4166 = vmatpush.bf16.msrb.mxu3 %v7028_v36  ;;  %v7023_v1 = vld [vmem:[%s9074_s1 + $0x1d0] sm:$0xff]  ;;  %v7006_v4 = vld [vmem:[%s9074_s1 + $0x148] sm:$0xff]  ;;  %v7036_v8 = vld [vmem:[%s9074_s1 + $0x238] sm:$0xff] }
  0x26   :  { %4128 = vmatpush.bf16.msrb.mxu0 %v7003_v37  ;;  %v7022_v5 = vld [vmem:[%s9074_s1 + $0x1c8] sm:$0xff]  ;;  %v7052_v9 = vld [vmem:[%s9074_s1 + $0x2b8] sm:$0xff]  ;;  %v7005_v10 = vld [vmem:[%s9074_s1 + $0x140] sm:$0xff] }
  0x27   :  { %4154 = vmatpush.bf16.msrb.mxu2 %v7019_v38  ;;  %v7021_v11 = vld [vmem:[%s9074_s1 + $0x1c0] sm:$0xff]  ;;  %v7044_v12 = vld [vmem:[%s9074_s1 + $0x278] sm:$0xff]  ;;  %v7035_v14 = vld [vmem:[%s9074_s1 + $0x230] sm:$0xff] }
  0x28   :  { %4141 = vmatpush.bf16.msrb.mxu1 %v7011_v41  ;;  %v7060_v13 = vld [vmem:[%s9074_s1 + $0x2f8] sm:$0xff]  ;;  %v7051_v15 = vld [vmem:[%s9074_s1 + $0x2b0] sm:$0xff]  ;;  %v7034_v18 = vld [vmem:[%s9074_s1 + $0x228] sm:$0xff] }
  0x29   :  { %4167 = vmatpush.bf16.msrb.mxu3 %v7027_v42  ;;  %v7043_v16 = vld [vmem:[%s9074_s1 + $0x270] sm:$0xff]  ;;  %v7050_v19 = vld [vmem:[%s9074_s1 + $0x2a8] sm:$0xff]  ;;  %v7033_v22 = vld [vmem:[%s9074_s1 + $0x220] sm:$0xff] }
  0x2a   :  { %4129 = vmatpush.bf16.msrb.mxu0 %v7002_v45  ;;  %v7059_v17 = vld [vmem:[%s9074_s1 + $0x2f0] sm:$0xff]  ;;  %v7042_v20 = vld [vmem:[%s9074_s1 + $0x268] sm:$0xff]  ;;  %v7049_v23 = vld [vmem:[%s9074_s1 + $0x2a0] sm:$0xff] }
  0x2b   :  { %4155 = vmatpush.bf16.msrb.mxu2 %v7018_v46  ;;  %v7058_v21 = vld [vmem:[%s9074_s1 + $0x2e8] sm:$0xff]  ;;  %v7041_v24 = vld [vmem:[%s9074_s1 + $0x260] sm:$0xff]  ;;  %v7032_v26 = vld [vmem:[%s9074_s1 + $0x218] sm:$0xff] }
  0x2c   :  { %4142 = vmatpush.bf16.msrb.mxu1 %v7010_v52  ;;  %v7057_v25 = vld [vmem:[%s9074_s1 + $0x2e0] sm:$0xff]  ;;  %v7048_v27 = vld [vmem:[%s9074_s1 + $0x298] sm:$0xff]  ;;  %v7031_v30 = vld [vmem:[%s9074_s1 + $0x210] sm:$0xff] }
  0x2d   :  { %4168 = vmatpush.bf16.msrb.mxu3 %v7026_v53  ;;  %v7040_v28 = vld [vmem:[%s9074_s1 + $0x258] sm:$0xff]  ;;  %v7047_v31 = vld [vmem:[%s9074_s1 + $0x290] sm:$0xff]  ;;  %v7030_v34 = vld [vmem:[%s9074_s1 + $0x208] sm:$0xff] }
  0x2e   :  { %4130 = vmatpush.bf16.msrb.mxu0 %v7001_v54  ;;  %v7056_v29 = vld [vmem:[%s9074_s1 + $0x2d8] sm:$0xff]  ;;  %v7039_v32 = vld [vmem:[%s9074_s1 + $0x250] sm:$0xff]  ;;  %v7046_v35 = vld [vmem:[%s9074_s1 + $0x288] sm:$0xff] }
  0x2f   :  { %4156 = vmatpush.bf16.msrb.mxu2 %v7017_v55  ;;  %v7055_v33 = vld [vmem:[%s9074_s1 + $0x2d0] sm:$0xff]  ;;  %v7038_v36 = vld [vmem:[%s9074_s1 + $0x248] sm:$0xff]  ;;  %v7029_v38 = vld [vmem:[%s9074_s1 + $0x200] sm:$0xff] }
  0x30   :  { %4143 = vmatpush.bf16.msrb.mxu1 %v7009_v56  ;;  %v7054_v37 = vld [vmem:[%s9074_s1 + $0x2c8] sm:$0xff]  ;;  %v7045_v39 = vld [vmem:[%s9074_s1 + $0x280] sm:$0xff]  ;;  %v7068_v40 = vld [vmem:[%s9074_s1 + $0x338] sm:$0xff] }
  0x31   :  { %4169 = vmatpush.bf16.msrb.mxu3 %v7025_v57  ;;  %v7084_v41 = vld [vmem:[%s9074_s1 + $0x3b8] sm:$0xff]  ;;  %v7037_v42 = vld [vmem:[%s9074_s1 + $0x240] sm:$0xff]  ;;  %v7067_v50 = vld [vmem:[%s9074_s1 + $0x330] sm:$0xff] }
  0x32   :  { %4131 = vmatpush.bf16.msrb.mxu0 %v7000_v58  ;;  %v7053_v43 = vld [vmem:[%s9074_s1 + $0x2c0] sm:$0xff]  ;;  %v7076_v44 = vld [vmem:[%s9074_s1 + $0x378] sm:$0xff]  ;;  %v7075_v52 = vld [vmem:[%s9074_s1 + $0x370] sm:$0xff] }
  0x33   :  { %4157 = vmatpush.bf16.msrb.mxu2 %v7016_v59  ;;  %v1021_v45 = vld [vmem:[#allocation1] sm:$0xff]  ;;  %v1023_v46 = vld [vmem:[#allocation1 + $0x12] sm:$0xff]  ;;  %v7066_v54 = vld [vmem:[%s9074_s1 + $0x328] sm:$0xff] }
  0x34   :  { %4144 = vmatpush.bf16.msrb.mxu1 %v7008_v60  ;;  %v7091_v53 = vld [vmem:[%s9074_s1 + $0x3f0] sm:$0xff]  ;;  %v7082_v55 = vld [vmem:[%s9074_s1 + $0x3a8] sm:$0xff]  ;;  %v7065_v58 = vld [vmem:[%s9074_s1 + $0x320] sm:$0xff] }
  0x35   :  { %4170 = vmatpush.bf16.msrb.mxu3 %v7024_v61  ;;  %v7074_v56 = vld [vmem:[%s9074_s1 + $0x368] sm:$0xff]  ;;  %v7081_v59 = vld [vmem:[%s9074_s1 + $0x3a0] sm:$0xff] }
  0x36   :  { %4132 = vmatpush.bf16.msrb.mxu0 %v6999_v62  ;;  %v7090_v57 = vld [vmem:[%s9074_s1 + $0x3e8] sm:$0xff]  ;;  %v7073_v60 = vld [vmem:[%s9074_s1 + $0x360] sm:$0xff]  ;;  %v7064_v62 = vld [vmem:[%s9074_s1 + $0x318] sm:$0xff] }
  0x37   :  { %4158 = vmatpush.bf16.msrb.mxu2 %v7015_v63  ;;  %v7089_v61 = vld [vmem:[%s9074_s1 + $0x3e0] sm:$0xff]  ;;  %v7080_v63 = vld [vmem:[%s9074_s1 + $0x398] sm:$0xff] }
  0x38   :  { %4145 = vmatpush.bf16.msrb.mxu1 %v7007_v0  ;;  %v7072_v0 = vld [vmem:[%s9074_s1 + $0x358] sm:$0xff] }
  0x39   :  { %4171 = vmatpush.bf16.msrb.mxu3 %v7023_v1  ;;  %v7088_v1 = vld [vmem:[%s9074_s1 + $0x3d8] sm:$0xff] }
  0x3a   :  { %4133 = vmatpush.bf16.msrb.mxu0 %v6998_v2  ;;  %v7063_v2 = vld [vmem:[%s9074_s1 + $0x310] sm:$0xff] }
  0x3b   :  { %4159 = vmatpush.bf16.msrb.mxu2 %v7014_v3  ;;  %v7079_v3 = vld [vmem:[%s9074_s1 + $0x390] sm:$0xff] }
  0x3c   :  { %4146 = vmatpush.bf16.msrb.mxu1 %v7006_v4  ;;  %v7071_v4 = vld [vmem:[%s9074_s1 + $0x350] sm:$0xff] }
  0x3d   :  { %4172 = vmatpush.bf16.msrb.mxu3 %v7022_v5  ;;  %v7087_v5 = vld [vmem:[%s9074_s1 + $0x3d0] sm:$0xff] }
  0x3e   :  { %4134 = vmatpush.bf16.msrb.mxu0 %v6997_v6  ;;  %v7062_v6 = vld [vmem:[%s9074_s1 + $0x308] sm:$0xff] }
  0x3f   :  { %4160 = vmatpush.bf16.msrb.mxu2 %v7013_v7  ;;  %v7078_v7 = vld [vmem:[%s9074_s1 + $0x388] sm:$0xff] }
  0x40   :  { %4147 = vmatpush.bf16.msrb.mxu1 %v7005_v10  ;;  %v1026_v10 = vld [vmem:[#allocation1 + $0x2d] sm:$0xff] }
  0x41   :  { %4173 = vmatpush.bf16.msrb.mxu3 %v7021_v11  ;;  %4135 = vmatmul.bf16.vlgmr.msrb.gmra.mxu0 %v7656_v48  ;;  %v1022_v48 = vld [vmem:[#allocation1 + $0x9] sm:$0xff]  ;;  %v1028_v11 = vld [vmem:[#allocation1 + $0x3f] sm:$0xff] }
  0x42   :  { %4179 = vmatpush.bf16.msra.mxu0 %v7036_v8  ;;  %4161 = vmatmul.bf16.vlgmr.msrb.gmra.mxu2 %v7654_v47  ;;  %v7092_v47 = vld [vmem:[%s9074_s1 + $0x3f8] sm:$0xff]  ;;  %v1025_v8 = vld [vmem:[#allocation1 + $0x24] sm:$0xff] }
  0x43   :  { %4205 = vmatpush.bf16.msra.mxu2 %v7052_v9  ;;  %4148 = vmatmul.bf16.vlgmr.msrb.gmra.mxu1 %v7663_v51  ;;  %v7083_v51 = vld [vmem:[%s9074_s1 + $0x3b0] sm:$0xff] }
  0x44   :  { %4192 = vmatpush.bf16.msra.mxu1 %v7044_v12  ;;  %4174 = vmatmul.bf16.vlgmr.msrb.gmra.mxu3 %v7658_v49  ;;  %v1024_v49 = vld [vmem:[#allocation1 + $0x1b] sm:$0xff]  ;;  %v23_v12 = vld [vmem:[%s9073_s0 + $0x10] sm:$0xff] }
  0x45   :  { %4218 = vmatpush.bf16.msra.mxu3 %v7060_v13  ;;  %v1027_v9 = vld [vmem:[#allocation1 + $0x36] sm:$0xff]  ;;  %v7070_v13 = vld [vmem:[%s9074_s1 + $0x348] sm:$0xff] }
  0x46   :  { %4180 = vmatpush.bf16.msra.mxu0 %v7035_v14  ;;  %1030 = vst [vmem:[#allocation1] ss:$9 sm:$0xff] %v23_v12  ;;  %v7086_v14 = vld [vmem:[%s9074_s1 + $0x3c8] sm:$0xff]  ;;  %v7144_v12 = vld [vmem:[%s9074_s1 + $0x598] sm:$0xff] }
  0x47   :  { %4206 = vmatpush.bf16.msra.mxu2 %v7051_v15  ;;  %v7061_v15 = vld [vmem:[%s9074_s1 + $0x300] sm:$0xff] }
  0x48   :  { %4193 = vmatpush.bf16.msra.mxu1 %v7043_v16  ;;  %v7077_v16 = vld [vmem:[%s9074_s1 + $0x380] sm:$0xff] }
  0x49   :  { %4219 = vmatpush.bf16.msra.mxu3 %v7059_v17  ;;  %v7100_v17 = vld [vmem:[%s9074_s1 + $0x438] sm:$0xff] }
  0x4a   :  { %4181 = vmatpush.bf16.msra.mxu0 %v7034_v18  ;;  %v7116_v18 = vld [vmem:[%s9074_s1 + $0x4b8] sm:$0xff] }
  0x4b   :  { %4207 = vmatpush.bf16.msra.mxu2 %v7050_v19  ;;  %v7069_v19 = vld [vmem:[%s9074_s1 + $0x340] sm:$0xff] }
  0x4c   :  { %4194 = vmatpush.bf16.msra.mxu1 %v7042_v20  ;;  %v7085_v20 = vld [vmem:[%s9074_s1 + $0x3c0] sm:$0xff] }
  0x4d   :  { %4220 = vmatpush.bf16.msra.mxu3 %v7058_v21  ;;  %v7108_v21 = vld [vmem:[%s9074_s1 + $0x478] sm:$0xff] }
  0x4e   :  { %4182 = vmatpush.bf16.msra.mxu0 %v7033_v22  ;;  %v7124_v22 = vld [vmem:[%s9074_s1 + $0x4f8] sm:$0xff] }
  0x4f   :  { %4208 = vmatpush.bf16.msra.mxu2 %v7049_v23  ;;  %v7099_v23 = vld [vmem:[%s9074_s1 + $0x430] sm:$0xff] }
  0x50   :  { %4195 = vmatpush.bf16.msra.mxu1 %v7041_v24  ;;  %v7115_v24 = vld [vmem:[%s9074_s1 + $0x4b0] sm:$0xff] }
  0x51   :  { %4221 = vmatpush.bf16.msra.mxu3 %v7057_v25  ;;  %v7107_v25 = vld [vmem:[%s9074_s1 + $0x470] sm:$0xff] }
  0x52   :  { %4183 = vmatpush.bf16.msra.mxu0 %v7032_v26  ;;  %v7123_v26 = vld [vmem:[%s9074_s1 + $0x4f0] sm:$0xff] }
  0x53   :  { %4209 = vmatpush.bf16.msra.mxu2 %v7048_v27  ;;  %v7098_v27 = vld [vmem:[%s9074_s1 + $0x428] sm:$0xff] }
  0x54   :  { %4196 = vmatpush.bf16.msra.mxu1 %v7040_v28  ;;  %v7114_v28 = vld [vmem:[%s9074_s1 + $0x4a8] sm:$0xff] }
  0x55   :  { %4222 = vmatpush.bf16.msra.mxu3 %v7056_v29  ;;  %v7106_v29 = vld [vmem:[%s9074_s1 + $0x468] sm:$0xff] }
  0x56   :  { %4184 = vmatpush.bf16.msra.mxu0 %v7031_v30  ;;  %v7122_v30 = vld [vmem:[%s9074_s1 + $0x4e8] sm:$0xff] }
  0x57   :  { %4210 = vmatpush.bf16.msra.mxu2 %v7047_v31  ;;  %v7097_v31 = vld [vmem:[%s9074_s1 + $0x420] sm:$0xff] }
  0x58   :  { %4197 = vmatpush.bf16.msra.mxu1 %v7039_v32  ;;  %v7113_v32 = vld [vmem:[%s9074_s1 + $0x4a0] sm:$0xff] }
  0x59   :  { %4223 = vmatpush.bf16.msra.mxu3 %v7055_v33  ;;  %v7105_v33 = vld [vmem:[%s9074_s1 + $0x460] sm:$0xff] }
  0x5a   :  { %4185 = vmatpush.bf16.msra.mxu0 %v7030_v34  ;;  %v7121_v34 = vld [vmem:[%s9074_s1 + $0x4e0] sm:$0xff] }
  0x5b   :  { %4211 = vmatpush.bf16.msra.mxu2 %v7046_v35  ;;  %v7096_v35 = vld [vmem:[%s9074_s1 + $0x418] sm:$0xff] }
  0x5c   :  { %4198 = vmatpush.bf16.msra.mxu1 %v7038_v36  ;;  %v7112_v36 = vld [vmem:[%s9074_s1 + $0x498] sm:$0xff] }
  0x5d   :  { %4224 = vmatpush.bf16.msra.mxu3 %v7054_v37  ;;  %v7104_v37 = vld [vmem:[%s9074_s1 + $0x458] sm:$0xff] }
  0x5e   :  { %4186 = vmatpush.bf16.msra.mxu0 %v7029_v38  ;;  %v7120_v38 = vld [vmem:[%s9074_s1 + $0x4d8] sm:$0xff] }
  0x5f   :  { %4212 = vmatpush.bf16.msra.mxu2 %v7045_v39  ;;  %v7095_v39 = vld [vmem:[%s9074_s1 + $0x410] sm:$0xff] }
  0x60   :  { %4199 = vmatpush.bf16.msra.mxu1 %v7037_v42  ;;  %v7119_v42 = vld [vmem:[%s9074_s1 + $0x4d0] sm:$0xff] }
  0x61   :  { %4225 = vmatpush.bf16.msra.mxu3 %v7053_v43  ;;  %4187 = vmatmul.bf16.vlgmr.msra.gmra.mxu0 %v1021_v45  ;;  %v7094_v43 = vld [vmem:[%s9074_s1 + $0x408] sm:$0xff] }
  0x62   :  { %4231 = vmatpush.bf16.msrb.mxu0 %v7068_v40  ;;  %4213 = vmatmul.bf16.vlgmr.msra.gmra.mxu2 %v1023_v46  ;;  %v7111_v40 = vld [vmem:[%s9074_s1 + $0x490] sm:$0xff]  ;;  %v7102_v45 = vld [vmem:[%s9074_s1 + $0x448] sm:$0xff] }
  0x63   :  { %4257 = vmatpush.bf16.msrb.mxu2 %v7084_v41  ;;  %4200 = vmatmul.bf16.vlgmr.msra.gmra.mxu1 %v1022_v48  ;;  %v7103_v41 = vld [vmem:[%s9074_s1 + $0x450] sm:$0xff]  ;;  %v7118_v46 = vld [vmem:[%s9074_s1 + $0x4c8] sm:$0xff]  ;;  %v7109_v48 = vld [vmem:[%s9074_s1 + $0x480] sm:$0xff] }
  0x64   :  { %4244 = vmatpush.bf16.msrb.mxu1 %v7076_v44  ;;  %4226 = vmatmul.bf16.vlgmr.msra.gmra.mxu3 %v1024_v49  ;;  %v7110_v44 = vld [vmem:[%s9074_s1 + $0x488] sm:$0xff]  ;;  %v7132_v49 = vld [vmem:[%s9074_s1 + $0x538] sm:$0xff] }
  0x65   :  { %4270 = vmatpush.bf16.msrb.mxu3 %v7092_v47  ;;  %v7093_v47 = vld [vmem:[%s9074_s1 + $0x400] sm:$0xff] }
  0x66   :  { %4232 = vmatpush.bf16.msrb.mxu0 %v7067_v50  ;;  %v7148_v50 = vld [vmem:[%s9074_s1 + $0x5b8] sm:$0xff] }
  0x67   :  { %4258 = vmatpush.bf16.msrb.mxu2 %v7083_v51  ;;  %v7101_v51 = vld [vmem:[%s9074_s1 + $0x440] sm:$0xff] }
  0x68   :  { %4245 = vmatpush.bf16.msrb.mxu1 %v7075_v52  ;;  %v7117_v52 = vld [vmem:[%s9074_s1 + $0x4c0] sm:$0xff] }
  0x69   :  { %4271 = vmatpush.bf16.msrb.mxu3 %v7091_v53  ;;  %v7140_v53 = vld [vmem:[%s9074_s1 + $0x578] sm:$0xff] }
  0x6a   :  { %4233 = vmatpush.bf16.msrb.mxu0 %v7066_v54  ;;  %v1031_v54 = vld [vmem:[#allocation1] sm:$0xff] }
  0x6b   :  { %4259 = vmatpush.bf16.msrb.mxu2 %v7082_v55  ;;  %v1033_v55 = vld [vmem:[#allocation1 + $0x12] sm:$0xff] }
  0x6c   :  { %4246 = vmatpush.bf16.msrb.mxu1 %v7074_v56  ;;  %v7156_v56 = vld [vmem:[%s9074_s1 + $0x5f8] sm:$0xff] }
  0x6d   :  { %4272 = vmatpush.bf16.msrb.mxu3 %v7090_v57  ;;  %v1032_v57 = vld [vmem:[#allocation1 + $0x9] sm:$0xff] }
  0x6e   :  { %4234 = vmatpush.bf16.msrb.mxu0 %v7065_v58  ;;  %v1034_v58 = vld [vmem:[#allocation1 + $0x1b] sm:$0xff] }
  0x6f   :  { %4260 = vmatpush.bf16.msrb.mxu2 %v7081_v59  ;;  %v7131_v59 = vld [vmem:[%s9074_s1 + $0x530] sm:$0xff] }
  0x70   :  { %4247 = vmatpush.bf16.msrb.mxu1 %v7073_v60  ;;  %v7147_v60 = vld [vmem:[%s9074_s1 + $0x5b0] sm:$0xff] }
  0x71   :  { %4273 = vmatpush.bf16.msrb.mxu3 %v7089_v61  ;;  %v7139_v61 = vld [vmem:[%s9074_s1 + $0x570] sm:$0xff] }
  0x72   :  { %4235 = vmatpush.bf16.msrb.mxu0 %v7064_v62  ;;  %v7155_v62 = vld [vmem:[%s9074_s1 + $0x5f0] sm:$0xff] }
  0x73   :  { %4261 = vmatpush.bf16.msrb.mxu2 %v7080_v63  ;;  %v7130_v63 = vld [vmem:[%s9074_s1 + $0x528] sm:$0xff] }
  0x74   :  { %4248 = vmatpush.bf16.msrb.mxu1 %v7072_v0  ;;  %v7146_v0 = vld [vmem:[%s9074_s1 + $0x5a8] sm:$0xff] }
  0x75   :  { %4274 = vmatpush.bf16.msrb.mxu3 %v7088_v1  ;;  %v7138_v1 = vld [vmem:[%s9074_s1 + $0x568] sm:$0xff] }
  0x76   :  { %4236 = vmatpush.bf16.msrb.mxu0 %v7063_v2  ;;  %v7154_v2 = vld [vmem:[%s9074_s1 + $0x5e8] sm:$0xff] }
  0x77   :  { %4262 = vmatpush.bf16.msrb.mxu2 %v7079_v3  ;;  %v7462_v3 = vld [vmem:[%s9075_s2] ss:$0 sm:$0xff] }
  0x78   :  { %4249 = vmatpush.bf16.msrb.mxu1 %v7071_v4  ;;  %v7129_v4 = vld [vmem:[%s9074_s1 + $0x520] sm:$0xff] }
  0x79   :  { %4275 = vmatpush.bf16.msrb.mxu3 %v7087_v5  ;;  %v7145_v5 = vld [vmem:[%s9074_s1 + $0x5a0] sm:$0xff] }
  0x7a   :  { %4237 = vmatpush.bf16.msrb.mxu0 %v7062_v6 }
  0x7b   :  { %4263 = vmatpush.bf16.msrb.mxu2 %v7078_v7  ;;  %v7137_v7 = vld [vmem:[%s9074_s1 + $0x560] sm:$0xff] }
  0x7c   :  { %4250 = vmatpush.bf16.msrb.mxu1 %v7070_v13 }
  0x7d   :  { %4276 = vmatpush.bf16.msrb.mxu3 %v7086_v14  ;;  %v7136_v14 = vld [vmem:[%s9074_s1 + $0x558] sm:$0xff] }
  0x7e   :  { %4238 = vmatpush.bf16.msrb.mxu0 %v7061_v15  ;;  %v7152_v15 = vld [vmem:[%s9074_s1 + $0x5d8] sm:$0xff] }
  0x7f   :  { %4264 = vmatpush.bf16.msrb.mxu2 %v7077_v16 }
  0x80   :  { %4251 = vmatpush.bf16.msrb.mxu1 %v7069_v19 }
  0x81   :  { %4277 = vmatpush.bf16.msrb.mxu3 %v7085_v20  ;;  %4239 = vmatmul.bf16.vlgmr.msrb.gmra.mxu0 %v1025_v8  ;;  %v7153_v8 = vld [vmem:[%s9074_s1 + $0x5e0] sm:$0xff] }
  0x82   :  { %4283 = vmatpush.bf16.msra.mxu0 %v7100_v17  ;;  %4265 = vmatmul.bf16.vlgmr.msrb.gmra.mxu2 %v1027_v9  ;;  %v7127_v17 = vld [vmem:[%s9074_s1 + $0x510] sm:$0xff] }
  0x83   :  { %4309 = vmatpush.bf16.msra.mxu2 %v7116_v18  ;;  %4252 = vmatmul.bf16.vlgmr.msrb.gmra.mxu1 %v1026_v10  ;;  %v7143_v18 = vld [vmem:[%s9074_s1 + $0x590] sm:$0xff] }
  0x84   :  { %4296 = vmatpush.bf16.msra.mxu1 %v7108_v21  ;;  %4278 = vmatmul.bf16.vlgmr.msrb.gmra.mxu3 %v1028_v11  ;;  %v7128_v11 = vld [vmem:[%s9074_s1 + $0x518] sm:$0xff] }
  0x85   :  { %4322 = vmatpush.bf16.msra.mxu3 %v7124_v22  ;;  %v7135_v22 = vld [vmem:[%s9074_s1 + $0x550] sm:$0xff] }
  0x86   :  { %4284 = vmatpush.bf16.msra.mxu0 %v7099_v23  ;;  %v7151_v23 = vld [vmem:[%s9074_s1 + $0x5d0] sm:$0xff] }
  0x87   :  { %4310 = vmatpush.bf16.msra.mxu2 %v7115_v24  ;;  %v7126_v24 = vld [vmem:[%s9074_s1 + $0x508] sm:$0xff] }
  0x88   :  { %4297 = vmatpush.bf16.msra.mxu1 %v7107_v25 }
  0x89   :  { %4323 = vmatpush.bf16.msra.mxu3 %v7123_v26  ;;  %v7142_v26 = vld [vmem:[%s9074_s1 + $0x588] sm:$0xff] }
  0x8a   :  { %4285 = vmatpush.bf16.msra.mxu0 %v7098_v27  ;;  %v1035_v27 = vld [vmem:[#allocation1 + $0x24] sm:$0xff] }
  0x8b   :  { %4311 = vmatpush.bf16.msra.mxu2 %v7114_v28  ;;  %v1037_v28 = vld [vmem:[#allocation1 + $0x36] sm:$0xff] }
  0x8c   :  { %4298 = vmatpush.bf16.msra.mxu1 %v7106_v29 }
  0x8d   :  { %4324 = vmatpush.bf16.msra.mxu3 %v7122_v30  ;;  %v1036_v30 = vld [vmem:[#allocation1 + $0x2d] sm:$0xff] }
  0x8e   :  { %4286 = vmatpush.bf16.msra.mxu0 %v7097_v31  ;;  %v1038_v31 = vld [vmem:[#allocation1 + $0x3f] sm:$0xff] }
  0x8f   :  { %4312 = vmatpush.bf16.msra.mxu2 %v7113_v32  ;;  %v24_v32 = vld [vmem:[%s9073_s0 + $0x18] sm:$0xff] }
  0x90   :  { %4299 = vmatpush.bf16.msra.mxu1 %v7105_v33  ;;  %1040 = vst [vmem:[#allocation1] ss:$9 sm:$0xff] %v24_v32  ;;  %v7134_v33 = vld [vmem:[%s9074_s1 + $0x548] sm:$0xff]  ;;  %v7219_v32 = vld [vmem:[%s9074_s1 + $0x7f0] sm:$0xff] }
  0x91   :  { %4325 = vmatpush.bf16.msra.mxu3 %v7121_v34  ;;  %v7150_v34 = vld [vmem:[%s9074_s1 + $0x5c8] sm:$0xff] }
  0x92   :  { %4287 = vmatpush.bf16.msra.mxu0 %v7096_v35 }
  0x93   :  { %4313 = vmatpush.bf16.msra.mxu2 %v7112_v36  ;;  %v7125_v36 = vld [vmem:[%s9074_s1 + $0x500] sm:$0xff] }
  0x94   :  { %4300 = vmatpush.bf16.msra.mxu1 %v7104_v37  ;;  %v7141_v37 = vld [vmem:[%s9074_s1 + $0x580] sm:$0xff] }
  0x95   :  { %4326 = vmatpush.bf16.msra.mxu3 %v7120_v38  ;;  %v7164_v38 = vld [vmem:[%s9074_s1 + $0x638] sm:$0xff] }
  0x96   :  { %4288 = vmatpush.bf16.msra.mxu0 %v7095_v39  ;;  %v7180_v39 = vld [vmem:[%s9074_s1 + $0x6b8] sm:$0xff] }
  0x97   :  { %4314 = vmatpush.bf16.msra.mxu2 %v7111_v40 }
  0x98   :  { %4301 = vmatpush.bf16.msra.mxu1 %v7103_v41  ;;  %v7133_v41 = vld [vmem:[%s9074_s1 + $0x540] sm:$0xff] }
  0x99   :  { %4327 = vmatpush.bf16.msra.mxu3 %v7119_v42  ;;  %v7149_v42 = vld [vmem:[%s9074_s1 + $0x5c0] sm:$0xff] }
  0x9a   :  { %4289 = vmatpush.bf16.msra.mxu0 %v7094_v43  ;;  %v7172_v43 = vld [vmem:[%s9074_s1 + $0x678] sm:$0xff] }
  0x9b   :  { %4315 = vmatpush.bf16.msra.mxu2 %v7110_v44  ;;  %v7188_v44 = vld [vmem:[%s9074_s1 + $0x6f8] sm:$0xff] }
  0x9c   :  { %4302 = vmatpush.bf16.msra.mxu1 %v7102_v45  ;;  %v7163_v45 = vld [vmem:[%s9074_s1 + $0x630] sm:$0xff] }
  0x9d   :  { %4328 = vmatpush.bf16.msra.mxu3 %v7118_v46  ;;  %v7179_v46 = vld [vmem:[%s9074_s1 + $0x6b0] sm:$0xff] }
  0x9e   :  { %4290 = vmatpush.bf16.msra.mxu0 %v7093_v47  ;;  %v4084_v6 = vpop.f32.mrf.mxu0  ;;  %v7171_v47 = vld [vmem:[%s9074_s1 + $0x670] sm:$0xff] }
  0x9f   :  { %4316 = vmatpush.bf16.msra.mxu2 %v7109_v48  ;;  %v4085_v9 = vadd.f32 %v7462_v3, %v4084_v6  ;;  %v7187_v48 = vld [vmem:[%s9074_s1 + $0x6f0] sm:$0xff] }
  0xa0   :  { %4303 = vmatpush.bf16.msra.mxu1 %v7101_v51  ;;  %v4097_v10 = vpop.f32.mrf.mxu1  ;;  %v7170_v51 = vld [vmem:[%s9074_s1 + $0x668] sm:$0xff]  ;;  %v7159_v3 = vld [vmem:[%s9074_s1 + $0x610] sm:$0xff] }
  0xa1   :  { %4329 = vmatpush.bf16.msra.mxu3 %v7117_v52  ;;  %4291 = vmatmul.bf16.vlgmr.msra.gmra.mxu0 %v1031_v54  ;;  %v4098_v13 = vadd.f32 %v4097_v10, %v4085_v9  ;;  %v7186_v52 = vld [vmem:[%s9074_s1 + $0x6e8] sm:$0xff]  ;;  %v7177_v54 = vld [vmem:[%s9074_s1 + $0x6a0] sm:$0xff]  ;;  %v7183_v9 = vld [vmem:[%s9074_s1 + $0x6d0] sm:$0xff] }
  0xa2   :  { %4335 = vmatpush.bf16.msrb.mxu0 %v7132_v49  ;;  %4317 = vmatmul.bf16.vlgmr.msra.gmra.mxu2 %v1033_v55  ;;  %v7162_v49 = vld [vmem:[%s9074_s1 + $0x628] sm:$0xff] }
  0xa3   :  { %4361 = vmatpush.bf16.msrb.mxu2 %v7148_v50  ;;  %4304 = vmatmul.bf16.vlgmr.msra.gmra.mxu1 %v1032_v57  ;;  %v7178_v50 = vld [vmem:[%s9074_s1 + $0x6a8] sm:$0xff]  ;;  %v7169_v57 = vld [vmem:[%s9074_s1 + $0x660] sm:$0xff] }
  0xa4   :  { %4348 = vmatpush.bf16.msrb.mxu1 %v7140_v53  ;;  %4330 = vmatmul.bf16.vlgmr.msra.gmra.mxu3 %v1034_v58  ;;  %v7161_v53 = vld [vmem:[%s9074_s1 + $0x620] sm:$0xff] }
  0xa5   :  { %4374 = vmatpush.bf16.msrb.mxu3 %v7156_v56  ;;  %v4110_v16 = vpop.f32.mrf.mxu2  ;;  %v7185_v58 = vld [vmem:[%s9074_s1 + $0x6e0] sm:$0xff] }
  0xa6   :  { %4336 = vmatpush.bf16.msrb.mxu0 %v7131_v59  ;;  %v4111_v19 = vadd.f32 %v4110_v16, %v4098_v13  ;;  %v4086_v21 = vpop.f32.mrf.mxu0  ;;  %v7166_v13 = vld [vmem:[%s9074_s1 + $0x648] sm:$0xff]  ;;  %v7157_v16 = vld [vmem:[%s9074_s1 + $0x600] sm:$0xff] }
  0xa7   :  { %4362 = vmatpush.bf16.msrb.mxu2 %v7147_v60  ;;  %v4123_v20 = vpop.f32.mrf.mxu3  ;;  %v7165_v21 = vld [vmem:[%s9074_s1 + $0x640] sm:$0xff] }
  0xa8   :  { %4349 = vmatpush.bf16.msrb.mxu1 %v7139_v61  ;;  %v4124_v25 = vadd.f32 %v4123_v20, %v4111_v19  ;;  %v4099_v29 = vpop.f32.mrf.mxu1  ;;  %v7160_v61 = vld [vmem:[%s9074_s1 + $0x618] sm:$0xff] }
  0xa9   :  { %4375 = vmatpush.bf16.msrb.mxu3 %v7155_v62  ;;  %v7176_v62 = vld [vmem:[%s9074_s1 + $0x698] sm:$0xff]  ;;  %v7195_v29 = vld [vmem:[%s9074_s1 + $0x730] sm:$0xff] }
  0xaa   :  { %4337 = vmatpush.bf16.msrb.mxu0 %v7130_v63  ;;  %v7168_v63 = vld [vmem:[%s9074_s1 + $0x658] sm:$0xff] }
  0xab   :  { %4363 = vmatpush.bf16.msrb.mxu2 %v7146_v0  ;;  %v7184_v0 = vld [vmem:[%s9074_s1 + $0x6d8] sm:$0xff] }
  0xac   :  { %4350 = vmatpush.bf16.msrb.mxu1 %v7138_v1  ;;  %v7196_v19 = vld [vmem:[%s9074_s1 + $0x738] sm:$0xff] }
  0xad   :  { %4376 = vmatpush.bf16.msrb.mxu3 %v7154_v2  ;;  %v4112_v35 = vpop.f32.mrf.mxu2  ;;  %v7212_v20 = vld [vmem:[%s9074_s1 + $0x7b8] sm:$0xff] }
  0xae   :  { %4338 = vmatpush.bf16.msrb.mxu0 %v7129_v4  ;;  %v7175_v4 = vld [vmem:[%s9074_s1 + $0x690] sm:$0xff]  ;;  %v7202_v35 = vld [vmem:[%s9074_s1 + $0x768] sm:$0xff] }
  0xaf   :  { %4364 = vmatpush.bf16.msrb.mxu2 %v7145_v5  ;;  %v4125_v40 = vpop.f32.mrf.mxu3 }
  0xb0   :  { %4351 = vmatpush.bf16.msrb.mxu1 %v7137_v7  ;;  %v7209_v40 = vld [vmem:[%s9074_s1 + $0x7a0] sm:$0xff] }
  0xb1   :  { %4377 = vmatpush.bf16.msrb.mxu3 %v7153_v8  ;;  %v7167_v8 = vld [vmem:[%s9074_s1 + $0x650] sm:$0xff] }
  0xb2   :  { %4339 = vmatpush.bf16.msrb.mxu0 %v7128_v11  ;;  %v7158_v11 = vld [vmem:[%s9074_s1 + $0x608] sm:$0xff] }
  0xb3   :  { %4365 = vmatpush.bf16.msrb.mxu2 %v7144_v12  ;;  %v7174_v12 = vld [vmem:[%s9074_s1 + $0x688] sm:$0xff] }
  0xb4   :  { %4352 = vmatpush.bf16.msrb.mxu1 %v7136_v14  ;;  %v7182_v14 = vld [vmem:[%s9074_s1 + $0x6c8] sm:$0xff] }
  0xb5   :  { %4378 = vmatpush.bf16.msrb.mxu3 %v7152_v15 }
  0xb6   :  { %4340 = vmatpush.bf16.msrb.mxu0 %v7127_v17  ;;  %v7173_v17 = vld [vmem:[%s9074_s1 + $0x680] sm:$0xff] }
  0xb7   :  { %4366 = vmatpush.bf16.msrb.mxu2 %v7143_v18 }
  0xb8   :  { %4353 = vmatpush.bf16.msrb.mxu1 %v7135_v22  ;;  %v7181_v22 = vld [vmem:[%s9074_s1 + $0x6c0] sm:$0xff] }
  0xb9   :  { %4379 = vmatpush.bf16.msrb.mxu3 %v7151_v23  ;;  %v7204_v23 = vld [vmem:[%s9074_s1 + $0x778] sm:$0xff] }
  0xba   :  { %4341 = vmatpush.bf16.msrb.mxu0 %v7126_v24  ;;  %v1041_v24 = vld [vmem:[#allocation1] sm:$0xff] }
  0xbb   :  { %4367 = vmatpush.bf16.msrb.mxu2 %v7142_v26  ;;  %v7220_v26 = vld [vmem:[%s9074_s1 + $0x7f8] sm:$0xff] }
  0xbc   :  { %4354 = vmatpush.bf16.msrb.mxu1 %v7134_v33  ;;  %v7194_v33 = vld [vmem:[%s9074_s1 + $0x728] sm:$0xff] }
  0xbd   :  { %4380 = vmatpush.bf16.msrb.mxu3 %v7150_v34  ;;  %v7210_v34 = vld [vmem:[%s9074_s1 + $0x7a8] sm:$0xff] }
  0xbe   :  { %4342 = vmatpush.bf16.msrb.mxu0 %v7125_v36  ;;  %v4136_v55 = vpop.f32.mrf.mxu0  ;;  %v7218_v36 = vld [vmem:[%s9074_s1 + $0x7e8] sm:$0xff] }
  0xbf   :  { %4368 = vmatpush.bf16.msrb.mxu2 %v7141_v37  ;;  %v4137_v56 = vadd.f32 %v4136_v55, %v4124_v25  ;;  %v1043_v25 = vld [vmem:[#allocation1 + $0x12] sm:$0xff] }
  0xc0   :  { %4355 = vmatpush.bf16.msrb.mxu1 %v7133_v41  ;;  %v4149_v59 = vpop.f32.mrf.mxu1  ;;  %v7207_v55 = vld [vmem:[%s9074_s1 + $0x790] sm:$0xff] }
  0xc1   :  { %4381 = vmatpush.bf16.msrb.mxu3 %v7149_v42  ;;  %4343 = vmatmul.bf16.vlgmr.msrb.gmra.mxu0 %v1035_v27  ;;  %v4150_v60 = vadd.f32 %v4149_v59, %v4137_v56  ;;  %v1042_v27 = vld [vmem:[#allocation1 + $0x9] sm:$0xff] }
  0xc2   :  { %4387 = vmatpush.bf16.msra.mxu0 %v7164_v38  ;;  %4369 = vmatmul.bf16.vlgmr.msrb.gmra.mxu2 %v1037_v28  ;;  %v1044_v28 = vld [vmem:[#allocation1 + $0x1b] sm:$0xff]  ;;  %v7190_v59 = vld [vmem:[%s9074_s1 + $0x708] sm:$0xff] }
  0xc3   :  { %4413 = vmatpush.bf16.msra.mxu2 %v7180_v39  ;;  %4356 = vmatmul.bf16.vlgmr.msrb.gmra.mxu1 %v1036_v30  ;;  %v7211_v30 = vld [vmem:[%s9074_s1 + $0x7b0] sm:$0xff]  ;;  %v7193_v39 = vld [vmem:[%s9074_s1 + $0x720] sm:$0xff] }
  0xc4   :  { %4400 = vmatpush.bf16.msra.mxu1 %v7172_v43  ;;  %4382 = vmatmul.bf16.vlgmr.msrb.gmra.mxu3 %v1038_v31  ;;  %v7203_v31 = vld [vmem:[%s9074_s1 + $0x770] sm:$0xff]  ;;  %v7201_v43 = vld [vmem:[%s9074_s1 + $0x760] sm:$0xff] }
  0xc5   :  { %4426 = vmatpush.bf16.msra.mxu3 %v7188_v44  ;;  %v4162_v1 = vpop.f32.mrf.mxu2  ;;  %v7217_v44 = vld [vmem:[%s9074_s1 + $0x7e0] sm:$0xff] }
  0xc6   :  { %4388 = vmatpush.bf16.msra.mxu0 %v7163_v45  ;;  %v4163_v2 = vadd.f32 %v4162_v1, %v4150_v60  ;;  %v4138_v6 = vpop.f32.mrf.mxu0  ;;  %v7192_v45 = vld [vmem:[%s9074_s1 + $0x718] sm:$0xff]  ;;  %v7206_v60 = vld [vmem:[%s9074_s1 + $0x788] sm:$0xff] }
  0xc7   :  { %4414 = vmatpush.bf16.msra.mxu2 %v7179_v46  ;;  %v4175_v5 = vpop.f32.mrf.mxu3  ;;  %v7208_v46 = vld [vmem:[%s9074_s1 + $0x798] sm:$0xff]  ;;  %v7189_v6 = vld [vmem:[%s9074_s1 + $0x700] sm:$0xff] }
  0xc8   :  { %4401 = vmatpush.bf16.msra.mxu1 %v7171_v47  ;;  %v4176_v7 = vadd.f32 %v4175_v5, %v4163_v2  ;;  %v4151_v10 = vpop.f32.mrf.mxu1  ;;  %v25_v2 = vld [vmem:[%s9073_s0 + $0x20] sm:$0xff] }
  0xc9   :  { %4427 = vmatpush.bf16.msra.mxu3 %v7187_v48  ;;  %v7197_v10 = vld [vmem:[%s9074_s1 + $0x740] sm:$0xff] }
  0xca   :  { %4389 = vmatpush.bf16.msra.mxu0 %v7162_v49  ;;  %v7200_v49 = vld [vmem:[%s9074_s1 + $0x758] sm:$0xff] }
  0xcb   :  { %4415 = vmatpush.bf16.msra.mxu2 %v7178_v50  ;;  %v7216_v50 = vld [vmem:[%s9074_s1 + $0x7d8] sm:$0xff] }
  0xcc   :  { %4402 = vmatpush.bf16.msra.mxu1 %v7170_v51 }
  0xcd   :  { %4428 = vmatpush.bf16.msra.mxu3 %v7186_v52  ;;  %v4164_v15 = vpop.f32.mrf.mxu2 }
  0xce   :  { %4390 = vmatpush.bf16.msra.mxu0 %v7161_v53  ;;  %v7243_v15 = vld [vmem:[%s9074_s1 + $0x8b0] sm:$0xff] }
  0xcf   :  { %4416 = vmatpush.bf16.msra.mxu2 %v7177_v54  ;;  %v4177_v18 = vpop.f32.mrf.mxu3  ;;  %v7191_v54 = vld [vmem:[%s9074_s1 + $0x710] sm:$0xff] }
  0xd0   :  { %4403 = vmatpush.bf16.msra.mxu1 %v7169_v57  ;;  %v7199_v57 = vld [vmem:[%s9074_s1 + $0x750] sm:$0xff]  ;;  %v7226_v18 = vld [vmem:[%s9074_s1 + $0x828] sm:$0xff] }
  0xd1   :  { %4429 = vmatpush.bf16.msra.mxu3 %v7185_v58  ;;  %v7215_v58 = vld [vmem:[%s9074_s1 + $0x7d0] sm:$0xff] }
  0xd2   :  { %4391 = vmatpush.bf16.msra.mxu0 %v7160_v61  ;;  %v1045_v61 = vld [vmem:[#allocation1 + $0x24] sm:$0xff] }
  0xd3   :  { %4417 = vmatpush.bf16.msra.mxu2 %v7176_v62  ;;  %v1047_v62 = vld [vmem:[#allocation1 + $0x36] sm:$0xff] }
  0xd4   :  { %4404 = vmatpush.bf16.msra.mxu1 %v7168_v63  ;;  %v1046_v63 = vld [vmem:[#allocation1 + $0x2d] sm:$0xff] }
  0xd5   :  { %4430 = vmatpush.bf16.msra.mxu3 %v7184_v0  ;;  %v1048_v0 = vld [vmem:[#allocation1 + $0x3f] sm:$0xff] }
  0xd6   :  { %4392 = vmatpush.bf16.msra.mxu0 %v7159_v3  ;;  %1050 = vst [vmem:[#allocation1] ss:$9 sm:$0xff] %v25_v2  ;;  %v7198_v3 = vld [vmem:[%s9074_s1 + $0x748] sm:$0xff] }
  0xd7   :  { %4418 = vmatpush.bf16.msra.mxu2 %v7175_v4  ;;  %v7214_v4 = vld [vmem:[%s9074_s1 + $0x7c8] sm:$0xff] }
  0xd8   :  { %4405 = vmatpush.bf16.msra.mxu1 %v7167_v8  ;;  %v7228_v8 = vld [vmem:[%s9074_s1 + $0x838] sm:$0xff]  ;;  %v7258_v2 = vld [vmem:[%s9074_s1 + $0x928] sm:$0xff] }
  0xd9   :  { %4431 = vmatpush.bf16.msra.mxu3 %v7183_v9  ;;  %v7244_v9 = vld [vmem:[%s9074_s1 + $0x8b8] sm:$0xff] }
  0xda   :  { %4393 = vmatpush.bf16.msra.mxu0 %v7158_v11  ;;  %v7213_v11 = vld [vmem:[%s9074_s1 + $0x7c0] sm:$0xff] }
  0xdb   :  { %4419 = vmatpush.bf16.msra.mxu2 %v7174_v12  ;;  %v7236_v12 = vld [vmem:[%s9074_s1 + $0x878] sm:$0xff] }
  0xdc   :  { %4406 = vmatpush.bf16.msra.mxu1 %v7166_v13  ;;  %v7252_v13 = vld [vmem:[%s9074_s1 + $0x8f8] sm:$0xff] }
  0xdd   :  { %4432 = vmatpush.bf16.msra.mxu3 %v7182_v14  ;;  %v7227_v14 = vld [vmem:[%s9074_s1 + $0x830] sm:$0xff] }
  0xde   :  { %4394 = vmatpush.bf16.msra.mxu0 %v7157_v16  ;;  %v4188_v37 = vpop.f32.mrf.mxu0  ;;  %v7235_v16 = vld [vmem:[%s9074_s1 + $0x870] sm:$0xff] }
  0xdf   :  { %4420 = vmatpush.bf16.msra.mxu2 %v7173_v17  ;;  %v4189_v38 = vadd.f32 %v4188_v37, %v4176_v7  ;;  %v7205_v7 = vld [vmem:[%s9074_s1 + $0x780] sm:$0xff]  ;;  %v7251_v17 = vld [vmem:[%s9074_s1 + $0x8f0] sm:$0xff] }
  0xe0   :  { %4407 = vmatpush.bf16.msra.mxu1 %v7165_v21  ;;  %v4201_v41 = vpop.f32.mrf.mxu1  ;;  %v7250_v21 = vld [vmem:[%s9074_s1 + $0x8e8] sm:$0xff] }
  0xe1   :  { %4433 = vmatpush.bf16.msra.mxu3 %v7181_v22  ;;  %4395 = vmatmul.bf16.vlgmr.msra.gmra.mxu0 %v1041_v24  ;;  %v4202_v42 = vadd.f32 %v4201_v41, %v4189_v38  ;;  %v7225_v24 = vld [vmem:[%s9074_s1 + $0x820] sm:$0xff] }
  0xe2   :  { %4439 = vmatpush.bf16.msrb.mxu0 %v7196_v19  ;;  %4421 = vmatmul.bf16.vlgmr.msra.gmra.mxu2 %v1043_v25  ;;  %v7242_v19 = vld [vmem:[%s9074_s1 + $0x8a8] sm:$0xff]  ;;  %v7241_v25 = vld [vmem:[%s9074_s1 + $0x8a0] sm:$0xff] }
  0xe3   :  { %4465 = vmatpush.bf16.msrb.mxu2 %v7212_v20  ;;  %4408 = vmatmul.bf16.vlgmr.msra.gmra.mxu1 %v1042_v27  ;;  %v7234_v20 = vld [vmem:[%s9074_s1 + $0x868] sm:$0xff] }
  0xe4   :  { %4452 = vmatpush.bf16.msrb.mxu1 %v7204_v23  ;;  %4434 = vmatmul.bf16.vlgmr.msra.gmra.mxu3 %v1044_v28  ;;  %v7233_v28 = vld [vmem:[%s9074_s1 + $0x860] sm:$0xff] }
  0xe5   :  { %4478 = vmatpush.bf16.msrb.mxu3 %v7220_v26  ;;  %v4214_v47 = vpop.f32.mrf.mxu2 }
  0xe6   :  { %4440 = vmatpush.bf16.msrb.mxu0 %v7195_v29  ;;  %v4215_v48 = vadd.f32 %v4214_v47, %v4202_v42  ;;  %v4190_v52 = vpop.f32.mrf.mxu0  ;;  %v7249_v29 = vld [vmem:[%s9074_s1 + $0x8e0] sm:$0xff]  ;;  %v7231_v42 = vld [vmem:[%s9074_s1 + $0x850] sm:$0xff]  ;;  %v7230_v47 = vld [vmem:[%s9074_s1 + $0x848] sm:$0xff] }
  0xe7   :  { %4466 = vmatpush.bf16.msrb.mxu2 %v7211_v30  ;;  %v4227_v51 = vpop.f32.mrf.mxu3  ;;  %v7224_v30 = vld [vmem:[%s9074_s1 + $0x818] sm:$0xff] }
  0xe8   :  { %4453 = vmatpush.bf16.msrb.mxu1 %v7203_v31  ;;  %v8284_v53 = vadd.f32 %v4227_v51, %v4215_v48  ;;  %v4203_v56 = vpop.f32.mrf.mxu1  ;;  %v7240_v31 = vld [vmem:[%s9074_s1 + $0x898] sm:$0xff]  ;;  %v7246_v48 = vld [vmem:[%s9074_s1 + $0x8c8] sm:$0xff]  ;;  %v7237_v51 = vld [vmem:[%s9074_s1 + $0x880] sm:$0xff] }
  0xe9   :  { %4479 = vmatpush.bf16.msrb.mxu3 %v7219_v32  ;;  %v7260_v52 = vld [vmem:[%s9074_s1 + $0x938] sm:$0xff] }
  0xea   :  { %4441 = vmatpush.bf16.msrb.mxu0 %v7194_v33  ;;  %v7268_v56 = vld [vmem:[%s9074_s1 + $0x978] sm:$0xff] }
  0xeb   :  { %4467 = vmatpush.bf16.msrb.mxu2 %v7210_v34  ;;  %v7232_v34 = vld [vmem:[%s9074_s1 + $0x858] sm:$0xff] }
  0xec   :  { %4454 = vmatpush.bf16.msrb.mxu1 %v7202_v35  ;;  %v7248_v35 = vld [vmem:[%s9074_s1 + $0x8d8] sm:$0xff] }
  0xed   :  { %4480 = vmatpush.bf16.msrb.mxu3 %v7218_v36  ;;  %v4216_v1 = vpop.f32.mrf.mxu2 }
  0xee   :  { %4442 = vmatpush.bf16.msrb.mxu0 %v7193_v39  ;;  %v7223_v39 = vld [vmem:[%s9074_s1 + $0x810] sm:$0xff] }
  0xef   :  { %4468 = vmatpush.bf16.msrb.mxu2 %v7209_v40  ;;  %v4229_v5 = vpop.f32.mrf.mxu3  ;;  %v7239_v40 = vld [vmem:[%s9074_s1 + $0x890] sm:$0xff] }
  0xf0   :  { %4455 = vmatpush.bf16.msrb.mxu1 %v7201_v43  ;;  %v7247_v43 = vld [vmem:[%s9074_s1 + $0x8d0] sm:$0xff]  ;;  %v7282_v5 = vld [vmem:[%s9074_s1 + $0x9e8] sm:$0xff] }
  0xf1   :  { %4481 = vmatpush.bf16.msrb.mxu3 %v7217_v44  ;;  %v7222_v44 = vld [vmem:[%s9074_s1 + $0x808] sm:$0xff]  ;;  %v7283_v1 = vld [vmem:[%s9074_s1 + $0x9f0] sm:$0xff] }
  0xf2   :  { %4443 = vmatpush.bf16.msrb.mxu0 %v7192_v45  ;;  %v7238_v45 = vld [vmem:[%s9074_s1 + $0x888] sm:$0xff] }
  0xf3   :  { %4469 = vmatpush.bf16.msrb.mxu2 %v7208_v46 }
  0xf4   :  { %4456 = vmatpush.bf16.msrb.mxu1 %v7200_v49 }
  0xf5   :  { %4482 = vmatpush.bf16.msrb.mxu3 %v7216_v50  ;;  %v7221_v50 = vld [vmem:[%s9074_s1 + $0x800] sm:$0xff] }
  0xf6   :  { %4444 = vmatpush.bf16.msrb.mxu0 %v7191_v54  ;;  %v7229_v54 = vld [vmem:[%s9074_s1 + $0x840] sm:$0xff] }
  0xf7   :  { %4470 = vmatpush.bf16.msrb.mxu2 %v7207_v55  ;;  %v7245_v55 = vld [vmem:[%s9074_s1 + $0x8c0] sm:$0xff] }
  0xf8   :  { %4457 = vmatpush.bf16.msrb.mxu1 %v7199_v57  ;;  %v1051_v57 = vld [vmem:[#allocation1] sm:$0xff] }
  0xf9   :  { %4483 = vmatpush.bf16.msrb.mxu3 %v7215_v58  ;;  %v1053_v58 = vld [vmem:[#allocation1 + $0x12] sm:$0xff] }
  0xfa   :  { %4445 = vmatpush.bf16.msrb.mxu0 %v7190_v59  ;;  %v7284_v59 = vld [vmem:[%s9074_s1 + $0x9f8] sm:$0xff] }
  0xfb   :  { %4471 = vmatpush.bf16.msrb.mxu2 %v7206_v60  ;;  %v1052_v60 = vld [vmem:[#allocation1 + $0x9] sm:$0xff] }
  0xfc   :  { %4458 = vmatpush.bf16.msrb.mxu1 %v7198_v3  ;;  %v7274_v3 = vld [vmem:[%s9074_s1 + $0x9a8] sm:$0xff] }
  0xfd   :  { %4484 = vmatpush.bf16.msrb.mxu3 %v7214_v4  ;;  %v7266_v4 = vld [vmem:[%s9074_s1 + $0x968] sm:$0xff] }
  0xfe   :  { %4446 = vmatpush.bf16.msrb.mxu0 %v7189_v6  ;;  %v4240_v22 = vpop.f32.mrf.mxu0 }
  0xff   :  { %4472 = vmatpush.bf16.msrb.mxu2 %v7205_v7  ;;  %v4241_v23 = vadd.f32 %v4240_v22, %v8284_v53  ;;  %v7276_v53 = vld [vmem:[%s9074_s1 + $0x9b8] sm:$0xff] }
 0x100   :  { %4459 = vmatpush.bf16.msrb.mxu1 %v7197_v10  ;;  %v4253_v26 = vpop.f32.mrf.mxu1 }
 0x101   :  { %4485 = vmatpush.bf16.msrb.mxu3 %v7213_v11  ;;  %4447 = vmatmul.bf16.vlgmr.msrb.gmra.mxu0 %v1045_v61  ;;  %v4254_v27 = vadd.f32 %v4253_v26, %v4241_v23  ;;  %v1054_v61 = vld [vmem:[#allocation1 + $0x1b] sm:$0xff]  ;;  %v7255_v23 = vld [vmem:[%s9074_s1 + $0x910] sm:$0xff] }
 0x102   :  { %4491 = vmatpush.bf16.msra.mxu0 %v7228_v8  ;;  %4473 = vmatmul.bf16.vlgmr.msrb.gmra.mxu2 %v1047_v62  ;;  %v7259_v62 = vld [vmem:[%s9074_s1 + $0x930] sm:$0xff]  ;;  %v7257_v8 = vld [vmem:[%s9074_s1 + $0x920] sm:$0xff] }
 0x103   :  { %4517 = vmatpush.bf16.msra.mxu2 %v7244_v9  ;;  %4460 = vmatmul.bf16.vlgmr.msrb.gmra.mxu1 %v1046_v63  ;;  %v7275_v63 = vld [vmem:[%s9074_s1 + $0x9b0] sm:$0xff]  ;;  %v7273_v9 = vld [vmem:[%s9074_s1 + $0x9a0] sm:$0xff] }
 0x104   :  { %4504 = vmatpush.bf16.msra.mxu1 %v7236_v12  ;;  %4486 = vmatmul.bf16.vlgmr.msrb.gmra.mxu3 %v1048_v0  ;;  %v7267_v0 = vld [vmem:[%s9074_s1 + $0x970] sm:$0xff]  ;;  %v7265_v12 = vld [vmem:[%s9074_s1 + $0x960] sm:$0xff] }
 0x105   :  { %4530 = vmatpush.bf16.msra.mxu3 %v7252_v13  ;;  %v4266_v32 = vpop.f32.mrf.mxu2  ;;  %v7281_v13 = vld [vmem:[%s9074_s1 + $0x9e0] sm:$0xff]  ;;  %v7263_v26 = vld [vmem:[%s9074_s1 + $0x950] sm:$0xff] }
 0x106   :  { %4492 = vmatpush.bf16.msra.mxu0 %v7227_v14  ;;  %v4267_v33 = vadd.f32 %v4266_v32, %v4254_v27  ;;  %v4242_v37 = vpop.f32.mrf.mxu0  ;;  %v7256_v14 = vld [vmem:[%s9074_s1 + $0x918] sm:$0xff]  ;;  %v7279_v27 = vld [vmem:[%s9074_s1 + $0x9d0] sm:$0xff] }
 0x107   :  { %4518 = vmatpush.bf16.msra.mxu2 %v7243_v15  ;;  %v4279_v36 = vpop.f32.mrf.mxu3  ;;  %v7272_v15 = vld [vmem:[%s9074_s1 + $0x998] sm:$0xff]  ;;  %v1056_v32 = vld [vmem:[#allocation1 + $0x2d] sm:$0xff] }
 0x108   :  { %4505 = vmatpush.bf16.msra.mxu1 %v7235_v16  ;;  %v4280_v38 = vadd.f32 %v4279_v36, %v4267_v33  ;;  %v4255_v41 = vpop.f32.mrf.mxu1  ;;  %v1058_v33 = vld [vmem:[#allocation1 + $0x3f] sm:$0xff]  ;;  %v7262_v36 = vld [vmem:[%s9074_s1 + $0x948] sm:$0xff] }
 0x109   :  { %4531 = vmatpush.bf16.msra.mxu3 %v7251_v17  ;;  %v7278_v37 = vld [vmem:[%s9074_s1 + $0x9c8] sm:$0xff]  ;;  %v7292_v41 = vld [vmem:[%s9074_s1 + $0xa38] sm:$0xff] }
 0x10a   :  { %4493 = vmatpush.bf16.msra.mxu0 %v7226_v18  ;;  %v7264_v18 = vld [vmem:[%s9074_s1 + $0x958] sm:$0xff] }
 0x10b   :  { %4519 = vmatpush.bf16.msra.mxu2 %v7242_v19  ;;  %v7280_v19 = vld [vmem:[%s9074_s1 + $0x9d8] sm:$0xff] }
 0x10c   :  { %4506 = vmatpush.bf16.msra.mxu1 %v7234_v20 }
 0x10d   :  { %4532 = vmatpush.bf16.msra.mxu3 %v7250_v21  ;;  %v4268_v46 = vpop.f32.mrf.mxu2 }
 0x10e   :  { %4494 = vmatpush.bf16.msra.mxu0 %v7225_v24  ;;  %v7271_v24 = vld [vmem:[%s9074_s1 + $0x990] sm:$0xff]  ;;  %v7316_v46 = vld [vmem:[%s9074_s1 + $0xaf8] sm:$0xff] }
 0x10f   :  { %4520 = vmatpush.bf16.msra.mxu2 %v7241_v25  ;;  %v4281_v49 = vpop.f32.mrf.mxu3 }
 0x110   :  { %4507 = vmatpush.bf16.msra.mxu1 %v7233_v28  ;;  %v7254_v28 = vld [vmem:[%s9074_s1 + $0x908] sm:$0xff]  ;;  %v7299_v49 = vld [vmem:[%s9074_s1 + $0xa70] sm:$0xff] }
 0x111   :  { %4533 = vmatpush.bf16.msra.mxu3 %v7249_v29  ;;  %v7270_v29 = vld [vmem:[%s9074_s1 + $0x988] sm:$0xff] }
 0x112   :  { %4495 = vmatpush.bf16.msra.mxu0 %v7224_v30  ;;  %v1055_v30 = vld [vmem:[#allocation1 + $0x24] sm:$0xff] }
 0x113   :  { %4521 = vmatpush.bf16.msra.mxu2 %v7240_v31  ;;  %v1057_v31 = vld [vmem:[#allocation1 + $0x36] sm:$0xff] }
 0x114   :  { %4508 = vmatpush.bf16.msra.mxu1 %v7232_v34 }
 0x115   :  { %4534 = vmatpush.bf16.msra.mxu3 %v7248_v35  ;;  %v26_v35 = vld [vmem:[%s9073_s0 + $0x28] sm:$0xff] }
 0x116   :  { %4496 = vmatpush.bf16.msra.mxu0 %v7223_v39  ;;  %1060 = vst [vmem:[#allocation1] ss:$9 sm:$0xff] %v26_v35  ;;  %v7253_v39 = vld [vmem:[%s9074_s1 + $0x900] sm:$0xff]  ;;  %v7322_v35 = vld [vmem:[%s9074_s1 + $0xb28] sm:$0xff] }
 0x117   :  { %4522 = vmatpush.bf16.msra.mxu2 %v7239_v40  ;;  %v7269_v40 = vld [vmem:[%s9074_s1 + $0x980] sm:$0xff] }
 0x118   :  { %4509 = vmatpush.bf16.msra.mxu1 %v7231_v42  ;;  %v7308_v42 = vld [vmem:[%s9074_s1 + $0xab8] sm:$0xff] }
 0x119   :  { %4535 = vmatpush.bf16.msra.mxu3 %v7247_v43  ;;  %v7261_v43 = vld [vmem:[%s9074_s1 + $0x940] sm:$0xff] }
 0x11a   :  { %4497 = vmatpush.bf16.msra.mxu0 %v7222_v44  ;;  %v7277_v44 = vld [vmem:[%s9074_s1 + $0x9c0] sm:$0xff] }
 0x11b   :  { %4523 = vmatpush.bf16.msra.mxu2 %v7238_v45  ;;  %v7300_v45 = vld [vmem:[%s9074_s1 + $0xa78] sm:$0xff] }
 0x11c   :  { %4510 = vmatpush.bf16.msra.mxu1 %v7230_v47  ;;  %v7291_v47 = vld [vmem:[%s9074_s1 + $0xa30] sm:$0xff] }
 0x11d   :  { %4536 = vmatpush.bf16.msra.mxu3 %v7246_v48  ;;  %v7307_v48 = vld [vmem:[%s9074_s1 + $0xab0] sm:$0xff] }
 0x11e   :  { %4498 = vmatpush.bf16.msra.mxu0 %v7221_v50  ;;  %v4292_v6 = vpop.f32.mrf.mxu0  ;;  %v7315_v50 = vld [vmem:[%s9074_s1 + $0xaf0] sm:$0xff] }
 0x11f   :  { %4524 = vmatpush.bf16.msra.mxu2 %v7237_v51  ;;  %v4293_v7 = vadd.f32 %v4292_v6, %v4280_v38  ;;  %v7290_v51 = vld [vmem:[%s9074_s1 + $0xa28] sm:$0xff] }
 0x120   :  { %4511 = vmatpush.bf16.msra.mxu1 %v7229_v54  ;;  %v4305_v10 = vpop.f32.mrf.mxu1  ;;  %v7314_v54 = vld [vmem:[%s9074_s1 + $0xae8] sm:$0xff] }
 0x121   :  { %4537 = vmatpush.bf16.msra.mxu3 %v7245_v55  ;;  %4499 = vmatmul.bf16.vlgmr.msra.gmra.mxu0 %v1051_v57  ;;  %v4306_v11 = vadd.f32 %v4305_v10, %v4293_v7  ;;  %v7289_v57 = vld [vmem:[%s9074_s1 + $0xa20] sm:$0xff] }
 0x122   :  { %4543 = vmatpush.bf16.msrb.mxu0 %v7260_v52  ;;  %4525 = vmatmul.bf16.vlgmr.msra.gmra.mxu2 %v1053_v58  ;;  %v7306_v52 = vld [vmem:[%s9074_s1 + $0xaa8] sm:$0xff]  ;;  %v7305_v58 = vld [vmem:[%s9074_s1 + $0xaa0] sm:$0xff] }
 0x123   :  { %4569 = vmatpush.bf16.msrb.mxu2 %v7276_v53  ;;  %4512 = vmatmul.bf16.vlgmr.msra.gmra.mxu1 %v1052_v60  ;;  %v7298_v53 = vld [vmem:[%s9074_s1 + $0xa68] sm:$0xff] }
 0x124   :  { %4556 = vmatpush.bf16.msrb.mxu1 %v7268_v56  ;;  %4538 = vmatmul.bf16.vlgmr.msra.gmra.mxu3 %v1054_v61  ;;  %v7297_v61 = vld [vmem:[%s9074_s1 + $0xa60] sm:$0xff] }
 0x125   :  { %4582 = vmatpush.bf16.msrb.mxu3 %v7284_v59  ;;  %v4318_v16 = vpop.f32.mrf.mxu2 }
 0x126   :  { %4544 = vmatpush.bf16.msrb.mxu0 %v7259_v62  ;;  %v4319_v17 = vadd.f32 %v4318_v16, %v4306_v11  ;;  %v4294_v21 = vpop.f32.mrf.mxu0  ;;  %v7313_v62 = vld [vmem:[%s9074_s1 + $0xae0] sm:$0xff]  ;;  %v7295_v11 = vld [vmem:[%s9074_s1 + $0xa50] sm:$0xff]  ;;  %v7294_v16 = vld [vmem:[%s9074_s1 + $0xa48] sm:$0xff] }
 0x127   :  { %4570 = vmatpush.bf16.msrb.mxu2 %v7275_v63  ;;  %v4331_v20 = vpop.f32.mrf.mxu3  ;;  %v7288_v63 = vld [vmem:[%s9074_s1 + $0xa18] sm:$0xff] }
 0x128   :  { %4557 = vmatpush.bf16.msrb.mxu1 %v7267_v0  ;;  %v8482_v22 = vadd.f32 %v4331_v20, %v4319_v17  ;;  %v4307_v25 = vpop.f32.mrf.mxu1  ;;  %v7304_v0 = vld [vmem:[%s9074_s1 + $0xa98] sm:$0xff]  ;;  %v7310_v17 = vld [vmem:[%s9074_s1 + $0xac8] sm:$0xff]  ;;  %v7301_v20 = vld [vmem:[%s9074_s1 + $0xa80] sm:$0xff] }
 0x129   :  { %4583 = vmatpush.bf16.msrb.mxu3 %v7283_v1  ;;  %v7324_v21 = vld [vmem:[%s9074_s1 + $0xb38] sm:$0xff] }
 0x12a   :  { %4545 = vmatpush.bf16.msrb.mxu0 %v7258_v2  ;;  %v7332_v25 = vld [vmem:[%s9074_s1 + $0xb78] sm:$0xff] }
 0x12b   :  { %4571 = vmatpush.bf16.msrb.mxu2 %v7274_v3  ;;  %v7296_v3 = vld [vmem:[%s9074_s1 + $0xa58] sm:$0xff] }
 0x12c   :  { %4558 = vmatpush.bf16.msrb.mxu1 %v7266_v4  ;;  %v7312_v4 = vld [vmem:[%s9074_s1 + $0xad8] sm:$0xff] }
 0x12d   :  { %4584 = vmatpush.bf16.msrb.mxu3 %v7282_v5  ;;  %v4320_v34 = vpop.f32.mrf.mxu2 }
 0x12e   :  { %4546 = vmatpush.bf16.msrb.mxu0 %v7257_v8  ;;  %v7287_v8 = vld [vmem:[%s9074_s1 + $0xa10] sm:$0xff] }
 0x12f   :  { %4572 = vmatpush.bf16.msrb.mxu2 %v7273_v9  ;;  %v4333_v38 = vpop.f32.mrf.mxu3  ;;  %v7303_v9 = vld [vmem:[%s9074_s1 + $0xa90] sm:$0xff] }
 0x130   :  { %4559 = vmatpush.bf16.msrb.mxu1 %v7265_v12  ;;  %v7311_v12 = vld [vmem:[%s9074_s1 + $0xad0] sm:$0xff]  ;;  %v7346_v38 = vld [vmem:[%s9074_s1 + $0xbe8] sm:$0xff] }
 0x131   :  { %4585 = vmatpush.bf16.msrb.mxu3 %v7281_v13  ;;  %v7286_v13 = vld [vmem:[%s9074_s1 + $0xa08] sm:$0xff]  ;;  %v7347_v34 = vld [vmem:[%s9074_s1 + $0xbf0] sm:$0xff] }
 0x132   :  { %4547 = vmatpush.bf16.msrb.mxu0 %v7256_v14  ;;  %v7302_v14 = vld [vmem:[%s9074_s1 + $0xa88] sm:$0xff] }
 0x133   :  { %4573 = vmatpush.bf16.msrb.mxu2 %v7272_v15 }
 0x134   :  { %4560 = vmatpush.bf16.msrb.mxu1 %v7264_v18 }
 0x135   :  { %4586 = vmatpush.bf16.msrb.mxu3 %v7280_v19  ;;  %v7285_v19 = vld [vmem:[%s9074_s1 + $0xa00] sm:$0xff] }
 0x136   :  { %4548 = vmatpush.bf16.msrb.mxu0 %v7255_v23  ;;  %v7293_v23 = vld [vmem:[%s9074_s1 + $0xa40] sm:$0xff] }
 0x137   :  { %4574 = vmatpush.bf16.msrb.mxu2 %v7271_v24  ;;  %v7309_v24 = vld [vmem:[%s9074_s1 + $0xac0] sm:$0xff] }
 0x138   :  { %4561 = vmatpush.bf16.msrb.mxu1 %v7263_v26  ;;  %v1061_v26 = vld [vmem:[#allocation1] sm:$0xff] }
 0x139   :  { %4587 = vmatpush.bf16.msrb.mxu3 %v7279_v27  ;;  %v1063_v27 = vld [vmem:[#allocation1 + $0x12] sm:$0xff] }
 0x13a   :  { %4549 = vmatpush.bf16.msrb.mxu0 %v7254_v28  ;;  %v7348_v28 = vld [vmem:[%s9074_s1 + $0xbf8] sm:$0xff] }
 0x13b   :  { %4575 = vmatpush.bf16.msrb.mxu2 %v7270_v29  ;;  %v1062_v29 = vld [vmem:[#allocation1 + $0x9] sm:$0xff] }
 0x13c   :  { %4562 = vmatpush.bf16.msrb.mxu1 %v7262_v36  ;;  %v7338_v36 = vld [vmem:[%s9074_s1 + $0xba8] sm:$0xff] }
 0x13d   :  { %4588 = vmatpush.bf16.msrb.mxu3 %v7278_v37  ;;  %v7330_v37 = vld [vmem:[%s9074_s1 + $0xb68] sm:$0xff] }
 0x13e   :  { %4550 = vmatpush.bf16.msrb.mxu0 %v7253_v39  ;;  %v4344_v55 = vpop.f32.mrf.mxu0 }
 0x13f   :  { %4576 = vmatpush.bf16.msrb.mxu2 %v7269_v40  ;;  %v4345_v56 = vadd.f32 %v4344_v55, %v8482_v22  ;;  %v7340_v22 = vld [vmem:[%s9074_s1 + $0xbb8] sm:$0xff] }
 0x140   :  { %4563 = vmatpush.bf16.msrb.mxu1 %v7261_v43  ;;  %v4357_v59 = vpop.f32.mrf.mxu1 }
 0x141   :  { %4589 = vmatpush.bf16.msrb.mxu3 %v7277_v44  ;;  %4551 = vmatmul.bf16.vlgmr.msrb.gmra.mxu0 %v1055_v30  ;;  %v4358_v60 = vadd.f32 %v4357_v59, %v4345_v56  ;;  %v1064_v30 = vld [vmem:[#allocation1 + $0x1b] sm:$0xff]  ;;  %v7319_v56 = vld [vmem:[%s9074_s1 + $0xb10] sm:$0xff] }
 0x142   :  { %4595 = vmatpush.bf16.msra.mxu0 %v7292_v41  ;;  %4577 = vmatmul.bf16.vlgmr.msrb.gmra.mxu2 %v1057_v31  ;;  %v7323_v31 = vld [vmem:[%s9074_s1 + $0xb30] sm:$0xff]  ;;  %v7321_v41 = vld [vmem:[%s9074_s1 + $0xb20] sm:$0xff] }
 0x143   :  { %4621 = vmatpush.bf16.msra.mxu2 %v7308_v42  ;;  %4564 = vmatmul.bf16.vlgmr.msrb.gmra.mxu1 %v1056_v32  ;;  %v7339_v32 = vld [vmem:[%s9074_s1 + $0xbb0] sm:$0xff]  ;;  %v7337_v42 = vld [vmem:[%s9074_s1 + $0xba0] sm:$0xff] }
 0x144   :  { %4608 = vmatpush.bf16.msra.mxu1 %v7300_v45  ;;  %4590 = vmatmul.bf16.vlgmr.msrb.gmra.mxu3 %v1058_v33  ;;  %v7331_v33 = vld [vmem:[%s9074_s1 + $0xb70] sm:$0xff]  ;;  %v7329_v45 = vld [vmem:[%s9074_s1 + $0xb60] sm:$0xff] }
 0x145   :  { %4634 = vmatpush.bf16.msra.mxu3 %v7316_v46  ;;  %v4370_v1 = vpop.f32.mrf.mxu2  ;;  %v7345_v46 = vld [vmem:[%s9074_s1 + $0xbe0] sm:$0xff]  ;;  %v7327_v59 = vld [vmem:[%s9074_s1 + $0xb50] sm:$0xff] }
 0x146   :  { %4596 = vmatpush.bf16.msra.mxu0 %v7291_v47  ;;  %v4371_v2 = vadd.f32 %v4370_v1, %v4358_v60  ;;  %v4346_v6 = vpop.f32.mrf.mxu0  ;;  %v7320_v47 = vld [vmem:[%s9074_s1 + $0xb18] sm:$0xff]  ;;  %v7343_v60 = vld [vmem:[%s9074_s1 + $0xbd0] sm:$0xff] }
 0x147   :  { %4622 = vmatpush.bf16.msra.mxu2 %v7307_v48  ;;  %v4383_v5 = vpop.f32.mrf.mxu3  ;;  %v7336_v48 = vld [vmem:[%s9074_s1 + $0xb98] sm:$0xff]  ;;  %v1066_v1 = vld [vmem:[#allocation1 + $0x2d] sm:$0xff] }
 0x148   :  { %4609 = vmatpush.bf16.msra.mxu1 %v7299_v49  ;;  %v4384_v7 = vadd.f32 %v4383_v5, %v4371_v2  ;;  %v4359_v10 = vpop.f32.mrf.mxu1  ;;  %v1068_v2 = vld [vmem:[#allocation1 + $0x3f] sm:$0xff]  ;;  %v7326_v5 = vld [vmem:[%s9074_s1 + $0xb48] sm:$0xff] }
 0x149   :  { %4635 = vmatpush.bf16.msra.mxu3 %v7315_v50  ;;  %v7342_v6 = vld [vmem:[%s9074_s1 + $0xbc8] sm:$0xff]  ;;  %v7356_v10 = vld [vmem:[%s9074_s1 + $0xc38] sm:$0xff] }
 0x14a   :  { %4597 = vmatpush.bf16.msra.mxu0 %v7290_v51  ;;  %v7328_v51 = vld [vmem:[%s9074_s1 + $0xb58] sm:$0xff] }
 0x14b   :  { %4623 = vmatpush.bf16.msra.mxu2 %v7306_v52  ;;  %v7344_v52 = vld [vmem:[%s9074_s1 + $0xbd8] sm:$0xff] }
 0x14c   :  { %4610 = vmatpush.bf16.msra.mxu1 %v7298_v53 }
 0x14d   :  { %4636 = vmatpush.bf16.msra.mxu3 %v7314_v54  ;;  %v4372_v15 = vpop.f32.mrf.mxu2 }
 0x14e   :  { %4598 = vmatpush.bf16.msra.mxu0 %v7289_v57  ;;  %v7335_v57 = vld [vmem:[%s9074_s1 + $0xb90] sm:$0xff]  ;;  %v7380_v15 = vld [vmem:[%s9074_s1 + $0xcf8] sm:$0xff] }
 0x14f   :  { %4624 = vmatpush.bf16.msra.mxu2 %v7305_v58  ;;  %v4385_v18 = vpop.f32.mrf.mxu3 }
 0x150   :  { %4611 = vmatpush.bf16.msra.mxu1 %v7297_v61  ;;  %v7318_v61 = vld [vmem:[%s9074_s1 + $0xb08] sm:$0xff]  ;;  %v7363_v18 = vld [vmem:[%s9074_s1 + $0xc70] sm:$0xff] }
 0x151   :  { %4637 = vmatpush.bf16.msra.mxu3 %v7313_v62  ;;  %v7334_v62 = vld [vmem:[%s9074_s1 + $0xb88] sm:$0xff] }
 0x152   :  { %4599 = vmatpush.bf16.msra.mxu0 %v7288_v63  ;;  %v1065_v63 = vld [vmem:[#allocation1 + $0x24] sm:$0xff] }
 0x153   :  { %4625 = vmatpush.bf16.msra.mxu2 %v7304_v0  ;;  %v1067_v0 = vld [vmem:[#allocation1 + $0x36] sm:$0xff] }
 0x154   :  { %4612 = vmatpush.bf16.msra.mxu1 %v7296_v3 }
 0x155   :  { %4638 = vmatpush.bf16.msra.mxu3 %v7312_v4  ;;  %v27_v4 = vld [vmem:[%s9073_s0 + $0x30] sm:$0xff] }
 0x156   :  { %4600 = vmatpush.bf16.msra.mxu0 %v7287_v8  ;;  %1070 = vst [vmem:[#allocation1] ss:$9 sm:$0xff] %v27_v4  ;;  %v7317_v8 = vld [vmem:[%s9074_s1 + $0xb00] sm:$0xff]  ;;  %v7386_v4 = vld [vmem:[%s9074_s1 + $0xd28] sm:$0xff] }
 0x157   :  { %4626 = vmatpush.bf16.msra.mxu2 %v7303_v9  ;;  %v7333_v9 = vld [vmem:[%s9074_s1 + $0xb80] sm:$0xff] }
 0x158   :  { %4613 = vmatpush.bf16.msra.mxu1 %v7295_v11  ;;  %v7372_v11 = vld [vmem:[%s9074_s1 + $0xcb8] sm:$0xff] }
 0x159   :  { %4639 = vmatpush.bf16.msra.mxu3 %v7311_v12  ;;  %v7325_v12 = vld [vmem:[%s9074_s1 + $0xb40] sm:$0xff] }
 0x15a   :  { %4601 = vmatpush.bf16.msra.mxu0 %v7286_v13  ;;  %v7341_v13 = vld [vmem:[%s9074_s1 + $0xbc0] sm:$0xff] }
 0x15b   :  { %4627 = vmatpush.bf16.msra.mxu2 %v7302_v14  ;;  %v7364_v14 = vld [vmem:[%s9074_s1 + $0xc78] sm:$0xff] }
 0x15c   :  { %4614 = vmatpush.bf16.msra.mxu1 %v7294_v16  ;;  %v7355_v16 = vld [vmem:[%s9074_s1 + $0xc30] sm:$0xff] }
 0x15d   :  { %4640 = vmatpush.bf16.msra.mxu3 %v7310_v17  ;;  %v7371_v17 = vld [vmem:[%s9074_s1 + $0xcb0] sm:$0xff] }
 0x15e   :  { %4602 = vmatpush.bf16.msra.mxu0 %v7285_v19  ;;  %v4396_v39 = vpop.f32.mrf.mxu0  ;;  %v7379_v19 = vld [vmem:[%s9074_s1 + $0xcf0] sm:$0xff] }
 0x15f   :  { %4628 = vmatpush.bf16.msra.mxu2 %v7301_v20  ;;  %v4397_v40 = vadd.f32 %v4396_v39, %v4384_v7  ;;  %v7354_v20 = vld [vmem:[%s9074_s1 + $0xc28] sm:$0xff] }
 0x160   :  { %4615 = vmatpush.bf16.msra.mxu1 %v7293_v23  ;;  %v4409_v43 = vpop.f32.mrf.mxu1  ;;  %v7378_v23 = vld [vmem:[%s9074_s1 + $0xce8] sm:$0xff] }
 0x161   :  { %4641 = vmatpush.bf16.msra.mxu3 %v7309_v24  ;;  %4603 = vmatmul.bf16.vlgmr.msra.gmra.mxu0 %v1061_v26  ;;  %v4410_v44 = vadd.f32 %v4409_v43, %v4397_v40  ;;  %v7353_v26 = vld [vmem:[%s9074_s1 + $0xc20] sm:$0xff] }
 0x162   :  { %4647 = vmatpush.bf16.msrb.mxu0 %v7324_v21  ;;  %4629 = vmatmul.bf16.vlgmr.msra.gmra.mxu2 %v1063_v27  ;;  %v7370_v21 = vld [vmem:[%s9074_s1 + $0xca8] sm:$0xff]  ;;  %v7369_v27 = vld [vmem:[%s9074_s1 + $0xca0] sm:$0xff] }
 0x163   :  { %4673 = vmatpush.bf16.msrb.mxu2 %v7340_v22  ;;  %4616 = vmatmul.bf16.vlgmr.msra.gmra.mxu1 %v1062_v29  ;;  %v7362_v22 = vld [vmem:[%s9074_s1 + $0xc68] sm:$0xff] }
 0x164   :  { %4660 = vmatpush.bf16.msrb.mxu1 %v7332_v25  ;;  %4642 = vmatmul.bf16.vlgmr.msra.gmra.mxu3 %v1064_v30  ;;  %v7361_v30 = vld [vmem:[%s9074_s1 + $0xc60] sm:$0xff] }
 0x165   :  { %4686 = vmatpush.bf16.msrb.mxu3 %v7348_v28  ;;  %v4422_v49 = vpop.f32.mrf.mxu2 }
 0x166   :  { %4648 = vmatpush.bf16.msrb.mxu0 %v7323_v31  ;;  %v4423_v50 = vadd.f32 %v4422_v49, %v4410_v44  ;;  %v4398_v54 = vpop.f32.mrf.mxu0  ;;  %v7377_v31 = vld [vmem:[%s9074_s1 + $0xce0] sm:$0xff]  ;;  %v7359_v44 = vld [vmem:[%s9074_s1 + $0xc50] sm:$0xff]  ;;  %v7358_v49 = vld [vmem:[%s9074_s1 + $0xc48] sm:$0xff] }
 0x167   :  { %4674 = vmatpush.bf16.msrb.mxu2 %v7339_v32  ;;  %v4435_v53 = vpop.f32.mrf.mxu3  ;;  %v7352_v32 = vld [vmem:[%s9074_s1 + $0xc18] sm:$0xff] }
 0x168   :  { %4661 = vmatpush.bf16.msrb.mxu1 %v7331_v33  ;;  %v8680_v55 = vadd.f32 %v4435_v53, %v4423_v50  ;;  %v4411_v58 = vpop.f32.mrf.mxu1  ;;  %v7368_v33 = vld [vmem:[%s9074_s1 + $0xc98] sm:$0xff]  ;;  %v7374_v50 = vld [vmem:[%s9074_s1 + $0xcc8] sm:$0xff]  ;;  %v7365_v53 = vld [vmem:[%s9074_s1 + $0xc80] sm:$0xff] }
 0x169   :  { %4687 = vmatpush.bf16.msrb.mxu3 %v7347_v34  ;;  %v7388_v54 = vld [vmem:[%s9074_s1 + $0xd38] sm:$0xff] }
 0x16a   :  { %4649 = vmatpush.bf16.msrb.mxu0 %v7322_v35  ;;  %v7396_v58 = vld [vmem:[%s9074_s1 + $0xd78] sm:$0xff] }
 0x16b   :  { %4675 = vmatpush.bf16.msrb.mxu2 %v7338_v36  ;;  %v7360_v36 = vld [vmem:[%s9074_s1 + $0xc58] sm:$0xff] }
 0x16c   :  { %4662 = vmatpush.bf16.msrb.mxu1 %v7330_v37  ;;  %v7376_v37 = vld [vmem:[%s9074_s1 + $0xcd8] sm:$0xff] }
 0x16d   :  { %4688 = vmatpush.bf16.msrb.mxu3 %v7346_v38  ;;  %v4424_v3 = vpop.f32.mrf.mxu2 }
 0x16e   :  { %4650 = vmatpush.bf16.msrb.mxu0 %v7321_v41  ;;  %v7351_v41 = vld [vmem:[%s9074_s1 + $0xc10] sm:$0xff] }
 0x16f   :  { %4676 = vmatpush.bf16.msrb.mxu2 %v7337_v42  ;;  %v4437_v7 = vpop.f32.mrf.mxu3  ;;  %v7367_v42 = vld [vmem:[%s9074_s1 + $0xc90] sm:$0xff] }
 0x170   :  { %4663 = vmatpush.bf16.msrb.mxu1 %v7329_v45  ;;  %v7375_v45 = vld [vmem:[%s9074_s1 + $0xcd0] sm:$0xff]  ;;  %v7410_v7 = vld [vmem:[%s9074_s1 + $0xde8] sm:$0xff] }
 0x171   :  { %4689 = vmatpush.bf16.msrb.mxu3 %v7345_v46  ;;  %v7350_v46 = vld [vmem:[%s9074_s1 + $0xc08] sm:$0xff]  ;;  %v7411_v3 = vld [vmem:[%s9074_s1 + $0xdf0] sm:$0xff] }
 0x172   :  { %4651 = vmatpush.bf16.msrb.mxu0 %v7320_v47  ;;  %v7366_v47 = vld [vmem:[%s9074_s1 + $0xc88] sm:$0xff] }
 0x173   :  { %4677 = vmatpush.bf16.msrb.mxu2 %v7336_v48 }
 0x174   :  { %4664 = vmatpush.bf16.msrb.mxu1 %v7328_v51 }
 0x175   :  { %4690 = vmatpush.bf16.msrb.mxu3 %v7344_v52  ;;  %v7349_v52 = vld [vmem:[%s9074_s1 + $0xc00] sm:$0xff] }
 0x176   :  { %4652 = vmatpush.bf16.msrb.mxu0 %v7319_v56  ;;  %v7357_v56 = vld [vmem:[%s9074_s1 + $0xc40] sm:$0xff] }
 0x177   :  { %4678 = vmatpush.bf16.msrb.mxu2 %v7335_v57  ;;  %v7373_v57 = vld [vmem:[%s9074_s1 + $0xcc0] sm:$0xff] }
 0x178   :  { %4665 = vmatpush.bf16.msrb.mxu1 %v7327_v59  ;;  %v1071_v59 = vld [vmem:[#allocation1] sm:$0xff] }
 0x179   :  { %4691 = vmatpush.bf16.msrb.mxu3 %v7343_v60  ;;  %v1073_v60 = vld [vmem:[#allocation1 + $0x12] sm:$0xff] }
 0x17a   :  { %4653 = vmatpush.bf16.msrb.mxu0 %v7318_v61  ;;  %v7412_v61 = vld [vmem:[%s9074_s1 + $0xdf8] sm:$0xff] }
 0x17b   :  { %4679 = vmatpush.bf16.msrb.mxu2 %v7334_v62  ;;  %v1072_v62 = vld [vmem:[#allocation1 + $0x9] sm:$0xff] }
 0x17c   :  { %4666 = vmatpush.bf16.msrb.mxu1 %v7326_v5  ;;  %v7402_v5 = vld [vmem:[%s9074_s1 + $0xda8] sm:$0xff] }
 0x17d   :  { %4692 = vmatpush.bf16.msrb.mxu3 %v7342_v6  ;;  %v7394_v6 = vld [vmem:[%s9074_s1 + $0xd68] sm:$0xff] }
 0x17e   :  { %4654 = vmatpush.bf16.msrb.mxu0 %v7317_v8  ;;  %v4448_v24 = vpop.f32.mrf.mxu0 }
 0x17f   :  { %4680 = vmatpush.bf16.msrb.mxu2 %v7333_v9  ;;  %v4449_v25 = vadd.f32 %v4448_v24, %v8680_v55  ;;  %v7404_v55 = vld [vmem:[%s9074_s1 + $0xdb8] sm:$0xff] }
 0x180   :  { %4667 = vmatpush.bf16.msrb.mxu1 %v7325_v12  ;;  %v4461_v28 = vpop.f32.mrf.mxu1 }
 0x181   :  { %4693 = vmatpush.bf16.msrb.mxu3 %v7341_v13  ;;  %4655 = vmatmul.bf16.vlgmr.msrb.gmra.mxu0 %v1065_v63  ;;  %v4462_v29 = vadd.f32 %v4461_v28, %v4449_v25  ;;  %v1074_v63 = vld [vmem:[#allocation1 + $0x1b] sm:$0xff]  ;;  %v7383_v25 = vld [vmem:[%s9074_s1 + $0xd10] sm:$0xff] }
 0x182   :  { %4699 = vmatpush.bf16.msra.mxu0 %v7356_v10  ;;  %4681 = vmatmul.bf16.vlgmr.msrb.gmra.mxu2 %v1067_v0  ;;  %v7387_v0 = vld [vmem:[%s9074_s1 + $0xd30] sm:$0xff]  ;;  %v7385_v10 = vld [vmem:[%s9074_s1 + $0xd20] sm:$0xff] }
 0x183   :  { %4725 = vmatpush.bf16.msra.mxu2 %v7372_v11  ;;  %4668 = vmatmul.bf16.vlgmr.msrb.gmra.mxu1 %v1066_v1  ;;  %v7403_v1 = vld [vmem:[%s9074_s1 + $0xdb0] sm:$0xff]  ;;  %v7401_v11 = vld [vmem:[%s9074_s1 + $0xda0] sm:$0xff] }
 0x184   :  { %4712 = vmatpush.bf16.msra.mxu1 %v7364_v14  ;;  %4694 = vmatmul.bf16.vlgmr.msrb.gmra.mxu3 %v1068_v2  ;;  %v7395_v2 = vld [vmem:[%s9074_s1 + $0xd70] sm:$0xff]  ;;  %v7393_v14 = vld [vmem:[%s9074_s1 + $0xd60] sm:$0xff] }
 0x185   :  { %4738 = vmatpush.bf16.msra.mxu3 %v7380_v15  ;;  %v4474_v34 = vpop.f32.mrf.mxu2  ;;  %v7409_v15 = vld [vmem:[%s9074_s1 + $0xde0] sm:$0xff]  ;;  %v7391_v28 = vld [vmem:[%s9074_s1 + $0xd50] sm:$0xff] }
 0x186   :  { %4700 = vmatpush.bf16.msra.mxu0 %v7355_v16  ;;  %v4475_v35 = vadd.f32 %v4474_v34, %v4462_v29  ;;  %v4450_v39 = vpop.f32.mrf.mxu0  ;;  %v7384_v16 = vld [vmem:[%s9074_s1 + $0xd18] sm:$0xff]  ;;  %v7407_v29 = vld [vmem:[%s9074_s1 + $0xdd0] sm:$0xff] }
 0x187   :  { %4726 = vmatpush.bf16.msra.mxu2 %v7371_v17  ;;  %v4487_v38 = vpop.f32.mrf.mxu3  ;;  %v7400_v17 = vld [vmem:[%s9074_s1 + $0xd98] sm:$0xff]  ;;  %v1076_v34 = vld [vmem:[#allocation1 + $0x2d] sm:$0xff] }
 0x188   :  { %4713 = vmatpush.bf16.msra.mxu1 %v7363_v18  ;;  %v4488_v40 = vadd.f32 %v4487_v38, %v4475_v35  ;;  %v4463_v43 = vpop.f32.mrf.mxu1  ;;  %v1078_v35 = vld [vmem:[#allocation1 + $0x3f] sm:$0xff]  ;;  %v7390_v38 = vld [vmem:[%s9074_s1 + $0xd48] sm:$0xff] }
 0x189   :  { %4739 = vmatpush.bf16.msra.mxu3 %v7379_v19  ;;  %v7406_v39 = vld [vmem:[%s9074_s1 + $0xdc8] sm:$0xff]  ;;  %v7420_v43 = vld [vmem:[%s9074_s1 + $0xe38] sm:$0xff] }
 0x18a   :  { %4701 = vmatpush.bf16.msra.mxu0 %v7354_v20  ;;  %v7392_v20 = vld [vmem:[%s9074_s1 + $0xd58] sm:$0xff] }
 0x18b   :  { %4727 = vmatpush.bf16.msra.mxu2 %v7370_v21  ;;  %v7408_v21 = vld [vmem:[%s9074_s1 + $0xdd8] sm:$0xff] }
 0x18c   :  { %4714 = vmatpush.bf16.msra.mxu1 %v7362_v22 }
 0x18d   :  { %4740 = vmatpush.bf16.msra.mxu3 %v7378_v23  ;;  %v4476_v48 = vpop.f32.mrf.mxu2 }
 0x18e   :  { %4702 = vmatpush.bf16.msra.mxu0 %v7353_v26  ;;  %v7399_v26 = vld [vmem:[%s9074_s1 + $0xd90] sm:$0xff]  ;;  %v7444_v48 = vld [vmem:[%s9074_s1 + $0xef8] sm:$0xff] }
 0x18f   :  { %4728 = vmatpush.bf16.msra.mxu2 %v7369_v27  ;;  %v4489_v51 = vpop.f32.mrf.mxu3 }
 0x190   :  { %4715 = vmatpush.bf16.msra.mxu1 %v7361_v30  ;;  %v7382_v30 = vld [vmem:[%s9074_s1 + $0xd08] sm:$0xff]  ;;  %v7427_v51 = vld [vmem:[%s9074_s1 + $0xe70] sm:$0xff] }
 0x191   :  { %4741 = vmatpush.bf16.msra.mxu3 %v7377_v31  ;;  %v7398_v31 = vld [vmem:[%s9074_s1 + $0xd88] sm:$0xff] }
 0x192   :  { %4703 = vmatpush.bf16.msra.mxu0 %v7352_v32  ;;  %v1075_v32 = vld [vmem:[#allocation1 + $0x24] sm:$0xff] }
 0x193   :  { %4729 = vmatpush.bf16.msra.mxu2 %v7368_v33  ;;  %v1077_v33 = vld [vmem:[#allocation1 + $0x36] sm:$0xff] }
 0x194   :  { %4716 = vmatpush.bf16.msra.mxu1 %v7360_v36 }
 0x195   :  { %4742 = vmatpush.bf16.msra.mxu3 %v7376_v37  ;;  %v28_v37 = vld [vmem:[%s9073_s0 + $0x38] sm:$0x1f] }
 0x196   :  { %4704 = vmatpush.bf16.msra.mxu0 %v7351_v41  ;;  %1080 = vst [vmem:[#allocation1] ss:$9 sm:$0xff] %v28_v37  ;;  %v7381_v41 = vld [vmem:[%s9074_s1 + $0xd00] sm:$0xff]  ;;  %v7448_v37 = vld [vmem:[%s9074_s1 + $0xf18] sm:$0xff] }
 0x197   :  { %4730 = vmatpush.bf16.msra.mxu2 %v7367_v42  ;;  %v7397_v42 = vld [vmem:[%s9074_s1 + $0xd80] sm:$0xff] }
 0x198   :  { %4717 = vmatpush.bf16.msra.mxu1 %v7359_v44  ;;  %v7436_v44 = vld [vmem:[%s9074_s1 + $0xeb8] sm:$0xff] }
 0x199   :  { %4743 = vmatpush.bf16.msra.mxu3 %v7375_v45  ;;  %v7389_v45 = vld [vmem:[%s9074_s1 + $0xd40] sm:$0xff] }
 0x19a   :  { %4705 = vmatpush.bf16.msra.mxu0 %v7350_v46  ;;  %v7405_v46 = vld [vmem:[%s9074_s1 + $0xdc0] sm:$0xff] }
 0x19b   :  { %4731 = vmatpush.bf16.msra.mxu2 %v7366_v47  ;;  %v7428_v47 = vld [vmem:[%s9074_s1 + $0xe78] sm:$0xff] }
 0x19c   :  { %4718 = vmatpush.bf16.msra.mxu1 %v7358_v49  ;;  %v7419_v49 = vld [vmem:[%s9074_s1 + $0xe30] sm:$0xff] }
 0x19d   :  { %4744 = vmatpush.bf16.msra.mxu3 %v7374_v50  ;;  %v7435_v50 = vld [vmem:[%s9074_s1 + $0xeb0] sm:$0xff] }
 0x19e   :  { %4706 = vmatpush.bf16.msra.mxu0 %v7349_v52  ;;  %v4500_v8 = vpop.f32.mrf.mxu0  ;;  %v7443_v52 = vld [vmem:[%s9074_s1 + $0xef0] sm:$0xff] }
 0x19f   :  { %4732 = vmatpush.bf16.msra.mxu2 %v7365_v53  ;;  %v4501_v9 = vadd.f32 %v4500_v8, %v4488_v40  ;;  %v7418_v53 = vld [vmem:[%s9074_s1 + $0xe28] sm:$0xff] }
 0x1a0   :  { %4719 = vmatpush.bf16.msra.mxu1 %v7357_v56  ;;  %v4513_v12 = vpop.f32.mrf.mxu1  ;;  %v7442_v56 = vld [vmem:[%s9074_s1 + $0xee8] sm:$0xff] }
 0x1a1   :  { %4745 = vmatpush.bf16.msra.mxu3 %v7373_v57  ;;  %4707 = vmatmul.bf16.vlgmr.msra.gmra.mxu0 %v1071_v59  ;;  %v4514_v13 = vadd.f32 %v4513_v12, %v4501_v9  ;;  %v7417_v59 = vld [vmem:[%s9074_s1 + $0xe20] sm:$0xff] }
 0x1a2   :  { %4751 = vmatpush.bf16.msrb.mxu0 %v7388_v54  ;;  %4733 = vmatmul.bf16.vlgmr.msra.gmra.mxu2 %v1073_v60  ;;  %v7434_v54 = vld [vmem:[%s9074_s1 + $0xea8] sm:$0xff]  ;;  %v7433_v60 = vld [vmem:[%s9074_s1 + $0xea0] sm:$0xff] }
 0x1a3   :  { %4777 = vmatpush.bf16.msrb.mxu2 %v7404_v55  ;;  %4720 = vmatmul.bf16.vlgmr.msra.gmra.mxu1 %v1072_v62  ;;  %v7426_v55 = vld [vmem:[%s9074_s1 + $0xe68] sm:$0xff] }
 0x1a4   :  { %4764 = vmatpush.bf16.msrb.mxu1 %v7396_v58  ;;  %4746 = vmatmul.bf16.vlgmr.msra.gmra.mxu3 %v1074_v63  ;;  %v7425_v63 = vld [vmem:[%s9074_s1 + $0xe60] sm:$0xff] }
 0x1a5   :  { %4790 = vmatpush.bf16.msrb.mxu3 %v7412_v61  ;;  %v4526_v18 = vpop.f32.mrf.mxu2 }
 0x1a6   :  { %4752 = vmatpush.bf16.msrb.mxu0 %v7387_v0  ;;  %v4527_v19 = vadd.f32 %v4526_v18, %v4514_v13  ;;  %v4502_v23 = vpop.f32.mrf.mxu0  ;;  %v7441_v0 = vld [vmem:[%s9074_s1 + $0xee0] sm:$0xff]  ;;  %v7423_v13 = vld [vmem:[%s9074_s1 + $0xe50] sm:$0xff]  ;;  %v7422_v18 = vld [vmem:[%s9074_s1 + $0xe48] sm:$0xff] }
 0x1a7   :  { %4778 = vmatpush.bf16.msrb.mxu2 %v7403_v1  ;;  %v4539_v22 = vpop.f32.mrf.mxu3  ;;  %v7416_v1 = vld [vmem:[%s9074_s1 + $0xe18] sm:$0xff] }
 0x1a8   :  { %4765 = vmatpush.bf16.msrb.mxu1 %v7395_v2  ;;  %v8878_v24 = vadd.f32 %v4539_v22, %v4527_v19  ;;  %v4515_v27 = vpop.f32.mrf.mxu1  ;;  %v7432_v2 = vld [vmem:[%s9074_s1 + $0xe98] sm:$0xff]  ;;  %v7438_v19 = vld [vmem:[%s9074_s1 + $0xec8] sm:$0xff]  ;;  %v7429_v22 = vld [vmem:[%s9074_s1 + $0xe80] sm:$0xff] }
 0x1a9   :  { %4791 = vmatpush.bf16.msrb.mxu3 %v7411_v3  ;;  %v7452_v23 = vld [vmem:[%s9074_s1 + $0xf38] sm:$0xff] }
 0x1aa   :  { %4753 = vmatpush.bf16.msrb.mxu0 %v7386_v4  ;;  %v1083_v27 = vld [vmem:[#allocation1 + $0x12] sm:$0xff] }
 0x1ab   :  { %4779 = vmatpush.bf16.msrb.mxu2 %v7402_v5  ;;  %v7424_v5 = vld [vmem:[%s9074_s1 + $0xe58] sm:$0xff] }
 0x1ac   :  { %4766 = vmatpush.bf16.msrb.mxu1 %v7394_v6  ;;  %v7440_v6 = vld [vmem:[%s9074_s1 + $0xed8] sm:$0xff] }
 0x1ad   :  { %4792 = vmatpush.bf16.msrb.mxu3 %v7410_v7  ;;  %v4528_v36 = vpop.f32.mrf.mxu2 }
 0x1ae   :  { %4754 = vmatpush.bf16.msrb.mxu0 %v7385_v10  ;;  %v7415_v10 = vld [vmem:[%s9074_s1 + $0xe10] sm:$0xff] }
 0x1af   :  { %4780 = vmatpush.bf16.msrb.mxu2 %v7401_v11  ;;  %v4541_v40 = vpop.f32.mrf.mxu3  ;;  %v7431_v11 = vld [vmem:[%s9074_s1 + $0xe90] sm:$0xff] }
 0x1b0   :  { %4767 = vmatpush.bf16.msrb.mxu1 %v7393_v14  ;;  %v7439_v14 = vld [vmem:[%s9074_s1 + $0xed0] sm:$0xff] }
 0x1b1   :  { %4793 = vmatpush.bf16.msrb.mxu3 %v7409_v15  ;;  %v7414_v15 = vld [vmem:[%s9074_s1 + $0xe08] sm:$0xff] }
 0x1b2   :  { %4755 = vmatpush.bf16.msrb.mxu0 %v7384_v16  ;;  %v7430_v16 = vld [vmem:[%s9074_s1 + $0xe88] sm:$0xff] }
 0x1b3   :  { %4781 = vmatpush.bf16.msrb.mxu2 %v7400_v17 }
 0x1b4   :  { %4768 = vmatpush.bf16.msrb.mxu1 %v7392_v20 }
 0x1b5   :  { %4794 = vmatpush.bf16.msrb.mxu3 %v7408_v21  ;;  %v7413_v21 = vld [vmem:[%s9074_s1 + $0xe00] sm:$0xff] }
 0x1b6   :  { %4756 = vmatpush.bf16.msrb.mxu0 %v7383_v25  ;;  %v7437_v25 = vld [vmem:[%s9074_s1 + $0xec0] sm:$0xff] }
 0x1b7   :  { %4782 = vmatpush.bf16.msrb.mxu2 %v7399_v26  ;;  %v1081_v26 = vld [vmem:[#allocation1] sm:$0xff] }
 0x1b8   :  { %4769 = vmatpush.bf16.msrb.mxu1 %v7391_v28  ;;  %v1082_v28 = vld [vmem:[#allocation1 + $0x9] sm:$0xff] }
 0x1b9   :  { %4795 = vmatpush.bf16.msrb.mxu3 %v7407_v29  ;;  %v1084_v29 = vld [vmem:[#allocation1 + $0x1b] sm:$0xff] }
 0x1ba   :  { %4757 = vmatpush.bf16.msrb.mxu0 %v7382_v30  ;;  %v7451_v30 = vld [vmem:[%s9074_s1 + $0xf30] sm:$0xff] }
 0x1bb   :  { %4783 = vmatpush.bf16.msrb.mxu2 %v7398_v31  ;;  %v7450_v31 = vld [vmem:[%s9074_s1 + $0xf28] sm:$0xff] }
 0x1bc   :  { %4770 = vmatpush.bf16.msrb.mxu1 %v7390_v38 }
 0x1bd   :  { %4796 = vmatpush.bf16.msrb.mxu3 %v7406_v39 }
 0x1be   :  { %4758 = vmatpush.bf16.msrb.mxu0 %v7381_v41  ;;  %v4552_v57 = vpop.f32.mrf.mxu0 }
 0x1bf   :  { %4784 = vmatpush.bf16.msrb.mxu2 %v7397_v42  ;;  %v4553_v58 = vadd.f32 %v4552_v57, %v8878_v24  ;;  %v7421_v24 = vld [vmem:[%s9074_s1 + $0xe40] sm:$0xff] }
 0x1c0   :  { %4771 = vmatpush.bf16.msrb.mxu1 %v7389_v45  ;;  %v4565_v61 = vpop.f32.mrf.mxu1  ;;  %v7446_v45 = vld [vmem:[%s9074_s1 + $0xf08] sm:$0xff] }
 0x1c1   :  { %4797 = vmatpush.bf16.msrb.mxu3 %v7405_v46  ;;  %4759 = vmatmul.bf16.vlgmr.msrb.gmra.mxu0 %v1075_v32  ;;  %v4566_v62 = vadd.f32 %v4565_v61, %v4553_v58 }
 0x1c2   :  { %4803 = vmatpush.bf16.msra.mxu0 %v7420_v43  ;;  %4785 = vmatmul.bf16.vlgmr.msrb.gmra.mxu2 %v1077_v33  ;;  %v7447_v43 = vld [vmem:[%s9074_s1 + $0xf10] sm:$0xff] }
 0x1c3   :  { %4829 = vmatpush.bf16.msra.mxu2 %v7436_v44  ;;  %4772 = vmatmul.bf16.vlgmr.msrb.gmra.mxu1 %v1076_v34  ;;  %v7449_v34 = vld [vmem:[%s9074_s1 + $0xf20] sm:$0xff] }
 0x1c4   :  { %4816 = vmatpush.bf16.msra.mxu1 %v7428_v47  ;;  %4798 = vmatmul.bf16.vlgmr.msrb.gmra.mxu3 %v1078_v35 }
 0x1c5   :  { %4842 = vmatpush.bf16.msra.mxu3 %v7444_v48  ;;  %v4578_v3 = vpop.f32.mrf.mxu2  ;;  %v7445_v48 = vld [vmem:[%s9074_s1 + $0xf00] sm:$0xff] }
 0x1c6   :  { %4804 = vmatpush.bf16.msra.mxu0 %v7419_v49  ;;  %v4579_v4 = vadd.f32 %v4578_v3, %v4566_v62  ;;  %v4554_v8 = vpop.f32.mrf.mxu0  ;;  %v1085_v49 = vld [vmem:[#allocation1 + $0x24] sm:$0xff] }
 0x1c7   :  { %4830 = vmatpush.bf16.msra.mxu2 %v7435_v50  ;;  %v4591_v7 = vpop.f32.mrf.mxu3 }
 0x1c8   :  { %4817 = vmatpush.bf16.msra.mxu1 %v7427_v51  ;;  %v4592_v9 = vadd.f32 %v4591_v7, %v4579_v4  ;;  %v4567_v12 = vpop.f32.mrf.mxu1 }
 0x1c9   :  { %4843 = vmatpush.bf16.msra.mxu3 %v7443_v52 }
 0x1ca   :  { %4805 = vmatpush.bf16.msra.mxu0 %v7418_v53 }
 0x1cb   :  { %4831 = vmatpush.bf16.msra.mxu2 %v7434_v54 }
 0x1cc   :  { %4818 = vmatpush.bf16.msra.mxu1 %v7426_v55 }
 0x1cd   :  { %4844 = vmatpush.bf16.msra.mxu3 %v7442_v56  ;;  %v4580_v17 = vpop.f32.mrf.mxu2 }
 0x1ce   :  { %4806 = vmatpush.bf16.msra.mxu0 %v7417_v59  ;;  %v7458_v17 = vld [vmem:[%s9076_s3 + $0x28] sm:$0xff] }
 0x1cf   :  { %4832 = vmatpush.bf16.msra.mxu2 %v7433_v60  ;;  %v4593_v20 = vpop.f32.mrf.mxu3 }
 0x1d0   :  { %4819 = vmatpush.bf16.msra.mxu1 %v7425_v63 }
 0x1d1   :  { %4845 = vmatpush.bf16.msra.mxu3 %v7441_v0 }
 0x1d2   :  { %4807 = vmatpush.bf16.msra.mxu0 %v7416_v1 }
 0x1d3   :  { %4833 = vmatpush.bf16.msra.mxu2 %v7432_v2 }
 0x1d4   :  { %4820 = vmatpush.bf16.msra.mxu1 %v7424_v5 }
 0x1d5   :  { %4846 = vmatpush.bf16.msra.mxu3 %v7440_v6 }
 0x1d6   :  { %4808 = vmatpush.bf16.msra.mxu0 %v7415_v10 }
 0x1d7   :  { %4834 = vmatpush.bf16.msra.mxu2 %v7431_v11  ;;  %v7460_v11 = vld [vmem:[%s9076_s3 + $0x38] sm:$0xff] }
 0x1d8   :  { %4821 = vmatpush.bf16.msra.mxu1 %v7423_v13 }
 0x1d9   :  { %4847 = vmatpush.bf16.msra.mxu3 %v7439_v14  ;;  %v7459_v14 = vld [vmem:[%s9076_s3 + $0x30] sm:$0xff] }
 0x1da   :  { %4809 = vmatpush.bf16.msra.mxu0 %v7414_v15 }
 0x1db   :  { %4835 = vmatpush.bf16.msra.mxu2 %v7430_v16 }
 0x1dc   :  { %4822 = vmatpush.bf16.msra.mxu1 %v7422_v18 }
 0x1dd   :  { %4848 = vmatpush.bf16.msra.mxu3 %v7438_v19  ;;  %v7457_v19 = vld [vmem:[%s9076_s3 + $0x20] sm:$0xff] }
 0x1de   :  { %4810 = vmatpush.bf16.msra.mxu0 %v7413_v21  ;;  %v4604_v32 = vpop.f32.mrf.mxu0 }
 0x1df   :  { %4836 = vmatpush.bf16.msra.mxu2 %v7429_v22  ;;  %v4605_v33 = vadd.f32 %v4604_v32, %v4592_v9  ;;  %v7456_v22 = vld [vmem:[%s9076_s3 + $0x18] sm:$0xff] }
 0x1e0   :  { %4823 = vmatpush.bf16.msra.mxu1 %v7421_v24  ;;  %v4617_v35 = vpop.f32.mrf.mxu1  ;;  %v7454_v24 = vld [vmem:[%s9076_s3 + $0x8] sm:$0xff] }
 0x1e1   :  { %4849 = vmatpush.bf16.msra.mxu3 %v7437_v25  ;;  %4811 = vmatmul.bf16.vlgmr.msra.gmra.mxu0 %v1081_v26  ;;  %v4618_v36 = vadd.f32 %v4617_v35, %v4605_v33  ;;  %v7453_v26 = vld [vmem:[%s9076_s3] sm:$0xff] }
 0x1e2   :  { %4855 = vmatpush.bf16.msrb.mxu0 %v7452_v23  ;;  %4837 = vmatmul.bf16.vlgmr.msra.gmra.mxu2 %v1083_v27  ;;  %v7455_v23 = vld [vmem:[%s9076_s3 + $0x10] sm:$0xff] }
 0x1e3   :  { %4824 = vmatmul.bf16.vlgmr.msra.gmra.mxu1 %v1082_v28 }
 0x1e4   :  { %4850 = vmatmul.bf16.vlgmr.msra.gmra.mxu3 %v1084_v29  ;;  %4938 = vmatpush.bf16.msrb.mxu1 %v7460_v11 }
 0x1e5   :  { %v4630_v38 = vpop.f32.mrf.mxu2 }
 0x1e6   :  { %4856 = vmatpush.bf16.msrb.mxu0 %v7451_v30  ;;  %v4631_v39 = vadd.f32 %v4630_v38, %v4618_v36  ;;  %v4606_v41 = vpop.f32.mrf.mxu0 }
 0x1e7   :  { %v4643_v40 = vpop.f32.mrf.mxu3 }
 0x1e8   :  { %v4644_v42 = vadd.f32 %v4643_v40, %v4631_v39  ;;  %v4619_v44 = vpop.f32.mrf.mxu1  ;;  %4939 = vmatpush.bf16.msrb.mxu1 %v7459_v14 }
 0x1ea   :  { %4857 = vmatpush.bf16.msrb.mxu0 %v7450_v31 }
 0x1ec   :  { %4940 = vmatpush.bf16.msrb.mxu1 %v7458_v17 }
 0x1ed   :  { %v4632_v46 = vpop.f32.mrf.mxu2 }
 0x1ee   :  { %4858 = vmatpush.bf16.msrb.mxu0 %v7449_v34 }
 0x1ef   :  { %v4645_v47 = vpop.f32.mrf.mxu3 }
 0x1f0   :  { %4941 = vmatpush.bf16.msrb.mxu1 %v7457_v19  ;;  %v7463_v47 = vld [vmem:[%s9077_s4] ss:$0 sm:$0xff]  ;;  %s4970_s4 = sshll.u32 %s7494_s24, 4  ;;  %s4971_s4 = int_to_ptr.vmem [resolvable:$true] %s4970_s4 }
 0x1f2   :  { %4859 = vmatpush.bf16.msrb.mxu0 %v7448_v37 }
 0x1f4   :  { %4942 = vmatpush.bf16.msrb.mxu1 %v7456_v22 }
 0x1f6   :  { %4860 = vmatpush.bf16.msrb.mxu0 %v7447_v43 }
 0x1f8   :  { %4943 = vmatpush.bf16.msrb.mxu1 %v7455_v23 }
 0x1fa   :  { %4861 = vmatpush.bf16.msrb.mxu0 %v7446_v45 }
 0x1fc   :  { %4944 = vmatpush.bf16.msrb.mxu1 %v7454_v24 }
 0x1fe   :  { %4862 = vmatpush.bf16.msrb.mxu0 %v7445_v48  ;;  %v4656_v50 = vpop.f32.mrf.mxu0 }
 0x1ff   :  { %v4657_v51 = vadd.f32 %v4656_v50, %v4644_v42 }
 0x200   :  { %v4669_v52 = vpop.f32.mrf.mxu1  ;;  %4945 = vmatpush.bf16.msrb.mxu1 %v7453_v26 }
 0x201   :  { %4863 = vmatmul.bf16.vlgmr.msrb.gmra.mxu0 %v1085_v49  ;;  %v4670_v53 = vadd.f32 %v4669_v52, %v4657_v51 }
 0x205   :  { %v4682_v54 = vpop.f32.mrf.mxu2 }
 0x206   :  { %v4683_v55 = vadd.f32 %v4682_v54, %v4670_v53  ;;  %v4658_v57 = vpop.f32.mrf.mxu0 }
 0x207   :  { %v4695_v56 = vpop.f32.mrf.mxu3 }
 0x208   :  { %v4696_v58 = vadd.f32 %v4695_v56, %v4683_v55  ;;  %v4671_v59 = vpop.f32.mrf.mxu1 }
 0x20d   :  { %v4684_v60 = vpop.f32.mrf.mxu2 }
 0x20f   :  { %v4697_v61 = vpop.f32.mrf.mxu3 }
 0x21e   :  { %v4708_v62 = vpop.f32.mrf.mxu0 }
 0x21f   :  { %v4709_v63 = vadd.f32 %v4708_v62, %v4696_v58 }
 0x220   :  { %v4721_v0 = vpop.f32.mrf.mxu1 }
 0x221   :  { %v4722_v1 = vadd.f32 %v4721_v0, %v4709_v63 }
 0x225   :  { %v4734_v2 = vpop.f32.mrf.mxu2 }
 0x226   :  { %v4735_v3 = vadd.f32 %v4734_v2, %v4722_v1  ;;  %v4710_v5 = vpop.f32.mrf.mxu0 }
 0x227   :  { %v4747_v4 = vpop.f32.mrf.mxu3 }
 0x228   :  { %v4748_v6 = vadd.f32 %v4747_v4, %v4735_v3  ;;  %v4723_v7 = vpop.f32.mrf.mxu1 }
 0x22d   :  { %v4736_v8 = vpop.f32.mrf.mxu2 }
 0x22f   :  { %v4749_v9 = vpop.f32.mrf.mxu3 }
 0x23e   :  { %v4760_v10 = vpop.f32.mrf.mxu0 }
 0x23f   :  { %v4761_v29 = vadd.f32 %v4760_v10, %v4748_v6 }
 0x240   :  { %v4773_v12 = vpop.f32.mrf.mxu1 }
 0x241   :  { %v4774_v33 = vadd.f32 %v4773_v12, %v4761_v29 }
 0x245   :  { %v4786_v13 = vpop.f32.mrf.mxu2 }
 0x246   :  { %v4762_v16 = vpop.f32.mrf.mxu0  ;;  %v4787_v34 = vadd.f32 %v4786_v13, %v4774_v33 }
 0x247   :  { %v4799_v15 = vpop.f32.mrf.mxu3 }
 0x248   :  { %v4775_v18 = vpop.f32.mrf.mxu1  ;;  %v4800_v37 = vadd.f32 %v4799_v15, %v4787_v34 }
 0x24d   :  { %v4788_v20 = vpop.f32.mrf.mxu2 }
 0x24f   :  { %v4801_v21 = vpop.f32.mrf.mxu3 }
 0x25e   :  { %v4812_v25 = vpop.f32.mrf.mxu0 }
 0x25f   :  { %v4813_v38 = vadd.f32 %v4812_v25, %v4800_v37 }
 0x260   :  { %v4825_v27 = vpop.f32.mrf.mxu1 }
 0x261   :  { %v4826_v39 = vadd.f32 %v4825_v27, %v4813_v38 }
 0x265   :  { %v4838_v28 = vpop.f32.mrf.mxu2 }
 0x266   :  { %v4814_v31 = vpop.f32.mrf.mxu0  ;;  %v4839_v40 = vadd.f32 %v4838_v28, %v4826_v39 }
 0x267   :  { %v4851_v30 = vpop.f32.mrf.mxu3 }
 0x268   :  { %v4827_v32 = vpop.f32.mrf.mxu1  ;;  %v4852_v41 = vadd.f32 %v4851_v30, %v4839_v40 }
 0x26d   :  { %v4840_v35 = vpop.f32.mrf.mxu2 }
 0x26f   :  { %v4853_v36 = vpop.f32.mrf.mxu3 }
 0x27e   :  { %v4864_v42 = vpop.f32.mrf.mxu0 }
 0x27f   :  { %v4865_v43 = vadd.f32 %v4864_v42, %v4852_v41 }
 0x281   :  { %v4868_v44 = vmax.f32 %v4865_v43, 0.0 }
 0x283   :  { %v4869_v45 = vpack.c.bf16 %v4868_v44, %v4868_v44 }
 0x285   :  { %4946 = vmatmul.bf16.vlgmr.msrb.gmra.mxu1 %v4869_v45 }
 0x286   :  { %v4866_v46 = vpop.f32.mrf.mxu0 }
 0x302   :  { %v4947_v48 = vpop.f32.mrf.mxu1 }
 0x303   :  { %v4948_v49 = vadd.f32 %v7463_v47, %v4947_v48 }
 0x305   :  { %v4952_v50 = vsel %vm4951_vm0, %v4948_v49, -inf }
 0x306   :  { %4953 = vmax.xlane.f32.xlu0 %v4952_v50 }
 0x30a   :  { %v4949_v51 = vpop.f32.mrf.mxu1 }
 0x379   :  { %v4954_v52 = vpop.xlane.xlu0 %4953 }
 0x37a   :  { %v4955_v53 = vsub.f32 %v4948_v49, %v4954_v52 }
 0x37c   :  { %v4956_v54 = vmul.f32 1.442695, %v4955_v53 }
 0x37e   :  { %7464 = vpow2.f32 %v4956_v54 }
 0x384   :  { %v7465_v55 = vpop.eup %7464 }
 0x385   :  { %v4958_v56 = vsel %vm4951_vm0, %v7465_v55, 0.0 }
 0x386   :  { %4959 = vadd.xlane.f32.xlu0 %v4958_v56 }
 0x3f9   :  { %v4960_v57 = vpop.xlane.xlu0 %4959 }
 0x3fa   :  { %7466 = vlog2.f32 %v4960_v57 }
 0x400   :  { %v7467_v58 = vpop.eup %7466 }
 0x401   :  { %v4962_v59 = vmul.f32 0.6931472, %v7467_v58 }
 0x403   :  { %v4963_v60 = vsub.f32 %v4955_v53, %v4962_v59 }
 0x405   :  { %4964 = vst.msk [vmem:[#allocation2] sm:$0x3] %vm4951_vm0, %v4963_v60 }
 0x406   :  { %4975 = dma.vmem_to_hbm [thread:$0]  %s4971_s4, 32, %s4973_s27, [#allocation3]  }
 0x407   :  { %7492 = dma.done.wait [#allocation3], 32  }
 0x408   :  { %7493 = vsyncadd [#allocation3], 4294967264 }
 0x409   :  { %4980 = vsyncpa [#allocation3], 1 }

// kernel: net_forward.2
= control target key start
LH: loop header
LB: loop body
LE: loop exit
PB: predicated region body
PF: predicated region fallthrough
CT: control target
= control target key end

     0   :  { %s10555_s18 = smov 0   ;;  %s15244_s0 = inlined_call_operand.vmem [shape: bf16[1680,9], index: 0, kind: input, shape index: {}]   ;;  %s15245_s1 = inlined_call_operand.vmem [shape: bf16[9,32], index: 1, kind: input, shape index: {}]   ;;  %s15246_s2 = inlined_call_operand.vmem [shape: f32[1,32], index: 2, kind: input, shape index: {}]   ;;  %s15247_s3 = inlined_call_operand.vmem [shape: bf16[384,64], index: 3, kind: input, shape index: {}]   ;;  %s15248_s4 = inlined_call_operand.vmem [shape: f32[1,64], index: 4, kind: input, shape index: {}]   ;;  %s15249_s5 = inlined_call_operand.vmem [shape: bf16[2,121,64], index: 5, kind: output, shape index: {}]  }
   0x1 LB: > { %s10561_s19 = sadd.s32 4294967295, %s10518_s18   ;;  %p8986_p0 = scmp.ge.s32.totalorder %s10518_s18, 1  ;;  %s10518_s18 = sphi %s10555_s18, %s15_s18  }
   0x2   : > { %p188_p1 = scmp.lt.s32.totalorder %s10518_s18, 3 }
   0x4   : > { %p189_p2 = pnand %p8986_p0, %p188_p1 }
   0x6   : > { %192 = sbr.rel (%p189_p2) target bundleno = 1393 (0x571), region = 40 }
   0xb   : > { %v9200_v0 = vld [vmem:[%s15245_s1] sm:$0xf]  ;;  %v10179_v1 = vld [vmem:[%s15245_s1] sm:$0x10]  ;;  %vm767_vm0 = vcmask 1043456   ;;  %vm768_vm1 = vcmask 1044480  }
   0xc   : > { %v9201_v2 = vor.u32 %v10179_v1, %v9200_v0  ;;  %s216_s24 = smul.u32 105, %s10561_s19  ;;  %v10520_v3 = vmov 65535   ;;  %vm607_vm2 = vcmask 72704   ;;  %v10598_v15 = vld [vmem:[%s15246_s2] ss:$0 sm:$0xff]  ;;  %vm1257_vm3 = vcmask 257024  }
   0xd   : > { %v769_v4 = vsel %vm767_vm0, 4294967295, %v10520_v3  ;;  %v10396_v50 = vld [vmem:[%s15247_s3 + $0xb8] sm:$0xff]  ;;  %v10395_v55 = vld [vmem:[%s15247_s3 + $0xb0] sm:$0xff]  ;;  %v10394_v60 = vld [vmem:[%s15247_s3 + $0xa8] sm:$0xff]  ;;  %vm1716_vm4 = vsmask.f32 7424 }
   0xe   : > { %v770_v5 = vsel %vm768_vm1, %v769_v4, 0  ;;  %p217_p3 = scmp.lt.s32.totalorder %s216_s24, 209  ;;  %7543 = vmatpush.bf16.msra.mxu3 %v10396_v50  ;;  %v10393_v0 = vld [vmem:[%s15247_s3 + $0xa0] sm:$0xff]  ;;  %s10521_s16 = smov 32   ;;  %vm2504_vm5 = vcmask 261120   ;;  %vm5405_vm6 = vcmask 1042432  }
   0xf   : > { %v772_v6 = vand.u32 %v9201_v2, %v770_v5  ;;  %vm5406_vm7 = vcmask 1046532   ;;  %s10523_s26 = smov 64   ;;  %vm2204_vm9 = vcmask 1046528   ;;  %vm2852_vm10 = vsmask.f32 256  ;;  %p222_p4 = scmp.lt.s32.totalorder %s10561_s19, 1 }
  0x10   : > { %s15366_s24 = smov (!%p217_p3, %s216_s24), 209  ;;  %vm10688_vm8 = vmor %vm5405_vm6, %vm5406_vm7  ;;  %vm2601_vm11 = vcmask 523264   ;;  %vm2698_vm12 = vcmask 785408   ;;  %vm4003_vm13 = vsmask.f32 3328  ;;  %vm8906_vm7 = vcmask 519168  }
  0x11   : > { %781 = vmatpush.bf16.msra.mxu0 %v772_v6  ;;  %10420 = vmatpush.bf16.msra.mxu1 %v772_v6  ;;  %s8987_s25 = sshll.u32 %s15366_s24, 2  ;;  %vm4004_vm14 = vsmask.f32 7440  ;;  %s15368_s19 = smov (!%p222_p4, %s10561_s19), 1 }
  0x12   : > { %s10577_s28 = scalar_lea.vmem %s15244_s0, %s8987_s25  ;;  %7544 = vmatpush.bf16.msra.mxu3 %v10395_v55  ;;  %s10522_s25 = smov 96   ;;  %vm11055_vm15 = vmor %vm4003_vm13, %vm4004_vm14  ;;  %vm8820_vm13 = vcmask 1045504   ;;  %vm8829_vm14 = vcmask 1040384  }
  0x13   : > { %v10127_v7 = vld [vmem:[%s10577_s28] sm:$0xff]  ;;  %v10128_v8 = vld [vmem:[%s10577_s28 + $0x8] sm:$0xff]  ;;  %v10129_v9 = vld [vmem:[%s10577_s28 + $0x10] sm:$0xff]  ;;  %s10126_s9 = sshll.u32 %s15368_s19, 6 }
  0x14   : > { %9202 = vmatmul.msk.bf16.vlgmr.msra.gmra.mxu0 %vm607_vm2, %v10127_v7  ;;  %v10130_v10 = vld [vmem:[%s10577_s28 + $0x18] sm:$0xff]  ;;  %v10131_v11 = vld [vmem:[%s10577_s28 + $0x20] sm:$0xff]  ;;  %v10132_v12 = vld [vmem:[%s10577_s28 + $0x28] sm:$0xff]  ;;  %s12430_s12 = scalar_lea.vmem %s15249_s5, %s10126_s9 }
  0x15   : > { %v10133_v13 = vld [vmem:[%s10577_s28 + $0x30] sm:$0xff]  ;;  %v10134_v14 = vld [vmem:[%s10577_s28 + $0x38] sm:$0xff]  ;;  %v10135_v16 = vld [vmem:[%s10577_s28 + $0x40] sm:$0xff] }
  0x16   : > { %v10136_v25 = vld [vmem:[%s10577_s28 + $0x48] sm:$0xff]  ;;  %v10137_v34 = vld [vmem:[%s10577_s28 + $0x50] sm:$0xff]  ;;  %v10138_v43 = vld [vmem:[%s10577_s28 + $0x58] sm:$0xff]  ;;  %7545 = vmatpush.bf16.msra.mxu3 %v10394_v60 }
  0x17   : > { %v10139_v57 = vld [vmem:[%s10577_s28 + $0x60] sm:$0xff]  ;;  %v10392_v7 = vld [vmem:[%s15247_s3 + $0x98] sm:$0xff] }
  0x1a   : > { %7546 = vmatpush.bf16.msra.mxu3 %v10393_v0 }
  0x1e   : > { %7547 = vmatpush.bf16.msra.mxu3 %v10392_v7 }
  0x24   : > { %9203 = vmatmul.msk.bf16.gmra.mxu0 %vm607_vm2, %v10128_v8 }
  0x34   : > { %9204 = vmatmul.msk.bf16.gmra.mxu0 %vm607_vm2, %v10129_v9 }
  0x44   : > { %9205 = vmatmul.msk.bf16.gmra.mxu0 %vm607_vm2, %v10130_v10 }
  0x54   : > { %9206 = vmatmul.msk.bf16.gmra.mxu0 %vm607_vm2, %v10131_v11 }
  0x64   : > { %9207 = vmatmul.msk.bf16.gmra.mxu0 %vm607_vm2, %v10132_v12 }
  0x74   : > { %9208 = vmatmul.msk.bf16.gmra.mxu0 %vm607_vm2, %v10133_v13  ;;  %v10391_v13 = vld [vmem:[%s15247_s3 + $0x90] sm:$0xff] }
  0x75   : > { %7548 = vmatpush.bf16.msra.mxu3 %v10391_v13 }
  0x84   : > { %9209 = vmatmul.msk.bf16.gmra.mxu0 %vm607_vm2, %v10134_v14  ;;  %v10140_v14 = vld [vmem:[%s10577_s28 + $0x68] sm:$0xff] }
  0x91   : > { %v783_v17 = vpop.f32.mrf.mxu0 }
  0x92   : > { %v784_v18 = vadd.f32 %v10598_v15, %v783_v17 }
  0x94   : > { %v1047_v19 = vmax.f32 %v784_v18, 0.0  ;;  %9210 = vmatmul.msk.bf16.gmra.mxu0 %vm607_vm2, %v10135_v16  ;;  %v10390_v18 = vld [vmem:[%s15247_s3 + $0x88] sm:$0xff] }
  0x95   : > { %7549 = vmatpush.bf16.msra.mxu3 %v10390_v18 }
  0x96   : > { %v1152_v20 = vpack.c.bf16 %v1047_v19, %v1047_v19 }
  0x98   : > { %1258 = vst.msk [vmem:[#allocation2] sm:$0xf] %vm1257_vm3, %v1152_v20 }
  0x99   : > { %v785_v21 = vpop.f32.mrf.mxu0 }
  0x9a   : > { %v786_v22 = vadd.f32 %v10598_v15, %v785_v21 }
  0x9c   : > { %v1048_v23 = vmax.f32 %v786_v22, 0.0  ;;  %v10389_v22 = vld [vmem:[%s15247_s3 + $0x80] sm:$0xff] }
  0x9d   : > { %7550 = vmatpush.bf16.msra.mxu3 %v10389_v22 }
  0x9e   : > { %v1153_v24 = vpack.c.bf16 %v1048_v23, %v1048_v23 }
  0xa0   : > { %1259 = vst.msk [vmem:[#allocation2 + $0x4] sm:$0xf] %vm1257_vm3, %v1153_v24 }
  0xa1   : > { %v788_v26 = vpop.f32.mrf.mxu0 }
  0xa2   : > { %v789_v27 = vadd.f32 %v10598_v15, %v788_v26 }
  0xa4   : > { %v1049_v28 = vmax.f32 %v789_v27, 0.0  ;;  %9211 = vmatmul.msk.bf16.gmra.mxu0 %vm607_vm2, %v10136_v25 }
  0xa6   : > { %v1154_v29 = vpack.c.bf16 %v1049_v28, %v1049_v28 }
  0xa7   : > { %v10662_v21 = vld [vmem:[#allocation2] sm:$0xff]  }
  0xa8   : > { %1260 = vst.msk [vmem:[#allocation2 + $0x8] sm:$0xf] %vm1257_vm3, %v1154_v29  ;;  %v1718_v55 = vshrl.u32 %v10662_v21, 16 }
  0xa9   : > { %v790_v30 = vpop.f32.mrf.mxu0 }
  0xaa   : > { %v791_v31 = vadd.f32 %v10598_v15, %v790_v30 }
  0xac   : > { %v1050_v32 = vmax.f32 %v791_v31, 0.0  ;;  %v1720_v31 = vshll.u32 %v10662_v21, 16 }
  0xae   : > { %v1155_v33 = vpack.c.bf16 %v1050_v32, %v1050_v32 }
  0xb0   : > { %1261 = vst.msk [vmem:[#allocation2 + $0xc] sm:$0xf] %vm1257_vm3, %v1155_v33 }
  0xb1   : > { %v793_v35 = vpop.f32.mrf.mxu0 }
  0xb2   : > { %v794_v36 = vadd.f32 %v10598_v15, %v793_v35 }
  0xb4   : > { %v1051_v37 = vmax.f32 %v794_v36, 0.0  ;;  %9212 = vmatmul.msk.bf16.gmra.mxu0 %vm607_vm2, %v10137_v34 }
  0xb6   : > { %v1156_v38 = vpack.c.bf16 %v1051_v37, %v1051_v37 }
  0xb7   : > { %v10674_v30 = vld [vmem:[#allocation2 + $0x8] sm:$0xff] }
  0xb8   : > { %1262 = vst.msk [vmem:[#allocation2 + $0x10] sm:$0xf] %vm1257_vm3, %v1156_v38 }
  0xb9   : > { %v795_v39 = vpop.f32.mrf.mxu0 }
  0xba   : > { %v796_v40 = vadd.f32 %v10598_v15, %v795_v39 }
  0xbc   : > { %v1052_v41 = vmax.f32 %v796_v40, 0.0 }
  0xbe   : > { %v1157_v42 = vpack.c.bf16 %v1052_v41, %v1052_v41 }
  0xbf   : > { %v10415_v54 = vld [vmem:[#allocation2 + $0x10] sm:$0xe] }
  0xc0   : > { %1263 = vst.msk [vmem:[#allocation2 + $0x14] sm:$0xf] %vm1257_vm3, %v1157_v42  ;;  %v1725_v42 = vshll.u32 %v10674_v30, 16 }
  0xc1   : > { %v798_v44 = vpop.f32.mrf.mxu0 }
  0xc2   : > { %v799_v45 = vadd.f32 %v10598_v15, %v798_v44 }
  0xc4   : > { %v1053_v46 = vmax.f32 %v799_v45, 0.0  ;;  %9213 = vmatmul.msk.bf16.gmra.mxu0 %vm607_vm2, %v10138_v43 }
  0xc6   : > { %v1158_v47 = vpack.c.bf16 %v1053_v46, %v1053_v46  ;;  %v10411_v46 = vld [vmem:[#allocation2] sm:$0xf0] }
  0xc7   : > { %v10414_v52 = vld [vmem:[#allocation2 + $0x10] sm:$0xf0] }
  0xc8   : > { %1264 = vst.msk [vmem:[#allocation2 + $0x18] sm:$0xf] %vm1257_vm3, %v1158_v47  ;;  %v10416_v56 = vor.u32 %v10415_v54, %v10414_v52  ;;  %v10141_v52 = vld [vmem:[%s10577_s28 + $0x70] sm:$0xff] }
  0xc9   : > { %v800_v48 = vpop.f32.mrf.mxu0 }
  0xca   : > { %v801_v49 = vadd.f32 %v10598_v15, %v800_v48  ;;  %v2804_v61 = vshll.u32 %v10416_v56, 16  ;;  %v2802_v5 = vshrl.u32 %v10416_v56, 16  ;;  %v1727_v56 = vrot.slane %v1725_v42, 1 }
  0xcc   : > { %v1054_v51 = vmax.f32 %v801_v49, 0.0  ;;  %v2806_v2 = vrot.slane %v2804_v61, 1  ;;  %v1722_v49 = vrot.slane %v1720_v31, 1  ;;  %v2206_v61 = vrot.slane %v10674_v30, 1  ;;  %v10142_v31 = vld [vmem:[%s10577_s28 + $0x78] sm:$0xff] }
  0xce   : > { %v1159_v53 = vpack.c.bf16 %v1054_v51, %v1054_v51  ;;  %v2807_v9 = vor.u32 %v2806_v2, %v2802_v5  ;;  %v1723_v60 = vor.u32 %v1722_v49, %v1718_v55 }
  0xd0   : > { %1265 = vst.msk [vmem:[#allocation2 + $0x1c] sm:$0xf] %vm1257_vm3, %v1159_v53  ;;  %v10412_v53 = vld [vmem:[#allocation2] sm:$0xe] }
  0xd1   : > { %v803_v58 = vpop.f32.mrf.mxu0 }
  0xd2   : > { %v804_v59 = vadd.f32 %v10598_v15, %v803_v58 }
  0xd4   : > { %v1055_v62 = vmax.f32 %v804_v59, 0.0  ;;  %9214 = vmatmul.msk.bf16.gmra.mxu0 %vm607_vm2, %v10139_v57  ;;  %v10413_v57 = vor.u32 %v10412_v53, %v10411_v46 }
  0xd6   : > { %v1160_v63 = vpack.c.bf16 %v1055_v62, %v1055_v62  ;;  %v2205_v0 = vrot.slane %v10413_v57, 1 }
  0xd7   : > { %v10639_v1 = vld [vmem:[#allocation2 + $0x18] sm:$0xff] }
  0xd8   : > { %1266 = vst.msk [vmem:[#allocation2 + $0x20] sm:$0xf] %vm1257_vm3, %v1160_v63  ;;  %v1741_v4 = vshll.u32 %v10639_v1, 16  ;;  %v1745_v35 = vshrl.u32 %v10639_v1, 16  ;;  %v1728_v63 = vsel %vm1716_vm4, %v1723_v60, %v1727_v56 }
  0xd9   : > { %v805_v3 = vpop.f32.mrf.mxu0 }
  0xda   : > { %v806_v6 = vadd.f32 %v10598_v15, %v805_v3  ;;  %v10647_v8 = vrot.slane %v1741_v4, 1  ;;  %v2207_v3 = vsel %vm2204_vm9, %v2205_v0, %v2206_v61 }
  0xdc   : > { %v1056_v10 = vmax.f32 %v806_v6, 0.0  ;;  %v2808_v11 = vsel %vm1716_vm4, %v2807_v9, %v10647_v8  ;;  %v1747_v41 = vor.u32 %v1745_v35, %v10647_v8 }
  0xdd   : > { %2832 = vrot.lane.b32.xlu0 %v2808_v11, %s10521_s16  ;;  %v10716_v11 = vld [vmem:[#allocation2 + $0x10] sm:$0xff]  }
  0xde   : > { %v1161_v12 = vpack.c.bf16 %v1056_v10, %v1056_v10 }
  0xdf   : > { %v10418_v23 = vld [vmem:[#allocation2 + $0x20] sm:$0xe] }
  0xe0   : > { %1267 = vst.msk [vmem:[#allocation2 + $0x24] sm:$0xf] %vm1257_vm3, %v1161_v12 }
  0xe1   : > { %v808_v16 = vpop.f32.mrf.mxu0 }
  0xe2   : > { %v809_v17 = vadd.f32 %v10598_v15, %v808_v16 }
  0xe4   : > { %v1057_v19 = vmax.f32 %v809_v17, 0.0  ;;  %9215 = vmatmul.msk.bf16.gmra.mxu0 %vm607_vm2, %v10140_v14 }
  0xe6   : > { %v1162_v20 = vpack.c.bf16 %v1057_v19, %v1057_v19 }
  0xe7   : > { %v10417_v24 = vld [vmem:[#allocation2 + $0x20] sm:$0xf0] }
  0xe8   : > { %v10667_v25 = vld [vmem:[#allocation2 + $0x20] sm:$0xff]   ;;  %v10419_v26 = vor.u32 %v10418_v23, %v10417_v24  ;;  %1268 = vst.msk [vmem:[#allocation2 + $0x28] sm:$0xf] %vm1257_vm3, %v1162_v20  ;;  %v1733_v24 = vshll.u32 %v10716_v11, 16 }
  0xe9   : > { %2412 = vrot.lane.b32.xlu1 %v10667_v25, %s10522_s25  ;;  %v1749_v27 = vshll.u32 %v10667_v25, 16  ;;  %v1753_v28 = vshrl.u32 %v10667_v25, 16  ;;  %v810_v29 = vpop.f32.mrf.mxu0 }
  0xea   : > { %v3278_v32 = vsel %vm2504_vm5, %v10419_v26, 0  ;;  %v811_v33 = vadd.f32 %v10598_v15, %v810_v29 }
  0xeb   : > { %v10679_v34 = vrot.slane %v1753_v28, 7  ;;  %v1751_v36 = vrot.slane %v1749_v27, 1  ;;  %v5211_v37 = vunpack.c.l.b16 %v3278_v32  ;;  %v5212_v38 = vunpack.c.h.b16 %v3278_v32 }
  0xec   : > { %v1058_v39 = vmax.f32 %v811_v33, 0.0 }
  0xed   : > { %v2854_v40 = vor.u32 %v10679_v34, %v1749_v27  ;;  %v5308_v43 = vpack.c.b16 %v5211_v37, %v5211_v37  ;;  %v5309_v44 = vpack.c.b16 %v5212_v38, %v5212_v38  ;;  %v1752_v48 = vsel %vm1716_vm4, %v1747_v41, %v1751_v36 }
  0xee   : > { %v1163_v45 = vpack.c.bf16 %v1058_v39, %v1058_v39  ;;  %v1755_v14 = vor.u32 %v1753_v28, %v1751_v36  ;;  %v1729_v37 = vshrl.u32 %v10674_v30, 16  ;;  %v1735_v38 = vrot.slane %v1733_v24, 1 }
  0xef   : > { %3006 = vrot.lane.b32.xlu0 %v2854_v40, %s10523_s26  ;;  %v9451_v50 = vrot.slane %v5308_v43, 9  ;;  %v5410_v51 = vrot.slane %v5309_v44, 5 }
  0xf0   : > { %1269 = vst.msk [vmem:[#allocation2 + $0x2c] sm:$0xf] %vm1257_vm3, %v1163_v45  ;;  %v1731_v40 = vor.u32 %v1729_v37, %v1727_v56 }
  0xf1   : > { %2111 = vrot.lane.b32.xlu1 %v1752_v48, %s10521_s16  ;;  %v813_v54 = vpop.f32.mrf.mxu0  ;;  %v5411_v58 = vsel %vm10688_vm8, %v9451_v50, %v5410_v51  ;;  %v5412_v27 = vrot.slane %v5410_v51, 4 }
  0xf2   : > { %v814_v59 = vadd.f32 %v10598_v15, %v813_v54  ;;  %5793 = vst [vmem:[#allocation3 + $0x8] sm:$0xf] %v5411_v58  ;;  %v1736_v42 = vsel %vm1716_vm4, %v1731_v40, %v1735_v38 }
  0xf4   : > { %v1059_v62 = vmax.f32 %v814_v59, 0.0  ;;  %9216 = vmatmul.msk.bf16.gmra.mxu0 %vm607_vm2, %v10141_v52 }
  0xf6   : > { %v1164_v2 = vpack.c.bf16 %v1059_v62, %v1059_v62 }
  0xf7   : > { %2105 = vrot.lane.b32.xlu0 %v1728_v63, %s10521_s16  ;;  %v10707_v4 = vld [vmem:[#allocation2 + $0x28] sm:$0xff] }
  0xf8   : > { %1270 = vst.msk [vmem:[#allocation2 + $0x30] sm:$0xf] %vm1257_vm3, %v1164_v2  ;;  %v1757_v6 = vshll.u32 %v10707_v4, 16  ;;  %v1761_v7 = vshrl.u32 %v10707_v4, 16  ;;  %v3279_v9 = vsel %vm2504_vm5, %v10707_v4, 0 }
  0xf9   : > { %2302 = vrot.lane.b32.xlu1 %v2207_v3, %s10523_s26  ;;  %v815_v5 = vpop.f32.mrf.mxu0  ;;  %v5213_v12 = vunpack.c.l.b16 %v3279_v9  ;;  %v5214_v13 = vunpack.c.h.b16 %v3279_v9  ;;  %v9462_v45 = vld [vmem:[#allocation3 + $0x8] sm:$0xf] }
  0xfa   : > { %v816_v10 = vadd.f32 %v10598_v15, %v815_v5  ;;  %v1759_v16 = vrot.slane %v1757_v6, 1  ;;  %v2855_v17 = vrot.slane %v1761_v7, 7 }
  0xfb   : > { %v5310_v19 = vpack.c.b16 %v5213_v12, %v5213_v12  ;;  %v5311_v20 = vpack.c.b16 %v5214_v13, %v5214_v13 }
  0xfc   : > { %v1060_v18 = vmax.f32 %v816_v10, 0.0  ;;  %v1760_v22 = vsel %vm1716_vm4, %v1755_v14, %v1759_v16  ;;  %v2856_v23 = vor.u32 %v2855_v17, %v1757_v6  ;;  %v1763_v56 = vor.u32 %v1761_v7, %v1759_v16  ;;  %v10143_v7 = vld [vmem:[%s10577_s28 + $0x80] sm:$0xff] }
  0xfd   : > { %v5413_v29 = vrot.slane %v5310_v19, 5  ;;  %v5416_v35 = vrot.slane %v5311_v20, 5  ;;  %v1737_v14 = vshrl.u32 %v10716_v11, 16  ;;  %v2208_v19 = vrot.slane %v10716_v11, 1 }
  0xfe   : > { %v1165_v26 = vpack.c.bf16 %v1060_v18, %v1060_v18  ;;  %v2857_v28 = vsel %vm2852_vm10, %v10679_v34, %v2856_v23 }
  0xff   : > { %2113 = vrot.lane.b32.xlu0 %v1760_v22, %s10521_s16  ;;  %3008 = vrot.lane.b32.xlu2 %v2857_v28, %s10523_s26  ;;  %v5414_v32 = vsel %vm10688_vm8, %v5412_v27, %v5413_v29  ;;  %v5415_v33 = vrot.slane %v5413_v29, 4  ;;  %v5418_v3 = vrot.slane %v5416_v35, 4  ;;  %v1739_v18 = vor.u32 %v1737_v14, %v1735_v38 }
 0x100   : > { %1271 = vst.msk [vmem:[#allocation2 + $0x34] sm:$0xf] %vm1257_vm3, %v1165_v26  ;;  %v2209_v24 = vsel %vm2204_vm9, %v2206_v61, %v2208_v19 }
 0x101   : > { %v818_v36 = vpop.f32.mrf.mxu0  ;;  %5794 = vst [vmem:[#allocation3 + $0x14] sm:$0xf] %v5414_v32  ;;  %v5417_v34 = vsel %vm10688_vm8, %v5415_v33, %v5416_v35  ;;  %v1744_v22 = vsel %vm1716_vm4, %v1739_v18, %v10647_v8 }
 0x102   : > { %v819_v39 = vadd.f32 %v10598_v15, %v818_v36  ;;  %5795 = vst [vmem:[#allocation3 + $0x20] sm:$0xf] %v5417_v34 }
 0x104   : > { %v1061_v41 = vmax.f32 %v819_v39, 0.0  ;;  %9217 = vmatmul.msk.bf16.gmra.mxu0 %vm607_vm2, %v10142_v31 }
 0x106   : > { %v1166_v43 = vpack.c.bf16 %v1061_v41, %v1061_v41 }
 0x107   : > { %2107 = vrot.lane.b32.xlu0 %v1736_v42, %s10521_s16  ;;  %v10735_v44 = vld [vmem:[#allocation2 + $0x30] sm:$0xff]  ;;  %2414 = vrot.lane.b32.xlu2 %v10707_v4, %s10522_s25 }
 0x108   : > { %1272 = vst.msk [vmem:[#allocation2 + $0x38] sm:$0xf] %vm1257_vm3, %v1166_v43  ;;  %v10231_v46 = vld [vmem:[#allocation3 + $0x10] sm:$0xf0]  ;;  %v1765_v50 = vshll.u32 %v10735_v44, 16  ;;  %v1769_v51 = vshrl.u32 %v10735_v44, 16 }
 0x109   : > { %v820_v48 = vpop.f32.mrf.mxu0  ;;  %v9463_v49 = vor.u32 %v10231_v46, %v9462_v45  ;;  %v3280_v52 = vsel %vm2504_vm5, %v10735_v44, 0  ;;  %v9474_v27 = vld [vmem:[#allocation3 + $0x20] sm:$0xf]  ;;  %v10144_v45 = vld [vmem:[%s10577_s28 + $0x88] sm:$0xff] }
 0x10a   : > { %v821_v53 = vadd.f32 %v10598_v15, %v820_v48  ;;  %v5215_v54 = vunpack.c.l.b16 %v3280_v52  ;;  %v5216_v55 = vunpack.c.h.b16 %v3280_v52  ;;  %v10745_v57 = vrot.slane %v1765_v50, 1 }
 0x10b   : > { %7551 = vmatmul.bf16.vlgmr.msra.gmra.mxu3 %v9463_v49  ;;  %v2858_v58 = vrot.slane %v1769_v51, 7 }
 0x10c   : > { %v1062_v59 = vmax.f32 %v821_v53, 0.0  ;;  %v5312_v60 = vpack.c.b16 %v5215_v54, %v5215_v54  ;;  %v5313_v62 = vpack.c.b16 %v5216_v55, %v5216_v55  ;;  %v1768_v63 = vsel %vm1716_vm4, %v1763_v56, %v10745_v57 }
 0x10d   : > { %v2859_v0 = vor.u32 %v2858_v58, %v1765_v50  ;;  %v2210_v54 = vrot.slane %v10639_v1, 1 }
 0x10e   : > { %v1167_v2 = vpack.c.bf16 %v1062_v59, %v1062_v59  ;;  %v5419_v5 = vrot.slane %v5312_v60, 5  ;;  %v5422_v12 = vrot.slane %v5313_v62, 5 }
 0x10f   : > { %2115 = vrot.lane.b32.xlu0 %v1768_v63, %s10521_s16  ;;  %v2860_v6 = vsel %vm2852_vm10, %v2855_v17, %v2859_v0  ;;  %2408 = vrot.lane.b32.xlu2 %v10716_v11, %s10522_s25 }
 0x110   : > { %1273 = vst.msk [vmem:[#allocation2 + $0x3c] sm:$0xf] %vm1257_vm3, %v1167_v2  ;;  %3010 = vrot.lane.b32.xlu1 %v2860_v6, %s10523_s26  ;;  %v5420_v9 = vsel %vm10688_vm8, %v5418_v3, %v5419_v5  ;;  %v5421_v10 = vrot.slane %v5419_v5, 4  ;;  %v5424_v41 = vrot.slane %v5422_v12, 4 }
 0x111   : > { %v823_v13 = vpop.f32.mrf.mxu0  ;;  %5796 = vst [vmem:[#allocation3 + $0x2c] sm:$0xf] %v5420_v9 }
 0x112   : > { %v824_v16 = vadd.f32 %v10598_v15, %v823_v13  ;;  %v5423_v17 = vsel %vm10688_vm8, %v5421_v10, %v5422_v12 }
 0x113   : > { %5797 = vst [vmem:[#allocation3 + $0x38] sm:$0xf] %v5423_v17  ;;  %v1771_v17 = vor.u32 %v1769_v51, %v10745_v57 }
 0x114   : > { %v1063_v20 = vmax.f32 %v824_v16, 0.0  ;;  %9218 = vmatmul.msk.bf16.gmra.mxu0 %vm607_vm2, %v10143_v7 }
 0x116   : > { %v1168_v23 = vpack.c.bf16 %v1063_v20, %v1063_v20 }
 0x117   : > { %2109 = vrot.lane.b32.xlu0 %v1744_v22, %s10521_s16  ;;  %v10772_v26 = vld [vmem:[#allocation2 + $0x38] sm:$0xff]  ;;  %2416 = vrot.lane.b32.xlu2 %v10735_v44, %s10522_s25 }
 0x118   : > { %1274 = vst.msk [vmem:[#allocation2 + $0x40] sm:$0xf] %vm1257_vm3, %v1168_v23  ;;  %2304 = vrot.lane.b32.xlu1 %v2209_v24, %s10523_s26  ;;  %v10234_v29 = vld [vmem:[#allocation3 + $0x28] sm:$0xf0]  ;;  %v1777_v31 = vshrl.u32 %v10772_v26, 16  ;;  %v3281_v30 = vsel %vm2504_vm5, %v10772_v26, 0 }
 0x119   : > { %v825_v28 = vpop.f32.mrf.mxu0  ;;  %v9475_v8 = vor.u32 %v10234_v29, %v9474_v27  ;;  %v5217_v32 = vunpack.c.l.b16 %v3281_v30  ;;  %v5218_v33 = vunpack.c.h.b16 %v3281_v30  ;;  %v1773_v35 = vshll.u32 %v10772_v26, 16  ;;  %v10145_v29 = vld [vmem:[%s10577_s28 + $0x90] sm:$0xff] }
 0x11a   : > { %v826_v61 = vadd.f32 %v10598_v15, %v825_v28  ;;  %v2861_v36 = vrot.slane %v1777_v31, 7  ;;  %v9486_v60 = vld [vmem:[#allocation3 + $0x38] sm:$0xf] }
 0x11b   : > { %7556 = vmatmul.bf16.gmra.mxu3 %v9475_v8  ;;  %v5314_v38 = vpack.c.b16 %v5217_v32, %v5217_v32  ;;  %v5315_v39 = vpack.c.b16 %v5218_v33, %v5218_v33  ;;  %v1775_v9 = vrot.slane %v1773_v35, 1 }
 0x11c   : > { %v1064_v37 = vmax.f32 %v826_v61, 0.0  ;;  %v2862_v34 = vor.u32 %v2861_v36, %v1773_v35  ;;  %v2212_v61 = vrot.slane %v10667_v25, 1 }
 0x11d   : > { %v5425_v42 = vrot.slane %v5314_v38, 5  ;;  %v5428_v49 = vrot.slane %v5315_v39, 5  ;;  %v1776_v23 = vsel %vm1716_vm4, %v1771_v17, %v1775_v9 }
 0x11e   : > { %v1169_v40 = vpack.c.bf16 %v1064_v37, %v1064_v37  ;;  %v2863_v43 = vsel %vm2852_vm10, %v2858_v58, %v2862_v34  ;;  %v2211_v58 = vsel %vm2204_vm9, %v2208_v19, %v2210_v54  ;;  %v2213_v37 = vsel %vm2204_vm9, %v2210_v54, %v2212_v61 }
 0x11f   : > { %2410 = vrot.lane.b32.xlu2 %v10639_v1, %s10522_s25  ;;  %v5426_v46 = vsel %vm10688_vm8, %v5424_v41, %v5425_v42  ;;  %v5427_v48 = vrot.slane %v5425_v42, 4  ;;  %v5430_v22 = vrot.slane %v5428_v49, 4 }
 0x120   : > { %1275 = vst.msk [vmem:[#allocation2 + $0x44] sm:$0xf] %vm1257_vm3, %v1169_v40  ;;  %3012 = vrot.lane.b32.xlu1 %v2863_v43, %s10523_s26  ;;  %v10178_v40 = vld [vmem:[%s10577_s28 + $0x198] sm:$0xff] }
 0x121   : > { %v828_v50 = vpop.f32.mrf.mxu0  ;;  %5798 = vst [vmem:[#allocation3 + $0x44] sm:$0xf] %v5426_v46  ;;  %v5429_v53 = vsel %vm10688_vm8, %v5427_v48, %v5428_v49  ;;  %9253 = vmatmul.msk.bf16.vlgmr.msra.gmra.mxu1 %vm607_vm2, %v10178_v40  ;;  %v10388_v49 = vld [vmem:[%s15247_s3 + $0x78] sm:$0xff]  ;;  %v2216_v40 = vrot.slane %v10735_v44, 1 }
 0x122   : > { %v829_v52 = vadd.f32 %v10598_v15, %v828_v50  ;;  %5799 = vst [vmem:[#allocation3 + $0x50] sm:$0xf] %v5429_v53  ;;  %v10380_v53 = vld [vmem:[%s15247_s3 + $0x38] sm:$0xff]  ;;  %7294 = vmatpush.bf16.msra.mxu2 %v10388_v49 }
 0x123   : > { %7045 = vmatpush.bf16.msrb.mxu1 %v10380_v53 }
 0x124   : > { %v1065_v55 = vmax.f32 %v829_v52, 0.0  ;;  %9219 = vmatmul.msk.bf16.gmra.mxu0 %vm607_vm2, %v10144_v45 }
 0x126   : > { %v1170_v56 = vpack.c.bf16 %v1065_v55, %v1065_v55 }
 0x127   : > { %v10799_v59 = vld [vmem:[#allocation2 + $0x40] sm:$0xff]  ;;  %2418 = vrot.lane.b32.xlu2 %v10772_v26, %s10522_s25 }
 0x128   : > { %1276 = vst.msk [vmem:[#allocation2 + $0x48] sm:$0xf] %vm1257_vm3, %v1170_v56  ;;  %2306 = vrot.lane.b32.xlu1 %v2211_v58, %s10523_s26  ;;  %v10237_v62 = vld [vmem:[#allocation3 + $0x40] sm:$0xf0]  ;;  %v3282_v2 = vsel %vm2504_vm5, %v10799_v59, 0  ;;  %v1785_v3 = vshrl.u32 %v10799_v59, 16 }
 0x129   : > { %v830_v63 = vpop.f32.mrf.mxu0  ;;  %v9487_v0 = vor.u32 %v10237_v62, %v9486_v60  ;;  %v5219_v6 = vunpack.c.l.b16 %v3282_v2  ;;  %v5220_v7 = vunpack.c.h.b16 %v3282_v2  ;;  %v1781_v10 = vshll.u32 %v10799_v59, 16  ;;  %v9498_v38 = vld [vmem:[#allocation3 + $0x50] sm:$0xf] }
 0x12a   : > { %v831_v5 = vadd.f32 %v10598_v15, %v830_v63  ;;  %v10812_v12 = vrot.slane %v1785_v3, 7  ;;  %v2214_v58 = vrot.slane %v10707_v4, 1  ;;  %v10387_v2 = vld [vmem:[%s15247_s3 + $0x70] sm:$0xff] }
 0x12b   : > { %7561 = vmatmul.bf16.gmra.mxu3 %v9487_v0  ;;  %v5316_v14 = vpack.c.b16 %v5219_v6, %v5219_v6  ;;  %v5317_v16 = vpack.c.b16 %v5220_v7, %v5220_v7  ;;  %v1783_v33 = vrot.slane %v1781_v10, 1  ;;  %v10379_v6 = vld [vmem:[%s15247_s3 + $0x30] sm:$0xff]  ;;  %7295 = vmatpush.bf16.msra.mxu2 %v10387_v2 }
 0x12c   : > { %v1066_v13 = vmax.f32 %v831_v5, 0.0  ;;  %v2865_v18 = vor.u32 %v10812_v12, %v1781_v10  ;;  %v10146_v10 = vld [vmem:[%s10577_s28 + $0x98] sm:$0xff]  ;;  %7046 = vmatpush.bf16.msrb.mxu1 %v10379_v6 }
 0x12d   : > { %v5431_v20 = vrot.slane %v5316_v14, 5  ;;  %v5434_v27 = vrot.slane %v5317_v16, 5 }
 0x12e   : > { %v1171_v19 = vpack.c.bf16 %v1066_v13, %v1066_v13  ;;  %v2866_v24 = vsel %vm2852_vm10, %v2861_v36, %v2865_v18  ;;  %v1779_v36 = vor.u32 %v1777_v31, %v1775_v9  ;;  %v2215_v9 = vsel %vm2204_vm9, %v2212_v61, %v2214_v58  ;;  %v10386_v18 = vld [vmem:[%s15247_s3 + $0x68] sm:$0xff] }
 0x12f   : > { %2117 = vrot.lane.b32.xlu2 %v1776_v23, %s10521_s16  ;;  %v5432_v51 = vsel %vm10688_vm8, %v5430_v22, %v5431_v20  ;;  %v5433_v57 = vrot.slane %v5431_v20, 4  ;;  %3014 = vrot.lane.b32.xlu0 %v2866_v24, %s10523_s26  ;;  %v5436_v0 = vrot.slane %v5434_v27, 4  ;;  %v10378_v20 = vld [vmem:[%s15247_s3 + $0x28] sm:$0xff]  ;;  %v1787_v23 = vor.u32 %v1785_v3, %v1783_v33 }
 0x130   : > { %1277 = vst.msk [vmem:[#allocation2 + $0x4c] sm:$0xf] %vm1257_vm3, %v1171_v19  ;;  %2420 = vrot.lane.b32.xlu1 %v10799_v59, %s10522_s25  ;;  %v1784_v25 = vsel %vm1716_vm4, %v1779_v36, %v1783_v33  ;;  %7296 = vmatpush.bf16.msra.mxu2 %v10386_v18 }
 0x131   : > { %v833_v28 = vpop.f32.mrf.mxu0  ;;  %5800 = vst [vmem:[#allocation3 + $0x5c] sm:$0xf] %v5432_v51  ;;  %v5435_v30 = vsel %vm10688_vm8, %v5433_v57, %v5434_v27  ;;  %7047 = vmatpush.bf16.msrb.mxu1 %v10378_v20  ;;  %v10385_v27 = vld [vmem:[%s15247_s3 + $0x60] sm:$0xff] }
 0x132   : > { %v834_v8 = vadd.f32 %v10598_v15, %v833_v28  ;;  %5801 = vst [vmem:[#allocation3 + $0x68] sm:$0xf] %v5435_v30  ;;  %v10377_v28 = vld [vmem:[%s15247_s3 + $0x20] sm:$0xff] }
 0x134   : > { %v1067_v32 = vmax.f32 %v834_v8, 0.0  ;;  %9220 = vmatmul.msk.bf16.gmra.mxu0 %vm607_vm2, %v10145_v29  ;;  %v332_v8 = vld [vmem:[%s10577_s28 + $0x1a0] sm:$0xf]  ;;  %7297 = vmatpush.bf16.msra.mxu2 %v10385_v27 }
 0x135   : > { %7048 = vmatpush.bf16.msrb.mxu1 %v10377_v28 }
 0x136   : > { %v1172_v35 = vpack.c.bf16 %v1067_v32, %v1067_v32 }
 0x137   : > { %v10836_v39 = vld [vmem:[#allocation2 + $0x48] sm:$0xff]  ;;  %2308 = vrot.lane.b32.xlu2 %v2213_v37, %s10523_s26  ;;  %2119 = vrot.lane.b32.xlu0 %v1784_v25, %s10521_s16 }
 0x138   : > { %1278 = vst.msk [vmem:[#allocation2 + $0x50] sm:$0xf] %vm1257_vm3, %v1172_v35  ;;  %v10240_v34 = vld [vmem:[#allocation3 + $0x58] sm:$0xf0]  ;;  %v3283_v31 = vsel %vm2504_vm5, %v10836_v39, 0  ;;  %v1793_v43 = vshrl.u32 %v10836_v39, 16 }
 0x139   : > { %v835_v41 = vpop.f32.mrf.mxu0  ;;  %v9499_v42 = vor.u32 %v10240_v34, %v9498_v38  ;;  %v5221_v46 = vunpack.c.l.b16 %v3283_v31  ;;  %v5222_v48 = vunpack.c.h.b16 %v3283_v31  ;;  %v1789_v50 = vshll.u32 %v10836_v39, 16  ;;  %v9510_v57 = vld [vmem:[#allocation3 + $0x68] sm:$0xf] }
 0x13a   : > { %v836_v45 = vadd.f32 %v10598_v15, %v835_v41  ;;  %v10854_v52 = vrot.slane %v1793_v43, 7  ;;  %v548_v38 = vunpack.c.l.b16 %v332_v8 }
 0x13b   : > { %7566 = vmatmul.bf16.gmra.mxu3 %v9499_v42  ;;  %v5318_v55 = vpack.c.b16 %v5221_v46, %v5221_v46  ;;  %v10859_v56 = vpack.c.b16 %v5222_v48, %v5222_v48  ;;  %v10889_v19 = vrot.slane %v1789_v50, 1  ;;  %v10384_v48 = vld [vmem:[%s15247_s3 + $0x58] sm:$0xff] }
 0x13c   : > { %v1068_v54 = vmax.f32 %v836_v45, 0.0  ;;  %v2868_v60 = vor.u32 %v10854_v52, %v1789_v50  ;;  %v601_v45 = vpack.c.b16 %v548_v38, %v548_v38  ;;  %7298 = vmatpush.bf16.msra.mxu2 %v10384_v48  ;;  %v10373_v38 = vld [vmem:[%s15247_s3] sm:$0xff] }
 0x13d   : > { %v5437_v63 = vrot.slane %v5318_v55, 5  ;;  %v5440_v7 = vrot.slane %v10859_v56, 5  ;;  %v1792_v29 = vsel %vm1716_vm4, %v1787_v23, %v10889_v19  ;;  %v2217_v55 = vsel %vm2204_vm9, %v2214_v58, %v2216_v40  ;;  %v10374_v23 = vld [vmem:[%s15247_s3 + $0x8] sm:$0xff] }
 0x13e   : > { %v1173_v62 = vpack.c.bf16 %v1068_v54, %v1068_v54  ;;  %v2869_v5 = vsel %vm2852_vm10, %v10812_v12, %v2868_v60  ;;  %9254 = vmatmul.msk.bf16.gmra.mxu1 %vm607_vm2, %v601_v45  ;;  %v10147_v60 = vld [vmem:[%s10577_s28 + $0xa0] sm:$0xff]  ;;  %v1795_v6 = vor.u32 %v1793_v43, %v10889_v19 }
 0x13f   : > { %2422 = vrot.lane.b32.xlu2 %v10836_v39, %s10522_s25  ;;  %3016 = vrot.lane.b32.xlu1 %v2869_v5, %s10523_s26  ;;  %v5438_v12 = vsel %vm10688_vm8, %v5436_v0, %v5437_v63  ;;  %v5439_v13 = vrot.slane %v5437_v63, 4  ;;  %v5442_v53 = vrot.slane %v5440_v7, 4 }
 0x140   : > { %1279 = vst.msk [vmem:[#allocation2 + $0x54] sm:$0xf] %vm1257_vm3, %v1173_v62  ;;  %2310 = vrot.lane.b32.xlu0 %v2215_v9, %s10523_s26 }
 0x141   : > { %v838_v14 = vpop.f32.mrf.mxu0  ;;  %5802 = vst [vmem:[#allocation3 + $0x74] sm:$0xf] %v5438_v12  ;;  %v5441_v17 = vsel %vm10688_vm8, %v5439_v13, %v5440_v7  ;;  %v10383_v7 = vld [vmem:[%s15247_s3 + $0x50] sm:$0xff] }
 0x142   : > { %v839_v16 = vadd.f32 %v10598_v15, %v838_v14  ;;  %5803 = vst [vmem:[#allocation3 + $0x80] sm:$0xf] %v5441_v17  ;;  %7299 = vmatpush.bf16.msra.mxu2 %v10383_v7 }
 0x144   : > { %v1069_v22 = vmax.f32 %v839_v16, 0.0  ;;  %9221 = vmatmul.msk.bf16.gmra.mxu0 %vm607_vm2, %v10146_v10  ;;  %v10375_v10 = vld [vmem:[%s15247_s3 + $0x10] sm:$0xff] }
 0x146   : > { %v1174_v24 = vpack.c.bf16 %v1069_v22, %v1069_v22  ;;  %v10382_v22 = vld [vmem:[%s15247_s3 + $0x48] sm:$0xff] }
 0x147   : > { %v10902_v51 = vld [vmem:[#allocation2 + $0x50] sm:$0xff]  ;;  %2121 = vrot.lane.b32.xlu1 %v1792_v29, %s10521_s16  ;;  %7300 = vmatpush.bf16.msra.mxu2 %v10382_v22 }
 0x148   : > { %1280 = vst.msk [vmem:[#allocation2 + $0x58] sm:$0xf] %vm1257_vm3, %v1174_v24  ;;  %v10243_v3 = vld [vmem:[#allocation3 + $0x70] sm:$0xf0]  ;;  %v3284_v61 = vsel %vm2504_vm5, %v10902_v51, 0  ;;  %2424 = vrot.lane.b32.xlu0 %v10902_v51, %s10522_s25  ;;  %v1801_v33 = vshrl.u32 %v10902_v51, 16 }
 0x149   : > { %v840_v30 = vpop.f32.mrf.mxu0  ;;  %v9511_v32 = vor.u32 %v10243_v3, %v9510_v57  ;;  %v5223_v36 = vunpack.c.l.b16 %v3284_v61  ;;  %v5224_v37 = vunpack.c.h.b16 %v3284_v61  ;;  %v1797_v25 = vshll.u32 %v10902_v51, 16  ;;  %v9522_v43 = vld [vmem:[#allocation3 + $0x80] sm:$0xf] }
 0x14a   : > { %v841_v35 = vadd.f32 %v10598_v15, %v840_v30  ;;  %v10919_v34 = vrot.slane %v1801_v33, 7  ;;  %v2218_v3 = vrot.slane %v10772_v26, 1  ;;  %v10381_v61 = vld [vmem:[%s15247_s3 + $0x40] sm:$0xff] }
 0x14b   : > { %7571 = vmatmul.bf16.gmra.mxu3 %v9511_v32  ;;  %v5320_v42 = vpack.c.b16 %v5223_v36, %v5223_v36  ;;  %v10922_v31 = vpack.c.b16 %v5224_v37, %v5224_v37  ;;  %v10949_v2 = vrot.slane %v1797_v25, 1  ;;  %7301 = vmatpush.bf16.msra.mxu2 %v10381_v61 }
 0x14c   : > { %v1070_v41 = vmax.f32 %v841_v35, 0.0  ;;  %v2871_v46 = vor.u32 %v10919_v34, %v1797_v25 }
 0x14d   : > { %v5443_v50 = vrot.slane %v5320_v42, 5  ;;  %v5446_v56 = vrot.slane %v10922_v31, 5  ;;  %v1800_v12 = vsel %vm1716_vm4, %v1795_v6, %v10949_v2  ;;  %v2219_v31 = vsel %vm2204_vm9, %v2216_v40, %v2218_v3 }
 0x14e   : > { %v1175_v49 = vpack.c.bf16 %v1070_v41, %v1070_v41  ;;  %v2872_v54 = vsel %vm2852_vm10, %v10854_v52, %v2871_v46  ;;  %v10376_v52 = vld [vmem:[%s15247_s3 + $0x18] sm:$0xff] }
 0x14f   : > { %3018 = vrot.lane.b32.xlu2 %v2872_v54, %s10523_s26  ;;  %2312 = vrot.lane.b32.xlu1 %v2217_v55, %s10523_s26  ;;  %v5444_v62 = vsel %vm10688_vm8, %v5442_v53, %v5443_v50  ;;  %v5445_v4 = vrot.slane %v5443_v50, 4  ;;  %v2833_v14 = vpop.permute.xlu0 %2832  ;;  %v5448_v42 = vrot.slane %v5446_v56, 4  ;;  %v10148_v50 = vld [vmem:[%s10577_s28 + $0xa8] sm:$0xff] }
 0x150   : > { %1281 = vst.msk [vmem:[#allocation2 + $0x5c] sm:$0xf] %vm1257_vm3, %v1175_v49  ;;  %7049 = vmatpush.bf16.msrb.mxu1 %v10376_v52  ;;  %v3114_v46 = vsel %vm2504_vm5, %v10716_v11, %v2833_v14 }
 0x151   : > { %v843_v63 = vpop.f32.mrf.mxu0  ;;  %5804 = vst [vmem:[#allocation3 + $0x8c] sm:$0xf] %v5444_v62  ;;  %v5447_v0 = vsel %vm10688_vm8, %v5445_v4, %v5446_v56 }
 0x152   : > { %v844_v58 = vadd.f32 %v10598_v15, %v843_v63  ;;  %5805 = vst [vmem:[#allocation3 + $0x98] sm:$0xf] %v5447_v0  ;;  %v1803_v0 = vor.u32 %v1801_v33, %v10949_v2 }
 0x154   : > { %v1071_v5 = vmax.f32 %v844_v58, 0.0  ;;  %9222 = vmatmul.msk.bf16.gmra.mxu0 %vm607_vm2, %v10147_v60  ;;  %7050 = vmatpush.bf16.msrb.mxu1 %v10375_v10 }
 0x156   : > { %v1176_v9 = vpack.c.bf16 %v1071_v5, %v1071_v5 }
 0x157   : > { %v10963_v13 = vld [vmem:[#allocation2 + $0x58] sm:$0xff]  ;;  %2123 = vrot.lane.b32.xlu2 %v1800_v12, %s10521_s16 }
 0x158   : > { %1282 = vst.msk [vmem:[#allocation2 + $0x60] sm:$0xf] %vm1257_vm3, %v1176_v9  ;;  %v10246_v16 = vld [vmem:[#allocation3 + $0x88] sm:$0xf0]  ;;  %v3285_v18 = vsel %vm2504_vm5, %v10963_v13, 0  ;;  %2426 = vrot.lane.b32.xlu1 %v10963_v13, %s10522_s25  ;;  %v1809_v20 = vshrl.u32 %v10963_v13, 16  ;;  %7051 = vmatpush.bf16.msrb.mxu1 %v10374_v23 }
 0x159   : > { %v845_v17 = vpop.f32.mrf.mxu0  ;;  %v9523_v19 = vor.u32 %v10246_v16, %v9522_v43  ;;  %v5225_v29 = vunpack.c.l.b16 %v3285_v18  ;;  %v5226_v57 = vunpack.c.h.b16 %v3285_v18  ;;  %v3009_v28 = vpop.permute.xlu2 %3008  ;;  %v1805_v8 = vshll.u32 %v10963_v13, 16  ;;  %v9534_v26 = vld [vmem:[#allocation3 + $0x98] sm:$0xf] }
 0x15a   : > { %v846_v24 = vadd.f32 %v10598_v15, %v845_v17  ;;  %v10985_v30 = vrot.slane %v1809_v20, 7 }
 0x15b   : > { %v10979_v27 = vpop.permute.xlu1 %2412  ;;  %7576 = vmatmul.bf16.gmra.mxu3 %v9523_v19  ;;  %v5322_v35 = vpack.c.b16 %v5225_v29, %v5225_v29  ;;  %v10990_v36 = vpack.c.b16 %v5226_v57, %v5226_v57  ;;  %v11018_v60 = vrot.slane %v1805_v8, 1 }
 0x15c   : > { %v1072_v32 = vmax.f32 %v846_v24, 0.0  ;;  %v2874_v37 = vor.u32 %v10985_v30, %v1805_v8  ;;  %7052 = vmatpush.bf16.msrb.mxu1 %v10373_v38  ;;  %v11050_v38 = vld [vmem:[%s15246_s2] ss:$0 sm:$0xff] }
 0x15d   : > { %v5449_v41 = vrot.slane %v5322_v35, 5  ;;  %v5452_v48 = vrot.slane %v10990_v36, 5  ;;  %v1808_v12 = vsel %vm1716_vm4, %v1803_v0, %v11018_v60 }
 0x15e   : > { %v1177_v25 = vpack.c.bf16 %v1072_v32, %v1072_v32  ;;  %v2875_v45 = vsel %vm2852_vm10, %v10919_v34, %v2874_v37  ;;  %v2220_v32 = vrot.slane %v10799_v59, 1 }
 0x15f   : > { %2314 = vrot.lane.b32.xlu2 %v2219_v31, %s10523_s26  ;;  %3020 = vrot.lane.b32.xlu0 %v2875_v45, %s10523_s26  ;;  %v5450_v44 = vsel %vm10688_vm8, %v5448_v42, %v5449_v41  ;;  %v5451_v40 = vrot.slane %v5449_v41, 4 }
 0x160   : > { %1283 = vst.msk [vmem:[#allocation2 + $0x64] sm:$0xf] %vm1257_vm3, %v1177_v25 }
 0x161   : > { %v3007_v49 = vpop.permute.xlu0 %3006  ;;  %v848_v53 = vpop.f32.mrf.mxu0  ;;  %5806 = vst [vmem:[#allocation3 + $0xa4] sm:$0xf] %v5450_v44  ;;  %v5453_v62 = vsel %vm10688_vm8, %v5451_v40, %v5452_v48 }
 0x162   : > { %v3124_v34 = vsel %vm2601_vm11, %v3114_v46, %v3007_v49  ;;  %v849_v54 = vadd.f32 %v10598_v15, %v848_v53  ;;  %v11016_v56 = vpop.permute.xlu2 %2414  ;;  %5807 = vst [vmem:[#allocation3 + $0xb0] sm:$0xf] %v5453_v62  ;;  %v2221_v62 = vsel %vm2204_vm9, %v2218_v3, %v2220_v32 }
 0x163   : > { %v3221_v11 = vsel %vm2698_vm12, %v3124_v34, %v10979_v27  ;;  %v2112_v55 = vpop.permute.xlu1 %2111 }
 0x164   : > { %v3809_v52 = vunpack.c.l.b16 %v3221_v11  ;;  %v3810_v4 = vunpack.c.h.b16 %v3221_v11  ;;  %v11026_v63 = vsel %vm2504_vm5, %v10639_v1, %v2112_v55  ;;  %v1073_v58 = vmax.f32 %v849_v54, 0.0  ;;  %9223 = vmatmul.msk.bf16.gmra.mxu0 %vm607_vm2, %v10148_v50 }
 0x165   : > { %v3126_v15 = vsel %vm2601_vm11, %v11026_v63, %v3009_v28 }
 0x166   : > { %v3906_v5 = vpack.c.b16 %v3809_v52, %v3809_v52  ;;  %v3907_v6 = vpack.c.b16 %v3810_v4, %v3810_v4  ;;  %v3222_v7 = vsel %vm2698_vm12, %v3126_v15, %v11016_v56  ;;  %v1178_v9 = vpack.c.bf16 %v1073_v58, %v1073_v58  ;;  %v10149_v15 = vld [vmem:[%s10577_s28 + $0xb0] sm:$0xff] }
 0x167   : > { %v3811_v10 = vunpack.c.l.b16 %v3222_v7  ;;  %v3812_v1 = vunpack.c.h.b16 %v3222_v7  ;;  %v11038_v18 = vld [vmem:[#allocation2 + $0x60] sm:$0xff]  ;;  %2125 = vrot.lane.b32.xlu0 %v1808_v12, %s10521_s16 }
 0x168   : > { %v4007_v14 = vshrl.u32 %v3906_v5, 16  ;;  %v4010_v43 = vshll.u32 %v3906_v5, 16  ;;  %v4016_v16 = vshll.u32 %v3907_v6, 16  ;;  %v4020_v17 = vshrl.u32 %v3907_v6, 16  ;;  %1284 = vst.msk [vmem:[#allocation2 + $0x68] sm:$0xf] %vm1257_vm3, %v1178_v9  ;;  %2428 = vrot.lane.b32.xlu2 %v11038_v18, %s10522_s25 }
 0x169   : > { %v3908_v33 = vpack.c.b16 %v3811_v10, %v3811_v10  ;;  %v11041_v2 = vpack.c.b16 %v3812_v1, %v3812_v1  ;;  %v2106_v29 = vpop.permute.xlu0 %2105  ;;  %v850_v57 = vpop.f32.mrf.mxu0  ;;  %v3286_v34 = vsel %vm2504_vm5, %v11038_v18, 0  ;;  %v10249_v55 = vld [vmem:[#allocation3 + $0xa0] sm:$0xf0]  ;;  %v1817_v1 = vshrl.u32 %v11038_v18, 16 }
 0x16a   : > { %v4009_v19 = vrot.slane %v4007_v14, 4  ;;  %v4012_v22 = vrot.slane %v4010_v43, 5  ;;  %v4018_v23 = vrot.slane %v4016_v16, 5  ;;  %v4022_v24 = vrot.slane %v4020_v17, 4  ;;  %v2409_v61 = vpop.permute.xlu2 %2408 }
 0x16b   : > { %v4026_v28 = vshll.u32 %v3908_v33, 16  ;;  %v4030_v8 = vshrl.u32 %v3908_v33, 16  ;;  %v851_v25 = vadd.f32 %v11050_v38, %v850_v57  ;;  %v4036_v45 = vshll.u32 %v11041_v2, 16  ;;  %v2303_v49 = vpop.permute.xlu1 %2302 }
 0x16c   : > { %v4013_v35 = vor.u32 %v4012_v22, %v4009_v19  ;;  %v4023_v37 = vor.u32 %v4022_v24, %v4018_v23  ;;  %v2506_v46 = vsel %vm2504_vm5, %v10662_v21, %v2106_v29  ;;  %v5227_v11 = vunpack.c.l.b16 %v3286_v34 }
 0x16d   : > { %v4028_v42 = vrot.slane %v4026_v28, 5  ;;  %v4032_v31 = vrot.slane %v4030_v8, 4  ;;  %v1074_v40 = vmax.f32 %v851_v25, 0.0  ;;  %v5228_v54 = vunpack.c.h.b16 %v3286_v34 }
 0x16e   : > { %v4014_v50 = vrot.slane %v4013_v35, 4  ;;  %v4024_v44 = vrot.slane %v4023_v37, 4  ;;  %v2603_v58 = vsel %vm2601_vm11, %v2506_v46, %v2303_v49  ;;  %v11075_v5 = vrot.slane %v4036_v45, 5 }
 0x16f   : > { %v4033_v53 = vor.u32 %v4032_v31, %v4028_v42  ;;  %v1179_v4 = vpack.c.bf16 %v1074_v40, %v1074_v40  ;;  %v5324_v6 = vpack.c.b16 %v5227_v11, %v5227_v11  ;;  %v11077_v7 = vpack.c.b16 %v5228_v54, %v5228_v54  ;;  %2316 = vrot.lane.b32.xlu0 %v2221_v62, %s10523_s26 }
 0x170   : > { %v4019_v21 = vsel %vm11055_vm15, %v4014_v50, %v4018_v23  ;;  %v4029_v52 = vsel %vm11055_vm15, %v4024_v44, %v4028_v42  ;;  %v2700_v3 = vsel %vm2698_vm12, %v2603_v58, %v2409_v61  ;;  %v9535_v9 = vor.u32 %v10249_v55, %v9534_v26  ;;  %v9546_v26 = vld [vmem:[#allocation3 + $0xb0] sm:$0xf] }
 0x171   : > { %5066 = vst [vmem:[#allocation3 + $0x4] sm:$0xf] %v4019_v21  ;;  %v4034_v0 = vrot.slane %v4033_v53, 4  ;;  %v853_v10 = vpop.f32.mrf.mxu0  ;;  %v5455_v14 = vrot.slane %v5324_v6, 5  ;;  %v3376_v43 = vunpack.c.l.b16 %v2700_v3  ;;  %v5454_v17 = vrot.slane %v5452_v48, 4  ;;  %v2114_v25 = vpop.permute.xlu0 %2113 }
 0x172   : > { %5067 = vst [vmem:[#allocation3 + $0x10] sm:$0xf] %v4029_v52  ;;  %v11086_v16 = vpop.permute.xlu2 %2416  ;;  %v3377_v33 = vunpack.c.h.b16 %v2700_v3  ;;  %7581 = vmatmul.bf16.gmra.mxu3 %v9535_v9  ;;  %v854_v19 = vadd.f32 %v11050_v38, %v853_v10  ;;  %v1813_v22 = vshll.u32 %v11038_v18, 16  ;;  %v2876_v23 = vrot.slane %v1817_v1, 7 }
 0x173   : > { %v4039_v12 = vsel %vm11055_vm15, %v4034_v0, %v11075_v5  ;;  %1285 = vst.msk [vmem:[#allocation2 + $0x6c] sm:$0xf] %vm1257_vm3, %v1179_v4  ;;  %v5458_v24 = vrot.slane %v11077_v7, 5  ;;  %v3472_v29 = vpack.c.b16 %v3376_v43, %v3376_v43  ;;  %v5456_v57 = vsel %vm10688_vm8, %v5454_v17, %v5455_v14 }
 0x174   : > { %5068 = vst [vmem:[#allocation3 + $0x1c] sm:$0xf] %v4039_v12  ;;  %9224 = vmatmul.msk.bf16.gmra.mxu0 %vm607_vm2, %v10149_v15  ;;  %v5457_v36 = vrot.slane %v5455_v14, 4  ;;  %v3473_v48 = vpack.c.b16 %v3377_v33, %v3377_v33  ;;  %v1075_v28 = vmax.f32 %v854_v19, 0.0  ;;  %v2877_v8 = vor.u32 %v2876_v23, %v1813_v22  ;;  %v10150_v12 = vld [vmem:[%s10577_s28 + $0xb8] sm:$0xff] }
 0x175   : > { %5808 = vst [vmem:[#allocation3 + $0xbc] sm:$0xf] %v5456_v57  ;;  %v1815_v40 = vrot.slane %v1813_v22, 1  ;;  %v1811_v62 = vor.u32 %v1809_v20, %v11018_v60  ;;  %v4040_v58 = vshrl.u32 %v11041_v2, 16  ;;  %v5460_v14 = vrot.slane %v5458_v24, 4  ;;  %v10437_v2 = vld [vmem:[#allocation2 + $0x20] sm:$0xff]  }
 0x176   : > { %3664 = vst [vmem:[#allocation3] sm:$0xf] %v3472_v29  ;;  %v5459_v61 = vsel %vm10688_vm8, %v5457_v36, %v5458_v24  ;;  %v1180_v35 = vpack.c.bf16 %v1075_v28, %v1075_v28  ;;  %v2878_v37 = vsel %vm2852_vm10, %v10985_v30, %v2877_v8  ;;  %v11131_v43 = vsel %vm2504_vm5, %v10437_v2, %v2114_v25 }
 0x177   : > { %3665 = vst [vmem:[#allocation3 + $0xc] sm:$0xf] %v3473_v48  ;;  %3022 = vrot.lane.b32.xlu1 %v2878_v37, %s10523_s26  ;;  %v1816_v3 = vsel %vm1716_vm4, %v1811_v62, %v1815_v40  ;;  %v2222_v22 = vrot.slane %v10836_v39, 1  ;;  %v4042_v8 = vrot.slane %v4040_v58, 4 }
 0x178   : > { %v10229_v42 = vld [vmem:[#allocation3 + $0x4] sm:$0xf]  ;;  %5809 = vst [vmem:[#allocation3 + $0xc8] sm:$0xf] %v5459_v61 }
 0x179   : > { %v9456_v31 = vld [vmem:[#allocation3 + $0xc] sm:$0xf0]  ;;  %1286 = vst.msk [vmem:[#allocation2 + $0x70] sm:$0xf] %vm1257_vm3, %v1180_v35  ;;  %v855_v45 = vpop.f32.mrf.mxu0  ;;  %v2108_v17 = vpop.permute.xlu0 %2107 }
 0x17a   : > { %v9459_v46 = vor.u32 %v10229_v42, %v9456_v31  ;;  %v11104_v49 = vld [vmem:[#allocation2 + $0x68] sm:$0xff]  ;;  %v856_v50 = vadd.f32 %v11050_v38, %v855_v45  ;;  %v11107_v44 = vpop.permute.xlu2 %2410  ;;  %v2223_v45 = vsel %vm2204_vm9, %v2220_v32, %v2222_v22 }
 0x17b   : > { %v3287_v30 = vsel %vm2504_vm5, %v11104_v49, 0  ;;  %2430 = vrot.lane.b32.xlu0 %v11104_v49, %s10522_s25  ;;  %v1825_v34 = vshrl.u32 %v11104_v49, 16  ;;  %v1821_v52 = vshll.u32 %v11104_v49, 16 }
 0x17c   : > { %7302 = vmatmul.bf16.vlgmr.msra.gmra.mxu2 %v9459_v46  ;;  %v1076_v53 = vmax.f32 %v856_v50, 0.0  ;;  %v5229_v11 = vunpack.c.l.b16 %v3287_v30  ;;  %v5230_v54 = vunpack.c.h.b16 %v3287_v30  ;;  %v10252_v55 = vld [vmem:[#allocation3 + $0xb8] sm:$0xf0]  ;;  %v2224_v46 = vrot.slane %v10902_v51, 1 }
 0x17d   : > { %v9454_v21 = vld [vmem:[#allocation3] sm:$0xf]  ;;  %v11120_v4 = vrot.slane %v1825_v34, 7  ;;  %v9547_v20 = vor.u32 %v10252_v55, %v9546_v26  ;;  %v11151_v42 = vrot.slane %v1821_v52, 1  ;;  %v4043_v50 = vor.u32 %v4042_v8, %v11075_v5 }
 0x17e   : > { %v1181_v15 = vpack.c.bf16 %v1076_v53, %v1076_v53  ;;  %v5326_v0 = vpack.c.b16 %v5229_v11, %v5229_v11  ;;  %v11123_v6 = vpack.c.b16 %v5230_v54, %v5230_v54  ;;  %v10230_v7 = vld [vmem:[#allocation3 + $0x8] sm:$0xf0]  ;;  %v1819_v11 = vor.u32 %v1817_v1, %v1815_v40 }
 0x17f   : > { %v9455_v9 = vor.u32 %v10230_v7, %v9454_v21  ;;  %v2880_v60 = vor.u32 %v11120_v4, %v1821_v52  ;;  %2127 = vrot.lane.b32.xlu1 %v1816_v3, %s10521_s16  ;;  %v2225_v26 = vsel %vm2204_vm9, %v2222_v22, %v2224_v46  ;;  %v10438_v3 = vld [vmem:[#allocation2 + $0x8] sm:$0xff] }
 0x180   : > { %1287 = vst.msk [vmem:[#allocation2 + $0x74] sm:$0xf] %vm1257_vm3, %v1181_v15  ;;  %v5461_v10 = vrot.slane %v5326_v0, 5  ;;  %v5464_v29 = vrot.slane %v11123_v6, 5  ;;  %v1824_v32 = vsel %vm1716_vm4, %v1819_v11, %v11151_v42  ;;  %v4044_v15 = vrot.slane %v4043_v50, 4  ;;  %v10439_v50 = vld [vmem:[#allocation2 + $0x28] sm:$0xff] }
 0x181   : > { %7053 = vmatmul.bf16.vlgmr.msrb.gmra.mxu1 %v9455_v9  ;;  %v858_v33 = vpop.f32.mrf.mxu0  ;;  %v2881_v19 = vsel %vm2852_vm10, %v2876_v23, %v2880_v60  ;;  %v2508_v9 = vsel %vm2504_vm5, %v10438_v3, %v2108_v17 }
 0x182   : > { %v859_v57 = vadd.f32 %v11050_v38, %v858_v33  ;;  %3024 = vrot.lane.b32.xlu2 %v2881_v19, %s10523_s26  ;;  %v11138_v36 = vpop.permute.xlu2 %2418  ;;  %v3011_v24 = vpop.permute.xlu1 %3010  ;;  %v5462_v48 = vsel %vm10688_vm8, %v5460_v14, %v5461_v10  ;;  %v5463_v28 = vrot.slane %v5461_v10, 4  ;;  %7586 = vmatmul.bf16.gmra.mxu3 %v9547_v20 }
 0x183   : > { %v3128_v23 = vsel %vm2601_vm11, %v11131_v43, %v3011_v24  ;;  %5810 = vst [vmem:[#allocation3 + $0xd4] sm:$0xf] %v5462_v48  ;;  %v2116_v20 = vpop.permute.xlu0 %2115 }
 0x184   : > { %v1077_v39 = vmax.f32 %v859_v57, 0.0  ;;  %v3223_v61 = vsel %vm2698_vm12, %v3128_v23, %v11086_v16  ;;  %9225 = vmatmul.msk.bf16.gmra.mxu0 %vm607_vm2, %v10150_v12  ;;  %v5465_v35 = vsel %vm10688_vm8, %v5463_v28, %v5464_v29 }
 0x185   : > { %v3813_v37 = vunpack.c.l.b16 %v3223_v61  ;;  %v3814_v25 = vunpack.c.h.b16 %v3223_v61  ;;  %5811 = vst [vmem:[#allocation3 + $0xe0] sm:$0xf] %v5465_v35  ;;  %v9558_v61 = vld [vmem:[#allocation3 + $0xc8] sm:$0xf] }
 0x186   : > { %v1182_v31 = vpack.c.bf16 %v1077_v39, %v1077_v39 }
 0x187   : > { %v3910_v30 = vpack.c.b16 %v3813_v37, %v3813_v37  ;;  %v3911_v53 = vpack.c.b16 %v3814_v25, %v3814_v25  ;;  %v11160_v54 = vld [vmem:[#allocation2 + $0x70] sm:$0xff]  ;;  %2318 = vrot.lane.b32.xlu1 %v2223_v45, %s10523_s26  ;;  %v5466_v45 = vrot.slane %v5464_v29, 4 }
 0x188   : > { %1288 = vst.msk [vmem:[#allocation2 + $0x78] sm:$0xf] %vm1257_vm3, %v1182_v31  ;;  %v3288_v1 = vsel %vm2504_vm5, %v11160_v54, 0  ;;  %v1829_v12 = vshll.u32 %v11160_v54, 16  ;;  %v1833_v25 = vshrl.u32 %v11160_v54, 16  ;;  %v10151_v31 = vld [vmem:[%s10577_s28 + $0xc0] sm:$0xff] }
 0x189   : > { %v4046_v55 = vshll.u32 %v3910_v30, 16  ;;  %v4050_v62 = vshrl.u32 %v3910_v30, 16  ;;  %v4056_v59 = vshll.u32 %v3911_v53, 16  ;;  %v860_v21 = vpop.f32.mrf.mxu0  ;;  %v4060_v52 = vshrl.u32 %v3911_v53, 16 }
 0x18a   : > { %v861_v5 = vadd.f32 %v11050_v38, %v860_v21  ;;  %2129 = vrot.lane.b32.xlu2 %v1824_v32, %s10521_s16  ;;  %v11170_v40 = vpop.permute.xlu2 %2117  ;;  %v2305_v58 = vpop.permute.xlu1 %2304  ;;  %v5231_v10 = vunpack.c.l.b16 %v3288_v1  ;;  %v10255_v57 = vld [vmem:[#allocation3 + $0xd0] sm:$0xf0]  ;;  %v5232_v8 = vunpack.c.h.b16 %v3288_v1  ;;  %v11205_v6 = vrot.slane %v1833_v25, 7 }
 0x18b   : > { %v4048_v0 = vrot.slane %v4046_v55, 5  ;;  %v4052_v7 = vrot.slane %v4050_v62, 4  ;;  %v11179_v33 = vrot.slane %v4056_v59, 5  ;;  %v2605_v19 = vsel %vm2601_vm11, %v2508_v9, %v2305_v58 }
 0x18c   : > { %v1078_v60 = vmax.f32 %v861_v5, 0.0  ;;  %v11182_v24 = vrot.slane %v4060_v52, 4  ;;  %v5328_v17 = vpack.c.b16 %v5231_v10, %v5231_v10  ;;  %v2702_v48 = vsel %vm2698_vm12, %v2605_v19, %v11107_v44 }
 0x18d   : > { %v4049_v14 = vsel %vm11055_vm15, %v4044_v15, %v4048_v0  ;;  %v4053_v2 = vor.u32 %v4052_v7, %v4048_v0  ;;  %v3378_v23 = vunpack.c.l.b16 %v2702_v48  ;;  %v3379_v39 = vunpack.c.h.b16 %v2702_v48 }
 0x18e   : > { %5069 = vst [vmem:[#allocation3 + $0x28] sm:$0xf] %v4049_v14  ;;  %v1183_v22 = vpack.c.bf16 %v1078_v60, %v1078_v60  ;;  %v5467_v35 = vrot.slane %v5328_v17, 5  ;;  %v9559_v37 = vor.u32 %v10255_v57, %v9558_v61  ;;  %v11194_v44 = vsel %vm2504_vm5, %v10439_v50, %v2116_v20  ;;  %v10232_v60 = vld [vmem:[#allocation3 + $0x1c] sm:$0xf]  ;;  %v2110_v14 = vpop.permute.xlu0 %2109 }
 0x18f   : > { %v4054_v28 = vrot.slane %v4053_v2, 4  ;;  %2432 = vrot.lane.b32.xlu1 %v11160_v54, %s10522_s25  ;;  %v3474_v53 = vpack.c.b16 %v3378_v23, %v3378_v23  ;;  %v3475_v11 = vpack.c.b16 %v3379_v39, %v3379_v39  ;;  %v4063_v62 = vor.u32 %v11182_v24, %v11179_v33 }
 0x190   : > { %1289 = vst.msk [vmem:[#allocation2 + $0x7c] sm:$0xf] %vm1257_vm3, %v1183_v22  ;;  %v5468_v32 = vsel %vm10688_vm8, %v5466_v45, %v5467_v35  ;;  %v11209_v52 = vpack.c.b16 %v5232_v8, %v5232_v8  ;;  %v11215_v58 = vrot.slane %v1829_v12, 1  ;;  %v2883_v0 = vor.u32 %v11205_v6, %v1829_v12  ;;  %v10440_v8 = vld [vmem:[#allocation2 + $0x10] sm:$0xff]  }
 0x191   : > { %v4059_v30 = vsel %vm11055_vm15, %v4054_v28, %v11179_v33  ;;  %v863_v55 = vpop.f32.mrf.mxu0  ;;  %3666 = vst [vmem:[#allocation3 + $0x18] sm:$0xf] %v3474_v53  ;;  %v5469_v19 = vrot.slane %v5467_v35, 4  ;;  %v2226_v28 = vrot.slane %v10963_v13, 1  ;;  %v1827_v35 = vor.u32 %v1825_v34, %v11151_v42 }
 0x192   : > { %5070 = vst [vmem:[#allocation3 + $0x34] sm:$0xf] %v4059_v30  ;;  %v864_v59 = vadd.f32 %v11050_v38, %v863_v55  ;;  %2320 = vrot.lane.b32.xlu2 %v2225_v26, %s10523_s26  ;;  %v2309_v29 = vpop.permute.xlu2 %2308  ;;  %v3013_v21 = vpop.permute.xlu1 %3012  ;;  %7591 = vmatmul.bf16.gmra.mxu3 %v9559_v37  ;;  %v2884_v12 = vsel %vm2852_vm10, %v11120_v4, %v2883_v0  ;;  %v5470_v48 = vrot.slane %v11209_v52, 5  ;;  %v4064_v37 = vrot.slane %v4063_v62, 4 }
 0x193   : > { %v2609_v5 = vsel %vm2601_vm11, %v11026_v63, %v2309_v29  ;;  %v3130_v1 = vsel %vm2601_vm11, %v11194_v44, %v3013_v21  ;;  %3667 = vst [vmem:[#allocation3 + $0x24] sm:$0xf] %v3475_v11  ;;  %3026 = vrot.lane.b32.xlu0 %v2884_v12, %s10523_s26  ;;  %v2510_v4 = vsel %vm2504_vm5, %v10440_v8, %v2110_v14  ;;  %v9570_v14 = vld [vmem:[#allocation3 + $0xe0] sm:$0xf] }
 0x194   : > { %v1079_v15 = vmax.f32 %v864_v59, 0.0  ;;  %v2706_v7 = vsel %vm2698_vm12, %v2609_v5, %v11016_v56  ;;  %v3224_v26 = vsel %vm2698_vm12, %v3130_v1, %v11138_v36  ;;  %9226 = vmatmul.msk.bf16.gmra.mxu0 %vm607_vm2, %v10151_v31  ;;  %5812 = vst [vmem:[#allocation3 + $0xec] sm:$0xf] %v5468_v32  ;;  %v5471_v30 = vsel %vm10688_vm8, %v5469_v19, %v5470_v48 }
 0x195   : > { %v3382_v3 = vunpack.c.l.b16 %v2706_v7  ;;  %v3383_v9 = vunpack.c.h.b16 %v2706_v7  ;;  %v3815_v63 = vunpack.c.l.b16 %v3224_v26  ;;  %v3816_v20 = vunpack.c.h.b16 %v3224_v26  ;;  %v9468_v10 = vld [vmem:[#allocation3 + $0x24] sm:$0xf0]  ;;  %5813 = vst [vmem:[#allocation3 + $0xf8] sm:$0xf] %v5471_v30 }
 0x196   : > { %v1184_v2 = vpack.c.bf16 %v1079_v15, %v1079_v15  ;;  %v9471_v33 = vor.u32 %v10232_v60, %v9468_v10  ;;  %v1832_v34 = vsel %vm1716_vm4, %v1827_v35, %v11215_v58  ;;  %v5472_v19 = vrot.slane %v5470_v48, 4 }
 0x197   : > { %v3478_v56 = vpack.c.b16 %v3382_v3, %v3382_v3  ;;  %v3479_v57 = vpack.c.b16 %v3383_v9, %v3383_v9  ;;  %v3912_v24 = vpack.c.b16 %v3815_v63, %v3815_v63  ;;  %v3913_v22 = vpack.c.b16 %v3816_v20, %v3816_v20  ;;  %v11226_v17 = vld [vmem:[#allocation2 + $0x78] sm:$0xff] }
 0x198   : > { %1290 = vst.msk [vmem:[#allocation2 + $0x80] sm:$0xf] %vm1257_vm3, %v1184_v2  ;;  %7307 = vmatmul.bf16.gmra.mxu2 %v9471_v33  ;;  %v3289_v45 = vsel %vm2504_vm5, %v11226_v17, 0  ;;  %v9466_v21 = vld [vmem:[#allocation3 + $0x18] sm:$0xf]  ;;  %v10152_v33 = vld [vmem:[%s10577_s28 + $0xc8] sm:$0xff] }
 0x199   : > { %3670 = vst [vmem:[#allocation3 + $0x48] sm:$0xf] %v3478_v56  ;;  %v4066_v23 = vshll.u32 %v3912_v24, 16  ;;  %v4070_v39 = vshrl.u32 %v3912_v24, 16  ;;  %v865_v61 = vpop.f32.mrf.mxu0  ;;  %v4076_v55 = vshll.u32 %v3913_v22, 16  ;;  %v5233_v62 = vunpack.c.l.b16 %v3289_v45  ;;  %v11254_v56 = vpop.f32.mrf.mxu3 }
 0x19a   : > { %3671 = vst [vmem:[#allocation3 + $0x54] sm:$0xf] %v3479_v57  ;;  %v866_v31 = vadd.f32 %v11050_v38, %v865_v61  ;;  %2434 = vrot.lane.b32.xlu2 %v11226_v17, %s10522_s25  ;;  %v2307_v50 = vpop.permute.xlu1 %2306  ;;  %v5234_v59 = vunpack.c.h.b16 %v3289_v45  ;;  %v10233_v32 = vld [vmem:[#allocation3 + $0x20] sm:$0xf0]  ;;  %v4080_v1 = vshrl.u32 %v3913_v22, 16 }
 0x19b   : > { %v4068_v53 = vrot.slane %v4066_v23, 5  ;;  %v4072_v11 = vrot.slane %v4070_v39, 4  ;;  %v2607_v29 = vsel %vm2601_vm11, %v2510_v4, %v2307_v50  ;;  %v10258_v0 = vld [vmem:[#allocation3 + $0xe8] sm:$0xf0]  ;;  %v5330_v26 = vpack.c.b16 %v5233_v62, %v5233_v62  ;;  %2131 = vrot.lane.b32.xlu0 %v1832_v34, %s10521_s16  ;;  %v11260_v39 = vpop.permute.xlu2 %2422 }
 0x19c   : > { %v1080_v42 = vmax.f32 %v866_v31, 0.0  ;;  %v2704_v15 = vsel %vm2698_vm12, %v2607_v29, %v10979_v27  ;;  %v11249_v3 = vpack.c.b16 %v5234_v59, %v5234_v59  ;;  %v4078_v20 = vrot.slane %v4076_v55, 5  ;;  %v10441_v31 = vld [vmem:[#allocation2 + $0x30] sm:$0xff]  ;;  %v10235_v29 = vld [vmem:[#allocation3 + $0x34] sm:$0xf] }
 0x19d   : > { %v4069_v52 = vsel %vm11055_vm15, %v4064_v37, %v4068_v53  ;;  %v4073_v5 = vor.u32 %v4072_v11, %v4068_v53  ;;  %v3380_v9 = vunpack.c.l.b16 %v2704_v15  ;;  %v3381_v60 = vunpack.c.h.b16 %v2704_v15 }
 0x19e   : > { %5071 = vst [vmem:[#allocation3 + $0x40] sm:$0xf] %v4069_v52  ;;  %v1185_v7 = vpack.c.bf16 %v1080_v42, %v1080_v42  ;;  %v9467_v10 = vor.u32 %v10233_v32, %v9466_v21  ;;  %v5473_v2 = vrot.slane %v5330_v26, 5  ;;  %v9571_v12 = vor.u32 %v10258_v0, %v9570_v14 }
 0x19f   : > { %v4074_v63 = vrot.slane %v4073_v5, 4  ;;  %v3476_v27 = vpack.c.b16 %v3380_v9, %v3380_v9  ;;  %v4082_v24 = vrot.slane %v4080_v1, 4  ;;  %v3477_v22 = vpack.c.b16 %v3381_v60, %v3381_v60 }
 0x1a0   : > { %1291 = vst.msk [vmem:[#allocation2 + $0x84] sm:$0xf] %vm1257_vm3, %v1185_v7  ;;  %7058 = vmatmul.bf16.gmra.mxu1 %v9467_v10  ;;  %v1841_v4 = vshrl.u32 %v11226_v17, 16  ;;  %v5476_v23 = vrot.slane %v11249_v3, 5  ;;  %v5474_v48 = vsel %vm10688_vm8, %v5472_v19, %v5473_v2  ;;  %v5475_v37 = vrot.slane %v5473_v2, 4 }
 0x1a1   : > { %v4079_v57 = vsel %vm11055_vm15, %v4074_v63, %v4078_v20  ;;  %v868_v8 = vpop.f32.mrf.mxu0  ;;  %v11269_v45 = vsel %vm2504_vm5, %v10441_v31, %v11170_v40  ;;  %3668 = vst [vmem:[#allocation3 + $0x30] sm:$0xf] %v3476_v27  ;;  %v1837_v50 = vshll.u32 %v11226_v17, 16  ;;  %v3015_v53 = vpop.permute.xlu0 %3014  ;;  %v4083_v34 = vor.u32 %v4082_v24, %v4078_v20 }
 0x1a2   : > { %5072 = vst [vmem:[#allocation3 + $0x4c] sm:$0xf] %v4079_v57  ;;  %v869_v61 = vadd.f32 %v11050_v38, %v868_v8  ;;  %v11263_v35 = vpop.permute.xlu1 %2420  ;;  %7596 = vmatmul.bf16.gmra.mxu3 %v9571_v12  ;;  %v11274_v30 = vrot.slane %v1841_v4, 7  ;;  %v3132_v55 = vsel %vm2601_vm11, %v11269_v45, %v3015_v53  ;;  %v5477_v40 = vsel %vm10688_vm8, %v5475_v37, %v5476_v23  ;;  %v11312_v24 = vpop.f32.mrf.mxu3 }
 0x1a3   : > { %3669 = vst [vmem:[#allocation3 + $0x3c] sm:$0xf] %v3477_v22  ;;  %v2227_v62 = vsel %vm2204_vm9, %v2224_v46, %v2226_v28  ;;  %v3225_v59 = vsel %vm2698_vm12, %v3132_v55, %v11263_v35  ;;  %v11294_v0 = vrot.slane %v1837_v50, 1  ;;  %v1835_v9 = vor.u32 %v1833_v25, %v11215_v58 }
 0x1a4   : > { %v1081_v11 = vmax.f32 %v869_v61, 0.0  ;;  %9227 = vmatmul.msk.bf16.gmra.mxu0 %vm607_vm2, %v10152_v33  ;;  %v2886_v42 = vor.u32 %v11274_v30, %v1837_v50  ;;  %5814 = vst [vmem:[#allocation3 + $0x104] sm:$0xf] %v5474_v48  ;;  %v3817_v52 = vunpack.c.l.b16 %v3225_v59  ;;  %v3818_v5 = vunpack.c.h.b16 %v3225_v59  ;;  %2322 = vrot.lane.b32.xlu0 %v2227_v62, %s10523_s26  ;;  %v9582_v62 = vld [vmem:[#allocation3 + $0xf8] sm:$0xf] }
 0x1a5   : > { %v9480_v21 = vld [vmem:[#allocation3 + $0x3c] sm:$0xf0]  ;;  %5815 = vst [vmem:[#allocation3 + $0x110] sm:$0xf] %v5477_v40  ;;  %v4084_v20 = vrot.slane %v4083_v34, 4  ;;  %v2228_v2 = vrot.slane %v11038_v18, 1  ;;  %v1840_v12 = vsel %vm1716_vm4, %v1835_v9, %v11294_v0 }
 0x1a6   : > { %v1186_v32 = vpack.c.bf16 %v1081_v11, %v1081_v11  ;;  %v9483_v1 = vor.u32 %v10235_v29, %v9480_v21  ;;  %v2887_v15 = vsel %vm2852_vm10, %v11205_v6, %v2886_v42  ;;  %v3914_v46 = vpack.c.b16 %v3817_v52, %v3817_v52 }
 0x1a7   : > { %v11296_v51 = vld [vmem:[#allocation2 + $0x80] sm:$0xff]  ;;  %3028 = vrot.lane.b32.xlu1 %v2887_v15, %s10523_s26  ;;  %v3915_v7 = vpack.c.b16 %v3818_v5, %v3818_v5  ;;  %v5478_v11 = vrot.slane %v5476_v23, 4  ;;  %v10153_v5 = vld [vmem:[%s10577_s28 + $0xd0] sm:$0xff]  ;;  %v10442_v15 = vld [vmem:[#allocation2 + $0x38] sm:$0xff] }
 0x1a8   : > { %1292 = vst.msk [vmem:[#allocation2 + $0x88] sm:$0xf] %vm1257_vm3, %v1186_v32  ;;  %7312 = vmatmul.bf16.gmra.mxu2 %v9483_v1  ;;  %v3290_v6 = vsel %vm2504_vm5, %v11296_v51, 0  ;;  %v1849_v63 = vshrl.u32 %v11296_v51, 16  ;;  %v4086_v60 = vshll.u32 %v3914_v46, 16  ;;  %v4090_v10 = vshrl.u32 %v3914_v46, 16 }
 0x1a9   : > { %v870_v26 = vpop.f32.mrf.mxu0  ;;  %v11306_v14 = vpop.permute.xlu2 %3018  ;;  %v5235_v33 = vunpack.c.l.b16 %v3290_v6  ;;  %v5236_v19 = vunpack.c.h.b16 %v3290_v6  ;;  %v9478_v58 = vld [vmem:[#allocation3 + $0x30] sm:$0xf]  ;;  %v4096_v61 = vshll.u32 %v3915_v7, 16  ;;  %v1845_v53 = vshll.u32 %v11296_v51, 16 }
 0x1aa   : > { %v871_v27 = vadd.f32 %v11050_v38, %v870_v26  ;;  %v2120_v25 = vpop.permute.xlu0 %2119  ;;  %v10236_v57 = vld [vmem:[#allocation3 + $0x38] sm:$0xf0]  ;;  %v4088_v22 = vrot.slane %v4086_v60, 5  ;;  %v4092_v8 = vrot.slane %v4090_v10, 4  ;;  %v11316_v37 = vrot.slane %v1849_v63, 7 }
 0x1ab   : > { %v10261_v48 = vld [vmem:[#allocation3 + $0x100] sm:$0xf0]  ;;  %v5332_v50 = vpack.c.b16 %v5235_v33, %v5235_v33  ;;  %v11323_v34 = vpack.c.b16 %v5236_v19, %v5236_v19  ;;  %v9479_v42 = vor.u32 %v10236_v57, %v9478_v58  ;;  %v4100_v59 = vshrl.u32 %v3915_v7, 16 }
 0x1ac   : > { %v1082_v31 = vmax.f32 %v871_v27, 0.0  ;;  %v4089_v55 = vsel %vm11055_vm15, %v4084_v20, %v4088_v22  ;;  %v4093_v40 = vor.u32 %v4092_v8, %v4088_v22  ;;  %2436 = vrot.lane.b32.xlu0 %v11296_v51, %s10522_s25  ;;  %v9583_v32 = vor.u32 %v10261_v48, %v9582_v62  ;;  %v11367_v48 = vpop.f32.mrf.mxu3 }
 0x1ad   : > { %5073 = vst [vmem:[#allocation3 + $0x58] sm:$0xf] %v4089_v55  ;;  %v5479_v21 = vrot.slane %v5332_v50, 5  ;;  %v11327_v3 = vrot.slane %v4096_v61, 5  ;;  %v2889_v23 = vor.u32 %v11316_v37, %v1845_v53  ;;  %v11334_v46 = vsel %vm2504_vm5, %v10442_v15, %v2120_v25  ;;  %v10238_v55 = vld [vmem:[#allocation3 + $0x4c] sm:$0xf] }
 0x1ae   : > { %v1187_v29 = vpack.c.bf16 %v1082_v31, %v1082_v31  ;;  %v4094_v52 = vrot.slane %v4093_v40, 4  ;;  %v5482_v6 = vrot.slane %v11323_v34, 5  ;;  %v2229_v33 = vsel %vm2204_vm9, %v2226_v28, %v2228_v2  ;;  %v10239_v15 = vld [vmem:[#allocation3 + $0x50] sm:$0xf0] }
 0x1af   : > { %2133 = vrot.lane.b32.xlu1 %v1840_v12, %s10521_s16  ;;  %v5481_v1 = vrot.slane %v5479_v21, 4  ;;  %v5480_v26 = vsel %vm10688_vm8, %v5478_v11, %v5479_v21  ;;  %v2890_v60 = vsel %vm2852_vm10, %v11274_v30, %v2889_v23  ;;  %v4102_v12 = vrot.slane %v4100_v59, 4 }
 0x1b0   : > { %1293 = vst.msk [vmem:[#allocation2 + $0x8c] sm:$0xf] %vm1257_vm3, %v1187_v29  ;;  %7063 = vmatmul.bf16.gmra.mxu1 %v9479_v42  ;;  %v4099_v9 = vsel %vm11055_vm15, %v4094_v52, %v11327_v3  ;;  %3030 = vrot.lane.b32.xlu2 %v2890_v60, %s10523_s26  ;;  %v2230_v61 = vrot.slane %v11104_v49, 1  ;;  %v11369_v11 = vrot.slane %v1845_v53, 1  ;;  %v9490_v53 = vld [vmem:[#allocation3 + $0x48] sm:$0xf] }
 0x1b1   : > { %v873_v7 = vpop.f32.mrf.mxu0  ;;  %v11345_v10 = vpop.permute.xlu2 %2123  ;;  %5816 = vst [vmem:[#allocation3 + $0x11c] sm:$0xf] %v5480_v26  ;;  %v5483_v13 = vsel %vm10688_vm8, %v5481_v1, %v5482_v6  ;;  %v4103_v42 = vor.u32 %v4102_v12, %v11327_v3 }
 0x1b2   : > { %v874_v20 = vadd.f32 %v11050_v38, %v873_v7  ;;  %v3017_v27 = vpop.permute.xlu1 %3016  ;;  %5074 = vst [vmem:[#allocation3 + $0x64] sm:$0xf] %v4099_v9  ;;  %7601 = vmatmul.bf16.gmra.mxu3 %v9583_v32  ;;  %v2311_v25 = vpop.permute.xlu0 %2310  ;;  %v1843_v32 = vor.u32 %v1841_v4, %v11294_v0 }
 0x1b3   : > { %v3134_v19 = vsel %vm2601_vm11, %v11334_v46, %v3017_v27  ;;  %v2611_v57 = vsel %vm2601_vm11, %v11131_v43, %v2311_v25  ;;  %5817 = vst [vmem:[#allocation3 + $0x128] sm:$0xf] %v5483_v13  ;;  %v4104_v60 = vrot.slane %v4103_v42, 4  ;;  %v10443_v42 = vld [vmem:[#allocation2 + $0x40] sm:$0xff] }
 0x1b4   : > { %v1083_v30 = vmax.f32 %v874_v20, 0.0  ;;  %v3226_v58 = vsel %vm2698_vm12, %v3134_v19, %v11260_v39  ;;  %9228 = vmatmul.msk.bf16.gmra.mxu0 %vm607_vm2, %v10153_v5  ;;  %v2708_v8 = vsel %vm2698_vm12, %v2611_v57, %v11086_v16  ;;  %v9492_v40 = vld [vmem:[#allocation3 + $0x54] sm:$0xf0]  ;;  %v1848_v9 = vsel %vm1716_vm4, %v1843_v32, %v11369_v11 }
 0x1b5   : > { %v3819_v22 = vunpack.c.l.b16 %v3226_v58  ;;  %v3820_v28 = vunpack.c.h.b16 %v3226_v58  ;;  %v3384_v50 = vunpack.c.l.b16 %v2708_v8  ;;  %v3385_v43 = vunpack.c.h.b16 %v2708_v8 }
 0x1b6   : > { %v1188_v31 = vpack.c.bf16 %v1083_v30, %v1083_v30  ;;  %v9495_v29 = vor.u32 %v10238_v55, %v9492_v40  ;;  %v9491_v58 = vor.u32 %v10239_v15, %v9490_v53  ;;  %v10154_v53 = vld [vmem:[%s10577_s28 + $0xd8] sm:$0xff] }
 0x1b7   : > { %v3916_v62 = vpack.c.b16 %v3819_v22, %v3819_v22  ;;  %v3917_v59 = vpack.c.b16 %v3820_v28, %v3820_v28  ;;  %2324 = vrot.lane.b32.xlu1 %v2229_v33, %s10523_s26  ;;  %v3480_v16 = vpack.c.b16 %v3384_v50, %v3384_v50  ;;  %v3481_v21 = vpack.c.b16 %v3385_v43, %v3385_v43  ;;  %v11377_v52 = vld [vmem:[#allocation2 + $0x88] sm:$0xff]  ;;  %v9594_v43 = vld [vmem:[#allocation3 + $0x110] sm:$0xf] }
 0x1b8   : > { %1294 = vst.msk [vmem:[#allocation2 + $0x90] sm:$0xf] %vm1257_vm3, %v1188_v31  ;;  %7317 = vmatmul.bf16.gmra.mxu2 %v9495_v29  ;;  %v3291_v20 = vsel %vm2504_vm5, %v11377_v52, 0  ;;  %2135 = vrot.lane.b32.xlu2 %v1848_v9, %s10521_s16  ;;  %v2231_v33 = vsel %vm2204_vm9, %v2228_v2, %v2230_v61  ;;  %v10264_v57 = vld [vmem:[#allocation3 + $0x118] sm:$0xf0]  ;;  %v11401_v29 = vpop.f32.mrf.mxu3 }
 0x1b9   : > { %v4106_v23 = vshll.u32 %v3916_v62, 16  ;;  %v4110_v5 = vshrl.u32 %v3916_v62, 16  ;;  %v4116_v1 = vshll.u32 %v3917_v59, 16  ;;  %v875_v3 = vpop.f32.mrf.mxu0  ;;  %v4120_v7 = vshrl.u32 %v3917_v59, 16  ;;  %3672 = vst [vmem:[#allocation3 + $0x60] sm:$0xf] %v3480_v16  ;;  %v2315_v4 = vpop.permute.xlu2 %2314 }
 0x1ba   : > { %v876_v26 = vadd.f32 %v11050_v38, %v875_v3  ;;  %v2122_v0 = vpop.permute.xlu1 %2121  ;;  %3673 = vst [vmem:[#allocation3 + $0x6c] sm:$0xf] %v3481_v21  ;;  %v5237_v25 = vunpack.c.l.b16 %v3291_v20  ;;  %v2615_v30 = vsel %vm2601_vm11, %v11269_v45, %v2315_v4  ;;  %v5238_v50 = vunpack.c.h.b16 %v3291_v20  ;;  %v11396_v55 = vpop.permute.xlu0 %2424 }
 0x1bb   : > { %v4108_v27 = vrot.slane %v4106_v23, 5  ;;  %v4112_v12 = vrot.slane %v4110_v5, 4  ;;  %v4118_v28 = vrot.slane %v4116_v1, 5  ;;  %v2712_v8 = vsel %vm2698_vm12, %v2615_v30, %v11263_v35 }
 0x1bc   : > { %v1084_v19 = vmax.f32 %v876_v26, 0.0  ;;  %v4122_v31 = vrot.slane %v4120_v7, 4  ;;  %v3388_v2 = vunpack.c.l.b16 %v2712_v8  ;;  %v3389_v40 = vunpack.c.h.b16 %v2712_v8 }
 0x1bd   : > { %v4109_v13 = vsel %vm11055_vm15, %v4104_v60, %v4108_v27  ;;  %v4113_v22 = vor.u32 %v4112_v12, %v4108_v27  ;;  %v11399_v62 = vsel %vm2504_vm5, %v10443_v42, %v2122_v0  ;;  %v9595_v59 = vor.u32 %v10264_v57, %v9594_v43 }
 0x1be   : > { %5075 = vst [vmem:[#allocation3 + $0x70] sm:$0xf] %v4109_v13  ;;  %v1189_v18 = vpack.c.bf16 %v1084_v19, %v1084_v19  ;;  %v11405_v35 = vrot.slane %v5482_v6, 4  ;;  %v11408_v16 = vpack.c.b16 %v5237_v25, %v5237_v25  ;;  %v3484_v21 = vpack.c.b16 %v3388_v2, %v3388_v2 }
 0x1bf   : > { %v4114_v45 = vrot.slane %v4113_v22, 4  ;;  %2438 = vrot.lane.b32.xlu1 %v11377_v52, %s10522_s25  ;;  %v3136_v32 = vsel %vm2601_vm11, %v11399_v62, %v11306_v14  ;;  %v3485_v5 = vpack.c.b16 %v3389_v40, %v3389_v40  ;;  %v1857_v1 = vshrl.u32 %v11377_v52, 16  ;;  %v11423_v14 = vpop.f32.mrf.mxu1 }
 0x1c0   : > { %1295 = vst.msk [vmem:[#allocation2 + $0x94] sm:$0xf] %vm1257_vm3, %v1189_v18  ;;  %7068 = vmatmul.bf16.gmra.mxu1 %v9491_v58  ;;  %v3227_v34 = vsel %vm2698_vm12, %v3136_v32, %v11396_v55  ;;  %v4123_v3 = vor.u32 %v4122_v31, %v4118_v28  ;;  %v11421_v15 = vpack.c.b16 %v5238_v50, %v5238_v50  ;;  %v1853_v4 = vshll.u32 %v11377_v52, 16  ;;  %v11456_v32 = vpop.f32.mrf.mxu3 }
 0x1c1   : > { %v4119_v23 = vsel %vm11055_vm15, %v4114_v45, %v4118_v28  ;;  %v878_v6 = vpop.f32.mrf.mxu0  ;;  %v3821_v7 = vunpack.c.l.b16 %v3227_v34  ;;  %v3822_v26 = vunpack.c.h.b16 %v3227_v34  ;;  %3676 = vst [vmem:[#allocation3 + $0x90] sm:$0xf] %v3484_v21  ;;  %2326 = vrot.lane.b32.xlu2 %v2231_v33, %s10523_s26  ;;  %v11430_v0 = vrot.slane %v1857_v1, 7 }
 0x1c2   : > { %5076 = vst [vmem:[#allocation3 + $0x7c] sm:$0xf] %v4119_v23  ;;  %v2313_v9 = vpop.permute.xlu1 %2312  ;;  %7606 = vmatmul.bf16.gmra.mxu3 %v9595_v59  ;;  %v879_v20 = vadd.f32 %v11050_v38, %v878_v6  ;;  %v5485_v27 = vrot.slane %v11408_v16, 5  ;;  %v4124_v13 = vrot.slane %v4123_v3, 4  ;;  %v5488_v31 = vrot.slane %v11421_v15, 5 }
 0x1c3   : > { %v2613_v60 = vsel %vm2601_vm11, %v11194_v44, %v2313_v9  ;;  %3677 = vst [vmem:[#allocation3 + $0x9c] sm:$0xf] %v3485_v5  ;;  %v3918_v12 = vpack.c.b16 %v3821_v7, %v3821_v7  ;;  %v11435_v19 = vpack.c.b16 %v3822_v26, %v3822_v26  ;;  %v2892_v30 = vor.u32 %v11430_v0, %v1853_v4  ;;  %v10241_v59 = vld [vmem:[#allocation3 + $0x64] sm:$0xf]  ;;  %v9502_v6 = vld [vmem:[#allocation3 + $0x60] sm:$0xf] }
 0x1c4   : > { %v2710_v25 = vsel %vm2698_vm12, %v2613_v60, %v11138_v36  ;;  %9229 = vmatmul.msk.bf16.gmra.mxu0 %vm607_vm2, %v10154_v53  ;;  %v1085_v33 = vmax.f32 %v879_v20, 0.0  ;;  %v1851_v44 = vor.u32 %v1849_v63, %v11369_v11  ;;  %v5487_v16 = vrot.slane %v5485_v27, 4  ;;  %v10242_v3 = vld [vmem:[#allocation3 + $0x68] sm:$0xf0] }
 0x1c5   : > { %v3386_v58 = vunpack.c.l.b16 %v2710_v25  ;;  %v3387_v57 = vunpack.c.h.b16 %v2710_v25  ;;  %v4126_v22 = vshll.u32 %v3918_v12, 16  ;;  %v4130_v28 = vshrl.u32 %v3918_v12, 16  ;;  %v9504_v8 = vld [vmem:[#allocation3 + $0x6c] sm:$0xf0]  ;;  %v11475_v25 = vld [vmem:[%s15246_s2] ss:$0 sm:$0xff] }
 0x1c6   : > { %v1190_v18 = vpack.c.bf16 %v1085_v33, %v1085_v33  ;;  %v2893_v36 = vsel %vm2852_vm10, %v11316_v37, %v2892_v30  ;;  %v4136_v40 = vshll.u32 %v11435_v19, 16  ;;  %v11452_v11 = vrot.slane %v1853_v4, 1 }
 0x1c7   : > { %v3482_v50 = vpack.c.b16 %v3386_v58, %v3386_v58  ;;  %v11447_v2 = vld [vmem:[#allocation2 + $0x90] sm:$0xff]  ;;  %v4128_v43 = vrot.slane %v4126_v22, 5  ;;  %v4132_v45 = vrot.slane %v4130_v28, 4  ;;  %3032 = vrot.lane.b32.xlu0 %v2893_v36, %s10523_s26  ;;  %v3483_v42 = vpack.c.b16 %v3387_v57, %v3387_v57 }
 0x1c8   : > { %1296 = vst.msk [vmem:[#allocation2 + $0x98] sm:$0xf] %vm1257_vm3, %v1190_v18  ;;  %v9507_v21 = vor.u32 %v10241_v59, %v9504_v8  ;;  %v3292_v37 = vsel %vm2504_vm5, %v11447_v2, 0  ;;  %v5486_v34 = vsel %vm10688_vm8, %v11405_v35, %v5485_v27  ;;  %v5490_v15 = vrot.slane %v5488_v31, 4  ;;  %v1040_v35 = vpop.f32.mrf.mxu1  ;;  %v10155_v18 = vld [vmem:[%s10577_s28 + $0xe0] sm:$0xff] }
 0x1c9   : > { %v880_v63 = vpop.f32.mrf.mxu0  ;;  %v4129_v53 = vsel %vm11055_vm15, %v4124_v13, %v4128_v43  ;;  %v4133_v23 = vor.u32 %v4132_v45, %v4128_v43  ;;  %3674 = vst [vmem:[#allocation3 + $0x78] sm:$0xf] %v3482_v50  ;;  %v4140_v7 = vshrl.u32 %v11435_v19, 16  ;;  %v5239_v26 = vunpack.c.l.b16 %v3292_v37  ;;  %2440 = vrot.lane.b32.xlu2 %v11447_v2, %s10522_s25 }
 0x1ca   : > { %v881_v5 = vadd.f32 %v11050_v38, %v880_v63  ;;  %5077 = vst [vmem:[#allocation3 + $0x88] sm:$0xf] %v4129_v53  ;;  %7322 = vmatmul.bf16.gmra.mxu2 %v9507_v21  ;;  %v5240_v9 = vunpack.c.h.b16 %v3292_v37  ;;  %v11467_v4 = vrot.slane %v4136_v40, 5  ;;  %v1865_v60 = vshrl.u32 %v11447_v2, 16 }
 0x1cb   : > { %v4134_v20 = vrot.slane %v4133_v23, 4  ;;  %3675 = vst [vmem:[#allocation3 + $0x84] sm:$0xf] %v3483_v42  ;;  %v1856_v27 = vsel %vm1716_vm4, %v1851_v44, %v11452_v11  ;;  %v5336_v12 = vpack.c.b16 %v5239_v26, %v5239_v26  ;;  %v9503_v19 = vor.u32 %v10242_v3, %v9502_v6  ;;  %v11515_v6 = vpop.permute.xlu2 %2428 }
 0x1cc   : > { %v1086_v38 = vmax.f32 %v881_v5, 0.0  ;;  %5818 = vst [vmem:[#allocation3 + $0x134] sm:$0xf] %v5486_v34  ;;  %v1039_v33 = vadd.f32 %v11475_v25, %v11423_v14  ;;  %v1861_v57 = vshll.u32 %v11447_v2, 16  ;;  %v11485_v13 = vrot.slane %v1865_v60, 7  ;;  %v11507_v5 = vpop.permute.xlu1 %2426 }
 0x1cd   : > { %v4139_v30 = vsel %vm11055_vm15, %v4134_v20, %v11467_v4  ;;  %v11487_v22 = vpack.c.b16 %v5240_v9, %v5240_v9  ;;  %v5491_v28 = vrot.slane %v5336_v12, 5  ;;  %v5489_v8 = vsel %vm10688_vm8, %v5487_v16, %v5488_v31  ;;  %v10445_v31 = vld [vmem:[#allocation2 + $0x48] sm:$0xff] }
 0x1ce   : > { %v1191_v58 = vpack.c.bf16 %v1086_v38, %v1086_v38  ;;  %5078 = vst [vmem:[#allocation3 + $0x94] sm:$0xf] %v4139_v30  ;;  %v1149_v44 = vmax.f32 %v1039_v33, 0.0  ;;  %v2895_v14 = vor.u32 %v11485_v13, %v1861_v57  ;;  %v1041_v36 = vadd.f32 %v11475_v25, %v1040_v35 }
 0x1cf   : > { %2137 = vrot.lane.b32.xlu0 %v1856_v27, %s10521_s16  ;;  %v5493_v50 = vrot.slane %v5491_v28, 4  ;;  %v2232_v45 = vrot.slane %v11160_v54, 1  ;;  %v5492_v42 = vsel %vm10688_vm8, %v5490_v15, %v5491_v28  ;;  %5819 = vst [vmem:[#allocation3 + $0x140] sm:$0xf] %v5489_v8  ;;  %v11501_v59 = vsel %vm2504_vm5, %v10445_v31, %v11345_v10  ;;  %v11513_v10 = vpop.f32.mrf.mxu3 }
 0x1d0   : > { %1297 = vst.msk [vmem:[#allocation2 + $0x9c] sm:$0xf] %vm1257_vm3, %v1191_v58  ;;  %7073 = vmatmul.bf16.gmra.mxu1 %v9503_v19  ;;  %v1254_v40 = vpack.c.bf16 %v1149_v44, %v1149_v44  ;;  %v2896_v63 = vsel %vm2852_vm10, %v11430_v0, %v2895_v14  ;;  %v1150_v37 = vmax.f32 %v1041_v36, 0.0  ;;  %v4142_v53 = vrot.slane %v4140_v7, 4  ;;  %v9606_v0 = vld [vmem:[#allocation3 + $0x128] sm:$0xf]  ;;  %v1043_v30 = vpop.f32.mrf.mxu1 }
 0x1d1   : > { %v883_v43 = vpop.f32.mrf.mxu0  ;;  %v3021_v21 = vpop.permute.xlu0 %3020  ;;  %5820 = vst [vmem:[#allocation3 + $0x14c] sm:$0xf] %v5492_v42  ;;  %v5494_v23 = vrot.slane %v11487_v22, 5  ;;  %3034 = vrot.lane.b32.xlu1 %v2896_v63, %s10523_s26  ;;  %v2233_v12 = vsel %vm2204_vm9, %v2230_v61, %v2232_v45  ;;  %v11527_v19 = vrot.slane %v1861_v57, 1  ;;  %v9516_v33 = vld [vmem:[#allocation3 + $0x84] sm:$0xf0]  ;;  %v1859_v49 = vor.u32 %v1857_v1, %v11452_v11 }
 0x1d2   : > { %v884_v16 = vadd.f32 %v11475_v25, %v883_v43  ;;  %v3138_v34 = vsel %vm2601_vm11, %v11501_v59, %v3021_v21  ;;  %1360 = vst.msk [vmem:[#allocation2 + $0x198] sm:$0xf] %vm1257_vm3, %v1254_v40  ;;  %v1255_v26 = vpack.c.bf16 %v1150_v37, %v1150_v37  ;;  %v4143_v58 = vor.u32 %v4142_v53, %v11467_v4  ;;  %v10244_v61 = vld [vmem:[#allocation3 + $0x7c] sm:$0xf]  ;;  %v9514_v42 = vld [vmem:[#allocation3 + $0x78] sm:$0xf] }
 0x1d3   : > { %v10267_v3 = vld [vmem:[#allocation3 + $0x130] sm:$0xf0]  ;;  %v3228_v7 = vsel %vm2698_vm12, %v3138_v34, %v11507_v5  ;;  %v5495_v35 = vsel %vm10688_vm8, %v5493_v50, %v5494_v23  ;;  %v9519_v4 = vor.u32 %v10244_v61, %v9516_v33  ;;  %v1864_v50 = vsel %vm1716_vm4, %v1859_v49, %v11527_v19  ;;  %v10245_v31 = vld [vmem:[#allocation3 + $0x80] sm:$0xf0] }
 0x1d4   : > { %v1087_v15 = vmax.f32 %v884_v16, 0.0  ;;  %9230 = vmatmul.msk.bf16.gmra.mxu0 %vm607_vm2, %v10155_v18  ;;  %v9607_v9 = vor.u32 %v10267_v3, %v9606_v0  ;;  %v3823_v20 = vunpack.c.l.b16 %v3228_v7  ;;  %v3824_v38 = vunpack.c.h.b16 %v3228_v7  ;;  %1361 = vst.msk [vmem:[#allocation2 + $0x19c] sm:$0xf] %vm1257_vm3, %v1255_v26 }
 0x1d5   : > { %5821 = vst [vmem:[#allocation3 + $0x158] sm:$0xf] %v5495_v35  ;;  %v2234_v18 = vrot.slane %v11226_v17, 1  ;;  %v1044_v1 = vadd.f32 %v11475_v25, %v1043_v30  ;;  %v4144_v11 = vrot.slane %v4143_v58, 4  ;;  %v5496_v37 = vrot.slane %v5494_v23, 4 }
 0x1d6   : > { %v1192_v27 = vpack.c.bf16 %v1087_v15, %v1087_v15  ;;  %7611 = vmatmul.bf16.gmra.mxu3 %v9607_v9  ;;  %v3920_v22 = vpack.c.b16 %v3823_v20, %v3823_v20  ;;  %v11531_v28 = vpack.c.b16 %v3824_v38, %v3824_v38  ;;  %v9515_v26 = vor.u32 %v10245_v31, %v9514_v42 }
 0x1d7   : > { %v11533_v44 = vld [vmem:[#allocation2 + $0x98] sm:$0xff]  ;;  %2328 = vrot.lane.b32.xlu0 %v2233_v12, %s10523_s26  ;;  %v11556_v20 = vpop.f32.mrf.mxu3  ;;  %v1151_v23 = vmax.f32 %v1044_v1, 0.0  ;;  %v9618_v1 = vld [vmem:[#allocation3 + $0x140] sm:$0xf] }
 0x1d8   : > { %1298 = vst.msk [vmem:[#allocation2 + $0xa0] sm:$0xf] %vm1257_vm3, %v1192_v27  ;;  %v4146_v57 = vshll.u32 %v3920_v22, 16  ;;  %v4150_v8 = vshrl.u32 %v3920_v22, 16  ;;  %v3293_v43 = vsel %vm2504_vm5, %v11533_v44, 0  ;;  %v4156_v21 = vshll.u32 %v11531_v28, 16  ;;  %v1045_v12 = vpop.f32.mrf.mxu1 }
 0x1d9   : > { %v885_v14 = vpop.f32.mrf.mxu0  ;;  %v11546_v40 = vpop.permute.xlu0 %2125  ;;  %2139 = vrot.lane.b32.xlu1 %v1864_v50, %s10521_s16  ;;  %v5241_v34 = vunpack.c.l.b16 %v3293_v43  ;;  %v5242_v0 = vunpack.c.h.b16 %v3293_v43  ;;  %v1873_v9 = vshrl.u32 %v11533_v44, 16  ;;  %v1869_v58 = vshll.u32 %v11533_v44, 16  ;;  %v10270_v61 = vld [vmem:[#allocation3 + $0x148] sm:$0xf0] }
 0x1da   : > { %v886_v36 = vadd.f32 %v11475_v25, %v885_v14  ;;  %v4148_v16 = vrot.slane %v4146_v57, 5  ;;  %v4152_v63 = vrot.slane %v4150_v8, 4  ;;  %7327 = vmatmul.bf16.gmra.mxu2 %v9519_v4  ;;  %v11560_v30 = vrot.slane %v4156_v21, 5  ;;  %v10156_v57 = vld [vmem:[%s10577_s28 + $0xe8] sm:$0xff] }
 0x1db   : > { %v5338_v35 = vpack.c.b16 %v5241_v34, %v5241_v34  ;;  %v11558_v27 = vpack.c.b16 %v5242_v0, %v5242_v0  ;;  %v11565_v22 = vrot.slane %v1873_v9, 7  ;;  %v1256_v8 = vpack.c.bf16 %v1151_v23, %v1151_v23 }
 0x1dc   : > { %v1088_v53 = vmax.f32 %v886_v36, 0.0  ;;  %v11551_v3 = vpop.permute.xlu2 %3024  ;;  %v4149_v15 = vsel %vm11055_vm15, %v4144_v11, %v4148_v16  ;;  %v4153_v7 = vor.u32 %v4152_v63, %v4148_v16  ;;  %v4160_v4 = vshrl.u32 %v11531_v28, 16 }
 0x1dd   : > { %5079 = vst [vmem:[#allocation3 + $0xa0] sm:$0xf] %v4149_v15  ;;  %v5497_v49 = vrot.slane %v5338_v35, 5  ;;  %v2898_v50 = vor.u32 %v11565_v22, %v1869_v58  ;;  %v2235_v43 = vsel %vm2204_vm9, %v2232_v45, %v2234_v18  ;;  %v5500_v31 = vrot.slane %v11558_v27, 5 }
 0x1de   : > { %v1193_v38 = vpack.c.bf16 %v1088_v53, %v1088_v53  ;;  %v4154_v33 = vrot.slane %v4153_v7, 4  ;;  %v9619_v63 = vor.u32 %v10270_v61, %v9618_v1  ;;  %1362 = vst.msk [vmem:[#allocation2 + $0x1a0] sm:$0xf] %vm1257_vm3, %v1256_v8  ;;  %v11602_v23 = vrot.slane %v1869_v58, 1  ;;  %v9526_v61 = vld [vmem:[#allocation3 + $0x90] sm:$0xf] }
 0x1df   : > { %2442 = vrot.lane.b32.xlu0 %v11533_v44, %s10522_s25  ;;  %v5499_v42 = vrot.slane %v5497_v49, 4  ;;  %v5498_v28 = vsel %vm10688_vm8, %v5496_v37, %v5497_v49  ;;  %v2899_v21 = vsel %vm2852_vm10, %v11485_v13, %v2898_v50  ;;  %v4162_v37 = vrot.slane %v4160_v4, 4  ;;  %v11606_v49 = vpop.f32.mrf.mxu3  ;;  %v10446_v50 = vld [vmem:[#allocation2 + $0x50] sm:$0xff] }
 0x1e0   : > { %1299 = vst.msk [vmem:[#allocation2 + $0xa4] sm:$0xf] %vm1257_vm3, %v1193_v38  ;;  %v4159_v14 = vsel %vm11055_vm15, %v4154_v33, %v11560_v30  ;;  %7078 = vmatmul.bf16.gmra.mxu1 %v9515_v26  ;;  %3036 = vrot.lane.b32.xlu2 %v2899_v21, %s10523_s26  ;;  %v10247_v26 = vld [vmem:[#allocation3 + $0x94] sm:$0xf]  ;;  %v2236_v38 = vrot.slane %v11296_v51, 1  ;;  %v1867_v4 = vor.u32 %v1865_v60, %v11527_v19 }
 0x1e1   : > { %v888_v36 = vpop.f32.mrf.mxu0  ;;  %5080 = vst [vmem:[#allocation3 + $0xac] sm:$0xf] %v4159_v14  ;;  %v2317_v16 = vpop.permute.xlu0 %2316  ;;  %2330 = vrot.lane.b32.xlu1 %v2235_v43, %s10523_s26  ;;  %v5501_v13 = vsel %vm10688_vm8, %v5499_v42, %v5500_v31  ;;  %v4163_v8 = vor.u32 %v4162_v37, %v11560_v30  ;;  %v11618_v43 = vsel %vm2504_vm5, %v10446_v50, %v11546_v40 }
 0x1e2   : > { %v889_v11 = vadd.f32 %v11475_v25, %v888_v36  ;;  %v2617_v54 = vsel %vm2601_vm11, %v11334_v46, %v2317_v16  ;;  %5822 = vst [vmem:[#allocation3 + $0x164] sm:$0xf] %v5498_v28  ;;  %v2237_v60 = vsel %vm2204_vm9, %v2234_v18, %v2236_v38 }
 0x1e3   : > { %v2714_v34 = vsel %vm2698_vm12, %v2617_v54, %v11260_v39  ;;  %5823 = vst [vmem:[#allocation3 + $0x170] sm:$0xf] %v5501_v13  ;;  %v4164_v54 = vrot.slane %v4163_v8, 4 }
 0x1e4   : > { %v1089_v45 = vmax.f32 %v889_v11, 0.0  ;;  %v11592_v53 = vpop.permute.xlu2 %2129  ;;  %9231 = vmatmul.msk.bf16.gmra.mxu0 %vm607_vm2, %v10156_v57  ;;  %v3390_v46 = vunpack.c.l.b16 %v2714_v34  ;;  %v3391_v0 = vunpack.c.h.b16 %v2714_v34  ;;  %v9528_v15 = vld [vmem:[#allocation3 + $0x9c] sm:$0xf0]  ;;  %v10248_v57 = vld [vmem:[#allocation3 + $0x98] sm:$0xf0]  ;;  %v1872_v11 = vsel %vm1716_vm4, %v1867_v4, %v11602_v23 }
 0x1e5   : > { %v9531_v12 = vor.u32 %v10247_v26, %v9528_v15  ;;  %v9527_v16 = vor.u32 %v10248_v57, %v9526_v61  ;;  %v9630_v61 = vld [vmem:[#allocation3 + $0x158] sm:$0xf] }
 0x1e6   : > { %v1194_v7 = vpack.c.bf16 %v1089_v45, %v1089_v45  ;;  %7616 = vmatmul.bf16.gmra.mxu3 %v9619_v63  ;;  %v3486_v35 = vpack.c.b16 %v3390_v46, %v3390_v46  ;;  %v3487_v39 = vpack.c.b16 %v3391_v0, %v3391_v0  ;;  %v5502_v46 = vrot.slane %v5500_v31, 4  ;;  %v10157_v31 = vld [vmem:[%s10577_s28 + $0xf0] sm:$0xff] }
 0x1e7   : > { %v11604_v33 = vld [vmem:[#allocation2 + $0xa0] sm:$0xff] }
 0x1e8   : > { %1300 = vst.msk [vmem:[#allocation2 + $0xa8] sm:$0xf] %vm1257_vm3, %v1194_v7  ;;  %v3294_v58 = vsel %vm2504_vm5, %v11604_v33, 0  ;;  %v1881_v36 = vshrl.u32 %v11604_v33, 16  ;;  %2141 = vrot.lane.b32.xlu2 %v1872_v11, %s10521_s16  ;;  %v1877_v7 = vshll.u32 %v11604_v33, 16 }
 0x1e9   : > { %3678 = vst [vmem:[#allocation3 + $0xa8] sm:$0xf] %v3486_v35  ;;  %v890_v14 = vpop.f32.mrf.mxu0  ;;  %v3023_v42 = vpop.permute.xlu1 %3022  ;;  %v5243_v1 = vunpack.c.l.b16 %v3294_v58  ;;  %v5244_v40 = vunpack.c.h.b16 %v3294_v58  ;;  %2444 = vrot.lane.b32.xlu1 %v11604_v33, %s10522_s25  ;;  %v10273_v37 = vld [vmem:[#allocation3 + $0x160] sm:$0xf0] }
 0x1ea   : > { %3679 = vst [vmem:[#allocation3 + $0xb4] sm:$0xf] %v3487_v39  ;;  %v891_v30 = vadd.f32 %v11475_v25, %v890_v14  ;;  %v3140_v19 = vsel %vm2601_vm11, %v11618_v43, %v3023_v42  ;;  %7332 = vmatmul.bf16.gmra.mxu2 %v9531_v12  ;;  %v11637_v21 = vrot.slane %v1881_v36, 7  ;;  %v9631_v8 = vor.u32 %v10273_v37, %v9630_v61  ;;  %v11651_v42 = vpop.f32.mrf.mxu3 }
 0x1eb   : > { %v3229_v28 = vsel %vm2698_vm12, %v3140_v19, %v11515_v6  ;;  %v5340_v17 = vpack.c.b16 %v5243_v1, %v5243_v1  ;;  %v11647_v57 = vpack.c.b16 %v5244_v40, %v5244_v40 }
 0x1ec   : > { %v1090_v63 = vmax.f32 %v891_v30, 0.0  ;;  %v2321_v18 = vpop.permute.xlu2 %2320  ;;  %v3825_v45 = vunpack.c.l.b16 %v3229_v28  ;;  %v3826_v34 = vunpack.c.h.b16 %v3229_v28  ;;  %v2901_v27 = vor.u32 %v11637_v21, %v1877_v7 }
 0x1ed   : > { %v2621_v13 = vsel %vm2601_vm11, %v11501_v59, %v2321_v18  ;;  %v5503_v59 = vrot.slane %v5340_v17, 5 }
 0x1ee   : > { %v1195_v0 = vpack.c.bf16 %v1090_v63, %v1090_v63  ;;  %v2718_v15 = vsel %vm2698_vm12, %v2621_v13, %v11507_v5  ;;  %v3922_v26 = vpack.c.b16 %v3825_v45, %v3825_v45  ;;  %v3923_v35 = vpack.c.b16 %v3826_v34, %v3826_v34  ;;  %v11656_v45 = vpop.permute.xlu0 %2430  ;;  %v10447_v34 = vld [vmem:[#allocation2 + $0x58] sm:$0xff] }
 0x1ef   : > { %v3394_v39 = vunpack.c.l.b16 %v2718_v15  ;;  %v3395_v12 = vunpack.c.h.b16 %v2718_v15  ;;  %v2902_v40 = vsel %vm2852_vm10, %v11565_v22, %v2901_v27  ;;  %v5504_v22 = vsel %vm10688_vm8, %v5502_v46, %v5503_v59 }
 0x1f0   : > { %1301 = vst.msk [vmem:[#allocation2 + $0xac] sm:$0xf] %vm1257_vm3, %v1195_v0  ;;  %v4166_v14 = vshll.u32 %v3922_v26, 16  ;;  %v4170_v4 = vshrl.u32 %v3922_v26, 16  ;;  %v4176_v58 = vshll.u32 %v3923_v35, 16  ;;  %v4180_v5 = vshrl.u32 %v3923_v35, 16  ;;  %7083 = vmatmul.bf16.gmra.mxu1 %v9527_v16  ;;  %3038 = vrot.lane.b32.xlu0 %v2902_v40, %s10523_s26 }
 0x1f1   : > { %v893_v50 = vpop.f32.mrf.mxu0  ;;  %v3490_v30 = vpack.c.b16 %v3394_v39, %v3394_v39  ;;  %v3491_v1 = vpack.c.b16 %v3395_v12, %v3395_v12  ;;  %v2128_v19 = vpop.permute.xlu1 %2127  ;;  %v5505_v16 = vrot.slane %v5503_v59, 4  ;;  %2332 = vrot.lane.b32.xlu2 %v2237_v60, %s10523_s26  ;;  %v5506_v35 = vrot.slane %v11647_v57, 5  ;;  %5824 = vst [vmem:[#allocation3 + $0x17c] sm:$0xf] %v5504_v22  ;;  %v9538_v22 = vld [vmem:[#allocation3 + $0xa8] sm:$0xf] }
 0x1f2   : > { %v894_v11 = vadd.f32 %v11475_v25, %v893_v50  ;;  %v4168_v28 = vrot.slane %v4166_v14, 5  ;;  %v4172_v63 = vrot.slane %v4170_v4, 4  ;;  %v4178_v17 = vrot.slane %v4176_v58, 5 }
 0x1f3   : > { %v4182_v18 = vrot.slane %v4180_v5, 4  ;;  %3682 = vst [vmem:[#allocation3 + $0xd8] sm:$0xf] %v3490_v30  ;;  %v11660_v13 = vsel %vm2504_vm5, %v10447_v34, %v2128_v19  ;;  %v11674_v12 = vrot.slane %v1877_v7, 1  ;;  %v2238_v57 = vrot.slane %v11377_v52, 1 }
 0x1f4   : > { %v1091_v37 = vmax.f32 %v894_v11, 0.0  ;;  %9232 = vmatmul.msk.bf16.gmra.mxu0 %vm607_vm2, %v10157_v31  ;;  %v4169_v0 = vsel %vm11055_vm15, %v4164_v54, %v4168_v28  ;;  %v4173_v15 = vor.u32 %v4172_v63, %v4168_v28  ;;  %3683 = vst [vmem:[#allocation3 + $0xe4] sm:$0xf] %v3491_v1  ;;  %v3142_v26 = vsel %vm2601_vm11, %v11660_v13, %v11551_v3  ;;  %v10250_v63 = vld [vmem:[#allocation3 + $0xac] sm:$0xf] }
 0x1f5   : > { %5081 = vst [vmem:[#allocation3 + $0xb8] sm:$0xf] %v4169_v0  ;;  %v3230_v60 = vsel %vm2698_vm12, %v3142_v26, %v11656_v45  ;;  %v4183_v46 = vor.u32 %v4182_v18, %v4178_v17  ;;  %v1875_v3 = vor.u32 %v1873_v9, %v11602_v23  ;;  %v5507_v7 = vsel %vm10688_vm8, %v5505_v16, %v5506_v35  ;;  %v11692_v9 = vld [vmem:[%s15248_s4] ss:$0 sm:$0xff]  ;;  %v10251_v0 = vld [vmem:[#allocation3 + $0xb0] sm:$0xf0] }
 0x1f6   : > { %v1196_v39 = vpack.c.bf16 %v1091_v37, %v1091_v37  ;;  %v4174_v61 = vrot.slane %v4173_v15, 4  ;;  %7621 = vmatmul.bf16.gmra.mxu3 %v9631_v8  ;;  %v3827_v59 = vunpack.c.l.b16 %v3230_v60  ;;  %v3828_v54 = vunpack.c.h.b16 %v3230_v60  ;;  %5825 = vst [vmem:[#allocation3 + $0x188] sm:$0xf] %v5507_v7 }
 0x1f7   : > { %v11676_v27 = vld [vmem:[#allocation2 + $0xa8] sm:$0xff]  ;;  %v1880_v50 = vsel %vm1716_vm4, %v1875_v3, %v11674_v12  ;;  %v4184_v19 = vrot.slane %v4183_v46, 4  ;;  %v5508_v11 = vrot.slane %v5506_v35, 4 }
 0x1f8   : > { %1302 = vst.msk [vmem:[#allocation2 + $0xb0] sm:$0xf] %vm1257_vm3, %v1196_v39  ;;  %v4179_v31 = vsel %vm11055_vm15, %v4174_v61, %v4178_v17  ;;  %v3924_v8 = vpack.c.b16 %v3827_v59, %v3827_v59  ;;  %v3925_v14 = vpack.c.b16 %v3828_v54, %v3828_v54  ;;  %v3295_v58 = vsel %vm2504_vm5, %v11676_v27, 0  ;;  %2143 = vrot.lane.b32.xlu0 %v1880_v50, %s10521_s16  ;;  %v11698_v17 = vpop.f32.mrf.mxu3  ;;  %v10158_v50 = vld [vmem:[%s10577_s28 + $0xf8] sm:$0xff] }
 0x1f9   : > { %v895_v4 = vpop.f32.mrf.mxu0  ;;  %5082 = vst [vmem:[#allocation3 + $0xc4] sm:$0xf] %v4179_v31  ;;  %v2319_v5 = vpop.permute.xlu1 %2318  ;;  %v5245_v30 = vunpack.c.l.b16 %v3295_v58  ;;  %v5246_v1 = vunpack.c.h.b16 %v3295_v58  ;;  %2446 = vrot.lane.b32.xlu2 %v11676_v27, %s10522_s25 }
 0x1fa   : > { %v896_v23 = vadd.f32 %v11475_v25, %v895_v4  ;;  %v4186_v40 = vshll.u32 %v3924_v8, 16  ;;  %v4190_v28 = vshrl.u32 %v3924_v8, 16  ;;  %v4196_v18 = vshll.u32 %v3925_v14, 16 }
 0x1fb   : > { %v2619_v16 = vsel %vm2601_vm11, %v11399_v62, %v2319_v5  ;;  %v5342_v37 = vpack.c.b16 %v5245_v30, %v5245_v30  ;;  %v4200_v35 = vshrl.u32 %v3925_v14, 16  ;;  %v11704_v39 = vpack.c.b16 %v5246_v1, %v5246_v1 }
 0x1fc   : > { %v1092_v34 = vmax.f32 %v896_v23, 0.0  ;;  %v4188_v15 = vrot.slane %v4186_v40, 5  ;;  %v4192_v26 = vrot.slane %v4190_v28, 4  ;;  %v9540_v60 = vld [vmem:[#allocation3 + $0xb4] sm:$0xf0]  ;;  %v2716_v61 = vsel %vm2698_vm12, %v2619_v16, %v11396_v55 }
 0x1fd   : > { %v9543_v62 = vor.u32 %v10250_v63, %v9540_v60  ;;  %v5509_v54 = vrot.slane %v5342_v37, 5  ;;  %v3392_v31 = vunpack.c.l.b16 %v2716_v61  ;;  %v9539_v8 = vor.u32 %v10251_v0, %v9538_v22  ;;  %v10276_v23 = vld [vmem:[#allocation3 + $0x178] sm:$0xf0]  ;;  %v11732_v60 = vpop.permute.xlu2 %2434 }
 0x1fe   : > { %v7054_v46 = vpop.f32.mrf.mxu1  ;;  %v1197_v59 = vpack.c.bf16 %v1092_v34, %v1092_v34  ;;  %v4189_v3 = vsel %vm11055_vm15, %v4184_v19, %v4188_v15  ;;  %v4193_v7 = vor.u32 %v4192_v26, %v4188_v15  ;;  %v3393_v14 = vunpack.c.h.b16 %v2716_v61  ;;  %v9642_v34 = vld [vmem:[#allocation3 + $0x170] sm:$0xf] }
 0x1ff   : > { %v7303_v4 = vpop.f32.mrf.mxu2  ;;  %5083 = vst [vmem:[#allocation3 + $0xd0] sm:$0xf] %v4189_v3  ;;  %v7055_v58 = vadd.f32 %v11692_v9, %v7054_v46  ;;  %7337 = vmatmul.bf16.gmra.mxu2 %v9543_v62  ;;  %v5511_v5 = vrot.slane %v5509_v54, 4  ;;  %v2239_v55 = vsel %vm2204_vm9, %v2236_v38, %v2238_v57  ;;  %v4198_v1 = vrot.slane %v4196_v18, 5 }
 0x200   : > { %v4194_v30 = vrot.slane %v4193_v7, 4  ;;  %v4202_v19 = vrot.slane %v4200_v35, 4  ;;  %v3488_v40 = vpack.c.b16 %v3392_v31, %v3392_v31  ;;  %1303 = vst.msk [vmem:[#allocation2 + $0xb4] sm:$0xf] %vm1257_vm3, %v1197_v59  ;;  %7088 = vmatmul.bf16.gmra.mxu1 %v9539_v8  ;;  %v3489_v63 = vpack.c.b16 %v3393_v14, %v3393_v14  ;;  %2334 = vrot.lane.b32.xlu0 %v2239_v55, %s10523_s26 }
 0x201   : > { %v898_v28 = vpop.f32.mrf.mxu0  ;;  %v5512_v16 = vrot.slane %v11704_v39, 5  ;;  %v7304_v37 = vadd.f32 %v7303_v4, %v7055_v58  ;;  %v9643_v38 = vor.u32 %v10276_v23, %v9642_v34  ;;  %v1889_v18 = vshrl.u32 %v11676_v27, 16  ;;  %v10448_v58 = vld [vmem:[#allocation2 + $0x60] sm:$0xff] }
 0x202   : > { %v899_v22 = vadd.f32 %v11475_v25, %v898_v28  ;;  %v4199_v51 = vsel %vm11055_vm15, %v4194_v30, %v4198_v1  ;;  %3680 = vst [vmem:[#allocation3 + $0xc0] sm:$0xf] %v3488_v40  ;;  %v5510_v0 = vsel %vm10688_vm8, %v5508_v11, %v5509_v54  ;;  %v1885_v61 = vshll.u32 %v11676_v27, 16  ;;  %v11739_v11 = vpop.f32.mrf.mxu3  ;;  %v11760_v40 = vpop.permute.xlu1 %2432 }
 0x203   : > { %5084 = vst [vmem:[#allocation3 + $0xdc] sm:$0xf] %v4199_v51  ;;  %v7553_v15 = vadd.f32 %v11254_v56, %v7304_v37  ;;  %v5513_v35 = vsel %vm10688_vm8, %v5511_v5, %v5512_v16  ;;  %v11737_v46 = vrot.slane %v1889_v18, 7  ;;  %v4203_v56 = vor.u32 %v4202_v19, %v4198_v1 }
 0x204   : > { %v1093_v26 = vmax.f32 %v899_v22, 0.0  ;;  %9233 = vmatmul.msk.bf16.gmra.mxu0 %vm607_vm2, %v10158_v50  ;;  %3681 = vst [vmem:[#allocation3 + $0xcc] sm:$0xf] %v3489_v63  ;;  %v2240_v4 = vrot.slane %v11447_v2, 1  ;;  %v2242_v14 = vrot.slane %v11533_v44, 1  ;;  %v11750_v5 = vsel %vm2504_vm5, %v10448_v58, %v11592_v53 }
 0x205   : > { %v7792_v59 = vmax.f32 %v7553_v15, 0.0  ;;  %5826 = vst [vmem:[#allocation3 + $0x194] sm:$0xf] %v5510_v0  ;;  %v2904_v7 = vor.u32 %v11737_v46, %v1885_v61  ;;  %v3027_v55 = vpop.permute.xlu0 %3026  ;;  %v1883_v1 = vor.u32 %v1881_v36, %v11674_v12  ;;  %v11758_v19 = vrot.slane %v4203_v56, 4  ;;  %v10253_v12 = vld [vmem:[#allocation3 + $0xc4] sm:$0xf] }
 0x206   : > { %v7056_v62 = vpop.f32.mrf.mxu1  ;;  %v1198_v54 = vpack.c.bf16 %v1093_v26, %v1093_v26  ;;  %7626 = vmatmul.bf16.gmra.mxu3 %v9643_v38  ;;  %5827 = vst [vmem:[#allocation3 + $0x1a0] sm:$0xf] %v5513_v35  ;;  %v3144_v53 = vsel %vm2601_vm11, %v11750_v5, %v3027_v55  ;;  %v9552_v63 = vld [vmem:[#allocation3 + $0xcc] sm:$0xf0]  ;;  %v11821_v52 = vsel %vm2204_vm9, %v2240_v4, %v2242_v14 }
 0x207   : > { %v7057_v3 = vadd.f32 %v11692_v9, %v7056_v62  ;;  %v7305_v31 = vpop.f32.mrf.mxu2  ;;  %7888 = vst.msk [vmem:[#allocation4] sm:$0xff] %vm2601_vm11, %v7792_v59  ;;  %v11744_v8 = vld [vmem:[#allocation2 + $0xb0] sm:$0xff]  ;;  %v2905_v23 = vsel %vm2852_vm10, %v11637_v21, %v2904_v7  ;;  %v3231_v34 = vsel %vm2698_vm12, %v3144_v53, %v11760_v40  ;;  %v1887_v59 = vrot.slane %v1885_v61, 1  ;;  %v9654_v53 = vld [vmem:[#allocation3 + $0x188] sm:$0xf] }
 0x208   : > { %1304 = vst.msk [vmem:[#allocation2 + $0xb8] sm:$0xf] %vm1257_vm3, %v1198_v54  ;;  %3040 = vrot.lane.b32.xlu1 %v2905_v23, %s10523_s26  ;;  %v3296_v21 = vsel %vm2504_vm5, %v11744_v8, 0  ;;  %2448 = vrot.lane.b32.xlu0 %v11744_v8, %s10522_s25  ;;  %v3829_v51 = vunpack.c.l.b16 %v3231_v34  ;;  %v3830_v38 = vunpack.c.h.b16 %v3231_v34  ;;  %v1897_v35 = vshrl.u32 %v11744_v8, 16 }
 0x209   : > { %v7306_v50 = vadd.f32 %v7305_v31, %v7057_v3  ;;  %v900_v30 = vpop.f32.mrf.mxu0  ;;  %v5247_v37 = vunpack.c.l.b16 %v3296_v21  ;;  %v5248_v22 = vunpack.c.h.b16 %v3296_v21  ;;  %v9550_v15 = vld [vmem:[#allocation3 + $0xc0] sm:$0xf]  ;;  %v9555_v62 = vor.u32 %v10253_v12, %v9552_v63 }
 0x20a   : > { %v901_v28 = vadd.f32 %v11475_v25, %v900_v30  ;;  %v11774_v3 = vpop.permute.xlu2 %3030  ;;  %v3927_v7 = vpack.c.b16 %v3830_v38, %v3830_v38  ;;  %v1893_v23 = vshll.u32 %v11744_v8, 16  ;;  %v11780_v61 = vrot.slane %v1897_v35, 7 }
 0x20b   : > { %v7555_v36 = vadd.f32 %v11312_v24, %v7306_v50  ;;  %v10254_v26 = vld [vmem:[#allocation3 + $0xc8] sm:$0xf0]  ;;  %v5344_v54 = vpack.c.b16 %v5247_v37, %v5247_v37  ;;  %v3926_v24 = vpack.c.b16 %v3829_v51, %v3829_v51  ;;  %v5345_v55 = vpack.c.b16 %v5248_v22, %v5248_v22 }
 0x20c   : > { %v1094_v0 = vmax.f32 %v901_v28, 0.0  ;;  %v10279_v58 = vld [vmem:[#allocation3 + $0x190] sm:$0xf0]  ;;  %v9551_v30 = vor.u32 %v10254_v26, %v9550_v15  ;;  %v11782_v28 = vpop.f32.mrf.mxu3  ;;  %v5514_v63 = vrot.slane %v5512_v16, 4  ;;  %v1888_v12 = vsel %vm1716_vm4, %v1883_v1, %v1887_v59 }
 0x20d   : > { %v7793_v56 = vmax.f32 %v7555_v36, 0.0  ;;  %v5515_v50 = vrot.slane %v5344_v54, 5  ;;  %v4206_v21 = vshll.u32 %v3926_v24, 16  ;;  %v4210_v34 = vshrl.u32 %v3926_v24, 16  ;;  %v10159_v36 = vld [vmem:[%s10577_s28 + $0x100] sm:$0xff]  ;;  %v2132_v22 = vpop.permute.xlu0 %2131 }
 0x20e   : > { %v1199_v31 = vpack.c.bf16 %v1094_v0, %v1094_v0  ;;  %v9655_v51 = vor.u32 %v10279_v58, %v9654_v53  ;;  %v2907_v0 = vor.u32 %v11780_v61, %v1893_v23  ;;  %v4220_v39 = vshrl.u32 %v3927_v7, 16  ;;  %v7985_v53 = vld [vmem:[#allocation4] sm:$0xff] }
 0x20f   : > { %7889 = vst.msk [vmem:[#allocation4 + $0x8] sm:$0xff] %vm2601_vm11, %v7793_v56  ;;  %7342 = vmatmul.bf16.gmra.mxu2 %v9555_v62  ;;  %v5517_v37 = vrot.slane %v5515_v50, 4  ;;  %v4208_v15 = vrot.slane %v4206_v21, 5  ;;  %v4212_v26 = vrot.slane %v4210_v34, 4  ;;  %v4216_v56 = vshll.u32 %v3927_v7, 16 }
 0x210   : > { %1305 = vst.msk [vmem:[#allocation2 + $0xbc] sm:$0xf] %vm1257_vm3, %v1199_v31  ;;  %7093 = vmatmul.bf16.gmra.mxu1 %v9551_v30  ;;  %2145 = vrot.lane.b32.xlu1 %v1888_v12, %s10521_s16  ;;  %v5518_v16 = vrot.slane %v5345_v55, 5  ;;  %v2908_v62 = vsel %vm2852_vm10, %v11737_v46, %v2907_v0  ;;  %v5516_v1 = vsel %vm10688_vm8, %v5514_v63, %v5515_v50  ;;  %v11801_v7 = vld [vmem:[#allocation3 + $0xd8] sm:$0xf]  ;;  %v11810_v50 = vrot.slane %v1893_v23, 1 }
 0x211   : > { %v903_v38 = vpop.f32.mrf.mxu0  ;;  %v4209_v24 = vsel %vm11055_vm15, %v11758_v19, %v4208_v15  ;;  %v4213_v31 = vor.u32 %v4212_v26, %v4208_v15  ;;  %3042 = vrot.lane.b32.xlu2 %v2908_v62, %s10523_s26  ;;  %5828 = vst [vmem:[#allocation3 + $0x1ac] sm:$0xf] %v5516_v1  ;;  %v2241_v46 = vsel %vm2204_vm9, %v2238_v57, %v2240_v4  ;;  %v11812_v19 = vld [vmem:[#allocation3 + $0xe0] sm:$0xf0]  ;;  %v4218_v21 = vrot.slane %v4216_v56, 5 }
 0x212   : > { %v904_v54 = vadd.f32 %v11475_v25, %v903_v38  ;;  %5085 = vst [vmem:[#allocation3 + $0xe8] sm:$0xf] %v4209_v24  ;;  %v11808_v55 = vpop.permute.xlu2 %2135  ;;  %v5519_v30 = vsel %vm10688_vm8, %v5517_v37, %v5518_v16  ;;  %v4222_v34 = vrot.slane %v4220_v39, 4  ;;  %v1891_v12 = vor.u32 %v1889_v18, %v1887_v59  ;;  %v10449_v26 = vld [vmem:[#allocation2 + $0x68] sm:$0xff] }
 0x213   : > { %v4214_v63 = vrot.slane %v4213_v31, 4  ;;  %5829 = vst [vmem:[#allocation3 + $0x1b8] sm:$0xf] %v5519_v30  ;;  %v11829_v15 = vrot.slane %v5518_v16, 4  ;;  %v9563_v2 = vor.u32 %v11812_v19, %v11801_v7  ;;  %v2244_v4 = vrot.slane %v11604_v33, 1 }
 0x214   : > { %9234 = vmatmul.msk.bf16.gmra.mxu0 %vm607_vm2, %v10159_v36  ;;  %v1095_v58 = vmax.f32 %v904_v54, 0.0  ;;  %v11835_v56 = vsel %vm2504_vm5, %v10449_v26, %v2132_v22  ;;  %v1896_v39 = vsel %vm1716_vm4, %v1891_v12, %v11810_v50  ;;  %v4223_v54 = vor.u32 %v4222_v34, %v4218_v21  ;;  %v11847_v31 = vpop.f32.mrf.mxu3 }
 0x215   : > { %v4219_v37 = vsel %vm11055_vm15, %v4214_v63, %v4218_v21  ;;  %v10256_v21 = vld [vmem:[#allocation3 + $0xdc] sm:$0xf] }
 0x216   : > { %v8081_v36 = vld [vmem:[#allocation4 + $0x1] sm:$0xff]  ;;  %7631 = vmatmul.bf16.gmra.mxu3 %v9655_v51  ;;  %v1200_v23 = vpack.c.bf16 %v1095_v58, %v1095_v58  ;;  %5086 = vst [vmem:[#allocation3 + $0xf4] sm:$0xf] %v4219_v37  ;;  %v2323_v18 = vpop.permute.xlu0 %2322 }
 0x217   : > { %v8177_v57 = vmax.f32 %v7985_v53, %v8081_v36  ;;  %v11825_v38 = vld [vmem:[#allocation2 + $0xb8] sm:$0xff]  ;;  %v8273_v0 = vld [vmem:[#allocation4 + $0x2] sm:$0xff]  ;;  %v2623_v1 = vsel %vm2601_vm11, %v11618_v43, %v2323_v18 }
 0x218   : > { %v3297_v16 = vsel %vm2504_vm5, %v11825_v38, 0  ;;  %1306 = vst.msk [vmem:[#allocation2 + $0xc0] sm:$0xf] %vm1257_vm3, %v1200_v23  ;;  %2336 = vrot.lane.b32.xlu1 %v2241_v46, %s10523_s26  ;;  %v1905_v24 = vshrl.u32 %v11825_v38, 16  ;;  %v2720_v58 = vsel %vm2698_vm12, %v2623_v1, %v11515_v6  ;;  %v10282_v37 = vld [vmem:[#allocation3 + $0x1a8] sm:$0xf0] }
 0x219   : > { %v8369_v51 = vmax.f32 %v8177_v57, %v8273_v0  ;;  %v905_v59 = vpop.f32.mrf.mxu0  ;;  %v3029_v62 = vpop.permute.xlu1 %3028  ;;  %v5249_v19 = vunpack.c.l.b16 %v3297_v16  ;;  %v5250_v46 = vunpack.c.h.b16 %v3297_v16  ;;  %v3396_v53 = vunpack.c.l.b16 %v2720_v58  ;;  %2147 = vrot.lane.b32.xlu2 %v1896_v39, %s10521_s16  ;;  %v9564_v34 = vld [vmem:[#allocation3 + $0xe4] sm:$0xf0] }
 0x21a   : > { %v906_v22 = vadd.f32 %v11475_v25, %v905_v59  ;;  %v3146_v7 = vsel %vm2601_vm11, %v11835_v56, %v3029_v62  ;;  %v3397_v25 = vunpack.c.h.b16 %v2720_v58  ;;  %v9567_v23 = vor.u32 %v10256_v21, %v9564_v34 }
 0x21b   : > { %8465 = vst.msk [vmem:[#allocation5] sm:$0xff] %vm2601_vm11, %v8369_v51  ;;  %v7308_v30 = vpop.f32.mrf.mxu2  ;;  %v3232_v43 = vsel %vm2698_vm12, %v3146_v7, %v11732_v60  ;;  %v2327_v12 = vpop.permute.xlu2 %2326  ;;  %v1901_v6 = vshll.u32 %v11825_v38, 16  ;;  %v3492_v0 = vpack.c.b16 %v3396_v53, %v3396_v53  ;;  %v11860_v59 = vrot.slane %v1905_v24, 7 }
 0x21c   : > { %v1096_v63 = vmax.f32 %v906_v22, 0.0  ;;  %v3831_v36 = vunpack.c.l.b16 %v3232_v43  ;;  %v3832_v57 = vunpack.c.h.b16 %v3232_v43  ;;  %v3493_v51 = vpack.c.b16 %v3397_v25, %v3397_v25  ;;  %v9666_v22 = vld [vmem:[#allocation3 + $0x1a0] sm:$0xf]  ;;  %v10160_v25 = vld [vmem:[%s10577_s28 + $0x108] sm:$0xff] }
 0x21d   : > { %v7059_v18 = vpop.f32.mrf.mxu1  ;;  %v11863_v1 = vpack.c.b16 %v5249_v19, %v5249_v19  ;;  %v4224_v7 = vrot.slane %v4223_v54, 4  ;;  %3684 = vst [vmem:[#allocation3 + $0xf0] sm:$0xf] %v3492_v0  ;;  %v11865_v58 = vpack.c.b16 %v5250_v46, %v5250_v46  ;;  %v2627_v43 = vsel %vm2601_vm11, %v11750_v5, %v2327_v12 }
 0x21e   : > { %v1201_v26 = vpack.c.bf16 %v1096_v63, %v1096_v63  ;;  %v3928_v16 = vpack.c.b16 %v3831_v36, %v3831_v36  ;;  %v3929_v39 = vpack.c.b16 %v3832_v57, %v3832_v57  ;;  %v7060_v62 = vadd.f32 %v11692_v9, %v7059_v18  ;;  %3685 = vst [vmem:[#allocation3 + $0xfc] sm:$0xf] %v3493_v51 }
 0x21f   : > { %7347 = vmatmul.bf16.gmra.mxu2 %v9567_v23  ;;  %v9667_v53 = vor.u32 %v10282_v37, %v9666_v22  ;;  %v2724_v54 = vsel %vm2698_vm12, %v2627_v43, %v11760_v40  ;;  %v2910_v5 = vor.u32 %v11860_v59, %v1901_v6  ;;  %v11876_v23 = vrot.slane %v1901_v6, 1 }
 0x220   : > { %v4226_v63 = vshll.u32 %v3928_v16, 16  ;;  %v4230_v21 = vshrl.u32 %v3928_v16, 16  ;;  %v4236_v34 = vshll.u32 %v3929_v39, 16  ;;  %v4240_v36 = vshrl.u32 %v3929_v39, 16  ;;  %7098 = vmatmul.bf16.gmra.mxu1 %v9563_v2  ;;  %1307 = vst.msk [vmem:[#allocation2 + $0xc4] sm:$0xf] %vm1257_vm3, %v1201_v26  ;;  %2450 = vrot.lane.b32.xlu1 %v11825_v38, %s10522_s25  ;;  %v11878_v2 = vpop.permute.xlu0 %2436 }
 0x221   : > { %v908_v57 = vpop.f32.mrf.mxu0  ;;  %v2134_v19 = vpop.permute.xlu1 %2133  ;;  %v7309_v46 = vadd.f32 %v7308_v30, %v7060_v62  ;;  %v3400_v26 = vunpack.c.l.b16 %v2724_v54  ;;  %v3401_v16 = vunpack.c.h.b16 %v2724_v54  ;;  %v10450_v39 = vld [vmem:[#allocation2 + $0x70] sm:$0xff]  ;;  %2338 = vrot.lane.b32.xlu2 %v11821_v52, %s10523_s26  ;;  %v5521_v43 = vrot.slane %v11863_v1, 5 }
 0x222   : > { %v4228_v12 = vrot.slane %v4226_v63, 5  ;;  %v4232_v37 = vrot.slane %v4230_v21, 4  ;;  %v4238_v0 = vrot.slane %v4236_v34, 5  ;;  %v4242_v51 = vrot.slane %v4240_v36, 4  ;;  %v11887_v30 = vpop.f32.mrf.mxu3 }
 0x223   : > { %v7310_v18 = vpop.f32.mrf.mxu2  ;;  %v11881_v22 = vsel %vm2504_vm5, %v10450_v39, %v2134_v19  ;;  %v7558_v40 = vadd.f32 %v11367_v48, %v7309_v46  ;;  %v3496_v48 = vpack.c.b16 %v3400_v26, %v3400_v26  ;;  %v3497_v34 = vpack.c.b16 %v3401_v16, %v3401_v16 }
 0x224   : > { %9235 = vmatmul.msk.bf16.gmra.mxu0 %vm607_vm2, %v10160_v25  ;;  %v4229_v6 = vsel %vm11055_vm15, %v4224_v7, %v4228_v12  ;;  %v4233_v62 = vor.u32 %v4232_v37, %v4228_v12  ;;  %v3148_v63 = vsel %vm2601_vm11, %v11881_v22, %v11774_v3  ;;  %v4243_v21 = vor.u32 %v4242_v51, %v4238_v0  ;;  %v11901_v3 = vld [vmem:[%s15246_s2] ss:$0 sm:$0xff] }
 0x225   : > { %5087 = vst [vmem:[#allocation3 + $0x100] sm:$0xf] %v4229_v6  ;;  %v3233_v52 = vsel %vm2698_vm12, %v3148_v63, %v11878_v2  ;;  %v7061_v25 = vpop.f32.mrf.mxu1  ;;  %v7794_v54 = vmax.f32 %v7558_v40, 0.0  ;;  %v5524_v46 = vrot.slane %v11865_v58, 5  ;;  %v909_v1 = vadd.f32 %v11901_v3, %v908_v57 }
 0x226   : > { %v4234_v36 = vrot.slane %v4233_v62, 4  ;;  %7636 = vmatmul.bf16.gmra.mxu3 %v9667_v53  ;;  %v3833_v19 = vunpack.c.l.b16 %v3233_v52  ;;  %v3834_v7 = vunpack.c.h.b16 %v3233_v52  ;;  %3688 = vst [vmem:[#allocation3 + $0x120] sm:$0xf] %v3496_v48  ;;  %v2911_v12 = vsel %vm2852_vm10, %v11780_v61, %v2910_v5  ;;  %v10259_v52 = vld [vmem:[#allocation3 + $0xf4] sm:$0xf] }
 0x227   : > { %v7062_v37 = vadd.f32 %v11692_v9, %v7061_v25  ;;  %v11909_v51 = vrot.slane %v5521_v43, 4  ;;  %3689 = vst [vmem:[#allocation3 + $0x12c] sm:$0xf] %v3497_v34  ;;  %3044 = vrot.lane.b32.xlu0 %v2911_v12, %s10523_s26  ;;  %v11914_v40 = vld [vmem:[#allocation2 + $0xc0] sm:$0xff]  ;;  %v1097_v57 = vmax.f32 %v909_v1, 0.0  ;;  %v4244_v62 = vrot.slane %v4243_v21, 4 }
 0x228   : > { %v4239_v53 = vsel %vm11055_vm15, %v4234_v36, %v4238_v0  ;;  %v3930_v26 = vpack.c.b16 %v3833_v19, %v3833_v19  ;;  %v11911_v16 = vpack.c.b16 %v3834_v7, %v3834_v7  ;;  %v5522_v0 = vsel %vm10688_vm8, %v11829_v15, %v5521_v43  ;;  %7890 = vst.msk [vmem:[#allocation4 + $0x10] sm:$0xff] %vm2601_vm11, %v7794_v54  ;;  %v9574_v25 = vld [vmem:[#allocation3 + $0xf0] sm:$0xf]  ;;  %v10260_v15 = vld [vmem:[#allocation3 + $0xf8] sm:$0xf0] }
 0x229   : > { %v910_v39 = vpop.f32.mrf.mxu0  ;;  %5088 = vst [vmem:[#allocation3 + $0x10c] sm:$0xf] %v4239_v53  ;;  %v2325_v6 = vpop.permute.xlu1 %2324  ;;  %v7311_v61 = vadd.f32 %v7310_v18, %v7062_v37  ;;  %v1899_v34 = vor.u32 %v1897_v35, %v11810_v50  ;;  %v1202_v19 = vpack.c.bf16 %v1097_v57, %v1097_v57  ;;  %2452 = vrot.lane.b32.xlu2 %v11914_v40, %s10522_s25 }
 0x22a   : > { %v911_v5 = vadd.f32 %v11901_v3, %v910_v39  ;;  %v4246_v63 = vshll.u32 %v3930_v26, 16  ;;  %v4250_v48 = vshrl.u32 %v3930_v26, 16  ;;  %v2625_v18 = vsel %vm2601_vm11, %v11660_v13, %v2325_v6  ;;  %5830 = vst [vmem:[#allocation3 + $0x1c4] sm:$0xf] %v5522_v0  ;;  %v11935_v26 = vpop.f32.mrf.mxu3 }
 0x22b   : > { %v7313_v36 = vpop.f32.mrf.mxu2  ;;  %v7560_v7 = vadd.f32 %v11401_v29, %v7311_v61  ;;  %v4256_v54 = vshll.u32 %v11911_v16, 16  ;;  %v1904_v35 = vsel %vm1716_vm4, %v1899_v34, %v11876_v23  ;;  %1308 = vst.msk [vmem:[#allocation2 + $0xc8] sm:$0xf] %vm1257_vm3, %v1202_v19  ;;  %v2722_v13 = vsel %vm2698_vm12, %v2625_v18, %v11656_v45  ;;  %v7986_v18 = vld [vmem:[#allocation4 + $0x8] sm:$0xff] }
 0x22c   : > { %v1098_v1 = vmax.f32 %v911_v5, 0.0  ;;  %v4248_v43 = vrot.slane %v4246_v63, 5  ;;  %v4252_v21 = vrot.slane %v4250_v48, 4  ;;  %v9576_v50 = vld [vmem:[#allocation3 + $0xfc] sm:$0xf0]  ;;  %v4260_v6 = vshrl.u32 %v11911_v16, 16 }
 0x22d   : > { %v7795_v29 = vmax.f32 %v7560_v7, 0.0  ;;  %v7064_v37 = vpop.f32.mrf.mxu1  ;;  %v9579_v53 = vor.u32 %v10259_v52, %v9576_v50  ;;  %v3398_v61 = vunpack.c.l.b16 %v2722_v13  ;;  %v3399_v5 = vunpack.c.h.b16 %v2722_v13  ;;  %v10161_v48 = vld [vmem:[%s10577_s28 + $0x110] sm:$0xff]  ;;  %v12030_v38 = vld [vmem:[#allocation3 + $0x120] sm:$0xf] }
 0x22e   : > { %v1203_v12 = vpack.c.bf16 %v1098_v1, %v1098_v1  ;;  %v4249_v39 = vsel %vm11055_vm15, %v4244_v62, %v4248_v43  ;;  %v4253_v57 = vor.u32 %v4252_v21, %v4248_v43  ;;  %v7065_v0 = vadd.f32 %v11692_v9, %v7064_v37  ;;  %v9678_v21 = vld [vmem:[#allocation3 + $0x1b8] sm:$0xf] }
 0x22f   : > { %5089 = vst [vmem:[#allocation3 + $0x118] sm:$0xf] %v4249_v39  ;;  %7352 = vmatmul.bf16.gmra.mxu2 %v9579_v53  ;;  %v3298_v45 = vsel %vm2504_vm5, %v11914_v40, 0  ;;  %v9575_v63 = vor.u32 %v10260_v15, %v9574_v25  ;;  %v11944_v52 = vrot.slane %v4256_v54, 5  ;;  %v3494_v19 = vpack.c.b16 %v3398_v61, %v3398_v61  ;;  %2149 = vrot.lane.b32.xlu0 %v1904_v35, %s10521_s16  ;;  %v8082_v7 = vld [vmem:[#allocation4 + $0x9] sm:$0xff] }
 0x230   : > { %v4254_v34 = vrot.slane %v4253_v57, 4  ;;  %7891 = vst.msk [vmem:[#allocation4 + $0x18] sm:$0xff] %vm2601_vm11, %v7795_v29  ;;  %v5251_v16 = vunpack.c.l.b16 %v3298_v45  ;;  %v3495_v1 = vpack.c.b16 %v3399_v5, %v3399_v5  ;;  %v5252_v43 = vunpack.c.h.b16 %v3298_v45  ;;  %v8274_v53 = vld [vmem:[#allocation4 + $0xa] sm:$0xff] }
 0x231   : > { %v913_v62 = vpop.f32.mrf.mxu0  ;;  %1309 = vst.msk [vmem:[#allocation2 + $0xcc] sm:$0xf] %vm1257_vm3, %v1203_v12  ;;  %7103 = vmatmul.bf16.gmra.mxu1 %v9575_v63  ;;  %v7314_v25 = vadd.f32 %v7313_v36, %v7065_v0  ;;  %v8178_v54 = vmax.f32 %v7986_v18, %v8082_v7  ;;  %v4262_v13 = vrot.slane %v4260_v6, 4  ;;  %v10285_v29 = vld [vmem:[#allocation3 + $0x1c0] sm:$0xf0]  ;;  %v1913_v0 = vshrl.u32 %v11914_v40, 16 }
 0x232   : > { %v914_v15 = vadd.f32 %v11901_v3, %v913_v62  ;;  %v4259_v50 = vsel %vm11055_vm15, %v4254_v34, %v11944_v52  ;;  %3686 = vst [vmem:[#allocation3 + $0x108] sm:$0xf] %v3494_v19  ;;  %v5348_v35 = vpack.c.b16 %v5251_v16, %v5251_v16  ;;  %v11953_v39 = vpack.c.b16 %v5252_v43, %v5252_v43  ;;  %v11962_v16 = vpop.permute.xlu2 %2440  ;;  %v7987_v7 = vld [vmem:[#allocation4 + $0x10] sm:$0xff] }
 0x233   : > { %v7315_v37 = vpop.f32.mrf.mxu2  ;;  %5090 = vst [vmem:[#allocation3 + $0x124] sm:$0xf] %v4259_v50  ;;  %v9679_v12 = vor.u32 %v10285_v29, %v9678_v21  ;;  %v7563_v57 = vadd.f32 %v11456_v32, %v7314_v25  ;;  %v8370_v61 = vmax.f32 %v8178_v54, %v8274_v53  ;;  %v5526_v6 = vrot.slane %v5524_v46, 4 }
 0x234   : > { %v1099_v36 = vmax.f32 %v914_v15, 0.0  ;;  %9236 = vmatmul.msk.bf16.gmra.mxu0 %vm607_vm2, %v10161_v48  ;;  %3687 = vst [vmem:[#allocation3 + $0x114] sm:$0xf] %v3495_v1  ;;  %v5527_v5 = vrot.slane %v5348_v35, 5  ;;  %v1909_v34 = vshll.u32 %v11914_v40, 16  ;;  %v11966_v48 = vrot.slane %v1913_v0, 7  ;;  %v11984_v15 = vpop.f32.mrf.mxu3 }
 0x235   : > { %v7796_v45 = vmax.f32 %v7563_v57, 0.0  ;;  %v7066_v19 = vpop.f32.mrf.mxu1  ;;  %8466 = vst.msk [vmem:[#allocation5 + $0x8] sm:$0xff] %vm2601_vm11, %v8370_v61  ;;  %v5525_v18 = vsel %vm10688_vm8, %v11909_v51, %v5524_v46  ;;  %v4263_v1 = vor.u32 %v4262_v13, %v11944_v52  ;;  %v5530_v21 = vrot.slane %v11953_v39, 5  ;;  %v10452_v13 = vld [vmem:[#allocation2 + $0x78] sm:$0xff]  ;;  %v12000_v57 = vpop.permute.xlu1 %2438 }
 0x236   : > { %v1204_v63 = vpack.c.bf16 %v1099_v36, %v1099_v36  ;;  %v5529_v32 = vrot.slane %v5527_v5, 4  ;;  %7641 = vmatmul.bf16.gmra.mxu3 %v9679_v12  ;;  %v7067_v62 = vadd.f32 %v11692_v9, %v7066_v19  ;;  %v2245_v25 = vsel %vm2204_vm9, %v2242_v14, %v2244_v4  ;;  %5831 = vst [vmem:[#allocation3 + $0x1d0] sm:$0xf] %v5525_v18 }
 0x237   : > { %v8083_v43 = vld [vmem:[#allocation4 + $0x11] sm:$0xff]  ;;  %7892 = vst.msk [vmem:[#allocation4 + $0x20] sm:$0xff] %vm2601_vm11, %v7796_v45  ;;  %v5528_v58 = vsel %vm10688_vm8, %v5526_v6, %v5527_v5  ;;  %v2913_v51 = vor.u32 %v11966_v48, %v1909_v34  ;;  %2340 = vrot.lane.b32.xlu0 %v2245_v25, %s10523_s26  ;;  %v2246_v50 = vrot.slane %v11676_v27, 1  ;;  %v11992_v44 = vsel %vm2504_vm5, %v10452_v13, %v11808_v55 }
 0x238   : > { %v8179_v46 = vmax.f32 %v7987_v7, %v8083_v43  ;;  %1310 = vst.msk [vmem:[#allocation2 + $0xd0] sm:$0xf] %vm1257_vm3, %v1204_v63  ;;  %v7316_v52 = vadd.f32 %v7315_v37, %v7067_v62  ;;  %v8275_v14 = vld [vmem:[#allocation4 + $0x12] sm:$0xff]  ;;  %v11995_v53 = vld [vmem:[#allocation2 + $0xc8] sm:$0xff]  ;;  %v5531_v39 = vsel %vm10688_vm8, %v5529_v32, %v5530_v21  ;;  %v2248_v37 = vrot.slane %v11744_v8, 1 }
 0x239   : > { %v915_v54 = vpop.f32.mrf.mxu0  ;;  %v3033_v35 = vpop.permute.xlu0 %3032  ;;  %v2914_v36 = vsel %vm2852_vm10, %v11860_v59, %v2913_v51  ;;  %v9588_v5 = vld [vmem:[#allocation3 + $0x114] sm:$0xf0]  ;;  %5832 = vst [vmem:[#allocation3 + $0x1dc] sm:$0xf] %v5528_v58  ;;  %v12007_v6 = vrot.slane %v4263_v1, 4  ;;  %v1911_v19 = vrot.slane %v1909_v34, 1  ;;  %v12018_v1 = vsel %vm2204_vm9, %v2244_v4, %v2246_v50 }
 0x23a   : > { %v916_v29 = vadd.f32 %v11901_v3, %v915_v54  ;;  %v8371_v12 = vmax.f32 %v8179_v46, %v8275_v14  ;;  %v3150_v55 = vsel %vm2601_vm11, %v11992_v44, %v3033_v35  ;;  %v7565_v61 = vadd.f32 %v11513_v10, %v7316_v52  ;;  %3046 = vrot.lane.b32.xlu1 %v2914_v36, %s10523_s26  ;;  %v10262_v32 = vld [vmem:[#allocation3 + $0x10c] sm:$0xf]  ;;  %v9586_v43 = vld [vmem:[#allocation3 + $0x108] sm:$0xf]  ;;  %v7988_v52 = vld [vmem:[#allocation4 + $0x18] sm:$0xff]  ;;  %v12028_v35 = vpop.permute.xlu2 %3036 }
 0x23b   : > { %v3234_v45 = vsel %vm2698_vm12, %v3150_v55, %v12000_v57  ;;  %v7318_v62 = vpop.f32.mrf.mxu2  ;;  %v10263_v10 = vld [vmem:[#allocation3 + $0x110] sm:$0xf0]  ;;  %v1907_v34 = vor.u32 %v1905_v24, %v11876_v23  ;;  %v9591_v46 = vor.u32 %v10262_v32, %v9588_v5  ;;  %v15250_v51 = vshrl.u32 %v11995_v53, 16  ;;  %5833 = vst [vmem:[#allocation3 + $0x1e8] sm:$0xf] %v5531_v39 }
 0x23c   : > { %v1100_v63 = vmax.f32 %v916_v29, 0.0  ;;  %8467 = vst.msk [vmem:[#allocation5 + $0x10] sm:$0xff] %vm2601_vm11, %v8371_v12  ;;  %v3835_v59 = vunpack.c.l.b16 %v3234_v45  ;;  %v3836_v18 = vunpack.c.h.b16 %v3234_v45  ;;  %v7797_v7 = vmax.f32 %v7565_v61, 0.0  ;;  %v10162_v39 = vld [vmem:[%s10577_s28 + $0x118] sm:$0xff]  ;;  %v12039_v12 = vld [vmem:[#allocation3 + $0x128] sm:$0xf0] }
 0x23d   : > { %v7069_v58 = vpop.f32.mrf.mxu1  ;;  %v12024_v54 = vrot.slane %v5530_v21, 4  ;;  %v1912_v23 = vsel %vm1716_vm4, %v1907_v34, %v1911_v19  ;;  %v12036_v21 = vsel %vm2504_vm5, %v11995_v53, 0  ;;  %v9587_v29 = vor.u32 %v10263_v10, %v9586_v43 }
 0x23e   : > { %v1205_v25 = vpack.c.bf16 %v1100_v63, %v1100_v63  ;;  %v8084_v13 = vld [vmem:[#allocation4 + $0x19] sm:$0xff]  ;;  %v3932_v14 = vpack.c.b16 %v3835_v59, %v3835_v59  ;;  %v3933_v33 = vpack.c.b16 %v3836_v18, %v3836_v18  ;;  %7893 = vst.msk [vmem:[#allocation4 + $0x28] sm:$0xff] %vm2601_vm11, %v7797_v7  ;;  %v7070_v4 = vadd.f32 %v11692_v9, %v7069_v58 }
 0x23f   : > { %v8180_v24 = vmax.f32 %v7988_v52, %v8084_v13  ;;  %7357 = vmatmul.bf16.gmra.mxu2 %v9591_v46  ;;  %v8276_v36 = vld [vmem:[#allocation4 + $0x1a] sm:$0xff]  ;;  %2454 = vrot.lane.b32.xlu0 %v11995_v53, %s10522_s25  ;;  %v12045_v43 = vrot.slane %v15250_v51, 7  ;;  %v12049_v10 = vor.u32 %v1913_v0, %v1911_v19  ;;  %v1917_v46 = vshll.u32 %v11995_v53, 16  ;;  %v9690_v19 = vld [vmem:[#allocation3 + $0x1d0] sm:$0xf] }
 0x240   : > { %1311 = vst.msk [vmem:[#allocation2 + $0xd4] sm:$0xf] %vm1257_vm3, %v1205_v25  ;;  %v4266_v55 = vshll.u32 %v3932_v14, 16  ;;  %v4270_v61 = vshrl.u32 %v3932_v14, 16  ;;  %v4276_v5 = vshll.u32 %v3933_v33, 16  ;;  %v4280_v45 = vshrl.u32 %v3933_v33, 16  ;;  %v12051_v25 = vpop.f32.mrf.mxu3 }
 0x241   : > { %v918_v63 = vpop.f32.mrf.mxu0  ;;  %v8372_v32 = vmax.f32 %v8180_v24, %v8276_v36  ;;  %v2138_v59 = vpop.permute.xlu0 %2137  ;;  %7108 = vmatmul.bf16.gmra.mxu1 %v9587_v29  ;;  %v7319_v18 = vadd.f32 %v7318_v62, %v7070_v4  ;;  %v10288_v7 = vld [vmem:[#allocation3 + $0x1d8] sm:$0xf0]  ;;  %v9599_v52 = vor.u32 %v12039_v12, %v12030_v38  ;;  %v5253_v14 = vunpack.c.l.b16 %v12036_v21 }
 0x242   : > { %v4268_v34 = vrot.slane %v4266_v55, 5  ;;  %v4272_v58 = vrot.slane %v4270_v61, 4  ;;  %v4278_v62 = vrot.slane %v4276_v5, 5  ;;  %v4282_v13 = vrot.slane %v4280_v45, 4  ;;  %2151 = vrot.lane.b32.xlu1 %v1912_v23, %s10521_s16  ;;  %v10453_v24 = vld [vmem:[#allocation2 + $0x80] sm:$0xff] }
 0x243   : > { %8468 = vst.msk [vmem:[#allocation5 + $0x18] sm:$0xff] %vm2601_vm11, %v8372_v32  ;;  %v7568_v0 = vadd.f32 %v11556_v20, %v7319_v18  ;;  %v12065_v29 = vsel %vm2504_vm5, %v10453_v24, %v2138_v59  ;;  %v9691_v36 = vor.u32 %v10288_v7, %v9690_v19  ;;  %v3035_v55 = vpop.permute.xlu1 %3034  ;;  %v7320_v61 = vpop.f32.mrf.mxu2  ;;  %v7989_v23 = vld [vmem:[#allocation4 + $0x20] sm:$0xff]  ;;  %v919_v20 = vadd.f32 %v11901_v3, %v918_v63 }
 0x244   : > { %9237 = vmatmul.msk.bf16.gmra.mxu0 %vm607_vm2, %v10162_v39  ;;  %v4269_v33 = vsel %vm11055_vm15, %v12007_v6, %v4268_v34  ;;  %v4273_v4 = vor.u32 %v4272_v58, %v4268_v34  ;;  %v2916_v39 = vor.u32 %v12045_v43, %v1917_v46  ;;  %v3152_v6 = vsel %vm2601_vm11, %v12065_v29, %v3035_v55  ;;  %v12073_v58 = vpop.permute.xlu2 %2141 }
 0x245   : > { %5091 = vst [vmem:[#allocation3 + $0x130] sm:$0xf] %v4269_v33  ;;  %v8085_v5 = vld [vmem:[#allocation4 + $0x21] sm:$0xff]  ;;  %v7798_v45 = vmax.f32 %v7568_v0, 0.0  ;;  %v7071_v32 = vpop.f32.mrf.mxu1  ;;  %v5254_v59 = vunpack.c.h.b16 %v12036_v21  ;;  %v4283_v19 = vor.u32 %v4282_v13, %v4278_v62  ;;  %v1101_v63 = vmax.f32 %v919_v20, 0.0 }
 0x246   : > { %v4274_v18 = vrot.slane %v4273_v4, 4  ;;  %v8181_v34 = vmax.f32 %v7989_v23, %v8085_v5  ;;  %7646 = vmatmul.bf16.gmra.mxu3 %v9691_v36  ;;  %v7072_v7 = vadd.f32 %v11692_v9, %v7071_v32  ;;  %v8277_v33 = vld [vmem:[#allocation4 + $0x22] sm:$0xff]  ;;  %v2917_v0 = vsel %vm2852_vm10, %v11966_v48, %v2916_v39 }
 0x247   : > { %7894 = vst.msk [vmem:[#allocation4 + $0x30] sm:$0xff] %vm2601_vm11, %v7798_v45  ;;  %v3235_v24 = vsel %vm2698_vm12, %v3152_v6, %v11962_v16  ;;  %3048 = vrot.lane.b32.xlu2 %v2917_v0, %s10523_s26  ;;  %v12083_v13 = vpack.c.b16 %v5253_v14, %v5253_v14  ;;  %v1206_v23 = vpack.c.bf16 %v1101_v63, %v1101_v63  ;;  %v12089_v32 = vrot.slane %v1917_v46, 1 }
 0x248   : > { %v4279_v4 = vsel %vm11055_vm15, %v4274_v18, %v4278_v62  ;;  %v8373_v21 = vmax.f32 %v8181_v34, %v8277_v33  ;;  %v3837_v9 = vunpack.c.l.b16 %v3235_v24  ;;  %v3838_v36 = vunpack.c.h.b16 %v3235_v24  ;;  %v12099_v34 = vpop.f32.mrf.mxu3 }
 0x249   : > { %v920_v55 = vpop.f32.mrf.mxu0  ;;  %5092 = vst [vmem:[#allocation3 + $0x13c] sm:$0xf] %v4279_v4  ;;  %v2329_v5 = vpop.permute.xlu0 %2328  ;;  %v7321_v45 = vadd.f32 %v7320_v61, %v7072_v7  ;;  %v12091_v6 = vpack.c.b16 %v5254_v59, %v5254_v59  ;;  %v4284_v7 = vrot.slane %v4283_v19, 4  ;;  %v1920_v19 = vsel %vm1716_vm4, %v12049_v10, %v12089_v32 }
 0x24a   : > { %v921_v48 = vadd.f32 %v11901_v3, %v920_v55  ;;  %8469 = vst.msk [vmem:[#allocation5 + $0x20] sm:$0xff] %vm2601_vm11, %v8373_v21  ;;  %v3934_v20 = vpack.c.b16 %v3837_v9, %v3837_v9  ;;  %v3935_v39 = vpack.c.b16 %v3838_v36, %v3838_v36  ;;  %v2629_v62 = vsel %vm2601_vm11, %v11835_v56, %v2329_v5  ;;  %v7990_v36 = vld [vmem:[#allocation4 + $0x28] sm:$0xff] }
 0x24b   : > { %1312 = vst.msk [vmem:[#allocation2 + $0xd8] sm:$0xf] %vm1257_vm3, %v1206_v23  ;;  %2342 = vrot.lane.b32.xlu1 %v12018_v1, %s10523_s26  ;;  %v2726_v14 = vsel %vm2698_vm12, %v2629_v62, %v11732_v60  ;;  %v7570_v61 = vadd.f32 %v11606_v49, %v7321_v45  ;;  %v2140_v63 = vpop.permute.xlu1 %2139  ;;  %v12101_v1 = vld [vmem:[#allocation2 + $0xd0] sm:$0xff] }
 0x24c   : > { %v1102_v18 = vmax.f32 %v921_v48, 0.0  ;;  %v4286_v33 = vshll.u32 %v3934_v20, 16  ;;  %v4290_v56 = vshrl.u32 %v3934_v20, 16  ;;  %v4296_v46 = vshll.u32 %v3935_v39, 16  ;;  %v9600_v9 = vld [vmem:[#allocation3 + $0x12c] sm:$0xf0]  ;;  %v2333_v5 = vpop.permute.xlu2 %2332 }
 0x24d   : > { %v3402_v59 = vunpack.c.l.b16 %v2726_v14  ;;  %v3403_v0 = vunpack.c.h.b16 %v2726_v14  ;;  %v7799_v24 = vmax.f32 %v7570_v61, 0.0  ;;  %v7074_v21 = vpop.f32.mrf.mxu1  ;;  %v4300_v23 = vshrl.u32 %v3935_v39, 16  ;;  %v7323_v45 = vpop.f32.mrf.mxu2  ;;  %v12110_v14 = vld [vmem:[%s15248_s4] ss:$0 sm:$0xff]  ;;  %v10265_v39 = vld [vmem:[#allocation3 + $0x124] sm:$0xf] }
 0x24e   : > { %v1207_v4 = vpack.c.bf16 %v1102_v18, %v1102_v18  ;;  %v8086_v60 = vld [vmem:[#allocation4 + $0x29] sm:$0xff]  ;;  %v4288_v55 = vrot.slane %v4286_v33, 5  ;;  %v4292_v49 = vrot.slane %v4290_v56, 4  ;;  %v7075_v61 = vadd.f32 %v12110_v14, %v7074_v21 }
 0x24f   : > { %v8182_v48 = vmax.f32 %v7990_v36, %v8086_v60  ;;  %v3498_v20 = vpack.c.b16 %v3402_v59, %v3402_v59  ;;  %v3499_v62 = vpack.c.b16 %v3403_v0, %v3403_v0  ;;  %7895 = vst.msk [vmem:[#allocation4 + $0x38] sm:$0xff] %vm2601_vm11, %v7799_v24  ;;  %v8278_v33 = vld [vmem:[#allocation4 + $0x2a] sm:$0xff]  ;;  %2153 = vrot.lane.b32.xlu2 %v1920_v19, %s10521_s16  ;;  %v10163_v24 = vld [vmem:[%s10577_s28 + $0x120] sm:$0xff]  ;;  %v4298_v60 = vrot.slane %v4296_v46, 5 }
 0x250   : > { %v4289_v10 = vsel %vm11055_vm15, %v4284_v7, %v4288_v55  ;;  %v4293_v56 = vor.u32 %v4292_v49, %v4288_v55  ;;  %1313 = vst.msk [vmem:[#allocation2 + $0xdc] sm:$0xf] %vm1257_vm3, %v1207_v4  ;;  %v9603_v59 = vor.u32 %v10265_v39, %v9600_v9  ;;  %v12121_v21 = vsel %vm2504_vm5, %v12101_v1, 0  ;;  %v10455_v9 = vld [vmem:[#allocation2 + $0x88] sm:$0xff] }
 0x251   : > { %v923_v0 = vpop.f32.mrf.mxu0  ;;  %v8374_v36 = vmax.f32 %v8182_v48, %v8278_v33  ;;  %5093 = vst [vmem:[#allocation3 + $0x148] sm:$0xf] %v4289_v10  ;;  %v2633_v51 = vsel %vm2601_vm11, %v11992_v44, %v2333_v5  ;;  %v4302_v7 = vrot.slane %v4300_v23, 4  ;;  %v12128_v55 = vsel %vm2504_vm5, %v10455_v9, %v2140_v63  ;;  %7113 = vmatmul.bf16.gmra.mxu1 %v9599_v52  ;;  %v12136_v44 = vpop.permute.xlu0 %2442 }
 0x252   : > { %v4294_v18 = vrot.slane %v4293_v56, 4  ;;  %3690 = vst [vmem:[#allocation3 + $0x138] sm:$0xf] %v3498_v20  ;;  %7362 = vmatmul.bf16.gmra.mxu2 %v9603_v59  ;;  %v2730_v4 = vsel %vm2698_vm12, %v2633_v51, %v12000_v57  ;;  %v2249_v57 = vsel %vm2204_vm9, %v2246_v50, %v2248_v37  ;;  %v5536_v51 = vrot.slane %v12091_v6, 5  ;;  %v12156_v48 = vpop.f32.mrf.mxu3 }
 0x253   : > { %8470 = vst.msk [vmem:[#allocation5 + $0x28] sm:$0xff] %vm2601_vm11, %v8374_v36  ;;  %2456 = vrot.lane.b32.xlu1 %v12101_v1, %s10522_s25  ;;  %v3406_v46 = vunpack.c.l.b16 %v2730_v4  ;;  %v3407_v49 = vunpack.c.h.b16 %v2730_v4  ;;  %v7324_v23 = vadd.f32 %v7323_v45, %v7075_v61  ;;  %v15297_v19 = vrot.slane %v12083_v13, 5  ;;  %v7991_v45 = vld [vmem:[#allocation4 + $0x30] sm:$0xff] }
 0x254   : > { %v4299_v63 = vsel %vm11055_vm15, %v4294_v18, %v4298_v60  ;;  %3691 = vst [vmem:[#allocation3 + $0x144] sm:$0xf] %v3499_v62  ;;  %9238 = vmatmul.msk.bf16.gmra.mxu0 %vm607_vm2, %v10163_v24  ;;  %v5255_v27 = vunpack.c.l.b16 %v12121_v21  ;;  %v3154_v52 = vsel %vm2601_vm11, %v12128_v55, %v12028_v35  ;;  %v4303_v20 = vor.u32 %v4302_v7, %v4298_v60  ;;  %v2331_v18 = vpop.permute.xlu1 %2330 }
 0x255   : > { %v5534_v38 = vsel %vm10688_vm8, %v12024_v54, %v15297_v19  ;;  %5094 = vst [vmem:[#allocation3 + $0x154] sm:$0xf] %v4299_v63  ;;  %v3502_v12 = vpack.c.b16 %v3406_v46, %v3406_v46  ;;  %v3503_v50 = vpack.c.b16 %v3407_v49, %v3407_v49  ;;  %v7076_v5 = vpop.f32.mrf.mxu1  ;;  %v7573_v61 = vadd.f32 %v11651_v42, %v7324_v23  ;;  %v7325_v59 = vpop.f32.mrf.mxu2 }
 0x256   : > { %v8087_v62 = vld [vmem:[#allocation4 + $0x31] sm:$0xff]  ;;  %5834 = vst [vmem:[#allocation3 + $0x1f4] sm:$0xf] %v5534_v38  ;;  %v3236_v54 = vsel %vm2698_vm12, %v3154_v52, %v12136_v44  ;;  %v924_v39 = vadd.f32 %v11901_v3, %v923_v0  ;;  %v1925_v35 = vshll.u32 %v12101_v1, 16  ;;  %v1929_v42 = vshrl.u32 %v12101_v1, 16 }
 0x257   : > { %v8183_v33 = vmax.f32 %v7991_v45, %v8087_v62  ;;  %3694 = vst [vmem:[#allocation3 + $0x168] sm:$0xf] %v3502_v12  ;;  %v3839_v10 = vunpack.c.l.b16 %v3236_v54  ;;  %v3840_v56 = vunpack.c.h.b16 %v3236_v54  ;;  %v8279_v24 = vld [vmem:[#allocation4 + $0x32] sm:$0xff]  ;;  %v7800_v36 = vmax.f32 %v7573_v61, 0.0  ;;  %2344 = vrot.lane.b32.xlu2 %v2249_v57, %s10523_s26 }
 0x258   : > { %3695 = vst [vmem:[#allocation3 + $0x174] sm:$0xf] %v3503_v50  ;;  %v1103_v60 = vmax.f32 %v924_v39, 0.0  ;;  %v7077_v7 = vadd.f32 %v12110_v14, %v7076_v5  ;;  %v2631_v46 = vsel %vm2601_vm11, %v11881_v22, %v2331_v18  ;;  %v12171_v63 = vrot.slane %v1929_v42, 7  ;;  %v9702_v22 = vld [vmem:[#allocation3 + $0x1e8] sm:$0xf] }
 0x259   : > { %v8375_v4 = vmax.f32 %v8183_v33, %v8279_v24  ;;  %v3936_v0 = vpack.c.b16 %v3839_v10, %v3839_v10  ;;  %v3937_v9 = vpack.c.b16 %v3840_v56, %v3840_v56  ;;  %7896 = vst.msk [vmem:[#allocation4 + $0x40] sm:$0xff] %vm2601_vm11, %v7800_v36  ;;  %v2728_v57 = vsel %vm2698_vm12, %v2631_v46, %v11878_v2  ;;  %v925_v19 = vpop.f32.mrf.mxu0  ;;  %v9610_v46 = vld [vmem:[#allocation3 + $0x138] sm:$0xf] }
 0x25a   : > { %v1208_v49 = vpack.c.bf16 %v1103_v60, %v1103_v60  ;;  %v7326_v23 = vadd.f32 %v7325_v59, %v7077_v7  ;;  %v4304_v38 = vrot.slane %v4303_v20, 4  ;;  %v12176_v12 = vpack.c.b16 %v5255_v27, %v5255_v27  ;;  %v12183_v27 = vld [vmem:[#allocation2 + $0xd8] sm:$0xff]  ;;  %v9612_v60 = vld [vmem:[#allocation3 + $0x144] sm:$0xf0] }
 0x25b   : > { %8471 = vst.msk [vmem:[#allocation5 + $0x30] sm:$0xff] %vm2601_vm11, %v8375_v4  ;;  %v4306_v50 = vshll.u32 %v3936_v0, 16  ;;  %v4310_v52 = vshrl.u32 %v3936_v0, 16  ;;  %v4316_v5 = vshll.u32 %v3937_v9, 16  ;;  %v2919_v45 = vor.u32 %v12171_v63, %v1925_v35 }
 0x25c   : > { %1314 = vst.msk [vmem:[#allocation2 + $0xe0] sm:$0xf] %vm1257_vm3, %v1208_v49  ;;  %v3404_v62 = vunpack.c.l.b16 %v2728_v57  ;;  %v3405_v61 = vunpack.c.h.b16 %v2728_v57  ;;  %v4320_v20 = vshrl.u32 %v3937_v9, 16  ;;  %v7575_v18 = vadd.f32 %v11698_v17, %v7326_v23  ;;  %v10268_v9 = vld [vmem:[#allocation3 + $0x13c] sm:$0xf]  ;;  %v12192_v49 = vpop.f32.mrf.mxu3 }
 0x25d   : > { %v10291_v2 = vld [vmem:[#allocation3 + $0x1f0] sm:$0xf0]  ;;  %v4308_v54 = vrot.slane %v4306_v50, 5  ;;  %v4312_v39 = vrot.slane %v4310_v52, 4  ;;  %v15298_v33 = vrot.slane %v12083_v13, 5  ;;  %v2920_v59 = vsel %vm2852_vm10, %v12045_v43, %v2919_v45  ;;  %v7079_v36 = vpop.f32.mrf.mxu1 }
 0x25e   : > { %v9703_v56 = vor.u32 %v10291_v2, %v9702_v22  ;;  %v3500_v24 = vpack.c.b16 %v3404_v62, %v3404_v62  ;;  %3050 = vrot.lane.b32.xlu0 %v2920_v59, %s10523_s26  ;;  %v3501_v0 = vpack.c.b16 %v3405_v61, %v3405_v61  ;;  %v7801_v17 = vmax.f32 %v7575_v18, 0.0  ;;  %v10269_v50 = vld [vmem:[#allocation3 + $0x140] sm:$0xf0]  ;;  %v7328_v2 = vpop.f32.mrf.mxu2 }
 0x25f   : > { %v5535_v10 = vrot.slane %v15298_v33, 4  ;;  %v4309_v7 = vsel %vm11055_vm15, %v4304_v38, %v4308_v54  ;;  %v4313_v4 = vor.u32 %v4312_v39, %v4308_v54  ;;  %v5256_v13 = vunpack.c.h.b16 %v12121_v21  ;;  %v7992_v38 = vld [vmem:[#allocation4 + $0x38] sm:$0xff]  ;;  %2458 = vrot.lane.b32.xlu2 %v12183_v27, %s10522_s25 }
 0x260   : > { %v5539_v57 = vrot.slane %v12176_v12, 5  ;;  %7651 = vmatmul.bf16.gmra.mxu3 %v9703_v56  ;;  %v4318_v43 = vrot.slane %v4316_v5, 5  ;;  %5095 = vst [vmem:[#allocation3 + $0x160] sm:$0xf] %v4309_v7  ;;  %v926_v23 = vadd.f32 %v11901_v3, %v925_v19  ;;  %v8088_v52 = vld [vmem:[#allocation4 + $0x39] sm:$0xff]  ;;  %v4322_v45 = vrot.slane %v4320_v20, 4 }
 0x261   : > { %v4314_v22 = vrot.slane %v4313_v4, 4  ;;  %3692 = vst [vmem:[#allocation3 + $0x150] sm:$0xf] %v3500_v24  ;;  %v7080_v62 = vadd.f32 %v12110_v14, %v7079_v36  ;;  %v9615_v61 = vor.u32 %v10268_v9, %v9612_v60  ;;  %v8184_v21 = vmax.f32 %v7992_v38, %v8088_v52  ;;  %v8280_v39 = vld [vmem:[#allocation4 + $0x3a] sm:$0xff] }
 0x262   : > { %3693 = vst [vmem:[#allocation3 + $0x15c] sm:$0xf] %v3501_v0  ;;  %v1104_v12 = vmax.f32 %v926_v23, 0.0  ;;  %v12202_v5 = vrot.slane %v1925_v35, 1  ;;  %v5537_v19 = vsel %vm10688_vm8, %v5535_v10, %v5536_v51  ;;  %v5538_v54 = vrot.slane %v5536_v51, 4  ;;  %v928_v10 = vpop.f32.mrf.mxu0 }
 0x263   : > { %v4319_v20 = vsel %vm11055_vm15, %v4314_v22, %v4318_v43  ;;  %7897 = vst.msk [vmem:[#allocation4 + $0x48] sm:$0xff] %vm2601_vm11, %v7801_v17  ;;  %7367 = vmatmul.bf16.gmra.mxu2 %v9615_v61  ;;  %v9611_v18 = vor.u32 %v10269_v50, %v9610_v46  ;;  %v8376_v33 = vmax.f32 %v8184_v21, %v8280_v39  ;;  %v15299_v56 = vshrl.u32 %v11995_v53, 16  ;;  %v12233_v46 = vpop.permute.xlu2 %2446  ;;  %v12245_v61 = vpop.permute.xlu1 %2444  ;;  %v12247_v21 = vld [vmem:[#allocation2 + $0xb8] sm:$0xff] }
 0x264   : > { %5096 = vst [vmem:[#allocation3 + $0x16c] sm:$0xf] %v4319_v20  ;;  %v1209_v35 = vpack.c.bf16 %v1104_v12, %v1104_v12  ;;  %v5540_v6 = vsel %vm10688_vm8, %v5538_v54, %v5539_v57  ;;  %v7329_v51 = vadd.f32 %v7328_v2, %v7080_v62  ;;  %v929_v24 = vadd.f32 %v11901_v3, %v928_v10  ;;  %v12238_v38 = vpop.f32.mrf.mxu3  ;;  %v3039_v20 = vpop.permute.xlu0 %3038 }
 0x265   : > { %v1923_v59 = vor.u32 %v15299_v56, %v12089_v32  ;;  %5835 = vst [vmem:[#allocation3 + $0x200] sm:$0xf] %v5537_v19  ;;  %7118 = vmatmul.bf16.gmra.mxu1 %v9611_v18  ;;  %v1937_v36 = vshrl.u32 %v12183_v27, 16  ;;  %v12220_v60 = vpack.c.b16 %v5256_v13, %v5256_v13  ;;  %v4323_v7 = vor.u32 %v4322_v45, %v4318_v43  ;;  %v7993_v45 = vld [vmem:[#allocation4 + $0x40] sm:$0xff]  ;;  %v7081_v39 = vpop.f32.mrf.mxu1 }
 0x266   : > { %8472 = vst.msk [vmem:[#allocation5 + $0x38] sm:$0xff] %vm2601_vm11, %v8376_v33  ;;  %v7578_v32 = vadd.f32 %v11739_v11, %v7329_v51  ;;  %v1105_v0 = vmax.f32 %v929_v24, 0.0  ;;  %v1933_v17 = vshll.u32 %v12183_v27, 16  ;;  %v3301_v13 = vsel %vm2504_vm5, %v12183_v27, 0  ;;  %v10456_v11 = vld [vmem:[#allocation2 + $0x90] sm:$0xff]  ;;  %v10164_v18 = vld [vmem:[%s10577_s28 + $0x128] sm:$0xff]  ;;  %v7330_v10 = vpop.f32.mrf.mxu2 }
 0x267   : > { %v1928_v4 = vsel %vm1716_vm4, %v1923_v59, %v12202_v5  ;;  %1315 = vst.msk [vmem:[#allocation2 + $0xe4] sm:$0xf] %vm1257_vm3, %v1209_v35  ;;  %v12231_v9 = vrot.slane %v1937_v36, 7  ;;  %v12242_v52 = vsel %vm2504_vm5, %v10456_v11, %v12073_v58  ;;  %v5542_v22 = vrot.slane %v12220_v60, 5  ;;  %9239 = vmatmul.msk.bf16.gmra.mxu0 %vm607_vm2, %v10164_v18 }
 0x268   : > { %2155 = vrot.lane.b32.xlu0 %v1928_v4, %s10521_s16  ;;  %5836 = vst [vmem:[#allocation3 + $0x20c] sm:$0xf] %v5540_v6  ;;  %v7802_v43 = vmax.f32 %v7578_v32, 0.0  ;;  %v1210_v23 = vpack.c.bf16 %v1105_v0, %v1105_v0  ;;  %v2250_v12 = vrot.slane %v12247_v21, 1  ;;  %v12250_v19 = vrot.slane %v5539_v57, 4 }
 0x269   : > { %v2922_v50 = vor.u32 %v12231_v9, %v1933_v17  ;;  %v12252_v2 = vrot.slane %v4323_v7, 4  ;;  %v5257_v35 = vunpack.c.l.b16 %v3301_v13  ;;  %v5258_v56 = vunpack.c.h.b16 %v3301_v13 }
 0x26a   : > { %v8089_v62 = vld [vmem:[#allocation4 + $0x41] sm:$0xff]  ;;  %7898 = vst.msk [vmem:[#allocation4 + $0x50] sm:$0xff] %vm2601_vm11, %v7802_v43  ;;  %v7082_v57 = vadd.f32 %v12110_v14, %v7081_v39  ;;  %v3156_v59 = vsel %vm2601_vm11, %v12242_v52, %v3039_v20  ;;  %v930_v6 = vpop.f32.mrf.mxu0  ;;  %v12267_v7 = vrot.slane %v1933_v17, 1  ;;  %v2251_v32 = vsel %vm2204_vm9, %v2248_v37, %v2250_v12 }
 0x26b   : > { %v8185_v54 = vmax.f32 %v7993_v45, %v8089_v62  ;;  %v2923_v58 = vsel %vm2852_vm10, %v12171_v63, %v2922_v50  ;;  %v8281_v33 = vld [vmem:[#allocation4 + $0x42] sm:$0xff]  ;;  %1316 = vst.msk [vmem:[#allocation2 + $0xe8] sm:$0xf] %vm1257_vm3, %v1210_v23  ;;  %v3237_v63 = vsel %vm2698_vm12, %v3156_v59, %v12245_v61  ;;  %v931_v24 = vadd.f32 %v11901_v3, %v930_v6  ;;  %v9622_v50 = vld [vmem:[#allocation3 + $0x150] sm:$0xf]  ;;  %v12282_v20 = vpop.permute.xlu2 %3042 }
 0x26c   : > { %3052 = vrot.lane.b32.xlu1 %v2923_v58, %s10523_s26  ;;  %v9714_v4 = vld [vmem:[#allocation3 + $0x200] sm:$0xf]  ;;  %v3841_v0 = vunpack.c.l.b16 %v3237_v63  ;;  %v3842_v13 = vunpack.c.h.b16 %v3237_v63  ;;  %v7331_v43 = vadd.f32 %v7330_v10, %v7082_v57  ;;  %v1931_v17 = vor.u32 %v1929_v42, %v12202_v5  ;;  %v10272_v45 = vld [vmem:[#allocation3 + $0x158] sm:$0xf0]  ;;  %v10271_v58 = vld [vmem:[#allocation3 + $0x154] sm:$0xf] }
 0x26d   : > { %v8377_v51 = vmax.f32 %v8185_v54, %v8281_v33  ;;  %v9624_v23 = vld [vmem:[#allocation3 + $0x15c] sm:$0xf0]  ;;  %v1106_v3 = vmax.f32 %v931_v24, 0.0  ;;  %v5354_v18 = vpack.c.b16 %v5257_v35, %v5257_v35  ;;  %v12284_v33 = vpack.c.b16 %v5258_v56, %v5258_v56  ;;  %v7994_v10 = vld [vmem:[#allocation4 + $0x48] sm:$0xff]  ;;  %v7084_v35 = vpop.f32.mrf.mxu1  ;;  %v2144_v56 = vpop.permute.xlu0 %2143 }
 0x26e   : > { %v3938_v8 = vpack.c.b16 %v3841_v0, %v3841_v0  ;;  %v3939_v54 = vpack.c.b16 %v3842_v13, %v3842_v13  ;;  %v7580_v37 = vadd.f32 %v11782_v28, %v7331_v43  ;;  %v12280_v39 = vld [vmem:[#allocation2 + $0xe0] sm:$0xff]  ;;  %v9627_v59 = vor.u32 %v10271_v58, %v9624_v23 }
 0x26f   : > { %8473 = vst.msk [vmem:[#allocation5 + $0x40] sm:$0xff] %vm2601_vm11, %v8377_v51  ;;  %v10294_v11 = vld [vmem:[#allocation3 + $0x208] sm:$0xf0]  ;;  %v1211_v57 = vpack.c.bf16 %v1106_v3, %v1106_v3  ;;  %v1936_v6 = vsel %vm1716_vm4, %v1931_v17, %v12267_v7  ;;  %v9623_v51 = vor.u32 %v10272_v45, %v9622_v50  ;;  %v7085_v43 = vadd.f32 %v12110_v14, %v7084_v35  ;;  %v7333_v50 = vpop.f32.mrf.mxu2 }
 0x270   : > { %2346 = vrot.lane.b32.xlu0 %v2251_v32, %s10523_s26  ;;  %v9715_v62 = vor.u32 %v10294_v11, %v9714_v4  ;;  %v4326_v42 = vshll.u32 %v3938_v8, 16  ;;  %v4330_v5 = vshrl.u32 %v3938_v8, 16  ;;  %v4336_v63 = vshll.u32 %v3939_v54, 16  ;;  %v12295_v11 = vld [vmem:[#allocation5 + $0x20] ss:$2 sm:$0xff]  ;;  %v12300_v8 = vpop.f32.mrf.mxu3 }
 0x271   : > { %v8090_v1 = vld [vmem:[#allocation4 + $0x49] sm:$0xff]  ;;  %v4340_v24 = vshrl.u32 %v3939_v54, 16  ;;  %v7803_v4 = vmax.f32 %v7580_v37, 0.0  ;;  %1317 = vst.msk [vmem:[#allocation2 + $0xec] sm:$0xf] %vm1257_vm3, %v1211_v57  ;;  %v12293_v23 = vsel %vm2504_vm5, %v12280_v39, 0  ;;  %v7334_v58 = vadd.f32 %v7333_v50, %v7085_v43 }
 0x272   : > { %7656 = vmatmul.bf16.gmra.mxu3 %v9715_v62  ;;  %v8186_v28 = vmax.f32 %v7994_v10, %v8090_v1  ;;  %v8282_v32 = vld [vmem:[#allocation4 + $0x4a] sm:$0xff]  ;;  %v4328_v0 = vrot.slane %v4326_v42, 5  ;;  %v4332_v13 = vrot.slane %v4330_v5, 4  ;;  %v5545_v3 = vrot.slane %v5354_v18, 5 }
 0x273   : > { %7372 = vmatmul.bf16.gmra.mxu2 %v9627_v59  ;;  %v5548_v17 = vrot.slane %v12284_v33, 5  ;;  %7899 = vst.msk [vmem:[#allocation4 + $0x58] sm:$0xff] %vm2601_vm11, %v7803_v4  ;;  %v2252_v62 = vrot.slane %v11914_v40, 1  ;;  %v8561_v57 = vld [vmem:[#allocation5] ss:$2 sm:$0xff]  ;;  %v5544_v18 = vrot.slane %v5542_v22, 4  ;;  %v5259_v1 = vunpack.c.l.b16 %v12293_v23 }
 0x274   : > { %2157 = vrot.lane.b32.xlu1 %v1936_v6, %s10521_s16  ;;  %v8378_v45 = vmax.f32 %v8186_v28, %v8282_v32  ;;  %v4329_v54 = vsel %vm11055_vm15, %v12252_v2, %v4328_v0  ;;  %v4333_v37 = vor.u32 %v4332_v13, %v4328_v0  ;;  %v12308_v59 = vrot.slane %v4336_v63, 5  ;;  %v10165_v4 = vld [vmem:[%s10577_s28 + $0x130] sm:$0xff]  ;;  %v10459_v13 = vld [vmem:[#allocation2 + $0x98] sm:$0xff] }
 0x275   : > { %7123 = vmatmul.bf16.gmra.mxu1 %v9623_v51  ;;  %v12310_v10 = vrot.slane %v4340_v24, 4  ;;  %v8656_v2 = vmax.f32 %v8561_v57, %v12295_v11  ;;  %5097 = vst [vmem:[#allocation3 + $0x178] sm:$0xf] %v4329_v54  ;;  %v7583_v5 = vadd.f32 %v11847_v31, %v7334_v58  ;;  %v15251_v6 = vrot.slane %v11995_v53, 1  ;;  %v933_v24 = vpop.f32.mrf.mxu0  ;;  %v7086_v11 = vpop.f32.mrf.mxu1 }
 0x276   : > { %8474 = vst.msk [vmem:[#allocation5 + $0x48] sm:$0xff] %vm2601_vm11, %v8378_v45  ;;  %v4334_v42 = vrot.slane %v4333_v37, 4  ;;  %v12318_v51 = vrot.slane %v5545_v3, 4  ;;  %v12322_v28 = vrot.slane %v5548_v17, 4  ;;  %v5543_v63 = vsel %vm10688_vm8, %v12250_v19, %v5542_v22  ;;  %v12343_v22 = vld [vmem:[%s15246_s2] ss:$0 sm:$0xff]  ;;  %v12346_v19 = vpop.permute.xlu2 %2147 }
 0x277   : > { %v2253_v31 = vsel %vm2204_vm9, %v2250_v12, %v2252_v62  ;;  %v7804_v32 = vmax.f32 %v7583_v5, 0.0  ;;  %v5546_v60 = vsel %vm10688_vm8, %v5544_v18, %v5545_v3  ;;  %5837 = vst [vmem:[#allocation3 + $0x218] sm:$0xf] %v5543_v63  ;;  %v934_v21 = vadd.f32 %v12343_v22, %v933_v24  ;;  %v7995_v45 = vld [vmem:[#allocation4 + $0x50] sm:$0xff]  ;;  %v2335_v18 = vpop.permute.xlu0 %2334  ;;  %9240 = vmatmul.msk.bf16.gmra.mxu0 %vm607_vm2, %v10165_v4 }
 0x278   : > { %2460 = vrot.lane.b32.xlu0 %v12280_v39, %s10522_s25  ;;  %v4339_v35 = vsel %vm11055_vm15, %v4334_v42, %v12308_v59  ;;  %v4343_v12 = vor.u32 %v12310_v10, %v12308_v59  ;;  %v12350_v0 = vpack.c.b16 %v5259_v1, %v5259_v1  ;;  %v12353_v43 = vsel %vm2504_vm5, %v10459_v13, %v2144_v56  ;;  %v7335_v59 = vpop.f32.mrf.mxu2  ;;  %v12387_v4 = vpop.f32.mrf.mxu3 }
 0x279   : > { %5098 = vst [vmem:[#allocation3 + $0x184] sm:$0xf] %v4339_v35  ;;  %v15252_v50 = vshrl.u32 %v12280_v39, 16  ;;  %v1107_v37 = vmax.f32 %v934_v21, 0.0  ;;  %v1941_v58 = vshll.u32 %v12280_v39, 16  ;;  %v7087_v57 = vadd.f32 %v12110_v14, %v7086_v11 }
 0x27a   : > { %v3041_v3 = vpop.permute.xlu1 %3040  ;;  %v8091_v54 = vld [vmem:[#allocation4 + $0x51] sm:$0xff]  ;;  %7900 = vst.msk [vmem:[#allocation4 + $0x60] sm:$0xff] %vm2601_vm11, %v7804_v32  ;;  %v2635_v5 = vsel %vm2601_vm11, %v12065_v29, %v2335_v18  ;;  %v12385_v29 = vsel %vm2204_vm9, %v2252_v62, %v15251_v6 }
 0x27b   : > { %v3158_v56 = vsel %vm2601_vm11, %v12353_v43, %v3041_v3  ;;  %v8187_v10 = vmax.f32 %v7995_v45, %v8091_v54  ;;  %5838 = vst [vmem:[#allocation3 + $0x224] sm:$0xf] %v5546_v60  ;;  %v12365_v1 = vrot.slane %v15252_v50, 7  ;;  %v8283_v24 = vld [vmem:[#allocation4 + $0x52] sm:$0xff]  ;;  %v2732_v60 = vsel %vm2698_vm12, %v2635_v5, %v11962_v16 }
 0x27c   : > { %2348 = vrot.lane.b32.xlu1 %v2253_v31, %s10523_s26  ;;  %v3238_v42 = vsel %vm2698_vm12, %v3158_v56, %v12233_v46  ;;  %v1212_v31 = vpack.c.bf16 %v1107_v37, %v1107_v37  ;;  %v9636_v3 = vld [vmem:[#allocation3 + $0x174] sm:$0xf0]  ;;  %v3408_v45 = vunpack.c.l.b16 %v2732_v60  ;;  %v3409_v54 = vunpack.c.h.b16 %v2732_v60  ;;  %v10274_v37 = vld [vmem:[#allocation3 + $0x16c] sm:$0xf]  ;;  %v12395_v56 = vld [vmem:[#allocation2 + $0xe8] sm:$0xff] }
 0x27d   : > { %v12372_v63 = vld [vmem:[#allocation5 + $0x40] ss:$2 sm:$0xff]  ;;  %v3843_v35 = vunpack.c.l.b16 %v3238_v42  ;;  %v3844_v32 = vunpack.c.h.b16 %v3238_v42  ;;  %v8379_v13 = vmax.f32 %v8187_v10, %v8283_v24  ;;  %v2925_v11 = vor.u32 %v12365_v1, %v1941_v58  ;;  %v935_v10 = vpop.f32.mrf.mxu0 }
 0x27e   : > { %v8700_v21 = vmax.f32 %v8656_v2, %v12372_v63  ;;  %1318 = vst.msk [vmem:[#allocation2 + $0xf0] sm:$0xf] %vm1257_vm3, %v1212_v31  ;;  %v7336_v18 = vadd.f32 %v7335_v59, %v7087_v57  ;;  %v9639_v42 = vor.u32 %v10274_v37, %v9636_v3  ;;  %v4344_v5 = vrot.slane %v4343_v12, 4  ;;  %v7089_v57 = vpop.f32.mrf.mxu1 }
 0x27f   : > { %v3940_v16 = vpack.c.b16 %v3843_v35, %v3843_v35  ;;  %v3941_v2 = vpack.c.b16 %v3844_v32, %v3844_v32  ;;  %v2926_v62 = vsel %vm2852_vm10, %v12231_v9, %v2925_v11  ;;  %8475 = vst.msk [vmem:[#allocation5 + $0x50] sm:$0xff] %vm2601_vm11, %v8379_v13  ;;  %v7996_v32 = vld [vmem:[#allocation4 + $0x58] sm:$0xff]  ;;  %v3504_v6 = vpack.c.b16 %v3408_v45, %v3408_v45 }
 0x280   : > { %8744 = vst.msk [vmem:[#allocation6] sm:$0xff] %vm2601_vm11, %v8700_v21  ;;  %3054 = vrot.lane.b32.xlu2 %v2926_v62, %s10523_s26  ;;  %v9726_v21 = vld [vmem:[#allocation3 + $0x218] sm:$0xf]  ;;  %v3505_v50 = vpack.c.b16 %v3409_v54, %v3409_v54  ;;  %v7585_v40 = vadd.f32 %v11887_v30, %v7336_v18  ;;  %v936_v9 = vadd.f32 %v12343_v22, %v935_v10  ;;  %v12410_v30 = vrot.slane %v1941_v58, 1  ;;  %v2339_v18 = vpop.permute.xlu2 %2338 }
 0x281   : > { %v4346_v24 = vshll.u32 %v3940_v16, 16  ;;  %v4350_v31 = vshrl.u32 %v3940_v16, 16  ;;  %v4356_v35 = vshll.u32 %v3941_v2, 16  ;;  %v8092_v60 = vld [vmem:[#allocation4 + $0x59] sm:$0xff]  ;;  %v4360_v3 = vshrl.u32 %v3941_v2, 16 }
 0x282   : > { %v8188_v12 = vmax.f32 %v7996_v32, %v8092_v60  ;;  %v10297_v59 = vld [vmem:[#allocation3 + $0x220] sm:$0xf0]  ;;  %v7338_v16 = vpop.f32.mrf.mxu2  ;;  %v8284_v37 = vld [vmem:[#allocation4 + $0x5a] sm:$0xff]  ;;  %3696 = vst [vmem:[#allocation3 + $0x180] sm:$0xf] %v3504_v6  ;;  %v7805_v45 = vmax.f32 %v7585_v40, 0.0  ;;  %v2146_v10 = vpop.permute.xlu1 %2145  ;;  %v5260_v40 = vunpack.c.h.b16 %v12293_v23  ;;  %v1939_v32 = vor.u32 %v1937_v36, %v12267_v7 }
 0x283   : > { %7377 = vmatmul.bf16.gmra.mxu2 %v9639_v42  ;;  %v4348_v13 = vrot.slane %v4346_v24, 5  ;;  %v4352_v11 = vrot.slane %v4350_v31, 4  ;;  %v9727_v62 = vor.u32 %v10297_v59, %v9726_v21  ;;  %v1108_v54 = vmax.f32 %v936_v9, 0.0  ;;  %v12412_v42 = vld [vmem:[#allocation5 + $0x30] ss:$2 sm:$0xff] }
 0x284   : > { %2462 = vrot.lane.b32.xlu1 %v12395_v56, %s10522_s25  ;;  %v8380_v24 = vmax.f32 %v8188_v12, %v8284_v37  ;;  %3697 = vst [vmem:[#allocation3 + $0x18c] sm:$0xf] %v3505_v50  ;;  %v12418_v6 = vsel %vm2504_vm5, %v12395_v56, 0  ;;  %v7090_v60 = vadd.f32 %v12110_v14, %v7089_v57  ;;  %v9634_v21 = vld [vmem:[#allocation3 + $0x168] sm:$0xf]  ;;  %v12435_v12 = vrot.slane %v4360_v3, 4 }
 0x285   : > { %v4349_v2 = vsel %vm11055_vm15, %v4344_v5, %v4348_v13  ;;  %v4353_v31 = vor.u32 %v4352_v11, %v4348_v13  ;;  %7661 = vmatmul.bf16.gmra.mxu3 %v9727_v62  ;;  %v1213_v58 = vpack.c.bf16 %v1108_v54, %v1108_v54  ;;  %v10275_v9 = vld [vmem:[#allocation3 + $0x170] sm:$0xf0]  ;;  %v12433_v5 = vrot.slane %v4356_v35, 5  ;;  %7901 = vst.msk [vmem:[#allocation4 + $0x68] sm:$0xff] %vm2601_vm11, %v7805_v45  ;;  %v938_v35 = vpop.f32.mrf.mxu0  ;;  %v8563_v13 = vld [vmem:[#allocation5 + $0x10] ss:$2 sm:$0xff]  ;;  %v12445_v11 = vpop.f32.mrf.mxu3 }
 0x286   : > { %5099 = vst [vmem:[#allocation3 + $0x190] sm:$0xf] %v4349_v2  ;;  %v2639_v27 = vsel %vm2601_vm11, %v12242_v52, %v2339_v18  ;;  %v1944_v7 = vsel %vm1716_vm4, %v1939_v32, %v12410_v30  ;;  %v5261_v57 = vunpack.c.l.b16 %v12418_v6  ;;  %v10460_v62 = vld [vmem:[#allocation2 + $0xa0] sm:$0xff]  ;;  %v10166_v54 = vld [vmem:[%s10577_s28 + $0x138] sm:$0xff]  ;;  %v9635_v18 = vor.u32 %v10275_v9, %v9634_v21 }
 0x287   : > { %v8788_v50 = vld [vmem:[#allocation6] sm:$0xff]  ;;  %8476 = vst.msk [vmem:[#allocation5 + $0x58] sm:$0xff] %vm2601_vm11, %v8380_v24  ;;  %v4354_v23 = vrot.slane %v4353_v31, 4  ;;  %v2736_v59 = vsel %vm2698_vm12, %v2639_v27, %v12245_v61  ;;  %v12453_v45 = vsel %vm2504_vm5, %v10460_v62, %v2146_v10  ;;  %v8657_v61 = vmax.f32 %v8563_v13, %v12412_v42  ;;  %v12464_v31 = vpop.permute.xlu0 %2448  ;;  %9241 = vmatmul.msk.bf16.gmra.mxu0 %vm607_vm2, %v10166_v54 }
 0x288   : > { %v8890_v36 = vpack.c.bf16 %v8788_v50, %v8788_v50  ;;  %1319 = vst.msk [vmem:[#allocation2 + $0xf4] sm:$0xf] %vm1257_vm3, %v1213_v58  ;;  %2159 = vrot.lane.b32.xlu2 %v1944_v7, %s10521_s16  ;;  %v3412_v3 = vunpack.c.l.b16 %v2736_v59  ;;  %v3413_v37 = vunpack.c.h.b16 %v2736_v59  ;;  %v7339_v24 = vadd.f32 %v7338_v16, %v7090_v60  ;;  %v7091_v58 = vpop.f32.mrf.mxu1  ;;  %7128 = vmatmul.bf16.gmra.mxu1 %v9635_v18  ;;  %v7997_v59 = vld [vmem:[#allocation4 + $0x60] sm:$0xff] }
 0x289   : > { %v4359_v52 = vsel %vm11055_vm15, %v4354_v23, %v12433_v5  ;;  %v5549_v2 = vsel %vm10688_vm8, %v12318_v51, %v5548_v17  ;;  %v12466_v32 = vpack.c.b16 %v5260_v40, %v5260_v40  ;;  %v15300_v42 = vrot.slane %v12350_v0, 5 }
 0x28a   : > { %8907 = vst.msk [vmem:[%s12430_s12] sm:$0xf] %vm8906_vm7, %v8890_v36  ;;  %v3508_v10 = vpack.c.b16 %v3412_v3, %v3412_v3  ;;  %v3509_v50 = vpack.c.b16 %v3413_v37, %v3413_v37  ;;  %v7340_v60 = vpop.f32.mrf.mxu2  ;;  %v7588_v33 = vadd.f32 %v11935_v26, %v7339_v24  ;;  %v3160_v17 = vsel %vm2601_vm11, %v12453_v45, %v12282_v20  ;;  %v2337_v7 = vpop.permute.xlu1 %2336 }
 0x28b   : > { %5100 = vst [vmem:[#allocation3 + $0x19c] sm:$0xf] %v4359_v52  ;;  %v5552_v16 = vsel %vm10688_vm8, %v12322_v28, %v15300_v42  ;;  %v939_v51 = vadd.f32 %v12343_v22, %v938_v35  ;;  %v4363_v40 = vor.u32 %v12435_v12, %v12433_v5  ;;  %v12480_v21 = vpack.c.b16 %v5261_v57, %v5261_v57 }
 0x28c   : > { %5839 = vst [vmem:[#allocation3 + $0x230] sm:$0xf] %v5549_v2  ;;  %v3239_v28 = vsel %vm2698_vm12, %v3160_v17, %v12464_v31  ;;  %v1953_v9 = vshrl.u32 %v12395_v56, 16  ;;  %v7806_v23 = vmax.f32 %v7588_v33, 0.0  ;;  %v8093_v12 = vld [vmem:[#allocation4 + $0x61] sm:$0xff]  ;;  %v1949_v57 = vshll.u32 %v12395_v56, 16 }
 0x28d   : > { %3700 = vst [vmem:[#allocation3 + $0x1b0] sm:$0xf] %v3508_v10  ;;  %v3845_v20 = vunpack.c.l.b16 %v3239_v28  ;;  %v3846_v27 = vunpack.c.h.b16 %v3239_v28  ;;  %v1109_v36 = vmax.f32 %v939_v51, 0.0  ;;  %v7092_v13 = vadd.f32 %v12110_v14, %v7091_v58  ;;  %v940_v54 = vpop.f32.mrf.mxu0  ;;  %v12506_v33 = vpop.f32.mrf.mxu3 }
 0x28e   : > { %v12486_v26 = vld [vmem:[#allocation5 + $0x50] ss:$2 sm:$0xff]  ;;  %3701 = vst [vmem:[#allocation3 + $0x1bc] sm:$0xf] %v3509_v50  ;;  %v12492_v35 = vrot.slane %v1953_v9, 7  ;;  %v8189_v52 = vmax.f32 %v7997_v59, %v8093_v12  ;;  %v2637_v24 = vsel %vm2601_vm11, %v12128_v55, %v2337_v7  ;;  %v5554_v58 = vrot.slane %v12466_v32, 5 }
 0x28f   : > { %v8701_v5 = vmax.f32 %v8657_v61, %v12486_v26  ;;  %5840 = vst [vmem:[#allocation3 + $0x23c] sm:$0xf] %v5552_v16  ;;  %v3942_v3 = vpack.c.b16 %v3845_v20, %v3845_v20  ;;  %v12496_v37 = vpack.c.b16 %v3846_v27, %v3846_v27  ;;  %v1214_v62 = vpack.c.bf16 %v1109_v36, %v1109_v36  ;;  %v8285_v61 = vld [vmem:[#allocation4 + $0x62] sm:$0xff]  ;;  %v9648_v59 = vld [vmem:[#allocation3 + $0x18c] sm:$0xf0] }
 0x290   : > { %7902 = vst.msk [vmem:[#allocation4 + $0x70] sm:$0xff] %vm2601_vm11, %v7806_v23  ;;  %2350 = vrot.lane.b32.xlu2 %v12385_v29, %s10523_s26  ;;  %v2928_v18 = vor.u32 %v12492_v35, %v1949_v57  ;;  %v7341_v2 = vadd.f32 %v7340_v60, %v7092_v13  ;;  %v8381_v10 = vmax.f32 %v8189_v52, %v8285_v61  ;;  %v7094_v16 = vpop.f32.mrf.mxu1  ;;  %v4364_v17 = vrot.slane %v4363_v40, 4  ;;  %v10277_v61 = vld [vmem:[#allocation3 + $0x184] sm:$0xf] }
 0x291   : > { %8745 = vst.msk [vmem:[#allocation6 + $0x8] sm:$0xff] %vm2601_vm11, %v8701_v5  ;;  %v4366_v50 = vshll.u32 %v3942_v3, 16  ;;  %v4370_v42 = vshrl.u32 %v3942_v3, 16  ;;  %v2734_v51 = vsel %vm2698_vm12, %v2637_v24, %v12136_v44  ;;  %v4376_v20 = vshll.u32 %v12496_v37, 16 }
 0x292   : > { %1320 = vst.msk [vmem:[#allocation2 + $0xf8] sm:$0xf] %vm1257_vm3, %v1214_v62  ;;  %v2929_v29 = vsel %vm2852_vm10, %v12365_v1, %v2928_v18  ;;  %v7590_v55 = vadd.f32 %v11984_v15, %v7341_v2  ;;  %v7343_v60 = vpop.f32.mrf.mxu2  ;;  %v3410_v27 = vunpack.c.l.b16 %v2734_v51  ;;  %v15301_v40 = vrot.slane %v12350_v0, 5  ;;  %v12520_v15 = vld [vmem:[#allocation2 + $0xf0] sm:$0xff]  ;;  %v9646_v18 = vld [vmem:[#allocation3 + $0x180] sm:$0xf] }
 0x293   : > { %8477 = vst.msk [vmem:[#allocation5 + $0x60] sm:$0xff] %vm2601_vm11, %v8381_v10  ;;  %v4368_v28 = vrot.slane %v4366_v50, 5  ;;  %v4372_v23 = vrot.slane %v4370_v42, 4  ;;  %3056 = vrot.lane.b32.xlu0 %v2929_v29, %s10523_s26  ;;  %v5557_v1 = vrot.slane %v12480_v21, 5  ;;  %v3411_v7 = vunpack.c.h.b16 %v2734_v51  ;;  %v9738_v5 = vld [vmem:[#allocation3 + $0x230] sm:$0xf] }
 0x294   : > { %v5553_v36 = vrot.slane %v15301_v40, 4  ;;  %v941_v44 = vadd.f32 %v12343_v22, %v940_v54  ;;  %v3506_v3 = vpack.c.b16 %v3410_v27, %v3410_v27  ;;  %v7807_v62 = vmax.f32 %v7590_v55, 0.0  ;;  %v7998_v0 = vld [vmem:[#allocation4 + $0x68] sm:$0xff] }
 0x295   : > { %v4369_v13 = vsel %vm11055_vm15, %v4364_v17, %v4368_v28  ;;  %v4373_v52 = vor.u32 %v4372_v23, %v4368_v28  ;;  %v3507_v10 = vpack.c.b16 %v3411_v7, %v3411_v7  ;;  %v12524_v54 = vrot.slane %v1949_v57, 1  ;;  %v10278_v28 = vld [vmem:[#allocation3 + $0x188] sm:$0xf0]  ;;  %v943_v55 = vpop.f32.mrf.mxu0  ;;  %v10167_v57 = vld [vmem:[%s10577_s28 + $0x140] sm:$0xff] }
 0x296   : > { %v10300_v12 = vld [vmem:[#allocation3 + $0x238] sm:$0xf0]  ;;  %5101 = vst [vmem:[#allocation3 + $0x1a8] sm:$0xf] %v4369_v13  ;;  %v1110_v50 = vmax.f32 %v941_v44, 0.0  ;;  %v12526_v51 = vrot.slane %v4376_v20, 5  ;;  %v7095_v17 = vadd.f32 %v12110_v14, %v7094_v16  ;;  %v9651_v44 = vor.u32 %v10277_v61, %v9648_v59  ;;  %v12555_v61 = vpop.f32.mrf.mxu3 }
 0x297   : > { %v8094_v24 = vld [vmem:[#allocation4 + $0x69] sm:$0xff]  ;;  %v9739_v2 = vor.u32 %v10300_v12, %v9738_v5  ;;  %v4374_v29 = vrot.slane %v4373_v52, 4  ;;  %3698 = vst [vmem:[#allocation3 + $0x198] sm:$0xf] %v3506_v3  ;;  %v15302_v40 = vshrl.u32 %v12280_v39, 16  ;;  %v5556_v20 = vrot.slane %v5554_v58, 4  ;;  %9242 = vmatmul.msk.bf16.gmra.mxu0 %vm607_vm2, %v10167_v57 }
 0x298   : > { %v8190_v42 = vmax.f32 %v7998_v0, %v8094_v24  ;;  %v8286_v23 = vld [vmem:[#allocation4 + $0x6a] sm:$0xff]  ;;  %3699 = vst [vmem:[#allocation3 + $0x1a4] sm:$0xf] %v3507_v10  ;;  %v1215_v27 = vpack.c.bf16 %v1110_v50, %v1110_v50  ;;  %2464 = vrot.lane.b32.xlu2 %v12520_v15, %s10522_s25  ;;  %v7096_v16 = vpop.f32.mrf.mxu1  ;;  %v4380_v12 = vshrl.u32 %v12496_v37, 16  ;;  %7382 = vmatmul.bf16.gmra.mxu2 %v9651_v44  ;;  %v1961_v52 = vshrl.u32 %v12520_v15, 16 }
 0x299   : > { %7666 = vmatmul.bf16.gmra.mxu3 %v9739_v2  ;;  %v1947_v7 = vor.u32 %v15302_v40, %v12410_v30  ;;  %v4379_v14 = vsel %vm11055_vm15, %v4374_v29, %v12526_v51  ;;  %7903 = vst.msk [vmem:[#allocation4 + $0x78] sm:$0xff] %vm2601_vm11, %v7807_v62  ;;  %v5555_v30 = vsel %vm10688_vm8, %v5553_v36, %v5554_v58  ;;  %v3045_v3 = vpop.permute.xlu0 %3044  ;;  %v12559_v58 = vld [vmem:[#allocation2 + $0xd0] sm:$0xff]  ;;  %v10463_v0 = vld [vmem:[#allocation2 + $0xa8] sm:$0xff]  ;;  %v1957_v10 = vshll.u32 %v12520_v15, 16 }
 0x29a   : > { %v8382_v5 = vmax.f32 %v8190_v42, %v8286_v23  ;;  %5102 = vst [vmem:[#allocation3 + $0x1b4] sm:$0xf] %v4379_v14  ;;  %v9647_v59 = vor.u32 %v10278_v28, %v9646_v18  ;;  %v5558_v37 = vsel %vm10688_vm8, %v5556_v20, %v5557_v1  ;;  %v7344_v13 = vadd.f32 %v7343_v60, %v7095_v17  ;;  %v7345_v62 = vpop.f32.mrf.mxu2  ;;  %v12565_v18 = vld [vmem:[%s15248_s4] ss:$0 sm:$0xff] }
 0x29b   : > { %v1952_v39 = vsel %vm1716_vm4, %v1947_v7, %v12524_v54  ;;  %1321 = vst.msk [vmem:[#allocation2 + $0xfc] sm:$0xf] %vm1257_vm3, %v1215_v27  ;;  %v944_v32 = vadd.f32 %v12343_v22, %v943_v55  ;;  %v2256_v36 = vrot.slane %v12559_v58, 1  ;;  %v7097_v60 = vadd.f32 %v12565_v18, %v7096_v16  ;;  %v12581_v55 = vpop.permute.xlu1 %2450 }
 0x29c   : > { %8478 = vst.msk [vmem:[#allocation5 + $0x68] sm:$0xff] %vm2601_vm11, %v8382_v5  ;;  %2161 = vrot.lane.b32.xlu0 %v1952_v39, %s10521_s16  ;;  %7133 = vmatmul.bf16.gmra.mxu1 %v9647_v59  ;;  %v12571_v24 = vsel %vm2504_vm5, %v10463_v0, %v12346_v19  ;;  %v7593_v2 = vadd.f32 %v12051_v25, %v7344_v13  ;;  %v12577_v50 = vrot.slane %v1961_v52, 7  ;;  %v4382_v42 = vrot.slane %v4380_v12, 4  ;;  %v7999_v25 = vld [vmem:[#allocation4 + $0x70] sm:$0xff]  ;;  %v12588_v5 = vpop.permute.xlu2 %2452 }
 0x29d   : > { %5841 = vst [vmem:[#allocation3 + $0x248] sm:$0xf] %v5555_v30  ;;  %v1111_v29 = vmax.f32 %v944_v32, 0.0  ;;  %v3162_v17 = vsel %vm2601_vm11, %v12571_v24, %v3045_v3  ;;  %v7346_v28 = vadd.f32 %v7345_v62, %v7097_v60  ;;  %v945_v27 = vpop.f32.mrf.mxu0  ;;  %v12605_v60 = vsel %vm2504_vm5, %v12520_v15, 0 }
 0x29e   : > { %5842 = vst [vmem:[#allocation3 + $0x254] sm:$0xf] %v5558_v37  ;;  %v7808_v19 = vmax.f32 %v7593_v2, 0.0  ;;  %v2931_v23 = vor.u32 %v12577_v50, %v1957_v10  ;;  %v3240_v44 = vsel %vm2698_vm12, %v3162_v17, %v12581_v55  ;;  %v946_v20 = vadd.f32 %v12343_v22, %v945_v27  ;;  %v9660_v17 = vld [vmem:[#allocation3 + $0x1a4] sm:$0xf0] }
 0x29f   : > { %v1216_v7 = vpack.c.bf16 %v1111_v29, %v1111_v29  ;;  %v7595_v57 = vadd.f32 %v12099_v34, %v7346_v28  ;;  %v3847_v39 = vunpack.c.l.b16 %v3240_v44  ;;  %v3848_v30 = vunpack.c.h.b16 %v3240_v44 }
 0x2a0   : > { %v8095_v40 = vld [vmem:[#allocation4 + $0x71] sm:$0xff]  ;;  %7904 = vst.msk [vmem:[#allocation4 + $0x80] sm:$0xff] %vm2601_vm11, %v7808_v19  ;;  %v2932_v12 = vsel %vm2852_vm10, %v12492_v35, %v2931_v23  ;;  %v7099_v59 = vpop.f32.mrf.mxu1  ;;  %v4383_v13 = vor.u32 %v4382_v42, %v12526_v51  ;;  %v15303_v34 = vrot.slane %v11995_v53, 1  ;;  %v1112_v32 = vmax.f32 %v946_v20, 0.0 }
 0x2a1   : > { %v8191_v14 = vmax.f32 %v7999_v25, %v8095_v40  ;;  %v8287_v16 = vld [vmem:[#allocation4 + $0x72] sm:$0xff]  ;;  %1322 = vst.msk [vmem:[#allocation2 + $0x100] sm:$0xf] %vm1257_vm3, %v1216_v7  ;;  %3058 = vrot.lane.b32.xlu1 %v2932_v12, %s10523_s26  ;;  %v7809_v62 = vmax.f32 %v7595_v57, 0.0  ;;  %v3944_v51 = vpack.c.b16 %v3847_v39, %v3847_v39  ;;  %v5262_v0 = vunpack.c.h.b16 %v12418_v6  ;;  %v10280_v25 = vld [vmem:[#allocation3 + $0x19c] sm:$0xf]  ;;  %v12615_v7 = vpop.f32.mrf.mxu3 }
 0x2a2   : > { %v2257_v3 = vsel %vm2204_vm9, %v15303_v34, %v2256_v36  ;;  %v12609_v42 = vpack.c.b16 %v3848_v30, %v3848_v30  ;;  %v1217_v53 = vpack.c.bf16 %v1112_v32, %v1112_v32  ;;  %v7100_v29 = vadd.f32 %v12565_v18, %v7099_v59  ;;  %v7348_v40 = vpop.f32.mrf.mxu2  ;;  %v9658_v20 = vld [vmem:[#allocation3 + $0x198] sm:$0xf] }
 0x2a3   : > { %v12593_v37 = vld [vmem:[#allocation5 + $0x60] ss:$2 sm:$0xff]  ;;  %v8383_v35 = vmax.f32 %v8191_v14, %v8287_v16  ;;  %7905 = vst.msk [vmem:[#allocation4 + $0x88] sm:$0xff] %vm2601_vm11, %v7809_v62  ;;  %v4386_v19 = vshll.u32 %v3944_v51, 16  ;;  %v4390_v23 = vshrl.u32 %v3944_v51, 16  ;;  %v12613_v27 = vrot.slane %v1957_v10, 1 }
 0x2a4   : > { %2352 = vrot.lane.b32.xlu0 %v2257_v3, %s10523_s26  ;;  %v9750_v2 = vld [vmem:[#allocation3 + $0x248] sm:$0xf]  ;;  %v4384_v44 = vrot.slane %v4383_v13, 4  ;;  %v5263_v6 = vunpack.c.l.b16 %v12605_v60  ;;  %v10281_v14 = vld [vmem:[#allocation3 + $0x1a0] sm:$0xf0]  ;;  %v4396_v39 = vshll.u32 %v12609_v42, 16  ;;  %v1955_v10 = vor.u32 %v1953_v9, %v12524_v54 }
 0x2a5   : > { %v10303_v28 = vld [vmem:[#allocation3 + $0x250] sm:$0xf0]  ;;  %8479 = vst.msk [vmem:[#allocation5 + $0x70] sm:$0xff] %vm2601_vm11, %v8383_v35  ;;  %v4388_v16 = vrot.slane %v4386_v19, 5  ;;  %v4392_v12 = vrot.slane %v4390_v23, 4  ;;  %v5359_v59 = vpack.c.b16 %v5262_v0, %v5262_v0  ;;  %v8000_v13 = vld [vmem:[#allocation4 + $0x78] sm:$0xff]  ;;  %v5264_v34 = vunpack.c.h.b16 %v12605_v60  ;;  %v2150_v60 = vpop.permute.xlu0 %2149 }
 0x2a6   : > { %v9751_v57 = vor.u32 %v10303_v28, %v9750_v2  ;;  %1323 = vst.msk [vmem:[#allocation2 + $0x104] sm:$0xf] %vm1257_vm3, %v1217_v53  ;;  %v12624_v30 = vld [vmem:[#allocation2 + $0xf8] sm:$0xff]  ;;  %v9663_v62 = vor.u32 %v10280_v25, %v9660_v17  ;;  %v7349_v32 = vadd.f32 %v7348_v40, %v7100_v29  ;;  %v1960_v53 = vsel %vm1716_vm4, %v1955_v10, %v12613_v27  ;;  %v12631_v28 = vpop.permute.xlu2 %3048 }
 0x2a7   : > { %v8096_v3 = vld [vmem:[#allocation4 + $0x79] sm:$0xff]  ;;  %v4389_v51 = vsel %vm11055_vm15, %v4384_v44, %v4388_v16  ;;  %v4393_v2 = vor.u32 %v4392_v12, %v4388_v16  ;;  %v5360_v9 = vpack.c.b16 %v5263_v6, %v5263_v6  ;;  %v9659_v0 = vor.u32 %v10281_v14, %v9658_v20 }
 0x2a8   : > { %v8192_v35 = vmax.f32 %v8000_v13, %v8096_v3  ;;  %v8288_v54 = vld [vmem:[#allocation4 + $0x7a] sm:$0xff]  ;;  %5103 = vst [vmem:[#allocation3 + $0x1c0] sm:$0xf] %v4389_v51  ;;  %7387 = vmatmul.bf16.gmra.mxu2 %v9663_v62  ;;  %v7598_v29 = vadd.f32 %v12156_v48, %v7349_v32  ;;  %v12635_v25 = vrot.slane %v4396_v39, 5  ;;  %v5560_v44 = vrot.slane %v5359_v59, 5 }
 0x2a9   : > { %7671 = vmatmul.bf16.gmra.mxu3 %v9751_v57  ;;  %2163 = vrot.lane.b32.xlu1 %v1960_v53, %s10521_s16  ;;  %v8001_v17 = vld [vmem:[#allocation4 + $0x80] sm:$0xff]  ;;  %v4394_v23 = vrot.slane %v4393_v2, 4  ;;  %v4400_v6 = vshrl.u32 %v12609_v42, 16  ;;  %v5559_v20 = vrot.slane %v5557_v1, 4  ;;  %v12646_v12 = vld [vmem:[#allocation2 + $0xd8] sm:$0xff]  ;;  %v12649_v10 = vpack.c.b16 %v5264_v34, %v5264_v34  ;;  %v12656_v1 = vpop.f32.mrf.mxu3  ;;  %v948_v2 = vpop.f32.mrf.mxu0 }
 0x2aa   : > { %v8384_v19 = vmax.f32 %v8192_v35, %v8288_v54  ;;  %v8097_v40 = vld [vmem:[#allocation4 + $0x81] sm:$0xff]  ;;  %v7810_v16 = vmax.f32 %v7598_v29, 0.0  ;;  %v15254_v39 = vrot.slane %v12646_v12, 1  ;;  %v5563_v42 = vrot.slane %v5360_v9, 5 }
 0x2ab   : > { %v8193_v57 = vmax.f32 %v8001_v17, %v8097_v40  ;;  %v4399_v48 = vsel %vm11055_vm15, %v4394_v23, %v12635_v25  ;;  %v8289_v14 = vld [vmem:[#allocation4 + $0x82] sm:$0xff]  ;;  %v12653_v21 = vsel %vm2504_vm5, %v12624_v30, 0  ;;  %v5562_v13 = vrot.slane %v5560_v44, 4  ;;  %v7101_v17 = vpop.f32.mrf.mxu1 }
 0x2ac   : > { %2466 = vrot.lane.b32.xlu0 %v12624_v30, %s10522_s25  ;;  %7138 = vmatmul.bf16.gmra.mxu1 %v9659_v0  ;;  %8480 = vst.msk [vmem:[#allocation5 + $0x78] sm:$0xff] %vm2601_vm11, %v8384_v19  ;;  %v4402_v3 = vrot.slane %v4400_v6, 4  ;;  %v5265_v62 = vunpack.c.l.b16 %v12653_v21  ;;  %v2259_v34 = vsel %vm2204_vm9, %v2256_v36, %v15254_v39  ;;  %v5561_v35 = vsel %vm10688_vm8, %v5559_v20, %v5560_v44  ;;  %v10168_v9 = vld [vmem:[%s10577_s28 + $0x148] sm:$0xff]  ;;  %v10465_v0 = vld [vmem:[#allocation2 + $0xb0] sm:$0xff] }
 0x2ad   : > { %5104 = vst [vmem:[#allocation3 + $0x1cc] sm:$0xf] %v4399_v48  ;;  %v8385_v59 = vmax.f32 %v8193_v57, %v8289_v14  ;;  %v5564_v51 = vsel %vm10688_vm8, %v5562_v13, %v5563_v42  ;;  %v15253_v53 = vshrl.u32 %v12624_v30, 16  ;;  %v12673_v54 = vrot.slane %v5563_v42, 4  ;;  %v3047_v57 = vpop.permute.xlu1 %3046  ;;  %9243 = vmatmul.msk.bf16.gmra.mxu0 %vm607_vm2, %v10168_v9  ;;  %v8002_v42 = vld [vmem:[#allocation4 + $0x88] sm:$0xff] }
 0x2ae   : > { %7906 = vst.msk [vmem:[#allocation4 + $0x90] sm:$0xff] %vm2601_vm11, %v7810_v16  ;;  %v5266_v58 = vunpack.c.h.b16 %v12653_v21  ;;  %v12677_v36 = vsel %vm2504_vm5, %v10465_v0, %v2150_v60  ;;  %v949_v29 = vadd.f32 %v12343_v22, %v948_v2  ;;  %v12680_v19 = vpop.permute.xlu2 %2153  ;;  %v4403_v40 = vor.u32 %v4402_v3, %v12635_v25  ;;  %v2341_v16 = vpop.permute.xlu0 %2340 }
 0x2af   : > { %8481 = vst.msk [vmem:[#allocation5 + $0x80] sm:$0xff] %vm2601_vm11, %v8385_v59  ;;  %v1965_v44 = vshll.u32 %v12624_v30, 16  ;;  %v12688_v6 = vrot.slane %v15253_v53, 7  ;;  %v7102_v60 = vadd.f32 %v12565_v18, %v7101_v17  ;;  %v12692_v20 = vpack.c.b16 %v5265_v62, %v5265_v62  ;;  %v7350_v25 = vpop.f32.mrf.mxu2 }
 0x2b0   : > { %5843 = vst [vmem:[#allocation3 + $0x260] sm:$0xf] %v5561_v35  ;;  %v1113_v48 = vmax.f32 %v949_v29, 0.0  ;;  %v3164_v14 = vsel %vm2601_vm11, %v12677_v36, %v3047_v57  ;;  %v9672_v29 = vld [vmem:[#allocation3 + $0x1bc] sm:$0xf0]  ;;  %v4404_v17 = vrot.slane %v4403_v40, 4 }
 0x2b1   : > { %2354 = vrot.lane.b32.xlu1 %v2259_v34, %s10523_s26  ;;  %5844 = vst [vmem:[#allocation3 + $0x26c] sm:$0xf] %v5564_v51  ;;  %v2934_v13 = vor.u32 %v12688_v6, %v1965_v44  ;;  %v3241_v3 = vsel %vm2698_vm12, %v3164_v14, %v12588_v5  ;;  %v2641_v34 = vsel %vm2601_vm11, %v12353_v43, %v2341_v16  ;;  %v12701_v51 = vld [vmem:[#allocation2 + $0x100] sm:$0xff]  ;;  %v12712_v40 = vpop.f32.mrf.mxu3 }
 0x2b2   : > { %v7351_v35 = vadd.f32 %v7350_v25, %v7102_v60  ;;  %v1218_v2 = vpack.c.bf16 %v1113_v48, %v1113_v48  ;;  %v3849_v9 = vunpack.c.l.b16 %v3241_v3  ;;  %v3850_v0 = vunpack.c.h.b16 %v3241_v3  ;;  %v10283_v48 = vld [vmem:[#allocation3 + $0x1b4] sm:$0xf] }
 0x2b3   : > { %v12682_v23 = vld [vmem:[#allocation5 + $0x70] ss:$2 sm:$0xff]  ;;  %v2935_v53 = vsel %vm2852_vm10, %v12577_v50, %v2934_v13  ;;  %v2738_v39 = vsel %vm2698_vm12, %v2641_v34, %v12233_v46  ;;  %v12714_v13 = vrot.slane %v1965_v44, 1  ;;  %v9675_v46 = vor.u32 %v10283_v48, %v9672_v29 }
 0x2b4   : > { %v7600_v14 = vadd.f32 %v12192_v49, %v7351_v35  ;;  %1324 = vst.msk [vmem:[#allocation2 + $0x108] sm:$0xf] %vm1257_vm3, %v1218_v2  ;;  %3060 = vrot.lane.b32.xlu2 %v2935_v53, %s10523_s26  ;;  %v3946_v43 = vpack.c.b16 %v3849_v9, %v3849_v9  ;;  %v12710_v60 = vpack.c.b16 %v3850_v0, %v3850_v0  ;;  %v3414_v16 = vunpack.c.l.b16 %v2738_v39  ;;  %v12718_v49 = vld [vmem:[#allocation2 + $0x1a0] sm:$0x1] }
 0x2b5   : > { %v8098_v59 = vld [vmem:[#allocation4 + $0x89] sm:$0xff]  ;;  %v8660_v48 = vmax.f32 %v12372_v63, %v12593_v37 }
 0x2b6   : > { %v8194_v62 = vmax.f32 %v8002_v42, %v8098_v59  ;;  %v8290_v57 = vld [vmem:[#allocation4 + $0x8a] sm:$0xff]  ;;  %v3415_v42 = vunpack.c.h.b16 %v2738_v39  ;;  %v7811_v50 = vmax.f32 %v7600_v14, 0.0  ;;  %v950_v59 = vpop.f32.mrf.mxu0  ;;  %v4406_v3 = vshll.u32 %v3946_v43, 16  ;;  %v2345_v29 = vpop.permute.xlu2 %2344 }
 0x2b7   : > { %v9762_v25 = vld [vmem:[#allocation3 + $0x260] sm:$0xf]  ;;  %v4410_v34 = vshrl.u32 %v3946_v43, 16  ;;  %v3510_v35 = vpack.c.b16 %v3414_v16, %v3414_v16  ;;  %v12723_v39 = vsel %vm2504_vm5, %v12701_v51, 0  ;;  %v4416_v44 = vshll.u32 %v12710_v60, 16 }
 0x2b8   : > { %v8386_v32 = vmax.f32 %v8194_v62, %v8290_v57  ;;  %v10306_v53 = vld [vmem:[#allocation3 + $0x268] sm:$0xf0]  ;;  %v7104_v62 = vpop.f32.mrf.mxu1  ;;  %v3511_v9 = vpack.c.b16 %v3415_v42, %v3415_v42  ;;  %7907 = vst.msk [vmem:[#allocation4 + $0x98] sm:$0xff] %vm2601_vm11, %v7811_v50  ;;  %v951_v0 = vadd.f32 %v12343_v22, %v950_v59  ;;  %7392 = vmatmul.bf16.gmra.mxu2 %v9675_v46  ;;  %v9670_v43 = vld [vmem:[#allocation3 + $0x1b0] sm:$0xf]  ;;  %v3105_v16 = vunpack.c.l.b16 %v12718_v49  ;;  %v7353_v59 = vpop.f32.mrf.mxu2 }
 0x2b9   : > { %2468 = vrot.lane.b32.xlu1 %v12701_v51, %s10522_s25  ;;  %v9763_v2 = vor.u32 %v10306_v53, %v9762_v25  ;;  %v4412_v57 = vrot.slane %v4410_v34, 4  ;;  %3702 = vst [vmem:[#allocation3 + $0x1c8] sm:$0xf] %v3510_v35  ;;  %v7105_v14 = vadd.f32 %v12565_v18, %v7104_v62  ;;  %v1963_v22 = vor.u32 %v1961_v52, %v12613_v27  ;;  %v10284_v50 = vld [vmem:[#allocation3 + $0x1b8] sm:$0xf0]  ;;  %v12808_v49 = vpop.permute.xlu0 %2454 }
 0x2ba   : > { %8482 = vst.msk [vmem:[#allocation5 + $0x88] sm:$0xff] %vm2601_vm11, %v8386_v32  ;;  %v4408_v32 = vrot.slane %v4406_v3, 5  ;;  %v1114_v25 = vmax.f32 %v951_v0, 0.0  ;;  %v5267_v42 = vunpack.c.l.b16 %v12723_v39  ;;  %v12739_v46 = vpack.c.b16 %v5266_v58, %v5266_v58 }
 0x2bb   : > { %7676 = vmatmul.bf16.gmra.mxu3 %v9763_v2  ;;  %3703 = vst [vmem:[#allocation3 + $0x1d4] sm:$0xf] %v3511_v9  ;;  %v2645_v37 = vsel %vm2601_vm11, %v12571_v24, %v2345_v29  ;;  %v5569_v3 = vrot.slane %v12692_v20, 5  ;;  %v12746_v34 = vrot.slane %v4416_v44, 5  ;;  %v1968_v27 = vsel %vm1716_vm4, %v1963_v22, %v12714_v13  ;;  %v10228_v2 = vld [vmem:[#allocation2 + $0x198] sm:$0xff] }
 0x2bc   : > { %v4409_v53 = vsel %vm11055_vm15, %v4404_v17, %v4408_v32  ;;  %v4413_v63 = vor.u32 %v4412_v57, %v4408_v32  ;;  %v1219_v52 = vpack.c.bf16 %v1114_v25, %v1114_v25  ;;  %2165 = vrot.lane.b32.xlu2 %v1968_v27, %s10521_s16  ;;  %v2742_v58 = vsel %vm2698_vm12, %v2645_v37, %v12581_v55  ;;  %v2152_v17 = vpop.permute.xlu1 %2151  ;;  %v8003_v32 = vld [vmem:[#allocation4 + $0x90] sm:$0xff] }
 0x2bd   : > { %5105 = vst [vmem:[#allocation3 + $0x1d8] sm:$0xf] %v4409_v53  ;;  %v9671_v35 = vor.u32 %v10284_v50, %v9670_v43  ;;  %v7354_v62 = vadd.f32 %v7353_v59, %v7105_v14  ;;  %v4420_v20 = vshrl.u32 %v12710_v60, 16  ;;  %v12757_v44 = vpack.c.b16 %v5267_v42, %v5267_v42  ;;  %v10466_v43 = vld [vmem:[#allocation2 + $0xe0] sm:$0xff]  ;;  %v12764_v60 = vpop.f32.mrf.mxu3 }
 0x2be   : > { %v4414_v21 = vrot.slane %v4413_v63, 4  ;;  %1325 = vst.msk [vmem:[#allocation2 + $0x10c] sm:$0xf] %vm1257_vm3, %v1219_v52  ;;  %v3418_v9 = vunpack.c.l.b16 %v2742_v58  ;;  %v3419_v0 = vunpack.c.h.b16 %v2742_v58  ;;  %v5572_v29 = vrot.slane %v12739_v46, 5 }
 0x2bf   : > { %v8099_v14 = vld [vmem:[#allocation4 + $0x91] sm:$0xff]  ;;  %7143 = vmatmul.bf16.gmra.mxu1 %v9671_v35  ;;  %v2260_v25 = vrot.slane %v10466_v43, 1  ;;  %v15255_v59 = vrot.slane %v12395_v56, 1  ;;  %v5571_v46 = vrot.slane %v5569_v3, 4  ;;  %v7603_v53 = vadd.f32 %v12238_v38, %v7354_v62 }
 0x2c0   : > { %v4419_v55 = vsel %vm11055_vm15, %v4414_v21, %v12746_v34  ;;  %v8195_v22 = vmax.f32 %v8003_v32, %v8099_v14  ;;  %v3514_v42 = vpack.c.b16 %v3418_v9, %v3418_v9  ;;  %v3515_v50 = vpack.c.b16 %v3419_v0, %v3419_v0  ;;  %v10467_v21 = vld [vmem:[#allocation2 + $0xb8] sm:$0xff]  ;;  %v10169_v43 = vld [vmem:[%s10577_s28 + $0x150] sm:$0xff] }
 0x2c1   : > { %v12753_v24 = vld [vmem:[#allocation5 + $0x80] ss:$2 sm:$0xff]  ;;  %5106 = vst [vmem:[#allocation3 + $0x1e4] sm:$0xf] %v4419_v55  ;;  %v12770_v63 = vsel %vm2504_vm5, %v10228_v2, 0  ;;  %v4422_v37 = vrot.slane %v4420_v20, 4  ;;  %v12774_v58 = vsel %vm2504_vm5, %v10467_v21, %v2152_v17  ;;  %v12790_v20 = vsel %vm2204_vm9, %v2260_v25, %v15255_v59  ;;  %9244 = vmatmul.msk.bf16.gmra.mxu0 %vm607_vm2, %v10169_v43 }
 0x2c2   : > { %v8704_v57 = vmax.f32 %v8660_v48, %v12753_v24  ;;  %v8291_v48 = vld [vmem:[#allocation4 + $0x92] sm:$0xff]  ;;  %v5575_v27 = vrot.slane %v12757_v44, 5  ;;  %3706 = vst [vmem:[#allocation3 + $0x1f8] sm:$0xf] %v3514_v42  ;;  %v15304_v35 = vrot.slane %v12649_v10, 5  ;;  %v5574_v0 = vrot.slane %v5572_v29, 4  ;;  %v7106_v42 = vpop.f32.mrf.mxu1 }
 0x2c3   : > { %v8387_v52 = vmax.f32 %v8195_v22, %v8291_v48  ;;  %3707 = vst [vmem:[#allocation3 + $0x204] sm:$0xf] %v3515_v50  ;;  %v7812_v32 = vmax.f32 %v7603_v53, 0.0  ;;  %v15306_v2 = vrot.slane %v12646_v12, 1  ;;  %v10468_v55 = vld [vmem:[#allocation2 + $0xc0] sm:$0xff]  ;;  %v3166_v14 = vsel %vm2601_vm11, %v12774_v58, %v12631_v28  ;;  %v953_v22 = vpop.f32.mrf.mxu0 }
 0x2c4   : > { %8748 = vst.msk [vmem:[#allocation6 + $0x20] sm:$0xff] %vm2601_vm11, %v8704_v57  ;;  %v5568_v9 = vrot.slane %v15304_v35, 4  ;;  %v15305_v38 = vmov %v15304_v35  ;;  %v12795_v57 = vpack.c.b16 %v3105_v16, %v3105_v16  ;;  %v1977_v16 = vshrl.u32 %v12701_v51, 16 }
 0x2c5   : > { %v5567_v62 = vsel %vm10688_vm8, %v12673_v54, %v15305_v38  ;;  %8483 = vst.msk [vmem:[#allocation5 + $0x90] sm:$0xff] %vm2601_vm11, %v8387_v52  ;;  %v2261_v17 = vsel %vm2204_vm9, %v15306_v2, %v2260_v25  ;;  %v12800_v54 = vsel %vm2504_vm5, %v10468_v55, %v12680_v19  ;;  %v4423_v25 = vor.u32 %v4422_v37, %v12746_v34  ;;  %v12825_v34 = vld [vmem:[%s15246_s2] ss:$0 sm:$0xff]  ;;  %v12842_v43 = vpop.f32.mrf.mxu3 }
 0x2c6   : > { %15307 = vst [vmem:[#allocation7_spill] sm:$0xff] %v12795_v57  ;;  %v5570_v12 = vsel %vm10688_vm8, %v5568_v9, %v5569_v3  ;;  %2356 = vrot.lane.b32.xlu2 %v2261_v17, %s10523_s26  ;;  %v3242_v19 = vsel %vm2698_vm12, %v3166_v14, %v12808_v49  ;;  %v9684_v3 = vld [vmem:[#allocation3 + $0x1d4] sm:$0xf0]  ;;  %v5573_v50 = vsel %vm10688_vm8, %v5571_v46, %v5572_v29  ;;  %v12830_v52 = vrot.slane %v1977_v16, 7  ;;  %v2343_v29 = vpop.permute.xlu1 %2342  ;;  %v10286_v46 = vld [vmem:[#allocation3 + $0x1cc] sm:$0xf] }
 0x2c7   : > { %7908 = vst.msk [vmem:[#allocation4 + $0xa0] sm:$0xff] %vm2601_vm11, %v7812_v32  ;;  %v5576_v28 = vsel %vm10688_vm8, %v5574_v0, %v5575_v27  ;;  %v3851_v48 = vunpack.c.l.b16 %v3242_v19  ;;  %v3852_v53 = vunpack.c.h.b16 %v3242_v19  ;;  %v954_v37 = vadd.f32 %v12825_v34, %v953_v22  ;;  %v7355_v32 = vpop.f32.mrf.mxu2  ;;  %v8789_v14 = vld [vmem:[#allocation6 + $0x8] sm:$0x7] }
 0x2c8   : > { %5845 = vst [vmem:[#allocation3 + $0x278] sm:$0xf] %v5567_v62  ;;  %v1973_v35 = vshll.u32 %v12701_v51, 16  ;;  %v7107_v9 = vadd.f32 %v12565_v18, %v7106_v42  ;;  %v2643_v0 = vsel %vm2601_vm11, %v12453_v45, %v2343_v29  ;;  %v9687_v38 = vor.u32 %v10286_v46, %v9684_v3 }
 0x2c9   : > { %5846 = vst [vmem:[#allocation3 + $0x284] sm:$0xf] %v5570_v12  ;;  %v3948_v2 = vpack.c.b16 %v3851_v48, %v3851_v48  ;;  %v3949_v17 = vpack.c.b16 %v3852_v53, %v3852_v53  ;;  %v1115_v55 = vmax.f32 %v954_v37, 0.0  ;;  %v12840_v12 = vld [vmem:[#allocation2 + $0x108] sm:$0xff]  ;;  %v4424_v19 = vrot.slane %v4423_v25, 4  ;;  %v8004_v37 = vld [vmem:[#allocation4 + $0x98] sm:$0xff] }
 0x2ca   : > { %5847 = vst [vmem:[#allocation3 + $0x290] sm:$0xf] %v5573_v50  ;;  %v5268_v22 = vunpack.c.h.b16 %v12723_v39  ;;  %v2937_v42 = vor.u32 %v12830_v52, %v1973_v35  ;;  %v7356_v45 = vadd.f32 %v7355_v32, %v7107_v9  ;;  %7397 = vmatmul.bf16.gmra.mxu2 %v9687_v38 }
 0x2cb   : > { %v12833_v21 = vld [vmem:[#allocation6 + $0x20] sm:$0xff]  ;;  %5848 = vst [vmem:[#allocation3 + $0x29c] sm:$0xf] %v5576_v28  ;;  %v4426_v50 = vshll.u32 %v3948_v2, 16  ;;  %v4430_v48 = vshrl.u32 %v3948_v2, 16  ;;  %v2740_v28 = vsel %vm2698_vm12, %v2643_v0, %v12464_v31  ;;  %v4436_v25 = vshll.u32 %v3949_v17, 16 }
 0x2cc   : > { %v15256_v62 = vrot.slane %v12833_v21, 5  ;;  %v1220_v46 = vpack.c.bf16 %v1115_v55, %v1115_v55  ;;  %v2938_v39 = vsel %vm2852_vm10, %v12688_v6, %v2937_v42  ;;  %v4440_v59 = vshrl.u32 %v3949_v17, 16  ;;  %v955_v42 = vpop.f32.mrf.mxu0 }
 0x2cd   : > { %v4428_v38 = vrot.slane %v4426_v50, 5  ;;  %v4432_v10 = vrot.slane %v4430_v48, 4  ;;  %3062 = vrot.lane.b32.xlu0 %v2938_v39, %s10523_s26  ;;  %v12858_v31 = vpack.c.b16 %v5268_v22, %v5268_v22  ;;  %v3416_v55 = vunpack.c.l.b16 %v2740_v28 }
 0x2ce   : > { %v8881_v3 = vsel %vm5405_vm6, %v8789_v14, %v15256_v62  ;;  %v8100_v29 = vld [vmem:[#allocation4 + $0x99] sm:$0xff]  ;;  %2470 = vrot.lane.b32.xlu2 %v12840_v12, %s10522_s25  ;;  %v3417_v14 = vunpack.c.h.b16 %v2740_v28  ;;  %v7605_v6 = vadd.f32 %v12300_v8, %v7356_v45  ;;  %1326 = vst.msk [vmem:[#allocation2 + $0x110] sm:$0xf] %vm1257_vm3, %v1220_v46  ;;  %v12866_v62 = vrot.slane %v1973_v35, 1  ;;  %v10287_v28 = vld [vmem:[#allocation3 + $0x1d0] sm:$0xf0]  ;;  %v12898_v44 = vpop.permute.xlu1 %2456 }
 0x2cf   : > { %v8891_v53 = vpack.c.bf16 %v8881_v3, %v8881_v3  ;;  %v8196_v9 = vmax.f32 %v8004_v37, %v8100_v29  ;;  %v8292_v32 = vld [vmem:[#allocation4 + $0x9a] sm:$0xff]  ;;  %v7109_v3 = vpop.f32.mrf.mxu1  ;;  %v4429_v17 = vsel %vm11055_vm15, %v4424_v19, %v4428_v38  ;;  %v4433_v37 = vor.u32 %v4432_v10, %v4428_v38  ;;  %v9682_v29 = vld [vmem:[#allocation3 + $0x1c8] sm:$0xf]  ;;  %v7358_v8 = vpop.f32.mrf.mxu2 }
 0x2d0   : > { %v9774_v0 = vld [vmem:[#allocation3 + $0x278] sm:$0xf]  ;;  %v10309_v2 = vld [vmem:[#allocation3 + $0x280] sm:$0xf0]  ;;  %5107 = vst [vmem:[#allocation3 + $0x1f0] sm:$0xf] %v4429_v17  ;;  %v3512_v22 = vpack.c.b16 %v3416_v55, %v3416_v55  ;;  %v3513_v39 = vpack.c.b16 %v3417_v14, %v3417_v14  ;;  %v956_v10 = vadd.f32 %v12825_v34, %v955_v42  ;;  %v7110_v19 = vadd.f32 %v12565_v18, %v7109_v3  ;;  %v3051_v46 = vpop.permute.xlu0 %3050  ;;  %v12881_v3 = vpop.f32.mrf.mxu3 }
 0x2d1   : > { %8908 = vst.msk [vmem:[%s12430_s12 + $0x4] sm:$0xf] %vm8906_vm7, %v8891_v53  ;;  %v8388_v50 = vmax.f32 %v8196_v9, %v8292_v32  ;;  %v9775_v48 = vor.u32 %v10309_v2, %v9774_v0  ;;  %v12864_v53 = vrot.slane %v4436_v25, 5  ;;  %v4434_v45 = vrot.slane %v4433_v37, 4  ;;  %v10170_v42 = vld [vmem:[%s10577_s28 + $0x158] sm:$0xff] }
 0x2d2   : > { %v7813_v9 = vmax.f32 %v7605_v6, 0.0  ;;  %v8661_v25 = vmax.f32 %v12486_v26, %v12682_v23  ;;  %v15258_v32 = vrot.slane %v12858_v31, 5  ;;  %v4442_v35 = vrot.slane %v4440_v59, 4  ;;  %3704 = vst [vmem:[#allocation3 + $0x1e0] sm:$0xf] %v3512_v22  ;;  %v12894_v59 = vpop.permute.xlu2 %2458  ;;  %9245 = vmatmul.msk.bf16.gmra.mxu0 %vm607_vm2, %v10170_v42  ;;  %v8005_v42 = vld [vmem:[#allocation4 + $0xa0] sm:$0xff] }
 0x2d3   : > { %8484 = vst.msk [vmem:[#allocation5 + $0x98] sm:$0xff] %vm2601_vm11, %v8388_v50  ;;  %7681 = vmatmul.bf16.gmra.mxu3 %v9775_v48  ;;  %v15308_v38 = vshrl.u32 %v12624_v30, 16  ;;  %v4439_v2 = vsel %vm11055_vm15, %v4434_v45, %v12864_v53  ;;  %v1116_v55 = vmax.f32 %v956_v10, 0.0  ;;  %v9683_v14 = vor.u32 %v10287_v28, %v9682_v29 }
 0x2d4   : > { %3705 = vst [vmem:[#allocation3 + $0x1ec] sm:$0xf] %v3513_v39  ;;  %v7359_v6 = vadd.f32 %v7358_v8, %v7110_v19  ;;  %v12885_v26 = vrot.slane %v5575_v27, 4  ;;  %v12891_v23 = vsel %vm2504_vm5, %v12840_v12, 0  ;;  %v3168_v48 = vsel %vm2601_vm11, %v12800_v54, %v3051_v46  ;;  %v958_v37 = vpop.f32.mrf.mxu0 }
 0x2d5   : > { %v1971_v0 = vor.u32 %v15308_v38, %v12714_v13  ;;  %5108 = vst [vmem:[#allocation3 + $0x1fc] sm:$0xf] %v4439_v2  ;;  %v15257_v13 = vshrl.u32 %v12840_v12, 16  ;;  %v1221_v50 = vpack.c.bf16 %v1116_v55, %v1116_v55  ;;  %7148 = vmatmul.bf16.gmra.mxu1 %v9683_v14  ;;  %v4443_v17 = vor.u32 %v4442_v35, %v12864_v53  ;;  %v10312_v2 = vld [vmem:[#allocation3 + $0x298] sm:$0xf0] }
 0x2d6   : > { %7909 = vst.msk [vmem:[#allocation4 + $0xa8] sm:$0xff] %vm2601_vm11, %v7813_v9  ;;  %v7608_v27 = vadd.f32 %v12387_v4, %v7359_v6  ;;  %v1981_v29 = vshll.u32 %v12840_v12, 16  ;;  %v3243_v28 = vsel %vm2698_vm12, %v3168_v48, %v12898_v44  ;;  %v959_v4 = vadd.f32 %v12825_v34, %v958_v37 }
 0x2d7   : > { %v1976_v30 = vsel %vm1716_vm4, %v1971_v0, %v12866_v62  ;;  %v12907_v22 = vrot.slane %v15257_v13, 7  ;;  %v7111_v39 = vpop.f32.mrf.mxu1  ;;  %1327 = vst.msk [vmem:[#allocation2 + $0x114] sm:$0xf] %vm1257_vm3, %v1221_v50  ;;  %v3853_v9 = vunpack.c.l.b16 %v3243_v28  ;;  %v12917_v53 = vrot.slane %v15258_v32, 4  ;;  %v7360_v38 = vpop.f32.mrf.mxu2  ;;  %v9696_v6 = vld [vmem:[#allocation3 + $0x1ec] sm:$0xf0] }
 0x2d8   : > { %2167 = vrot.lane.b32.xlu0 %v1976_v30, %s10521_s16  ;;  %v7814_v8 = vmax.f32 %v7608_v27, 0.0  ;;  %v7112_v45 = vadd.f32 %v12565_v18, %v7111_v39  ;;  %v5269_v19 = vunpack.c.l.b16 %v12891_v23  ;;  %v3854_v35 = vunpack.c.h.b16 %v3243_v28  ;;  %v9786_v50 = vld [vmem:[#allocation3 + $0x290] sm:$0xf] }
 0x2d9   : > { %v2940_v46 = vor.u32 %v12907_v22, %v1981_v29  ;;  %v1117_v55 = vmax.f32 %v959_v4, 0.0  ;;  %v3950_v14 = vpack.c.b16 %v3853_v9, %v3853_v9  ;;  %v5270_v30 = vunpack.c.h.b16 %v12891_v23  ;;  %v10289_v4 = vld [vmem:[#allocation3 + $0x1e4] sm:$0xf] }
 0x2da   : > { %v12919_v10 = vld [vmem:[#allocation5 + $0x90] ss:$2 sm:$0xff]  ;;  %7910 = vst.msk [vmem:[#allocation4 + $0xb0] sm:$0xff] %vm2601_vm11, %v7814_v8  ;;  %v12929_v48 = vpack.c.b16 %v3854_v35, %v3854_v35  ;;  %v7361_v37 = vadd.f32 %v7360_v38, %v7112_v45  ;;  %v12933_v9 = vpop.permute.xlu0 %2155  ;;  %v12935_v13 = vpack.c.b16 %v5269_v19, %v5269_v19  ;;  %v9787_v32 = vor.u32 %v10312_v2, %v9786_v50 }
 0x2db   : > { %v8705_v0 = vmax.f32 %v8661_v25, %v12919_v10  ;;  %v2941_v27 = vsel %vm2852_vm10, %v12830_v52, %v2940_v46  ;;  %v4444_v25 = vrot.slane %v4443_v17, 4  ;;  %v1222_v39 = vpack.c.bf16 %v1117_v55, %v1117_v55 }
 0x2dc   : > { %3064 = vrot.lane.b32.xlu1 %v2941_v27, %s10523_s26  ;;  %v4446_v28 = vshll.u32 %v3950_v14, 16  ;;  %v4450_v8 = vshrl.u32 %v3950_v14, 16  ;;  %v7610_v52 = vadd.f32 %v12445_v11, %v7361_v37  ;;  %v9699_v46 = vor.u32 %v10289_v4, %v9696_v6  ;;  %v960_v2 = vpop.f32.mrf.mxu0 }
 0x2dd   : > { %8749 = vst.msk [vmem:[#allocation6 + $0x28] sm:$0xff] %vm2601_vm11, %v8705_v0  ;;  %v8101_v23 = vld [vmem:[#allocation4 + $0xa1] sm:$0xff]  ;;  %v4456_v38 = vshll.u32 %v12929_v48, 16  ;;  %v12942_v0 = vpop.permute.xlu2 %3054  ;;  %v12944_v14 = vpack.c.b16 %v5270_v30, %v5270_v30  ;;  %v12946_v50 = vrot.slane %v1981_v29, 1  ;;  %v15260_v6 = vrot.slane %v12520_v15, 1 }
 0x2de   : > { %v8197_v45 = vmax.f32 %v8005_v42, %v8101_v23  ;;  %1328 = vst.msk [vmem:[#allocation2 + $0x118] sm:$0xf] %vm1257_vm3, %v1222_v39  ;;  %v4448_v17 = vrot.slane %v4446_v28, 5  ;;  %v4452_v35 = vrot.slane %v4450_v8, 4  ;;  %v8293_v55 = vld [vmem:[#allocation4 + $0xa2] sm:$0xff]  ;;  %v7815_v19 = vmax.f32 %v7610_v52, 0.0  ;;  %7402 = vmatmul.bf16.gmra.mxu2 %v9699_v46  ;;  %v12949_v42 = vpop.f32.mrf.mxu3 }
 0x2df   : > { %v7114_v11 = vpop.f32.mrf.mxu1  ;;  %v961_v39 = vadd.f32 %v12825_v34, %v960_v2  ;;  %v9694_v28 = vld [vmem:[#allocation3 + $0x1e0] sm:$0xf]  ;;  %v10290_v30 = vld [vmem:[#allocation3 + $0x1e8] sm:$0xf0]  ;;  %v5581_v4 = vrot.slane %v12935_v13, 5  ;;  %v4460_v23 = vshrl.u32 %v12929_v48, 16  ;;  %v1979_v52 = vor.u32 %v1977_v16, %v12866_v62 }
 0x2e0   : > { %2358 = vrot.lane.b32.xlu0 %v12790_v20, %s10523_s26  ;;  %v8389_v20 = vmax.f32 %v8197_v45, %v8293_v55  ;;  %v4449_v27 = vsel %vm11055_vm15, %v4444_v25, %v4448_v17  ;;  %v4453_v37 = vor.u32 %v4452_v35, %v4448_v17  ;;  %v8006_v8 = vld [vmem:[#allocation4 + $0xa8] sm:$0xff]  ;;  %v7115_v46 = vadd.f32 %v12565_v18, %v7114_v11  ;;  %v7363_v45 = vpop.f32.mrf.mxu2 }
 0x2e1   : > { %v8102_v29 = vld [vmem:[#allocation4 + $0xa9] sm:$0xff]  ;;  %5109 = vst [vmem:[#allocation3 + $0x208] sm:$0xf] %v4449_v27  ;;  %v12961_v35 = vrot.slane %v4456_v38, 5  ;;  %v1118_v13 = vmax.f32 %v961_v39, 0.0  ;;  %v1984_v51 = vsel %vm1716_vm4, %v1979_v52, %v12946_v50  ;;  %v9695_v16 = vor.u32 %v10290_v30, %v9694_v28  ;;  %v10171_v27 = vld [vmem:[%s10577_s28 + $0x160] sm:$0xff] }
 0x2e2   : > { %8485 = vst.msk [vmem:[#allocation5 + $0xa0] sm:$0xff] %vm2601_vm11, %v8389_v20  ;;  %v8198_v25 = vmax.f32 %v8006_v8, %v8102_v29  ;;  %v4454_v17 = vrot.slane %v4453_v37, 4  ;;  %v12963_v55 = vld [vmem:[#allocation2 + $0x110] sm:$0xff]  ;;  %v7364_v62 = vadd.f32 %v7363_v45, %v7115_v46  ;;  %v15309_v2 = vrot.slane %v12858_v31, 5  ;;  %v10470_v30 = vld [vmem:[#allocation2 + $0xc8] sm:$0xff]  ;;  %9246 = vmatmul.msk.bf16.gmra.mxu0 %vm607_vm2, %v10171_v27 }
 0x2e3   : > { %7686 = vmatmul.bf16.gmra.mxu3 %v9787_v32  ;;  %v8294_v48 = vld [vmem:[#allocation4 + $0xaa] sm:$0xff]  ;;  %7911 = vst.msk [vmem:[#allocation4 + $0xb8] sm:$0xff] %vm2601_vm11, %v7815_v19  ;;  %v1223_v20 = vpack.c.bf16 %v1118_v13, %v1118_v13  ;;  %v3053_v19 = vpop.permute.xlu1 %3052  ;;  %v12980_v37 = vsel %vm2504_vm5, %v12795_v57, 0  ;;  %v4462_v31 = vrot.slane %v4460_v23, 4  ;;  %v12992_v8 = vsel %vm2504_vm5, %v10470_v30, %v12933_v9  ;;  %v2347_v23 = vpop.permute.xlu0 %2346 }
 0x2e4   : > { %v5579_v32 = vsel %vm10688_vm8, %v12885_v26, %v15309_v2  ;;  %v8390_v11 = vmax.f32 %v8198_v25, %v8294_v48  ;;  %v4459_v38 = vsel %vm11055_vm15, %v4454_v17, %v12961_v35  ;;  %2169 = vrot.lane.b32.xlu1 %v1984_v51, %s10521_s16  ;;  %v7613_v39 = vadd.f32 %v12506_v33, %v7364_v62  ;;  %v963_v45 = vpop.f32.mrf.mxu0 }
 0x2e5   : > { %5849 = vst [vmem:[#allocation3 + $0x2a8] sm:$0xf] %v5579_v32  ;;  %v5582_v26 = vsel %vm10688_vm8, %v12917_v53, %v5581_v4  ;;  %7153 = vmatmul.bf16.gmra.mxu1 %v9695_v16  ;;  %v15259_v29 = vshrl.u32 %v12963_v55, 16  ;;  %v15310_v33 = vrot.slane %v12395_v56, 1  ;;  %v13000_v52 = vrot.slane %v5581_v4, 4  ;;  %v13012_v48 = vpop.permute.xlu2 %2159 }
 0x2e6   : > { %5110 = vst [vmem:[#allocation3 + $0x214] sm:$0xf] %v4459_v38  ;;  %v7816_v46 = vmax.f32 %v7613_v39, 0.0  ;;  %v1989_v25 = vshll.u32 %v12963_v55, 16  ;;  %v3170_v17 = vsel %vm2601_vm11, %v12992_v8, %v3053_v19  ;;  %v964_v13 = vadd.f32 %v12825_v34, %v963_v45  ;;  %v13023_v38 = vpop.f32.mrf.mxu3 }
 0x2e7   : > { %8486 = vst.msk [vmem:[#allocation5 + $0xa8] sm:$0xff] %vm2601_vm11, %v8390_v11  ;;  %v2265_v53 = vsel %vm2204_vm9, %v15310_v33, %v15260_v6  ;;  %v7116_v9 = vpop.f32.mrf.mxu1  ;;  %v13009_v56 = vrot.slane %v15259_v29, 7  ;;  %v3244_v51 = vsel %vm2698_vm12, %v3170_v17, %v12894_v59  ;;  %v4463_v16 = vor.u32 %v4462_v31, %v12961_v35 }
 0x2e8   : > { %2472 = vrot.lane.b32.xlu0 %v12963_v55, %s10522_s25  ;;  %1329 = vst.msk [vmem:[#allocation2 + $0x11c] sm:$0xf] %vm1257_vm3, %v1223_v20  ;;  %v7117_v4 = vadd.f32 %v12565_v18, %v7116_v9  ;;  %v13020_v62 = vsel %vm2504_vm5, %v12963_v55, 0  ;;  %v3855_v2 = vunpack.c.l.b16 %v3244_v51  ;;  %v3856_v32 = vunpack.c.h.b16 %v3244_v51  ;;  %v7365_v11 = vpop.f32.mrf.mxu2  ;;  %v8007_v18 = vld [vmem:[#allocation4 + $0xb0] sm:$0xff] }
 0x2e9   : > { %5850 = vst [vmem:[#allocation3 + $0x2b4] sm:$0xf] %v5582_v26  ;;  %v1119_v19 = vmax.f32 %v964_v13, 0.0  ;;  %v2943_v27 = vor.u32 %v13009_v56, %v1989_v25  ;;  %v2647_v35 = vsel %vm2601_vm11, %v12677_v36, %v2347_v23 }
 0x2ea   : > { %7912 = vst.msk [vmem:[#allocation4 + $0xc0] sm:$0xff] %vm2601_vm11, %v7816_v46  ;;  %v8103_v20 = vld [vmem:[#allocation4 + $0xb1] sm:$0xff]  ;;  %v7366_v31 = vadd.f32 %v7365_v11, %v7117_v4  ;;  %v3952_v26 = vpack.c.b16 %v3855_v2, %v3855_v2  ;;  %v13030_v30 = vpack.c.b16 %v3856_v32, %v3856_v32  ;;  %v2744_v33 = vsel %vm2698_vm12, %v2647_v35, %v12588_v5  ;;  %v9708_v11 = vld [vmem:[#allocation3 + $0x204] sm:$0xf0] }
 0x2eb   : > { %v8199_v39 = vmax.f32 %v8007_v18, %v8103_v20  ;;  %v8295_v46 = vld [vmem:[#allocation4 + $0xb2] sm:$0xff]  ;;  %v1224_v45 = vpack.c.bf16 %v1119_v19, %v1119_v19  ;;  %v2944_v9 = vsel %vm2852_vm10, %v12907_v22, %v2943_v27  ;;  %v3420_v17 = vunpack.c.l.b16 %v2744_v33 }
 0x2ec   : > { %2360 = vrot.lane.b32.xlu1 %v2265_v53, %s10523_s26  ;;  %v3421_v13 = vunpack.c.h.b16 %v2744_v33  ;;  %3066 = vrot.lane.b32.xlu2 %v2944_v9, %s10523_s26  ;;  %v4466_v23 = vshll.u32 %v3952_v26, 16  ;;  %v4470_v4 = vshrl.u32 %v3952_v26, 16  ;;  %v4476_v2 = vshll.u32 %v13030_v30, 16  ;;  %v9798_v32 = vld [vmem:[#allocation3 + $0x2a8] sm:$0xf]  ;;  %v965_v26 = vpop.f32.mrf.mxu0  ;;  %v8008_v33 = vld [vmem:[#allocation4 + $0xb8] sm:$0xff] }
 0x2ed   : > { %v8391_v36 = vmax.f32 %v8199_v39, %v8295_v46  ;;  %1330 = vst.msk [vmem:[#allocation2 + $0x120] sm:$0xf] %vm1257_vm3, %v1224_v45  ;;  %v3516_v5 = vpack.c.b16 %v3420_v17, %v3420_v17  ;;  %v15311_v53 = vunpack.c.l.b16 %v12770_v63  ;;  %v4464_v20 = vrot.slane %v4463_v16, 4 }
 0x2ee   : > { %v13037_v51 = vld [vmem:[#allocation5 + $0xa0] ss:$2 sm:$0xff]  ;;  %v4468_v27 = vrot.slane %v4466_v23, 5  ;;  %v4472_v35 = vrot.slane %v4470_v4, 4  ;;  %v3517_v39 = vpack.c.b16 %v3421_v13, %v3421_v13  ;;  %v5271_v46 = vunpack.c.l.b16 %v13020_v62  ;;  %v9706_v4 = vld [vmem:[#allocation3 + $0x1f8] sm:$0xf] }
 0x2ef   : > { %v13046_v18 = vpack.c.b16 %v15311_v53, %v15311_v53  ;;  %8487 = vst.msk [vmem:[#allocation5 + $0xb0] sm:$0xff] %vm2601_vm11, %v8391_v36  ;;  %v7615_v17 = vadd.f32 %v12555_v61, %v7366_v31  ;;  %v966_v29 = vadd.f32 %v12825_v34, %v965_v26  ;;  %v7119_v6 = vpop.f32.mrf.mxu1  ;;  %v10292_v53 = vld [vmem:[#allocation3 + $0x1fc] sm:$0xf]  ;;  %v13052_v22 = vld [vmem:[#allocation2 + $0x118] sm:$0xff]  ;;  %v13056_v13 = vrot.slane %v4476_v2, 5 }
 0x2f0   : > { %v10315_v19 = vld [vmem:[#allocation3 + $0x2b0] sm:$0xf0]  ;;  %v4469_v36 = vsel %vm11055_vm15, %v4464_v20, %v4468_v27  ;;  %v4473_v23 = vor.u32 %v4472_v35, %v4468_v27  ;;  %3708 = vst [vmem:[#allocation3 + $0x210] sm:$0xf] %v3516_v5  ;;  %v15313_v31 = vshrl.u32 %v12840_v12, 16  ;;  %v13063_v26 = vrot.slane %v1989_v25, 1 }
 0x2f1   : > { %15312 = vst [vmem:[#allocation8_spill] sm:$0xff] %v13046_v18  ;;  %v8104_v45 = vld [vmem:[#allocation4 + $0xb9] sm:$0xff]  ;;  %v9799_v9 = vor.u32 %v10315_v19, %v9798_v32  ;;  %v7817_v32 = vmax.f32 %v7615_v17, 0.0  ;;  %v1120_v61 = vmax.f32 %v966_v29, 0.0  ;;  %v9711_v29 = vor.u32 %v10292_v53, %v9708_v11  ;;  %v10293_v35 = vld [vmem:[#allocation3 + $0x200] sm:$0xf0] }
 0x2f2   : > { %v8200_v16 = vmax.f32 %v8008_v33, %v8104_v45  ;;  %v8296_v28 = vld [vmem:[#allocation4 + $0xba] sm:$0xff]  ;;  %5111 = vst [vmem:[#allocation3 + $0x220] sm:$0xf] %v4469_v36  ;;  %v1987_v19 = vor.u32 %v15313_v31, %v12946_v50  ;;  %v2351_v33 = vpop.permute.xlu2 %2350  ;;  %v4474_v27 = vrot.slane %v4473_v23, 4  ;;  %v7368_v45 = vpop.f32.mrf.mxu2  ;;  %v5272_v50 = vunpack.c.h.b16 %v13020_v62 }
 0x2f3   : > { %7691 = vmatmul.bf16.gmra.mxu3 %v9799_v9  ;;  %3709 = vst [vmem:[#allocation3 + $0x21c] sm:$0xf] %v3517_v39  ;;  %v13068_v2 = vld [vmem:[%s15248_s4] ss:$0 sm:$0xff]  ;;  %v13071_v9 = vpop.f32.mrf.mxu3  ;;  %v1225_v25 = vpack.c.bf16 %v1120_v61, %v1120_v61  ;;  %v13079_v39 = vsel %vm2504_vm5, %v13052_v22, 0  ;;  %7407 = vmatmul.bf16.gmra.mxu2 %v9711_v29  ;;  %v2651_v11 = vsel %vm2601_vm11, %v12800_v54, %v2351_v33  ;;  %v15261_v31 = vrot.slane %v13046_v18, 5 }
 0x2f4   : > { %v8392_v20 = vmax.f32 %v8200_v16, %v8296_v28  ;;  %v7120_v5 = vadd.f32 %v13068_v2, %v7119_v6  ;;  %7913 = vst.msk [vmem:[#allocation4 + $0xc8] sm:$0xff] %vm2601_vm11, %v7817_v32  ;;  %v1992_v28 = vsel %vm1716_vm4, %v1987_v19, %v13063_v26  ;;  %2474 = vrot.lane.b32.xlu1 %v13052_v22, %s10522_s25  ;;  %v5273_v17 = vunpack.c.l.b16 %v13079_v39 }
 0x2f5   : > { %v5368_v6 = vpack.c.b16 %v5271_v46, %v5271_v46  ;;  %v4479_v62 = vsel %vm11055_vm15, %v4474_v27, %v13056_v13  ;;  %2171 = vrot.lane.b32.xlu2 %v1992_v28, %s10521_s16  ;;  %v2748_v53 = vsel %vm2698_vm12, %v2651_v11, %v12898_v44  ;;  %v9707_v16 = vor.u32 %v10293_v35, %v9706_v4  ;;  %v13104_v4 = vld [vmem:[#allocation2 + $0xf8] sm:$0xff]  ;;  %v2158_v35 = vpop.permute.xlu1 %2157 }
 0x2f6   : > { %8488 = vst.msk [vmem:[#allocation5 + $0xb8] sm:$0xff] %vm2601_vm11, %v8392_v20  ;;  %v7369_v46 = vadd.f32 %v7368_v45, %v7120_v5  ;;  %v3424_v36 = vunpack.c.l.b16 %v2748_v53  ;;  %v3425_v23 = vunpack.c.h.b16 %v2748_v53  ;;  %v15314_v32 = vunpack.c.h.b16 %v12770_v63 }
 0x2f7   : > { %5112 = vst [vmem:[#allocation3 + $0x22c] sm:$0xf] %v4479_v62  ;;  %v5369_v19 = vpack.c.b16 %v5272_v50, %v5272_v50  ;;  %7158 = vmatmul.bf16.gmra.mxu1 %v9707_v16  ;;  %v15315_v33 = vrot.slane %v12944_v14, 5  ;;  %v15263_v20 = vrot.slane %v13104_v4, 1  ;;  %v5587_v27 = vrot.slane %v5368_v6, 5  ;;  %v8009_v50 = vld [vmem:[#allocation4 + $0xc0] sm:$0xff] }
 0x2f8   : > { %1331 = vst.msk [vmem:[#allocation2 + $0x124] sm:$0xf] %vm1257_vm3, %v1225_v25  ;;  %v5403_v61 = vpack.c.b16 %v15314_v32, %v15314_v32  ;;  %v7618_v54 = vadd.f32 %v12615_v7, %v7369_v46  ;;  %v4480_v63 = vshrl.u32 %v13030_v30, 16  ;;  %v3520_v5 = vpack.c.b16 %v3424_v36, %v3424_v36 }
 0x2f9   : > { %v5585_v44 = vsel %vm10688_vm8, %v13000_v52, %v15315_v33  ;;  %v3521_v29 = vpack.c.b16 %v3425_v23, %v3425_v23  ;;  %v13108_v45 = vpack.c.b16 %v5273_v17, %v5273_v17  ;;  %v15316_v28 = vunpack.c.l.b16 %v12980_v37 }
 0x2fa   : > { %5851 = vst [vmem:[#allocation3 + $0x2c0] sm:$0xf] %v5585_v44  ;;  %v7818_v7 = vmax.f32 %v7618_v54, 0.0  ;;  %v5692_v62 = vrot.slane %v5403_v61, 5  ;;  %v15317_v11 = vmov %v15315_v33  ;;  %v5590_v6 = vrot.slane %v5369_v19, 5  ;;  %v10473_v54 = vld [vmem:[#allocation2 + $0xd0] sm:$0xff] }
 0x2fb   : > { %v8105_v25 = vld [vmem:[#allocation4 + $0xc1] sm:$0xff]  ;;  %v5404_v52 = vpack.c.b16 %v15316_v28, %v15316_v28  ;;  %v5586_v53 = vrot.slane %v15317_v11, 4  ;;  %3712 = vst [vmem:[#allocation3 + $0x240] sm:$0xf] %v3520_v5  ;;  %v15318_v17 = vrot.slane %v12520_v15, 1  ;;  %v5589_v36 = vrot.slane %v5587_v27, 4  ;;  %v13125_v32 = vpop.f32.mrf.mxu3  ;;  %v968_v11 = vpop.f32.mrf.mxu0 }
 0x2fc   : > { %v8201_v30 = vmax.f32 %v8009_v50, %v8105_v25  ;;  %v4482_v23 = vrot.slane %v4480_v63, 4  ;;  %v8297_v37 = vld [vmem:[#allocation4 + $0xc2] sm:$0xff]  ;;  %3713 = vst [vmem:[#allocation3 + $0x24c] sm:$0xf] %v3521_v29  ;;  %v5691_v14 = vrot.slane %v15261_v31, 4  ;;  %v5593_v19 = vrot.slane %v13108_v45, 5  ;;  %v13139_v25 = vpop.permute.xlu0 %2460 }
 0x2fd   : > { %v13115_v16 = vld [vmem:[#allocation5 + $0xb0] ss:$2 sm:$0xff]  ;;  %v2267_v46 = vsel %vm2204_vm9, %v15318_v17, %v15263_v20  ;;  %v13129_v15 = vsel %vm2504_vm5, %v10473_v54, %v2158_v35  ;;  %7914 = vst.msk [vmem:[#allocation4 + $0xd0] sm:$0xff] %vm2601_vm11, %v7818_v7  ;;  %v5588_v33 = vsel %vm10688_vm8, %v5586_v53, %v5587_v27  ;;  %v5592_v44 = vrot.slane %v5590_v6, 4  ;;  %v7121_v53 = vpop.f32.mrf.mxu1  ;;  %v7370_v54 = vpop.f32.mrf.mxu2  ;;  %v10173_v45 = vld [vmem:[%s10577_s28 + $0x170] sm:$0xff] }
 0x2fe   : > { %2362 = vrot.lane.b32.xlu2 %v2267_v46, %s10523_s26  ;;  %v8393_v61 = vmax.f32 %v8201_v30, %v8297_v37  ;;  %v5694_v63 = vrot.slane %v5692_v62, 4  ;;  %v5695_v5 = vrot.slane %v5404_v52, 5  ;;  %v4483_v29 = vor.u32 %v4482_v23, %v13056_v13  ;;  %5852 = vst [vmem:[#allocation3 + $0x2cc] sm:$0xf] %v5588_v33  ;;  %v10172_v7 = vld [vmem:[%s10577_s28 + $0x168] sm:$0xff] }
 0x2ff   : > { %v3172_v50 = vsel %vm2601_vm11, %v13129_v15, %v12942_v0  ;;  %v15262_v35 = vshrl.u32 %v13052_v22, 16  ;;  %v13143_v28 = vld [vmem:[#allocation2 + $0x120] sm:$0xff]  ;;  %v5693_v27 = vsel %vm10688_vm8, %v5691_v14, %v5692_v62  ;;  %v1997_v13 = vshll.u32 %v13052_v22, 16  ;;  %v2349_v14 = vpop.permute.xlu1 %2348  ;;  %9247 = vmatmul.msk.bf16.gmra.mxu0 %vm607_vm2, %v10172_v7 }
 0x300   : > { %8489 = vst.msk [vmem:[#allocation5 + $0xc0] sm:$0xff] %vm2601_vm11, %v8393_v61  ;;  %v3245_v52 = vsel %vm2698_vm12, %v3172_v50, %v13139_v25  ;;  %v9720_v30 = vld [vmem:[#allocation3 + $0x21c] sm:$0xf0]  ;;  %v5591_v0 = vsel %vm10688_vm8, %v5589_v36, %v5590_v6  ;;  %v5594_v17 = vsel %vm10688_vm8, %v5592_v44, %v5593_v19  ;;  %v969_v62 = vadd.f32 %v12825_v34, %v968_v11  ;;  %v10295_v61 = vld [vmem:[#allocation3 + $0x214] sm:$0xf]  ;;  %v8010_v50 = vld [vmem:[#allocation4 + $0xc8] sm:$0xff] }
 0x301   : > { %v3857_v46 = vunpack.c.l.b16 %v3245_v52  ;;  %v3858_v23 = vunpack.c.h.b16 %v3245_v52  ;;  %v13159_v37 = vrot.slane %v15262_v35, 7  ;;  %5853 = vst [vmem:[#allocation3 + $0x2d8] sm:$0xf] %v5591_v0  ;;  %v7122_v6 = vadd.f32 %v13068_v2, %v7121_v53 }
 0x302   : > { %v2649_v36 = vsel %vm2601_vm11, %v12774_v58, %v2349_v14  ;;  %v9723_v33 = vor.u32 %v10295_v61, %v9720_v30  ;;  %5854 = vst [vmem:[#allocation3 + $0x2e4] sm:$0xf] %v5594_v17  ;;  %v5696_v44 = vsel %vm10688_vm8, %v5694_v63, %v5695_v5  ;;  %v1121_v35 = vmax.f32 %v969_v62, 0.0  ;;  %v9810_v62 = vld [vmem:[#allocation3 + $0x2c0] sm:$0xf] }
 0x303   : > { %v3954_v11 = vpack.c.b16 %v3857_v46, %v3857_v46  ;;  %v13167_v31 = vpack.c.b16 %v3858_v23, %v3858_v23  ;;  %v2946_v7 = vor.u32 %v13159_v37, %v1997_v13  ;;  %5887 = vst [vmem:[#allocation3 + $0x470] sm:$0xf] %v5693_v27  ;;  %v2746_v53 = vsel %vm2698_vm12, %v2649_v36, %v12808_v49  ;;  %v13176_v46 = vpop.f32.mrf.mxu3 }
 0x304   : > { %v8106_v52 = vld [vmem:[#allocation4 + $0xc9] sm:$0xff]  ;;  %v7371_v30 = vadd.f32 %v7370_v54, %v7122_v6  ;;  %7412 = vmatmul.bf16.gmra.mxu2 %v9723_v33  ;;  %v4484_v63 = vrot.slane %v4483_v29, 4  ;;  %5888 = vst [vmem:[#allocation3 + $0x47c] sm:$0xf] %v5696_v44  ;;  %v1226_v61 = vpack.c.bf16 %v1121_v35, %v1121_v35  ;;  %v3423_v29 = vunpack.c.h.b16 %v2746_v53  ;;  %v970_v33 = vpop.f32.mrf.mxu0 }
 0x305   : > { %v8202_v58 = vmax.f32 %v8010_v50, %v8106_v52  ;;  %v8298_v5 = vld [vmem:[#allocation4 + $0xca] sm:$0xff]  ;;  %v4486_v0 = vshll.u32 %v3954_v11, 16  ;;  %v4490_v17 = vshrl.u32 %v3954_v11, 16  ;;  %v2947_v27 = vsel %vm2852_vm10, %v13009_v56, %v2946_v7  ;;  %v7124_v44 = vpop.f32.mrf.mxu1 }
 0x306   : > { %2476 = vrot.lane.b32.xlu2 %v13143_v28, %s10522_s25  ;;  %v10318_v14 = vld [vmem:[#allocation3 + $0x2c8] sm:$0xf0]  ;;  %v3422_v50 = vunpack.c.l.b16 %v2746_v53  ;;  %v4496_v6 = vshll.u32 %v13167_v31, 16  ;;  %3068 = vrot.lane.b32.xlu0 %v2947_v27, %s10523_s26  ;;  %v7620_v54 = vadd.f32 %v12656_v1, %v7371_v30  ;;  %1332 = vst.msk [vmem:[#allocation2 + $0x128] sm:$0xf] %vm1257_vm3, %v1226_v61  ;;  %v971_v11 = vadd.f32 %v12825_v34, %v970_v33  ;;  %v7373_v30 = vpop.f32.mrf.mxu2 }
 0x307   : > { %v8394_v23 = vmax.f32 %v8202_v58, %v8298_v5  ;;  %v9811_v52 = vor.u32 %v10318_v14, %v9810_v62  ;;  %v4488_v20 = vrot.slane %v4486_v0, 5  ;;  %v4492_v49 = vrot.slane %v4490_v17, 4  ;;  %v9718_v7 = vld [vmem:[#allocation3 + $0x210] sm:$0xf]  ;;  %v10296_v58 = vld [vmem:[#allocation3 + $0x218] sm:$0xf0] }
 0x308   : > { %v3518_v36 = vpack.c.b16 %v3422_v50, %v3422_v50  ;;  %v3519_v5 = vpack.c.b16 %v3423_v29, %v3423_v29  ;;  %v7819_v0 = vmax.f32 %v7620_v54, 0.0  ;;  %v13190_v53 = vrot.slane %v1997_v13, 1  ;;  %v8791_v50 = vld [vmem:[#allocation6 + $0x28] sm:$0x7] }
 0x309   : > { %8490 = vst.msk [vmem:[#allocation5 + $0xc8] sm:$0xff] %vm2601_vm11, %v8394_v23  ;;  %7696 = vmatmul.bf16.gmra.mxu3 %v9811_v52  ;;  %v4489_v56 = vsel %vm11055_vm15, %v4484_v63, %v4488_v20  ;;  %v4493_v35 = vor.u32 %v4492_v49, %v4488_v20  ;;  %v7125_v1 = vadd.f32 %v13068_v2, %v7124_v44  ;;  %v13193_v23 = vrot.slane %v4496_v6, 5 }
 0x30a   : > { %5113 = vst [vmem:[#allocation3 + $0x238] sm:$0xf] %v4489_v56  ;;  %v1122_v20 = vmax.f32 %v971_v11, 0.0  ;;  %v15319_v63 = vshrl.u32 %v12963_v55, 16  ;;  %v9719_v14 = vor.u32 %v10296_v58, %v9718_v7  ;;  %v8664_v52 = vmax.f32 %v12753_v24, %v13037_v51  ;;  %v10474_v56 = vld [vmem:[#allocation2 + $0x100] sm:$0xff]  ;;  %v13223_v11 = vpop.permute.xlu2 %2464 }
 0x30b   : > { %v4494_v17 = vrot.slane %v4493_v35, 4  ;;  %3710 = vst [vmem:[#allocation3 + $0x228] sm:$0xf] %v3518_v36  ;;  %v7374_v61 = vadd.f32 %v7373_v30, %v7125_v1  ;;  %v5274_v49 = vunpack.c.h.b16 %v13079_v39  ;;  %v13212_v36 = vpop.f32.mrf.mxu3  ;;  %v4500_v24 = vshrl.u32 %v13167_v31, 16  ;;  %v8011_v31 = vld [vmem:[#allocation4 + $0xd0] sm:$0xff] }
 0x30c   : > { %3711 = vst [vmem:[#allocation3 + $0x234] sm:$0xf] %v3519_v5  ;;  %v1995_v62 = vor.u32 %v15319_v63, %v13063_v26  ;;  %v1227_v27 = vpack.c.bf16 %v1122_v20, %v1122_v20  ;;  %7163 = vmatmul.bf16.gmra.mxu1 %v9719_v14  ;;  %v8814_v39 = vrot.slane %v8791_v50, 5  ;;  %v13218_v33 = vsel %vm2504_vm5, %v13143_v28, 0  ;;  %v9822_v1 = vld [vmem:[#allocation3 + $0x2d8] sm:$0xf] }
 0x30d   : > { %v4499_v13 = vsel %vm11055_vm15, %v4494_v17, %v13193_v23  ;;  %7915 = vst.msk [vmem:[#allocation4 + $0xd8] sm:$0xff] %vm2601_vm11, %v7819_v0  ;;  %v7623_v26 = vadd.f32 %v12712_v40, %v7374_v61  ;;  %v13220_v44 = vpack.c.b16 %v5274_v49, %v5274_v49  ;;  %v10321_v40 = vld [vmem:[#allocation3 + $0x2e0] sm:$0xf0]  ;;  %v2268_v35 = vrot.slane %v10474_v56, 1  ;;  %v10475_v20 = vld [vmem:[#allocation2 + $0xd8] sm:$0xff] }
 0x30e   : > { %5114 = vst [vmem:[#allocation3 + $0x244] sm:$0xf] %v4499_v13  ;;  %v2000_v6 = vsel %vm1716_vm4, %v1995_v62, %v13190_v53  ;;  %v15264_v7 = vrot.slane %v12840_v12, 1  ;;  %v13227_v58 = vrot.slane %v4500_v24, 4  ;;  %v5275_v0 = vunpack.c.l.b16 %v13218_v33 }
 0x30f   : > { %1333 = vst.msk [vmem:[#allocation2 + $0x12c] sm:$0xf] %vm1257_vm3, %v1227_v27  ;;  %2173 = vrot.lane.b32.xlu0 %v2000_v6, %s10521_s16  ;;  %v7820_v51 = vmax.f32 %v7623_v26, 0.0  ;;  %v15320_v30 = vrot.slane %v12833_v21, 5  ;;  %v13235_v63 = vsel %vm2504_vm5, %v10475_v20, %v13012_v48  ;;  %v9823_v14 = vor.u32 %v10321_v40, %v9822_v1  ;;  %v973_v48 = vpop.f32.mrf.mxu0  ;;  %9248 = vmatmul.msk.bf16.gmra.mxu0 %vm607_vm2, %v10173_v45 }
 0x310   : > { %v13208_v29 = vld [vmem:[#allocation5 + $0xc0] ss:$2 sm:$0xff]  ;;  %v13239_v61 = vrot.slane %v5593_v19, 4  ;;  %v5596_v13 = vrot.slane %v13220_v44, 5  ;;  %v15321_v21 = vrot.slane %v13104_v4, 1  ;;  %v15265_v6 = vshrl.u32 %v13143_v28, 16 }
 0x311   : > { %v8708_v54 = vmax.f32 %v8664_v52, %v13208_v29  ;;  %7916 = vst.msk [vmem:[#allocation4 + $0xe0] sm:$0xff] %vm2601_vm11, %v7820_v51  ;;  %v8815_v17 = vsel %vm5405_vm6, %v15320_v30, %v8814_v39  ;;  %v13253_v19 = vsel %vm2204_vm9, %v2268_v35, %v15264_v7  ;;  %v4503_v4 = vor.u32 %v13227_v58, %v13193_v23  ;;  %v7126_v51 = vpop.f32.mrf.mxu1  ;;  %v3057_v39 = vpop.permute.xlu0 %3056  ;;  %v9732_v40 = vld [vmem:[#allocation3 + $0x234] sm:$0xf0] }
 0x312   : > { %v2269_v50 = vsel %vm2204_vm9, %v15321_v21, %v2268_v35  ;;  %v5276_v26 = vunpack.c.h.b16 %v13218_v33  ;;  %v974_v24 = vadd.f32 %v12825_v34, %v973_v48  ;;  %v2005_v35 = vshll.u32 %v13143_v28, 16  ;;  %v7375_v58 = vpop.f32.mrf.mxu2  ;;  %v13283_v45 = vpop.permute.xlu2 %3060 }
 0x313   : > { %8752 = vst.msk [vmem:[#allocation6 + $0x40] sm:$0xff] %vm2601_vm11, %v8708_v54  ;;  %v13258_v54 = vpack.c.b16 %v5275_v0, %v5275_v0  ;;  %v13269_v23 = vrot.slane %v15265_v6, 7  ;;  %v7127_v33 = vadd.f32 %v13068_v2, %v7126_v51  ;;  %v3174_v34 = vsel %vm2601_vm11, %v13235_v63, %v3057_v39  ;;  %v13275_v0 = vpop.f32.mrf.mxu3  ;;  %v9730_v39 = vld [vmem:[#allocation3 + $0x228] sm:$0xf]  ;;  %v10299_v7 = vld [vmem:[#allocation3 + $0x230] sm:$0xf0] }
 0x314   : > { %v8107_v5 = vld [vmem:[#allocation4 + $0xd1] sm:$0xff]  ;;  %v5598_v57 = vrot.slane %v5596_v13, 4 }
 0x315   : > { %v8203_v62 = vmax.f32 %v8011_v31, %v8107_v5  ;;  %v8299_v27 = vld [vmem:[#allocation4 + $0xd2] sm:$0xff]  ;;  %v13264_v31 = vpop.permute.xlu1 %2462  ;;  %v10298_v5 = vld [vmem:[#allocation3 + $0x22c] sm:$0xf] }
 0x316   : > { %v8012_v30 = vld [vmem:[#allocation4 + $0xd8] sm:$0xff]  ;;  %v13281_v51 = vld [vmem:[#allocation2 + $0x128] sm:$0xff] }
 0x317   : > { %v8395_v49 = vmax.f32 %v8203_v62, %v8299_v27  ;;  %2364 = vrot.lane.b32.xlu0 %v2269_v50, %s10523_s26  ;;  %v1123_v62 = vmax.f32 %v974_v24, 0.0  ;;  %v9735_v27 = vor.u32 %v10298_v5, %v9732_v40  ;;  %v2949_v50 = vor.u32 %v13269_v23, %v2005_v35 }
 0x318   : > { %v8108_v20 = vld [vmem:[#allocation4 + $0xd9] sm:$0xff]  ;;  %v13288_v24 = vpack.c.b16 %v5276_v26, %v5276_v26  ;;  %v7376_v5 = vadd.f32 %v7375_v58, %v7127_v33  ;;  %v4504_v33 = vrot.slane %v4503_v4, 4  ;;  %v13310_v4 = vrot.slane %v2005_v35, 1 }
 0x319   : > { %8491 = vst.msk [vmem:[#allocation5 + $0xd0] sm:$0xff] %vm2601_vm11, %v8395_v49  ;;  %7701 = vmatmul.bf16.gmra.mxu3 %v9823_v14  ;;  %v3246_v14 = vsel %vm2698_vm12, %v3174_v34, %v13264_v31  ;;  %v8204_v21 = vmax.f32 %v8012_v30, %v8108_v20  ;;  %v8300_v34 = vld [vmem:[#allocation4 + $0xda] sm:$0xff]  ;;  %v1228_v40 = vpack.c.bf16 %v1123_v62, %v1123_v62  ;;  %v975_v62 = vpop.f32.mrf.mxu0  ;;  %v13320_v35 = vsel %vm2504_vm5, %v13281_v51, 0 }
 0x31a   : > { %v13261_v56 = vld [vmem:[#allocation6 + $0x40] sm:$0xff]  ;;  %v3859_v49 = vunpack.c.l.b16 %v3246_v14  ;;  %v3860_v48 = vunpack.c.h.b16 %v3246_v14  ;;  %7417 = vmatmul.bf16.gmra.mxu2 %v9735_v27  ;;  %v2950_v14 = vsel %vm2852_vm10, %v13159_v37, %v2949_v50  ;;  %v7625_v26 = vadd.f32 %v12764_v60, %v7376_v5  ;;  %v13307_v60 = vld [vmem:[%s15246_s2] ss:$0 sm:$0xff]  ;;  %v2162_v50 = vpop.permute.xlu0 %2161 }
 0x31b   : > { %v15267_v1 = vrot.slane %v13261_v56, 2  ;;  %v8396_v20 = vmax.f32 %v8204_v21, %v8300_v34  ;;  %1334 = vst.msk [vmem:[#allocation2 + $0x130] sm:$0xf] %vm1257_vm3, %v1228_v40  ;;  %3070 = vrot.lane.b32.xlu1 %v2950_v14, %s10523_s26  ;;  %v5599_v27 = vrot.slane %v13258_v54, 5  ;;  %v7378_v34 = vpop.f32.mrf.mxu2 }
 0x31c   : > { %v3956_v52 = vpack.c.b16 %v3859_v49, %v3859_v49  ;;  %v7821_v21 = vmax.f32 %v7625_v26, 0.0 }
 0x31d   : > { %v8882_v6 = vsel %vm8820_vm13, %v8815_v17, %v15267_v1  ;;  %v3957_v17 = vpack.c.b16 %v3860_v48, %v3860_v48  ;;  %v9731_v1 = vor.u32 %v10299_v7, %v9730_v39  ;;  %8492 = vst.msk [vmem:[#allocation5 + $0xd8] sm:$0xff] %vm2601_vm11, %v8396_v20  ;;  %v976_v7 = vadd.f32 %v13307_v60, %v975_v62 }
 0x31e   : > { %v8892_v30 = vpack.c.bf16 %v8882_v6, %v8882_v6  ;;  %v4506_v6 = vshll.u32 %v3956_v52, 16  ;;  %v4510_v58 = vshrl.u32 %v3956_v52, 16  ;;  %v7129_v52 = vpop.f32.mrf.mxu1  ;;  %7917 = vst.msk [vmem:[#allocation4 + $0xe8] sm:$0xff] %vm2601_vm11, %v7821_v21  ;;  %v3059_v21 = vpop.permute.xlu1 %3058  ;;  %v5600_v44 = vsel %vm10688_vm8, %v5598_v57, %v5599_v27 }
 0x31f   : > { %2478 = vrot.lane.b32.xlu0 %v13281_v51, %s10522_s25  ;;  %7168 = vmatmul.bf16.gmra.mxu1 %v9731_v1  ;;  %v4516_v39 = vshll.u32 %v3957_v17, 16  ;;  %v7130_v54 = vadd.f32 %v13068_v2, %v7129_v52  ;;  %v1124_v5 = vmax.f32 %v976_v7, 0.0  ;;  %v4520_v26 = vshrl.u32 %v3957_v17, 16  ;;  %5856 = vst [vmem:[#allocation3 + $0x2fc] sm:$0xf] %v5600_v44 }
 0x320   : > { %8909 = vst.msk [vmem:[%s12430_s12 + $0x8] sm:$0xf] %vm8906_vm7, %v8892_v30  ;;  %v4508_v49 = vrot.slane %v4506_v6, 5  ;;  %v4512_v48 = vrot.slane %v4510_v58, 4  ;;  %v15322_v30 = vshrl.u32 %v13052_v22, 16  ;;  %v13324_v6 = vpop.f32.mrf.mxu3  ;;  %v13326_v58 = vrot.slane %v5599_v27, 4 }
 0x321   : > { %v1229_v62 = vpack.c.bf16 %v1124_v5, %v1124_v5  ;;  %v13330_v52 = vrot.slane %v4516_v39, 5  ;;  %v5597_v17 = vsel %vm10688_vm8, %v13239_v61, %v5596_v13  ;;  %v4522_v13 = vrot.slane %v4520_v26, 4 }
 0x322   : > { %v2003_v20 = vor.u32 %v15322_v30, %v13190_v53  ;;  %v4509_v1 = vsel %vm11055_vm15, %v4504_v33, %v4508_v49  ;;  %v4513_v14 = vor.u32 %v4512_v48, %v4508_v49  ;;  %v7379_v53 = vadd.f32 %v7378_v34, %v7130_v54  ;;  %v13338_v33 = vpop.permute.xlu2 %2165  ;;  %v10174_v49 = vld [vmem:[%s10577_s28 + $0x178] sm:$0xff]  ;;  %v10477_v54 = vld [vmem:[#allocation2 + $0xe0] sm:$0xff]  ;;  %5855 = vst [vmem:[#allocation3 + $0x2f0] sm:$0xf] %v5597_v17  ;;  %v2353_v26 = vpop.permute.xlu0 %2352 }
 0x323   : > { %5115 = vst [vmem:[#allocation3 + $0x250] sm:$0xf] %v4509_v1  ;;  %v5277_v30 = vunpack.c.l.b16 %v13320_v35  ;;  %v5278_v48 = vunpack.c.h.b16 %v13320_v35  ;;  %v13345_v39 = vsel %vm2504_vm5, %v10477_v54, %v2162_v50  ;;  %v15268_v1 = vshrl.u32 %v13281_v51, 16  ;;  %9249 = vmatmul.msk.bf16.gmra.mxu0 %vm607_vm2, %v10174_v49  ;;  %v7380_v54 = vpop.f32.mrf.mxu2 }
 0x324   : > { %v2008_v22 = vsel %vm1716_vm4, %v2003_v20, %v13310_v4  ;;  %v4514_v7 = vrot.slane %v4513_v14, 4  ;;  %1335 = vst.msk [vmem:[#allocation2 + $0x134] sm:$0xf] %vm1257_vm3, %v1229_v62  ;;  %v7628_v34 = vadd.f32 %v12842_v43, %v7379_v53  ;;  %v13350_v5 = vld [vmem:[#allocation5 + $0xd0] ss:$2 sm:$0xff]  ;;  %v978_v20 = vpop.f32.mrf.mxu0  ;;  %v3176_v50 = vsel %vm2601_vm11, %v13345_v39, %v3059_v21 }
 0x325   : > { %2175 = vrot.lane.b32.xlu1 %v2008_v22, %s10521_s16  ;;  %v15323_v43 = vmax.f32 %v12919_v10, %v13115_v16  ;;  %v979_v27 = vadd.f32 %v13307_v60, %v978_v20  ;;  %v2013_v62 = vshll.u32 %v13281_v51, 16  ;;  %v8013_v53 = vld [vmem:[#allocation4 + $0xe0] sm:$0xff]  ;;  %v13366_v17 = vrot.slane %v15268_v1, 7 }
 0x326   : > { %v4519_v61 = vsel %vm11055_vm15, %v4514_v7, %v13330_v52  ;;  %v7822_v57 = vmax.f32 %v7628_v34, 0.0  ;;  %v7131_v22 = vpop.f32.mrf.mxu1  ;;  %v8109_v7 = vld [vmem:[#allocation4 + $0xe1] sm:$0xff]  ;;  %v3247_v10 = vsel %vm2698_vm12, %v3176_v50, %v13223_v11  ;;  %v2653_v16 = vsel %vm2601_vm11, %v12992_v8, %v2353_v26 }
 0x327   : > { %v8709_v14 = vmax.f32 %v15323_v43, %v13350_v5  ;;  %5116 = vst [vmem:[#allocation3 + $0x25c] sm:$0xf] %v4519_v61  ;;  %v7132_v21 = vadd.f32 %v13068_v2, %v7131_v22  ;;  %v8205_v34 = vmax.f32 %v8013_v53, %v8109_v7  ;;  %v1125_v61 = vmax.f32 %v979_v27, 0.0  ;;  %v8301_v1 = vld [vmem:[#allocation4 + $0xe2] sm:$0xff] }
 0x328   : > { %v3861_v44 = vunpack.c.l.b16 %v3247_v10  ;;  %v3862_v20 = vunpack.c.h.b16 %v3247_v10  ;;  %v4523_v43 = vor.u32 %v4522_v13, %v13330_v52  ;;  %7918 = vst.msk [vmem:[#allocation4 + $0xf0] sm:$0xff] %vm2601_vm11, %v7822_v57  ;;  %v2952_v22 = vor.u32 %v13366_v17, %v2013_v62  ;;  %v10301_v13 = vld [vmem:[#allocation3 + $0x244] sm:$0xf]  ;;  %v13383_v57 = vpop.f32.mrf.mxu3 }
 0x329   : > { %8753 = vst.msk [vmem:[#allocation6 + $0x48] sm:$0xff] %vm2601_vm11, %v8709_v14  ;;  %v2750_v50 = vsel %vm2698_vm12, %v2653_v16, %v12894_v59  ;;  %v7381_v8 = vadd.f32 %v7380_v54, %v7132_v21  ;;  %v8397_v49 = vmax.f32 %v8205_v34, %v8301_v1  ;;  %v1230_v37 = vpack.c.bf16 %v1125_v61, %v1125_v61  ;;  %v9834_v54 = vld [vmem:[#allocation3 + $0x2f0] sm:$0xf] }
 0x32a   : > { %v9744_v26 = vld [vmem:[#allocation3 + $0x24c] sm:$0xf0]  ;;  %v3958_v40 = vpack.c.b16 %v3861_v44, %v3861_v44  ;;  %v3959_v14 = vpack.c.b16 %v3862_v20, %v3862_v20  ;;  %v2953_v27 = vsel %vm2852_vm10, %v13269_v23, %v2952_v22  ;;  %v3426_v53 = vunpack.c.l.b16 %v2750_v50  ;;  %v2164_v23 = vpop.permute.xlu1 %2163  ;;  %v2357_v20 = vpop.permute.xlu2 %2356 }
 0x32b   : > { %v3427_v7 = vunpack.c.h.b16 %v2750_v50  ;;  %v7630_v52 = vadd.f32 %v12881_v3, %v7381_v8  ;;  %8493 = vst.msk [vmem:[#allocation5 + $0xe0] sm:$0xff] %vm2601_vm11, %v8397_v49  ;;  %v13386_v10 = vpack.c.b16 %v5277_v30, %v5277_v30  ;;  %3072 = vrot.lane.b32.xlu2 %v2953_v27, %s10523_s26  ;;  %v9747_v21 = vor.u32 %v10301_v13, %v9744_v26  ;;  %v10324_v30 = vld [vmem:[#allocation3 + $0x2f8] sm:$0xf0] }
 0x32c   : > { %v4526_v59 = vshll.u32 %v3958_v40, 16  ;;  %v4530_v1 = vshrl.u32 %v3958_v40, 16  ;;  %v4524_v16 = vrot.slane %v4523_v43, 4  ;;  %1336 = vst.msk [vmem:[#allocation2 + $0x138] sm:$0xf] %vm1257_vm3, %v1230_v37  ;;  %v4536_v3 = vshll.u32 %v3959_v14, 16  ;;  %v980_v44 = vpop.f32.mrf.mxu0 }
 0x32d   : > { %2366 = vrot.lane.b32.xlu1 %v13253_v19, %s10523_s26  ;;  %v3522_v34 = vpack.c.b16 %v3426_v53, %v3426_v53  ;;  %v3523_v61 = vpack.c.b16 %v3427_v7, %v3427_v7  ;;  %v7823_v8 = vmax.f32 %v7630_v52, 0.0  ;;  %v981_v49 = vadd.f32 %v13307_v60, %v980_v44  ;;  %7422 = vmatmul.bf16.gmra.mxu2 %v9747_v21  ;;  %v8014_v7 = vld [vmem:[#allocation4 + $0xe8] sm:$0xff]  ;;  %v9742_v44 = vld [vmem:[#allocation3 + $0x240] sm:$0xf] }
 0x32e   : > { %v4528_v22 = vrot.slane %v4526_v59, 5  ;;  %v4532_v50 = vrot.slane %v4530_v1, 4  ;;  %v7134_v19 = vpop.f32.mrf.mxu1  ;;  %v13398_v43 = vpack.c.b16 %v5278_v48, %v5278_v48  ;;  %v9835_v37 = vor.u32 %v10324_v30, %v9834_v54  ;;  %v13405_v1 = vld [vmem:[#allocation2 + $0x130] sm:$0xff]  ;;  %v7383_v48 = vpop.f32.mrf.mxu2 }
 0x32f   : > { %v4540_v26 = vshrl.u32 %v3959_v14, 16  ;;  %3714 = vst [vmem:[#allocation3 + $0x258] sm:$0xf] %v3522_v34  ;;  %v13400_v27 = vrot.slane %v2013_v62, 1  ;;  %v8110_v52 = vld [vmem:[#allocation4 + $0xe9] sm:$0xff]  ;;  %v2657_v35 = vsel %vm2601_vm11, %v13235_v63, %v2357_v20  ;;  %v1126_v62 = vmax.f32 %v981_v49, 0.0 }
 0x330   : > { %v13393_v40 = vld [vmem:[#allocation6 + $0x48] sm:$0x7]  ;;  %v4529_v13 = vsel %vm11055_vm15, %v4524_v16, %v4528_v22  ;;  %v4533_v59 = vor.u32 %v4532_v50, %v4528_v22  ;;  %3715 = vst [vmem:[#allocation3 + $0x264] sm:$0xf] %v3523_v61  ;;  %v8206_v21 = vmax.f32 %v8014_v7, %v8110_v52  ;;  %7706 = vmatmul.bf16.gmra.mxu3 %v9835_v37  ;;  %v15324_v14 = vshrl.u32 %v13143_v28, 16  ;;  %v10478_v7 = vld [vmem:[#allocation2 + $0xe8] sm:$0xff] }
 0x331   : > { %v15270_v53 = vrot.slane %v13393_v40, 2  ;;  %5117 = vst [vmem:[#allocation3 + $0x268] sm:$0xf] %v4529_v13  ;;  %v7135_v34 = vadd.f32 %v13068_v2, %v7134_v19  ;;  %v15325_v16 = vrot.slane %v13261_v56, 2  ;;  %v8302_v30 = vld [vmem:[#allocation4 + $0xea] sm:$0xff]  ;;  %v13418_v20 = vrot.slane %v4536_v3, 5 }
 0x332   : > { %v2011_v54 = vor.u32 %v15324_v14, %v13310_v4  ;;  %v4534_v63 = vrot.slane %v4533_v59, 4  ;;  %7919 = vst.msk [vmem:[#allocation4 + $0xf8] sm:$0xff] %vm2601_vm11, %v7823_v8  ;;  %v2754_v28 = vsel %vm2698_vm12, %v2657_v35, %v13264_v31  ;;  %v10302_v4 = vld [vmem:[#allocation3 + $0x248] sm:$0xf0]  ;;  %v8398_v50 = vmax.f32 %v8206_v21, %v8302_v30  ;;  %v10175_v8 = vld [vmem:[%s10577_s28 + $0x180] sm:$0xff]  ;;  %v13443_v35 = vpop.permute.xlu0 %2466 }
 0x333   : > { %v8823_v61 = vsel %vm8820_vm13, %v15325_v16, %v15270_v53  ;;  %v13423_v49 = vrot.slane %v4540_v26, 4  ;;  %v1231_v37 = vpack.c.bf16 %v1126_v62, %v1126_v62  ;;  %v13433_v3 = vsel %vm2504_vm5, %v13405_v1, 0  ;;  %9250 = vmatmul.msk.bf16.gmra.mxu0 %vm607_vm2, %v10175_v8 }
 0x334   : > { %v8893_v22 = vpack.c.bf16 %v8823_v61, %v8823_v61  ;;  %v2016_v56 = vsel %vm1716_vm4, %v2011_v54, %v13400_v27  ;;  %v4539_v19 = vsel %vm11055_vm15, %v4534_v63, %v13418_v20  ;;  %v3430_v31 = vunpack.c.l.b16 %v2754_v28  ;;  %v983_v21 = vpop.f32.mrf.mxu0  ;;  %8494 = vst.msk [vmem:[#allocation5 + $0xe8] sm:$0xff] %vm2601_vm11, %v8398_v50 }
 0x335   : > { %2177 = vrot.lane.b32.xlu2 %v2016_v56, %s10521_s16  ;;  %2480 = vrot.lane.b32.xlu1 %v13405_v1, %s10522_s25  ;;  %v3431_v26 = vunpack.c.h.b16 %v2754_v28  ;;  %v13441_v52 = vsel %vm2504_vm5, %v10478_v7, %v2164_v23  ;;  %v9743_v13 = vor.u32 %v10302_v4, %v9742_v44  ;;  %v7384_v59 = vadd.f32 %v7383_v48, %v7135_v34  ;;  %v2355_v44 = vpop.permute.xlu1 %2354  ;;  %v13454_v48 = vpop.f32.mrf.mxu3 }
 0x336   : > { %8910 = vst.msk [vmem:[%s12430_s12 + $0xc] sm:$0xf] %vm8906_vm7, %v8893_v22  ;;  %v15326_v62 = vrot.slane %v13288_v24, 5  ;;  %v5605_v54 = vrot.slane %v13386_v10, 5  ;;  %v3526_v16 = vpack.c.b16 %v3430_v31, %v3430_v31  ;;  %v15327_v61 = vrot.slane %v12963_v55, 1  ;;  %v7136_v63 = vpop.f32.mrf.mxu1 }
 0x337   : > { %v15328_v30 = vrot.slane %v12840_v12, 1  ;;  %v5608_v34 = vrot.slane %v13398_v43, 5  ;;  %v4543_v28 = vor.u32 %v13423_v49, %v13418_v20  ;;  %5118 = vst [vmem:[#allocation3 + $0x274] sm:$0xf] %v4539_v19  ;;  %v3527_v4 = vpack.c.b16 %v3431_v26, %v3431_v26  ;;  %7173 = vmatmul.bf16.gmra.mxu1 %v9743_v13  ;;  %v8015_v49 = vld [vmem:[#allocation4 + $0xf0] sm:$0xff]  ;;  %v7385_v13 = vpop.f32.mrf.mxu2 }
 0x338   : > { %v5604_v14 = vrot.slane %v15326_v62, 4  ;;  %v7633_v22 = vadd.f32 %v12949_v42, %v7384_v59  ;;  %1337 = vst.msk [vmem:[#allocation2 + $0x13c] sm:$0xf] %vm1257_vm3, %v1231_v37  ;;  %v5279_v12 = vunpack.c.l.b16 %v13433_v3  ;;  %v15329_v50 = vmov %v15326_v62 }
 0x339   : > { %v2273_v23 = vsel %vm2204_vm9, %v15328_v30, %v15327_v61  ;;  %v5603_v56 = vsel %vm10688_vm8, %v13326_v58, %v15329_v50  ;;  %v3178_v31 = vsel %vm2601_vm11, %v13441_v52, %v13283_v45  ;;  %v984_v20 = vadd.f32 %v13307_v60, %v983_v21  ;;  %v8111_v42 = vld [vmem:[#allocation4 + $0xf1] sm:$0xff]  ;;  %3718 = vst [vmem:[#allocation3 + $0x288] sm:$0xf] %v3526_v16 }
 0x33a   : > { %v7824_v19 = vmax.f32 %v7633_v22, 0.0  ;;  %v3248_v37 = vsel %vm2698_vm12, %v3178_v31, %v13443_v35  ;;  %v7137_v24 = vadd.f32 %v13068_v2, %v7136_v63  ;;  %v2655_v58 = vsel %vm2601_vm11, %v13129_v15, %v2355_v44  ;;  %3719 = vst [vmem:[#allocation3 + $0x294] sm:$0xf] %v3527_v4  ;;  %v8303_v59 = vld [vmem:[#allocation4 + $0xf2] sm:$0xff] }
 0x33b   : > { %v8207_v26 = vmax.f32 %v8015_v49, %v8111_v42  ;;  %v5606_v45 = vsel %vm10688_vm8, %v5604_v14, %v5605_v54  ;;  %v3863_v8 = vunpack.c.l.b16 %v3248_v37  ;;  %v2021_v7 = vshll.u32 %v13405_v1, 16  ;;  %5857 = vst [vmem:[#allocation3 + $0x308] sm:$0xf] %v5603_v56  ;;  %v13487_v44 = vld [vmem:[#allocation5 + $0xe0] ss:$2 sm:$0xff] }
 0x33c   : > { %7920 = vst.msk [vmem:[#allocation4 + $0x100] sm:$0xff] %vm2601_vm11, %v7824_v19  ;;  %v3864_v21 = vunpack.c.h.b16 %v3248_v37  ;;  %v1127_v62 = vmax.f32 %v984_v20, 0.0  ;;  %v2025_v16 = vshrl.u32 %v13405_v1, 16  ;;  %v2752_v15 = vsel %vm2698_vm12, %v2655_v58, %v13139_v25  ;;  %v985_v49 = vpop.f32.mrf.mxu0 }
 0x33d   : > { %v8399_v61 = vmax.f32 %v8207_v26, %v8303_v59  ;;  %v3960_v30 = vpack.c.b16 %v3863_v8, %v3863_v8  ;;  %2368 = vrot.lane.b32.xlu2 %v2273_v23, %s10523_s26  ;;  %v3428_v14 = vunpack.c.l.b16 %v2752_v15  ;;  %v3429_v63 = vunpack.c.h.b16 %v2752_v15  ;;  %5858 = vst [vmem:[#allocation3 + $0x314] sm:$0xf] %v5606_v45  ;;  %v13504_v8 = vpop.f32.mrf.mxu3  ;;  %v10304_v15 = vld [vmem:[#allocation3 + $0x25c] sm:$0xf] }
 0x33e   : > { %v13489_v4 = vpack.c.b16 %v3864_v21, %v3864_v21  ;;  %v1232_v22 = vpack.c.bf16 %v1127_v62, %v1127_v62  ;;  %v13493_v50 = vrot.slane %v2025_v16, 7  ;;  %v7386_v31 = vadd.f32 %v7385_v13, %v7137_v24  ;;  %v8016_v13 = vld [vmem:[#allocation4 + $0xf8] sm:$0xff]  ;;  %v7139_v62 = vpop.f32.mrf.mxu1 }
 0x33f   : > { %v4544_v20 = vrot.slane %v4543_v28, 4  ;;  %8495 = vst.msk [vmem:[#allocation5 + $0xf0] sm:$0xff] %vm2601_vm11, %v8399_v61  ;;  %v4546_v25 = vshll.u32 %v3960_v30, 16  ;;  %v4550_v56 = vshrl.u32 %v3960_v30, 16  ;;  %v5376_v23 = vpack.c.b16 %v5279_v12, %v5279_v12  ;;  %v13502_v24 = vld [vmem:[#allocation2 + $0x138] sm:$0xff] }
 0x340   : > { %v4556_v42 = vshll.u32 %v13489_v4, 16  ;;  %1338 = vst.msk [vmem:[#allocation2 + $0x140] sm:$0xf] %vm1257_vm3, %v1232_v22  ;;  %v2955_v19 = vor.u32 %v13493_v50, %v2021_v7  ;;  %v3524_v37 = vpack.c.b16 %v3428_v14, %v3428_v14  ;;  %v3525_v45 = vpack.c.b16 %v3429_v63, %v3429_v63  ;;  %v9756_v61 = vld [vmem:[#allocation3 + $0x264] sm:$0xf0] }
 0x341   : > { %v4548_v58 = vrot.slane %v4546_v25, 5  ;;  %v4552_v26 = vrot.slane %v4550_v56, 4  ;;  %v7635_v28 = vadd.f32 %v13023_v38, %v7386_v31  ;;  %v5607_v12 = vrot.slane %v5605_v54, 4  ;;  %v9754_v54 = vld [vmem:[#allocation3 + $0x258] sm:$0xf] }
 0x342   : > { %v2956_v59 = vsel %vm2852_vm10, %v13366_v17, %v2955_v19  ;;  %3716 = vst [vmem:[#allocation3 + $0x270] sm:$0xf] %v3524_v37  ;;  %v986_v21 = vadd.f32 %v13307_v60, %v985_v49  ;;  %v5280_v30 = vunpack.c.h.b16 %v13433_v3  ;;  %v10305_v22 = vld [vmem:[#allocation3 + $0x260] sm:$0xf0]  ;;  %v5611_v17 = vrot.slane %v5376_v23, 5 }
 0x343   : > { %v8112_v38 = vld [vmem:[#allocation4 + $0xf9] sm:$0xff]  ;;  %v4549_v14 = vsel %vm11055_vm15, %v4544_v20, %v4548_v58  ;;  %v4553_v63 = vor.u32 %v4552_v26, %v4548_v58  ;;  %3074 = vrot.lane.b32.xlu0 %v2956_v59, %s10523_s26  ;;  %3717 = vst [vmem:[#allocation3 + $0x27c] sm:$0xf] %v3525_v45  ;;  %v7825_v10 = vmax.f32 %v7635_v28, 0.0  ;;  %v13515_v56 = vrot.slane %v4556_v42, 5  ;;  %v7388_v28 = vpop.f32.mrf.mxu2 }
 0x344   : > { %v8208_v31 = vmax.f32 %v8016_v13, %v8112_v38  ;;  %v8304_v25 = vld [vmem:[#allocation4 + $0xfa] sm:$0xff]  ;;  %5119 = vst [vmem:[#allocation3 + $0x280] sm:$0xf] %v4549_v14  ;;  %v1128_v49 = vmax.f32 %v986_v21, 0.0  ;;  %v9846_v19 = vld [vmem:[#allocation3 + $0x308] sm:$0xf]  ;;  %v7140_v20 = vadd.f32 %v13068_v2, %v7139_v62  ;;  %v9759_v58 = vor.u32 %v10304_v15, %v9756_v61 }
 0x345   : > { %v10327_v3 = vld [vmem:[#allocation3 + $0x310] sm:$0xf0]  ;;  %v4554_v37 = vrot.slane %v4553_v63, 4  ;;  %7921 = vst.msk [vmem:[#allocation4 + $0x108] sm:$0xff] %vm2601_vm11, %v7825_v10  ;;  %2482 = vrot.lane.b32.xlu2 %v13502_v24, %s10522_s25  ;;  %v13523_v42 = vrot.slane %v2021_v7, 1  ;;  %v5610_v13 = vrot.slane %v5608_v34, 4  ;;  %v13527_v59 = vpack.c.b16 %v5280_v30, %v5280_v30 }
 0x346   : > { %v8400_v26 = vmax.f32 %v8208_v31, %v8304_v25  ;;  %v9847_v45 = vor.u32 %v10327_v3, %v9846_v19  ;;  %v1233_v23 = vpack.c.bf16 %v1128_v49, %v1128_v49  ;;  %7427 = vmatmul.bf16.gmra.mxu2 %v9759_v58  ;;  %v15330_v21 = vshrl.u32 %v13281_v51, 16  ;;  %v13554_v31 = vld [vmem:[#allocation2 + $0x118] sm:$0xff] }
 0x347   : > { %v4559_v2 = vsel %vm11055_vm15, %v4554_v37, %v13515_v56  ;;  %v5609_v7 = vsel %vm10688_vm8, %v5607_v12, %v5608_v34  ;;  %v9755_v15 = vor.u32 %v10305_v22, %v9754_v54  ;;  %v5612_v61 = vsel %vm10688_vm8, %v5610_v13, %v5611_v17  ;;  %v8017_v12 = vld [vmem:[#allocation4 + $0x100] sm:$0xff] }
 0x348   : > { %8496 = vst.msk [vmem:[#allocation5 + $0xf8] sm:$0xff] %vm2601_vm11, %v8400_v26  ;;  %7711 = vmatmul.bf16.gmra.mxu3 %v9847_v45  ;;  %v2019_v62 = vor.u32 %v15330_v21, %v13400_v27  ;;  %v7389_v30 = vadd.f32 %v7388_v28, %v7140_v20  ;;  %v5613_v38 = vrot.slane %v5611_v17, 4  ;;  %v13547_v27 = vpop.f32.mrf.mxu3  ;;  %v15272_v34 = vrot.slane %v13527_v59, 5  ;;  %v10480_v20 = vld [vmem:[#allocation2 + $0xf0] sm:$0xff]  ;;  %v988_v45 = vpop.f32.mrf.mxu0  ;;  %v10176_v13 = vld [vmem:[%s10577_s28 + $0x188] sm:$0xff] }
 0x349   : > { %5120 = vst [vmem:[#allocation3 + $0x28c] sm:$0xf] %v4559_v2  ;;  %7178 = vmatmul.bf16.gmra.mxu1 %v9755_v15  ;;  %v13552_v17 = vsel %vm2504_vm5, %v13502_v24, 0  ;;  %v15271_v25 = vrot.slane %v13554_v31, 1  ;;  %v4560_v19 = vshrl.u32 %v13489_v4, 16  ;;  %v13569_v58 = vsel %vm2504_vm5, %v10480_v20, %v13338_v33  ;;  %v7141_v15 = vpop.f32.mrf.mxu1  ;;  %9251 = vmatmul.msk.bf16.gmra.mxu0 %vm607_vm2, %v10176_v13  ;;  %v13603_v20 = vpop.permute.xlu2 %2470 }
 0x34a   : > { %1339 = vst.msk [vmem:[#allocation2 + $0x144] sm:$0xf] %vm1257_vm3, %v1233_v23  ;;  %v2024_v14 = vsel %vm1716_vm4, %v2019_v62, %v13523_v42  ;;  %v7638_v43 = vadd.f32 %v13071_v9, %v7389_v30  ;;  %v5615_v9 = vsel %vm10688_vm8, %v5613_v38, %v15272_v34  ;;  %v5281_v37 = vunpack.c.l.b16 %v13552_v17 }
 0x34b   : > { %2179 = vrot.lane.b32.xlu0 %v2024_v14, %s10521_s16  ;;  %5859 = vst [vmem:[#allocation3 + $0x320] sm:$0xf] %v5609_v7  ;;  %v15269_v23 = vshrl.u32 %v13502_v24, 16  ;;  %v15331_v4 = vrot.slane %v12963_v55, 1  ;;  %v4562_v2 = vrot.slane %v4560_v19, 4  ;;  %v5282_v21 = vunpack.c.h.b16 %v13552_v17  ;;  %v13582_v14 = vpop.permute.xlu1 %2468 }
 0x34c   : > { %v8113_v63 = vld [vmem:[#allocation4 + $0x101] sm:$0xff]  ;;  %5860 = vst [vmem:[#allocation3 + $0x32c] sm:$0xf] %v5612_v61  ;;  %v7826_v54 = vmax.f32 %v7638_v43, 0.0  ;;  %v989_v7 = vadd.f32 %v13307_v60, %v988_v45  ;;  %v2029_v33 = vshll.u32 %v13502_v24, 16  ;;  %v3063_v61 = vpop.permute.xlu0 %3062 }
 0x34d   : > { %v8209_v10 = vmax.f32 %v8017_v12, %v8113_v63  ;;  %v8305_v22 = vld [vmem:[#allocation4 + $0x102] sm:$0xff]  ;;  %5861 = vst [vmem:[#allocation3 + $0x338] sm:$0xf] %v5615_v9  ;;  %v2275_v28 = vsel %vm2204_vm9, %v15331_v4, %v15271_v25  ;;  %v13586_v55 = vrot.slane %v15269_v23, 7  ;;  %v13591_v43 = vld [vmem:[%s15248_s4] ss:$0 sm:$0xff]  ;;  %v3180_v63 = vsel %vm2601_vm11, %v13569_v58, %v3063_v61 }
 0x34e   : > { %7922 = vst.msk [vmem:[#allocation4 + $0x110] sm:$0xff] %vm2601_vm11, %v7826_v54  ;;  %v9768_v30 = vld [vmem:[#allocation3 + $0x27c] sm:$0xf0]  ;;  %v7142_v12 = vadd.f32 %v13591_v43, %v7141_v15  ;;  %v10307_v54 = vld [vmem:[#allocation3 + $0x274] sm:$0xf]  ;;  %v1129_v17 = vmax.f32 %v989_v7, 0.0  ;;  %v3249_v9 = vsel %vm2698_vm12, %v3180_v63, %v13582_v14  ;;  %v4563_v15 = vor.u32 %v4562_v2, %v13515_v56 }
 0x34f   : > { %v13561_v49 = vld [vmem:[#allocation5 + $0xf0] ss:$2 sm:$0xff]  ;;  %v8401_v3 = vmax.f32 %v8209_v10, %v8305_v22  ;;  %v7390_v10 = vpop.f32.mrf.mxu2  ;;  %v13597_v22 = vpack.c.b16 %v5281_v37, %v5281_v37  ;;  %v9771_v19 = vor.u32 %v10307_v54, %v9768_v30  ;;  %v2958_v4 = vor.u32 %v13586_v55, %v2029_v33  ;;  %v9766_v63 = vld [vmem:[#allocation3 + $0x270] sm:$0xf] }
 0x350   : > { %v7391_v13 = vadd.f32 %v7390_v10, %v7142_v12  ;;  %v1234_v61 = vpack.c.bf16 %v1129_v17, %v1129_v17  ;;  %v10308_v30 = vld [vmem:[#allocation3 + $0x278] sm:$0xf0]  ;;  %v5379_v56 = vpack.c.b16 %v5282_v21, %v5282_v21 }
 0x351   : > { %8497 = vst.msk [vmem:[#allocation5 + $0x100] sm:$0xff] %vm2601_vm11, %v8401_v3  ;;  %v13601_v3 = vpop.f32.mrf.mxu3  ;;  %v13607_v7 = vld [vmem:[#allocation2 + $0x140] sm:$0xff]  ;;  %v2959_v23 = vsel %vm2852_vm10, %v13493_v50, %v2958_v4  ;;  %v5617_v12 = vrot.slane %v13597_v22, 5  ;;  %v4564_v22 = vrot.slane %v4563_v15, 4 }
 0x352   : > { %v9858_v26 = vld [vmem:[#allocation3 + $0x320] sm:$0xf]  ;;  %v7640_v34 = vadd.f32 %v13125_v32, %v7391_v13  ;;  %1340 = vst.msk [vmem:[#allocation2 + $0x148] sm:$0xf] %vm1257_vm3, %v1234_v61  ;;  %3076 = vrot.lane.b32.xlu1 %v2959_v23, %s10523_s26  ;;  %v7144_v32 = vpop.f32.mrf.mxu1 }
 0x353   : > { %v10330_v62 = vld [vmem:[#allocation3 + $0x328] sm:$0xf0]  ;;  %2370 = vrot.lane.b32.xlu0 %v2275_v28, %s10523_s26  ;;  %v3865_v28 = vunpack.c.l.b16 %v3249_v9 }
 0x354   : > { %v9859_v38 = vor.u32 %v10330_v62, %v9858_v26  ;;  %v8018_v26 = vld [vmem:[#allocation4 + $0x108] sm:$0xff]  ;;  %v3866_v62 = vunpack.c.h.b16 %v3249_v9  ;;  %v990_v9 = vpop.f32.mrf.mxu0 }
 0x355   : > { %v8114_v45 = vld [vmem:[#allocation4 + $0x109] sm:$0xff]  ;;  %v3962_v53 = vpack.c.b16 %v3865_v28, %v3865_v28  ;;  %v991_v50 = vadd.f32 %v13307_v60, %v990_v9 }
 0x356   : > { %v8210_v37 = vmax.f32 %v8018_v26, %v8114_v45  ;;  %7432 = vmatmul.bf16.gmra.mxu2 %v9771_v19  ;;  %v8306_v54 = vld [vmem:[#allocation4 + $0x10a] sm:$0xff]  ;;  %v3963_v25 = vpack.c.b16 %v3866_v62, %v3866_v62  ;;  %v7827_v19 = vmax.f32 %v7640_v34, 0.0  ;;  %v13617_v26 = vrot.slane %v2029_v33, 1 }
 0x357   : > { %v4566_v2 = vshll.u32 %v3962_v53, 16  ;;  %v4570_v17 = vshrl.u32 %v3962_v53, 16  ;;  %v7393_v21 = vpop.f32.mrf.mxu2  ;;  %v5619_v53 = vrot.slane %v5617_v12, 4  ;;  %v1130_v28 = vmax.f32 %v991_v50, 0.0  ;;  %v10482_v50 = vld [vmem:[#allocation2 + $0x120] sm:$0xff] }
 0x358   : > { %7716 = vmatmul.bf16.gmra.mxu3 %v9859_v38  ;;  %v8402_v10 = vmax.f32 %v8210_v37, %v8306_v54  ;;  %v9767_v38 = vor.u32 %v10308_v30, %v9766_v63  ;;  %v4576_v23 = vshll.u32 %v3963_v25, 16  ;;  %7923 = vst.msk [vmem:[#allocation4 + $0x118] sm:$0xff] %vm2601_vm11, %v7827_v19  ;;  %v2027_v34 = vor.u32 %v2025_v16, %v13523_v42  ;;  %v13630_v63 = vpop.permute.xlu2 %3066  ;;  %v2168_v42 = vpop.permute.xlu0 %2167 }
 0x359   : > { %v4568_v45 = vrot.slane %v4566_v2, 5  ;;  %v4572_v4 = vrot.slane %v4570_v17, 4  ;;  %v7145_v33 = vadd.f32 %v13591_v43, %v7144_v32  ;;  %v15332_v62 = vrot.slane %v13527_v59, 5  ;;  %v13636_v2 = vpop.f32.mrf.mxu3 }
 0x35a   : > { %8498 = vst.msk [vmem:[#allocation5 + $0x108] sm:$0xff] %vm2601_vm11, %v8402_v10  ;;  %7183 = vmatmul.bf16.gmra.mxu1 %v9767_v38  ;;  %v5620_v37 = vrot.slane %v5379_v56, 5  ;;  %v1235_v30 = vpack.c.bf16 %v1130_v28, %v1130_v28  ;;  %v2032_v54 = vsel %vm1716_vm4, %v2027_v34, %v13617_v26  ;;  %v3314_v16 = vsel %vm2504_vm5, %v13607_v7, 0 }
 0x35b   : > { %2484 = vrot.lane.b32.xlu0 %v13607_v7, %s10522_s25  ;;  %v5616_v13 = vrot.slane %v15332_v62, 4  ;;  %v4569_v15 = vsel %vm11055_vm15, %v4564_v22, %v4568_v45  ;;  %v4573_v61 = vor.u32 %v4572_v4, %v4568_v45  ;;  %v7394_v10 = vadd.f32 %v7393_v21, %v7145_v33  ;;  %2181 = vrot.lane.b32.xlu1 %v2032_v54, %s10521_s16  ;;  %v8019_v21 = vld [vmem:[#allocation4 + $0x110] sm:$0xff]  ;;  %v9778_v62 = vld [vmem:[#allocation3 + $0x288] sm:$0xf]  ;;  %v10310_v54 = vld [vmem:[#allocation3 + $0x28c] sm:$0xf] }
 0x35c   : > { %5121 = vst [vmem:[#allocation3 + $0x298] sm:$0xf] %v4569_v15  ;;  %v13638_v56 = vrot.slane %v4576_v23, 5  ;;  %v4580_v17 = vshrl.u32 %v3963_v25, 16  ;;  %v8668_v38 = vmax.f32 %v13208_v29, %v13487_v44  ;;  %v2276_v32 = vrot.slane %v10482_v50, 1 }
 0x35d   : > { %v4574_v59 = vrot.slane %v4573_v61, 4  ;;  %v5618_v9 = vsel %vm10688_vm8, %v5616_v13, %v5617_v12  ;;  %1341 = vst.msk [vmem:[#allocation2 + $0x14c] sm:$0xf] %vm1257_vm3, %v1235_v30  ;;  %v7643_v19 = vadd.f32 %v13176_v46, %v7394_v10  ;;  %v5621_v22 = vsel %vm10688_vm8, %v5619_v53, %v5620_v37 }
 0x35e   : > { %v5283_v12 = vunpack.c.l.b16 %v3314_v16  ;;  %5862 = vst [vmem:[#allocation3 + $0x344] sm:$0xf] %v5618_v9  ;;  %v2278_v29 = vrot.slane %v13281_v51, 1  ;;  %v15273_v44 = vrot.slane %v13405_v1, 1  ;;  %v5284_v46 = vunpack.c.h.b16 %v3314_v16  ;;  %v10311_v16 = vld [vmem:[#allocation3 + $0x290] sm:$0xf0]  ;;  %v993_v9 = vpop.f32.mrf.mxu0 }
 0x35f   : > { %v4579_v25 = vsel %vm11055_vm15, %v4574_v59, %v13638_v56  ;;  %v7828_v23 = vmax.f32 %v7643_v19, 0.0  ;;  %v13657_v28 = vrot.slane %v4580_v17, 4  ;;  %v8115_v53 = vld [vmem:[#allocation4 + $0x111] sm:$0xff]  ;;  %5863 = vst [vmem:[#allocation3 + $0x350] sm:$0xf] %v5621_v22  ;;  %v13659_v34 = vrot.slane %v5620_v37, 4 }
 0x360   : > { %5122 = vst [vmem:[#allocation3 + $0x2a4] sm:$0xf] %v4579_v25  ;;  %v8211_v33 = vmax.f32 %v8019_v21, %v8115_v53  ;;  %v2041_v51 = vshrl.u32 %v13607_v7, 16  ;;  %v8307_v13 = vld [vmem:[#allocation4 + $0x112] sm:$0xff]  ;;  %v13663_v15 = vpack.c.b16 %v5283_v12, %v5283_v12  ;;  %v15333_v61 = vrot.slane %v13554_v31, 1 }
 0x361   : > { %v13649_v45 = vld [vmem:[#allocation5 + $0x100] ss:$2 sm:$0xff]  ;;  %7924 = vst.msk [vmem:[#allocation4 + $0x120] sm:$0xff] %vm2601_vm11, %v7828_v23  ;;  %v13670_v37 = vsel %vm2204_vm9, %v2276_v32, %v2278_v29  ;;  %v13675_v10 = vsel %vm2204_vm9, %v2278_v29, %v15273_v44  ;;  %v13677_v17 = vpack.c.b16 %v5284_v46, %v5284_v46  ;;  %v994_v12 = vadd.f32 %v13307_v60, %v993_v9  ;;  %v7146_v29 = vpop.f32.mrf.mxu1  ;;  %v9870_v23 = vld [vmem:[#allocation3 + $0x338] sm:$0xf] }
 0x362   : > { %v8712_v4 = vmax.f32 %v8668_v38, %v13649_v45  ;;  %v2277_v30 = vsel %vm2204_vm9, %v15333_v61, %v2276_v32  ;;  %v8403_v59 = vmax.f32 %v8211_v33, %v8307_v13  ;;  %v2037_v38 = vshll.u32 %v13607_v7, 16  ;;  %v10177_v19 = vld [vmem:[%s10577_s28 + $0x190] sm:$0xff]  ;;  %v10483_v22 = vld [vmem:[#allocation2 + $0xf8] sm:$0xff]  ;;  %v13698_v13 = vpop.f32.mrf.mxu3 }
 0x363   : > { %v13682_v31 = vrot.slane %v2041_v51, 7  ;;  %v9780_v50 = vld [vmem:[#allocation3 + $0x294] sm:$0xf0]  ;;  %v4583_v32 = vor.u32 %v13657_v28, %v13638_v56  ;;  %v13688_v25 = vsel %vm2504_vm5, %v10483_v22, %v2168_v42  ;;  %2372 = vrot.lane.b32.xlu1 %v2277_v30, %s10523_s26  ;;  %v7147_v56 = vadd.f32 %v13591_v43, %v7146_v29  ;;  %v3065_v28 = vpop.permute.xlu1 %3064  ;;  %v2359_v42 = vpop.permute.xlu0 %2358  ;;  %9252 = vmatmul.msk.bf16.gmra.mxu0 %vm607_vm2, %v10177_v19 }
 0x364   : > { %8756 = vst.msk [vmem:[#allocation6 + $0x60] sm:$0xff] %vm2601_vm11, %v8712_v4  ;;  %v13691_v4 = vpop.permute.xlu2 %2171  ;;  %v9783_v46 = vor.u32 %v10310_v54, %v9780_v50  ;;  %v9779_v33 = vor.u32 %v10311_v16, %v9778_v62  ;;  %v1131_v54 = vmax.f32 %v994_v12, 0.0  ;;  %v2659_v9 = vsel %vm2601_vm11, %v13345_v39, %v2359_v42  ;;  %v7395_v50 = vpop.f32.mrf.mxu2 }
 0x365   : > { %8499 = vst.msk [vmem:[#allocation5 + $0x110] sm:$0xff] %vm2601_vm11, %v8403_v59  ;;  %v10333_v21 = vld [vmem:[#allocation3 + $0x340] sm:$0xf0]  ;;  %v2961_v53 = vor.u32 %v13682_v31, %v2037_v38  ;;  %v3182_v59 = vsel %vm2601_vm11, %v13688_v25, %v3065_v28  ;;  %v2756_v62 = vsel %vm2698_vm12, %v2659_v9, %v13223_v11  ;;  %v7396_v16 = vadd.f32 %v7395_v50, %v7147_v56 }
 0x366   : > { %v9871_v61 = vor.u32 %v10333_v21, %v9870_v23  ;;  %7437 = vmatmul.bf16.gmra.mxu2 %v9783_v46  ;;  %v3250_v22 = vsel %vm2698_vm12, %v3182_v59, %v13603_v20  ;;  %v1236_v12 = vpack.c.bf16 %v1131_v54, %v1131_v54  ;;  %v3432_v23 = vunpack.c.l.b16 %v2756_v62  ;;  %v8020_v21 = vld [vmem:[#allocation4 + $0x118] sm:$0xff]  ;;  %v13717_v11 = vld [vmem:[#allocation2 + $0x148] sm:$0xff] }
 0x367   : > { %v2962_v30 = vsel %vm2852_vm10, %v13586_v55, %v2961_v53  ;;  %v3867_v29 = vunpack.c.l.b16 %v3250_v22  ;;  %v3868_v39 = vunpack.c.h.b16 %v3250_v22  ;;  %v3433_v53 = vunpack.c.h.b16 %v2756_v62 }
 0x368   : > { %7721 = vmatmul.bf16.gmra.mxu3 %v9871_v61  ;;  %3078 = vrot.lane.b32.xlu2 %v2962_v30, %s10523_s26  ;;  %v8116_v55 = vld [vmem:[#allocation4 + $0x119] sm:$0xff]  ;;  %v7645_v28 = vadd.f32 %v13212_v36, %v7396_v16  ;;  %v13715_v42 = vrot.slane %v2037_v38, 1  ;;  %1342 = vst.msk [vmem:[#allocation2 + $0x150] sm:$0xf] %vm1257_vm3, %v1236_v12  ;;  %v3528_v59 = vpack.c.b16 %v3432_v23, %v3432_v23  ;;  %v15334_v9 = vrot.slane %v13393_v40, 2  ;;  %v995_v38 = vpop.f32.mrf.mxu0 }
 0x369   : > { %v8212_v56 = vmax.f32 %v8020_v21, %v8116_v55  ;;  %v3964_v61 = vpack.c.b16 %v3867_v29, %v3867_v29  ;;  %v3965_v54 = vpack.c.b16 %v3868_v39, %v3868_v39  ;;  %v8308_v30 = vld [vmem:[#allocation4 + $0x11a] sm:$0xff]  ;;  %v3529_v22 = vpack.c.b16 %v3433_v53, %v3433_v53  ;;  %v7149_v23 = vpop.f32.mrf.mxu1 }
 0x36a   : > { %7188 = vmatmul.bf16.gmra.mxu1 %v9779_v33  ;;  %v7829_v36 = vmax.f32 %v7645_v28, 0.0  ;;  %v15335_v62 = vshrl.u32 %v13502_v24, 16  ;;  %3720 = vst [vmem:[#allocation3 + $0x2a0] sm:$0xf] %v3528_v59  ;;  %v4584_v55 = vrot.slane %v4583_v32, 4  ;;  %v5623_v40 = vrot.slane %v13663_v15, 5 }
 0x36b   : > { %v13710_v19 = vld [vmem:[#allocation6 + $0x60] sm:$0xff]  ;;  %v8404_v12 = vmax.f32 %v8212_v56, %v8308_v30  ;;  %v4586_v29 = vshll.u32 %v3964_v61, 16  ;;  %v4590_v39 = vshrl.u32 %v3964_v61, 16  ;;  %3721 = vst [vmem:[#allocation3 + $0x2ac] sm:$0xf] %v3529_v22  ;;  %v996_v53 = vadd.f32 %v13307_v60, %v995_v38  ;;  %2486 = vrot.lane.b32.xlu1 %v13717_v11, %s10522_s25  ;;  %v2170_v24 = vpop.permute.xlu1 %2169  ;;  %v13741_v30 = vpop.f32.mrf.mxu3 }
 0x36c   : > { %v8830_v46 = vrot.slane %v13710_v19, 7  ;;  %v2035_v33 = vor.u32 %v15335_v62, %v13617_v26  ;;  %v2363_v21 = vpop.permute.xlu2 %2362  ;;  %v4596_v56 = vshll.u32 %v3965_v54, 16  ;;  %v7398_v32 = vpop.f32.mrf.mxu2  ;;  %v4600_v15 = vshrl.u32 %v3965_v54, 16  ;;  %7925 = vst.msk [vmem:[#allocation4 + $0x128] sm:$0xff] %vm2601_vm11, %v7829_v36 }
 0x36d   : > { %v4588_v26 = vrot.slane %v4586_v29, 5  ;;  %v4592_v28 = vrot.slane %v4590_v39, 4  ;;  %8500 = vst.msk [vmem:[#allocation5 + $0x118] sm:$0xff] %vm2601_vm11, %v8404_v12  ;;  %v1132_v59 = vmax.f32 %v996_v53, 0.0  ;;  %v2663_v60 = vsel %vm2601_vm11, %v13569_v58, %v2363_v21  ;;  %v10484_v21 = vld [vmem:[#allocation2 + $0x100] sm:$0xff] }
 0x36e   : > { %v8883_v50 = vsel %vm8829_vm14, %v15334_v9, %v8830_v46  ;;  %v15275_v9 = vrot.slane %v13677_v17, 5  ;;  %v2040_v61 = vsel %vm1716_vm4, %v2035_v33, %v13715_v42  ;;  %v8669_v22 = vmax.f32 %v13350_v5, %v13561_v49 }
 0x36f   : > { %v8894_v16 = vpack.c.bf16 %v8883_v50, %v8883_v50  ;;  %v7150_v50 = vadd.f32 %v13591_v43, %v7149_v23  ;;  %v4589_v38 = vsel %vm11055_vm15, %v4584_v55, %v4588_v26  ;;  %v4593_v62 = vor.u32 %v4592_v28, %v4588_v26  ;;  %v13766_v26 = vpop.permute.xlu0 %2472 }
 0x370   : > { %2183 = vrot.lane.b32.xlu2 %v2040_v61, %s10521_s16  ;;  %v13751_v54 = vsel %vm2504_vm5, %v13717_v11, 0  ;;  %v13753_v33 = vrot.slane %v5623_v40, 4  ;;  %v13757_v58 = vrot.slane %v15275_v9, 4  ;;  %5123 = vst [vmem:[#allocation3 + $0x2b0] sm:$0xf] %v4589_v38  ;;  %v1237_v5 = vpack.c.bf16 %v1132_v59, %v1132_v59  ;;  %v998_v28 = vpop.f32.mrf.mxu0 }
 0x371   : > { %8911 = vst.msk [vmem:[%s12430_s12 + $0x10] sm:$0xf] %vm8906_vm7, %v8894_v16  ;;  %v2760_v49 = vsel %vm2698_vm12, %v2663_v60, %v13582_v14  ;;  %v4594_v16 = vrot.slane %v4593_v62, 4  ;;  %v4598_v12 = vrot.slane %v4596_v56, 5  ;;  %v4602_v39 = vrot.slane %v4600_v15, 4  ;;  %v7151_v15 = vpop.f32.mrf.mxu1 }
 0x372   : > { %v3436_v36 = vunpack.c.l.b16 %v2760_v49  ;;  %v3437_v29 = vunpack.c.h.b16 %v2760_v49  ;;  %1343 = vst.msk [vmem:[#allocation2 + $0x154] sm:$0xf] %vm1257_vm3, %v1237_v5  ;;  %v5285_v23 = vunpack.c.l.b16 %v13751_v54  ;;  %v13764_v55 = vsel %vm2504_vm5, %v10484_v21, %v2170_v24 }
 0x373   : > { %v7399_v53 = vadd.f32 %v7398_v32, %v7150_v50  ;;  %v4599_v14 = vsel %vm11055_vm15, %v4594_v16, %v4598_v12  ;;  %v5286_v56 = vunpack.c.h.b16 %v13751_v54  ;;  %v5624_v24 = vsel %vm10688_vm8, %v13659_v34, %v5623_v40  ;;  %v8021_v16 = vld [vmem:[#allocation4 + $0x120] sm:$0xff] }
 0x374   : > { %v3532_v61 = vpack.c.b16 %v3436_v36, %v3436_v36  ;;  %v3533_v59 = vpack.c.b16 %v3437_v29, %v3437_v29  ;;  %5124 = vst [vmem:[#allocation3 + $0x2bc] sm:$0xf] %v4599_v14  ;;  %v3184_v32 = vsel %vm2601_vm11, %v13764_v55, %v13630_v63  ;;  %v2045_v50 = vshll.u32 %v13717_v11, 16  ;;  %v13779_v38 = vld [vmem:[#allocation5 + $0x110] ss:$2 sm:$0xff]  ;;  %v2361_v63 = vpop.permute.xlu1 %2360  ;;  %v7400_v49 = vpop.f32.mrf.mxu2 }
 0x375   : > { %v7648_v60 = vadd.f32 %v13275_v0, %v7399_v53  ;;  %v3251_v62 = vsel %vm2698_vm12, %v3184_v32, %v13766_v26  ;;  %v13786_v0 = vld [vmem:[%s15246_s2] ss:$0 sm:$0xff]  ;;  %v15274_v34 = vshrl.u32 %v13717_v11, 16  ;;  %v7152_v40 = vadd.f32 %v13591_v43, %v7151_v15  ;;  %v8117_v21 = vld [vmem:[#allocation4 + $0x121] sm:$0xff]  ;;  %5864 = vst [vmem:[#allocation3 + $0x35c] sm:$0xf] %v5624_v24 }
 0x376   : > { %3724 = vst [vmem:[#allocation3 + $0x2d0] sm:$0xf] %v3532_v61  ;;  %v999_v5 = vadd.f32 %v13786_v0, %v998_v28  ;;  %v8713_v36 = vmax.f32 %v8669_v22, %v13779_v38  ;;  %v4603_v29 = vor.u32 %v4602_v39, %v4598_v12  ;;  %v3869_v14 = vunpack.c.l.b16 %v3251_v62  ;;  %v8309_v15 = vld [vmem:[#allocation4 + $0x122] sm:$0xff] }
 0x377   : > { %3725 = vst [vmem:[#allocation3 + $0x2dc] sm:$0xf] %v3533_v59  ;;  %v7830_v53 = vmax.f32 %v7648_v60, 0.0  ;;  %v8213_v61 = vmax.f32 %v8021_v16, %v8117_v21  ;;  %v3870_v32 = vunpack.c.h.b16 %v3251_v62  ;;  %v13796_v28 = vrot.slane %v15274_v34, 7  ;;  %v13803_v60 = vpop.f32.mrf.mxu3 }
 0x378   : > { %v1133_v44 = vmax.f32 %v999_v5, 0.0  ;;  %2374 = vrot.lane.b32.xlu2 %v13670_v37, %s10523_s26  ;;  %8757 = vst.msk [vmem:[#allocation6 + $0x68] sm:$0xff] %vm2601_vm11, %v8713_v36  ;;  %v13799_v22 = vpack.c.b16 %v5285_v23, %v5285_v23  ;;  %v3966_v12 = vpack.c.b16 %v3869_v14, %v3869_v14  ;;  %v2661_v39 = vsel %vm2601_vm11, %v13441_v52, %v2361_v63  ;;  %v1000_v52 = vpop.f32.mrf.mxu0 }
 0x379   : > { %v7401_v59 = vadd.f32 %v7400_v49, %v7152_v40  ;;  %v8405_v24 = vmax.f32 %v8213_v61, %v8309_v15  ;;  %7926 = vst.msk [vmem:[#allocation4 + $0x130] sm:$0xff] %vm2601_vm11, %v7830_v53  ;;  %v3967_v37 = vpack.c.b16 %v3870_v32, %v3870_v32  ;;  %v2964_v5 = vor.u32 %v13796_v28, %v2045_v50  ;;  %v7154_v53 = vpop.f32.mrf.mxu1  ;;  %v13815_v14 = vld [vmem:[#allocation2 + $0x150] sm:$0xff] }
 0x37a   : > { %v1238_v62 = vpack.c.bf16 %v1133_v44, %v1133_v44  ;;  %v4606_v16 = vshll.u32 %v3966_v12, 16  ;;  %v4610_v36 = vshrl.u32 %v3966_v12, 16  ;;  %v2758_v23 = vsel %vm2698_vm12, %v2661_v39, %v13443_v35  ;;  %v9882_v61 = vld [vmem:[#allocation3 + $0x350] sm:$0xf] }
 0x37b   : > { %v7650_v21 = vadd.f32 %v13324_v6, %v7401_v59  ;;  %v4604_v40 = vrot.slane %v4603_v29, 4  ;;  %8501 = vst.msk [vmem:[#allocation5 + $0x120] sm:$0xff] %vm2601_vm11, %v8405_v24  ;;  %v4616_v63 = vshll.u32 %v3967_v37, 16  ;;  %v2965_v49 = vsel %vm2852_vm10, %v13682_v31, %v2964_v5  ;;  %v10313_v31 = vld [vmem:[#allocation3 + $0x2a4] sm:$0xf] }
 0x37c   : > { %v3434_v44 = vunpack.c.l.b16 %v2758_v23  ;;  %v4608_v32 = vrot.slane %v4606_v16, 5  ;;  %v4612_v15 = vrot.slane %v4610_v36, 4  ;;  %1344 = vst.msk [vmem:[#allocation2 + $0x158] sm:$0xf] %vm1257_vm3, %v1238_v62  ;;  %3080 = vrot.lane.b32.xlu0 %v2965_v49, %s10523_s26  ;;  %v3435_v6 = vunpack.c.h.b16 %v2758_v23  ;;  %v9792_v24 = vld [vmem:[#allocation3 + $0x2ac] sm:$0xf0]  ;;  %v7403_v5 = vpop.f32.mrf.mxu2 }
 0x37d   : > { %v7831_v35 = vmax.f32 %v7650_v21, 0.0  ;;  %v5629_v29 = vrot.slane %v13799_v22, 5  ;;  %v4620_v12 = vshrl.u32 %v3967_v37, 16  ;;  %v1001_v59 = vadd.f32 %v13786_v0, %v1000_v52  ;;  %v10336_v34 = vld [vmem:[#allocation3 + $0x358] sm:$0xf0] }
 0x37e   : > { %v3530_v39 = vpack.c.b16 %v3434_v44, %v3434_v44  ;;  %v4609_v16 = vsel %vm11055_vm15, %v4604_v40, %v4608_v32  ;;  %v4613_v36 = vor.u32 %v4612_v15, %v4608_v32  ;;  %v13823_v9 = vrot.slane %v4616_v63, 5  ;;  %v9790_v23 = vld [vmem:[#allocation3 + $0x2a0] sm:$0xf]  ;;  %v8022_v63 = vld [vmem:[#allocation4 + $0x128] sm:$0xff] }
 0x37f   : > { %v3531_v62 = vpack.c.b16 %v3435_v6, %v3435_v6  ;;  %7927 = vst.msk [vmem:[#allocation4 + $0x138] sm:$0xff] %vm2601_vm11, %v7831_v35  ;;  %v8795_v21 = vld [vmem:[#allocation6 + $0x68] sm:$0x7]  ;;  %v13829_v37 = vpack.c.b16 %v5286_v56, %v5286_v56  ;;  %v9883_v52 = vor.u32 %v10336_v34, %v9882_v61  ;;  %v1134_v49 = vmax.f32 %v1001_v59, 0.0  ;;  %v10314_v35 = vld [vmem:[#allocation3 + $0x2a8] sm:$0xf0] }
 0x380   : > { %5125 = vst [vmem:[#allocation3 + $0x2c8] sm:$0xf] %v4609_v16  ;;  %v13833_v44 = vrot.slane %v2045_v50, 1  ;;  %2488 = vrot.lane.b32.xlu2 %v13815_v14, %s10522_s25  ;;  %v8831_v40 = vrot.slane %v8795_v21, 7  ;;  %v8118_v32 = vld [vmem:[#allocation4 + $0x129] sm:$0xff]  ;;  %v4614_v15 = vrot.slane %v4613_v36, 4  ;;  %v7155_v6 = vadd.f32 %v13591_v43, %v7154_v53  ;;  %v3069_v16 = vpop.permute.xlu0 %3068  ;;  %v13857_v36 = vpop.f32.mrf.mxu3 }
 0x381   : > { %v9795_v54 = vor.u32 %v10313_v31, %v9792_v24  ;;  %v8214_v56 = vmax.f32 %v8022_v63, %v8118_v32  ;;  %7726 = vmatmul.bf16.gmra.mxu3 %v9883_v52  ;;  %3722 = vst [vmem:[#allocation3 + $0x2b8] sm:$0xf] %v3530_v39  ;;  %v1239_v34 = vpack.c.bf16 %v1134_v49, %v1134_v49  ;;  %v13843_v61 = vsel %vm2504_vm5, %v13815_v14, 0  ;;  %v10486_v53 = vld [vmem:[#allocation2 + $0x108] sm:$0xff]  ;;  %v7156_v49 = vpop.f32.mrf.mxu1  ;;  %v8023_v63 = vld [vmem:[#allocation4 + $0x130] sm:$0xff] }
 0x382   : > { %v2043_v50 = vor.u32 %v2041_v51, %v13715_v42  ;;  %v13848_v59 = vsel %vm8829_vm14, %v8830_v46, %v8831_v40  ;;  %v13852_v31 = vsel %vm2504_vm5, %v10486_v53, %v13691_v4  ;;  %v8310_v39 = vld [vmem:[#allocation4 + $0x12a] sm:$0xff]  ;;  %v4619_v24 = vsel %vm11055_vm15, %v4614_v15, %v13823_v9  ;;  %3723 = vst [vmem:[#allocation3 + $0x2c4] sm:$0xf] %v3531_v62  ;;  %v1003_v42 = vpop.f32.mrf.mxu0 }
 0x383   : > { %v4622_v51 = vrot.slane %v4620_v12, 4  ;;  %7442 = vmatmul.bf16.gmra.mxu2 %v9795_v54  ;;  %v8406_v19 = vmax.f32 %v8214_v56, %v8310_v39  ;;  %5126 = vst [vmem:[#allocation3 + $0x2d4] sm:$0xf] %v4619_v24  ;;  %v15336_v4 = vrot.slane %v13677_v17, 5  ;;  %v9791_v52 = vor.u32 %v10314_v35, %v9790_v23 }
 0x384   : > { %v2048_v46 = vsel %vm1716_vm4, %v2043_v50, %v13833_v44  ;;  %v15277_v12 = vrot.slane %v13829_v37, 5  ;;  %1345 = vst.msk [vmem:[#allocation2 + $0x15c] sm:$0xf] %vm1257_vm3, %v1239_v34  ;;  %v5287_v62 = vunpack.c.l.b16 %v13843_v61  ;;  %v5630_v17 = vsel %vm10688_vm8, %v13757_v58, %v5629_v29  ;;  %v7405_v35 = vpop.f32.mrf.mxu2  ;;  %v13882_v58 = vpop.permute.xlu1 %2474 }
 0x385   : > { %v5627_v21 = vsel %vm10688_vm8, %v13753_v33, %v15336_v4  ;;  %2185 = vrot.lane.b32.xlu0 %v2048_v46, %s10521_s16  ;;  %v7404_v40 = vadd.f32 %v7403_v5, %v7155_v6  ;;  %8502 = vst.msk [vmem:[#allocation5 + $0x128] sm:$0xff] %vm2601_vm11, %v8406_v19  ;;  %7193 = vmatmul.bf16.gmra.mxu1 %v9791_v52  ;;  %v15276_v32 = vshrl.u32 %v13815_v14, 16  ;;  %v2053_v6 = vshll.u32 %v13815_v14, 16  ;;  %v13894_v19 = vpop.permute.xlu2 %2476 }
 0x386   : > { %v8119_v33 = vld [vmem:[#allocation4 + $0x131] sm:$0xff]  ;;  %v1004_v23 = vadd.f32 %v13786_v0, %v1003_v42  ;;  %v7157_v15 = vadd.f32 %v13591_v43, %v7156_v49  ;;  %v3186_v54 = vsel %vm2601_vm11, %v13852_v31, %v3069_v16  ;;  %v4623_v56 = vor.u32 %v4622_v51, %v13823_v9  ;;  %5865 = vst [vmem:[#allocation3 + $0x368] sm:$0xf] %v5627_v21 }
 0x387   : > { %v8215_v34 = vmax.f32 %v8023_v63, %v8119_v33  ;;  %v7653_v5 = vadd.f32 %v13383_v57, %v7404_v40  ;;  %v8311_v50 = vld [vmem:[#allocation4 + $0x132] sm:$0xff]  ;;  %5866 = vst [vmem:[#allocation3 + $0x374] sm:$0xf] %v5630_v17  ;;  %v13888_v39 = vrot.slane %v15276_v32, 7  ;;  %v3252_v24 = vsel %vm2698_vm12, %v3186_v54, %v13882_v58 }
 0x388   : > { %v1135_v53 = vmax.f32 %v1004_v23, 0.0  ;;  %v7406_v42 = vadd.f32 %v7405_v35, %v7157_v15  ;;  %v13892_v51 = vpack.c.b16 %v5287_v62, %v5287_v62  ;;  %v3871_v4 = vunpack.c.l.b16 %v3252_v24  ;;  %v9804_v15 = vld [vmem:[#allocation3 + $0x2c4] sm:$0xf0] }
 0x389   : > { %v8407_v9 = vmax.f32 %v8215_v34, %v8311_v50  ;;  %v7832_v16 = vmax.f32 %v7653_v5, 0.0  ;;  %v2967_v46 = vor.u32 %v13888_v39, %v2053_v6  ;;  %v3872_v21 = vunpack.c.h.b16 %v3252_v24  ;;  %v13923_v34 = vpop.f32.mrf.mxu3  ;;  %v10317_v32 = vld [vmem:[#allocation3 + $0x2c0] sm:$0xf0] }
 0x38a   : > { %v1240_v57 = vpack.c.bf16 %v1135_v53, %v1135_v53  ;;  %v13899_v52 = vrot.slane %v5629_v29, 4  ;;  %v13903_v49 = vrot.slane %v15277_v12, 4  ;;  %v4624_v17 = vrot.slane %v4623_v56, 4  ;;  %v1005_v40 = vpop.f32.mrf.mxu0  ;;  %v7159_v29 = vpop.f32.mrf.mxu1 }
 0x38b   : > { %8503 = vst.msk [vmem:[#allocation5 + $0x130] sm:$0xff] %vm2601_vm11, %v8407_v9  ;;  %v7655_v62 = vadd.f32 %v13454_v48, %v7406_v42  ;;  %v2968_v63 = vsel %vm2852_vm10, %v13796_v28, %v2967_v46  ;;  %v3968_v33 = vpack.c.b16 %v3871_v4, %v3871_v4  ;;  %v13910_v23 = vpack.c.b16 %v3872_v21, %v3872_v21  ;;  %v13913_v54 = vld [vmem:[#allocation2 + $0x158] sm:$0xff]  ;;  %v10316_v21 = vld [vmem:[#allocation3 + $0x2bc] sm:$0xf] }
 0x38c   : > { %7928 = vst.msk [vmem:[#allocation4 + $0x140] sm:$0xff] %vm2601_vm11, %v7832_v16  ;;  %v1006_v22 = vadd.f32 %v13786_v0, %v1005_v40  ;;  %v13915_v35 = vld [vmem:[#allocation5 + $0x120] ss:$2 sm:$0xff]  ;;  %v5288_v56 = vunpack.c.h.b16 %v13843_v61  ;;  %v5635_v48 = vrot.slane %v13892_v51, 5  ;;  %3082 = vrot.lane.b32.xlu1 %v2968_v63, %s10523_s26  ;;  %v13925_v24 = vrot.slane %v2053_v6, 1 }
 0x38d   : > { %1346 = vst.msk [vmem:[#allocation2 + $0x160] sm:$0xf] %vm1257_vm3, %v1240_v57  ;;  %2376 = vrot.lane.b32.xlu0 %v13675_v10, %s10523_s26  ;;  %v7833_v28 = vmax.f32 %v7655_v62, 0.0  ;;  %v9894_v5 = vld [vmem:[#allocation3 + $0x368] sm:$0xf]  ;;  %v4626_v50 = vshll.u32 %v3968_v33, 16  ;;  %v7160_v10 = vadd.f32 %v13591_v43, %v7159_v29  ;;  %v7408_v62 = vpop.f32.mrf.mxu2 }
 0x38e   : > { %v4630_v53 = vshrl.u32 %v3968_v33, 16  ;;  %v10339_v42 = vld [vmem:[#allocation3 + $0x370] sm:$0xf0]  ;;  %v4636_v61 = vshll.u32 %v13910_v23, 16  ;;  %v1136_v9 = vmax.f32 %v1006_v22, 0.0  ;;  %v15337_v51 = vshrl.u32 %v13717_v11, 16 }
 0x38f   : > { %7929 = vst.msk [vmem:[#allocation4 + $0x148] sm:$0xff] %vm2601_vm11, %v7833_v28  ;;  %v9895_v57 = vor.u32 %v10339_v42, %v9894_v5  ;;  %v4628_v46 = vrot.slane %v4626_v50, 5  ;;  %v13935_v6 = vsel %vm2504_vm5, %v13913_v54, 0  ;;  %v5385_v40 = vpack.c.b16 %v5288_v56, %v5288_v56  ;;  %v9802_v28 = vld [vmem:[#allocation3 + $0x2b8] sm:$0xf]  ;;  %v13942_v50 = vpop.permute.xlu2 %3072 }
 0x390   : > { %v2051_v16 = vor.u32 %v15337_v51, %v13833_v44  ;;  %v4632_v4 = vrot.slane %v4630_v53, 4  ;;  %v1241_v63 = vpack.c.bf16 %v1136_v9, %v1136_v9  ;;  %v9807_v33 = vor.u32 %v10316_v21, %v9804_v15  ;;  %v8024_v53 = vld [vmem:[#allocation4 + $0x138] sm:$0xff]  ;;  %v2174_v51 = vpop.permute.xlu0 %2173 }
 0x391   : > { %v5289_v22 = vunpack.c.l.b16 %v13935_v6  ;;  %v5637_v12 = vrot.slane %v5635_v48, 4  ;;  %7731 = vmatmul.bf16.gmra.mxu3 %v9895_v57  ;;  %v4629_v44 = vsel %vm11055_vm15, %v4624_v17, %v4628_v46  ;;  %v13944_v56 = vrot.slane %v4636_v61, 5 }
 0x392   : > { %v4633_v29 = vor.u32 %v4632_v4, %v4628_v46  ;;  %v2056_v5 = vsel %vm1716_vm4, %v2051_v16, %v13925_v24  ;;  %v4640_v15 = vshrl.u32 %v13910_v23, 16  ;;  %5127 = vst [vmem:[#allocation3 + $0x2e0] sm:$0xf] %v4629_v44  ;;  %v7409_v57 = vadd.f32 %v7408_v62, %v7160_v10 }
 0x393   : > { %v8120_v42 = vld [vmem:[#allocation4 + $0x139] sm:$0xff]  ;;  %7447 = vmatmul.bf16.gmra.mxu2 %v9807_v33  ;;  %v13947_v9 = vpack.c.b16 %v5289_v22, %v5289_v22  ;;  %1347 = vst.msk [vmem:[#allocation2 + $0x164] sm:$0xf] %vm1257_vm3, %v1241_v63  ;;  %v9803_v46 = vor.u32 %v10317_v32, %v9802_v28  ;;  %v15338_v16 = vrot.slane %v13829_v37, 5  ;;  %v5638_v4 = vrot.slane %v5385_v40, 5 }
 0x394   : > { %v8216_v21 = vmax.f32 %v8024_v53, %v8120_v42  ;;  %v4634_v17 = vrot.slane %v4633_v29, 4  ;;  %v8312_v18 = vld [vmem:[#allocation4 + $0x13a] sm:$0xff]  ;;  %2187 = vrot.lane.b32.xlu1 %v2056_v5, %s10521_s16  ;;  %v7658_v23 = vadd.f32 %v13504_v8, %v7409_v57  ;;  %v5636_v10 = vsel %vm10688_vm8, %v13903_v49, %v5635_v48  ;;  %v13969_v49 = vpop.f32.mrf.mxu3 }
 0x395   : > { %v5633_v61 = vsel %vm10688_vm8, %v13899_v52, %v15338_v16  ;;  %2490 = vrot.lane.b32.xlu0 %v13913_v54, %s10522_s25  ;;  %v8025_v32 = vld [vmem:[#allocation4 + $0x140] sm:$0xff]  ;;  %7198 = vmatmul.bf16.gmra.mxu1 %v9803_v46  ;;  %5868 = vst [vmem:[#allocation3 + $0x38c] sm:$0xf] %v5636_v10  ;;  %v15281_v63 = vrot.slane %v13947_v9, 5  ;;  %v13966_v8 = vld [vmem:[#allocation2 + $0x138] sm:$0xff]  ;;  %v15279_v28 = vshrl.u32 %v13913_v54, 16  ;;  %v5639_v44 = vsel %vm10688_vm8, %v5637_v12, %v5638_v4 }
 0x396   : > { %5867 = vst [vmem:[#allocation3 + $0x380] sm:$0xf] %v5633_v61  ;;  %v8408_v37 = vmax.f32 %v8216_v21, %v8312_v18  ;;  %v4639_v52 = vsel %vm11055_vm15, %v4634_v17, %v13944_v56  ;;  %v8121_v62 = vld [vmem:[#allocation4 + $0x141] sm:$0xff]  ;;  %v7834_v33 = vmax.f32 %v7658_v23, 0.0  ;;  %v15280_v22 = vrot.slane %v13966_v8, 1  ;;  %v7161_v21 = vpop.f32.mrf.mxu1  ;;  %v10488_v46 = vld [vmem:[#allocation2 + $0x110] sm:$0xff]  ;;  %v1008_v61 = vpop.f32.mrf.mxu0 }
 0x397   : > { %5128 = vst [vmem:[#allocation3 + $0x2ec] sm:$0xf] %v4639_v52  ;;  %v8217_v40 = vmax.f32 %v8025_v32, %v8121_v62  ;;  %v13972_v18 = vrot.slane %v4640_v15, 4  ;;  %v8313_v48 = vld [vmem:[#allocation4 + $0x142] sm:$0xff]  ;;  %v5640_v29 = vrot.slane %v5638_v4, 4  ;;  %v5290_v53 = vunpack.c.h.b16 %v13935_v6  ;;  %v14001_v23 = vpop.permute.xlu2 %2177 }
 0x398   : > { %8504 = vst.msk [vmem:[#allocation5 + $0x138] sm:$0xff] %vm2601_vm11, %v8408_v37  ;;  %v2061_v42 = vshll.u32 %v13913_v54, 16  ;;  %v13982_v57 = vrot.slane %v15279_v28, 7  ;;  %v15339_v15 = vrot.slane %v13405_v1, 1  ;;  %v13997_v16 = vsel %vm2504_vm5, %v10488_v46, %v2174_v51  ;;  %v10319_v10 = vld [vmem:[#allocation3 + $0x2d4] sm:$0xf]  ;;  %v2365_v51 = vpop.permute.xlu0 %2364 }
 0x399   : > { %v8409_v5 = vmax.f32 %v8217_v40, %v8313_v48  ;;  %7930 = vst.msk [vmem:[#allocation4 + $0x150] sm:$0xff] %vm2601_vm11, %v7834_v33  ;;  %v5642_v6 = vsel %vm10688_vm8, %v5640_v29, %v15281_v63  ;;  %v4643_v17 = vor.u32 %v13972_v18, %v13944_v56  ;;  %v7162_v1 = vadd.f32 %v13591_v43, %v7161_v21  ;;  %v9816_v32 = vld [vmem:[#allocation3 + $0x2dc] sm:$0xf0]  ;;  %v3071_v33 = vpop.permute.xlu1 %3070 }
 0x39a   : > { %5869 = vst [vmem:[#allocation3 + $0x398] sm:$0xf] %v5639_v44  ;;  %v2283_v12 = vsel %vm2204_vm9, %v15339_v15, %v15280_v22  ;;  %v2970_v4 = vor.u32 %v13982_v57, %v2061_v42  ;;  %v14003_v37 = vpack.c.b16 %v5290_v53, %v5290_v53  ;;  %v1009_v40 = vadd.f32 %v13786_v0, %v1008_v61  ;;  %v7410_v53 = vpop.f32.mrf.mxu2 }
 0x39b   : > { %8505 = vst.msk [vmem:[#allocation5 + $0x140] sm:$0xff] %vm2601_vm11, %v8409_v5  ;;  %v9819_v48 = vor.u32 %v10319_v10, %v9816_v32  ;;  %v3188_v29 = vsel %vm2601_vm11, %v13997_v16, %v3071_v33  ;;  %v2665_v5 = vsel %vm2601_vm11, %v13688_v25, %v2365_v51  ;;  %v7411_v46 = vadd.f32 %v7410_v53, %v7162_v1 }
 0x39c   : > { %v10342_v62 = vld [vmem:[#allocation3 + $0x388] sm:$0xf0]  ;;  %2378 = vrot.lane.b32.xlu1 %v2283_v12, %s10523_s26  ;;  %5870 = vst [vmem:[#allocation3 + $0x3a4] sm:$0xf] %v5642_v6  ;;  %v2971_v43 = vsel %vm2852_vm10, %v13888_v39, %v2970_v4  ;;  %v1137_v21 = vmax.f32 %v1009_v40, 0.0  ;;  %v3253_v12 = vsel %vm2698_vm12, %v3188_v29, %v13894_v19  ;;  %v2762_v6 = vsel %vm2698_vm12, %v2665_v5, %v13603_v20  ;;  %v14025_v28 = vpop.f32.mrf.mxu3 }
 0x39d   : > { %v9906_v52 = vld [vmem:[#allocation3 + $0x380] sm:$0xf]  ;;  %3084 = vrot.lane.b32.xlu2 %v2971_v43, %s10523_s26  ;;  %v8026_v39 = vld [vmem:[#allocation4 + $0x148] sm:$0xff]  ;;  %v3873_v4 = vunpack.c.l.b16 %v3253_v12  ;;  %v3874_v10 = vunpack.c.h.b16 %v3253_v12  ;;  %v15340_v25 = vshrl.u32 %v13815_v14, 16  ;;  %v3438_v33 = vunpack.c.l.b16 %v2762_v6  ;;  %v9814_v43 = vld [vmem:[#allocation3 + $0x2d0] sm:$0xf] }
 0x39e   : > { %v9907_v44 = vor.u32 %v10342_v62, %v9906_v52  ;;  %v14023_v52 = vld [vmem:[#allocation2 + $0x160] sm:$0xff]  ;;  %v1242_v40 = vpack.c.bf16 %v1137_v21, %v1137_v21  ;;  %v3439_v51 = vunpack.c.h.b16 %v2762_v6  ;;  %v7660_v53 = vadd.f32 %v13547_v27, %v7411_v46  ;;  %v7164_v21 = vpop.f32.mrf.mxu1  ;;  %v1010_v63 = vpop.f32.mrf.mxu0 }
 0x39f   : > { %v14013_v15 = vld [vmem:[#allocation5 + $0x130] ss:$2 sm:$0xff]  ;;  %v2059_v32 = vor.u32 %v15340_v25, %v13925_v24  ;;  %v3970_v1 = vpack.c.b16 %v3873_v4, %v3873_v4  ;;  %v3971_v5 = vpack.c.b16 %v3874_v10, %v3874_v10  ;;  %v14028_v12 = vrot.slane %v2061_v42, 1  ;;  %v2369_v4 = vpop.permute.xlu2 %2368 }
 0x3a0   : > { %v8122_v61 = vld [vmem:[#allocation4 + $0x149] sm:$0xff]  ;;  %v10320_v29 = vld [vmem:[#allocation3 + $0x2d8] sm:$0xf0]  ;;  %1348 = vst.msk [vmem:[#allocation2 + $0x168] sm:$0xf] %vm1257_vm3, %v1242_v40  ;;  %v3534_v24 = vpack.c.b16 %v3438_v33, %v3438_v33  ;;  %v2284_v6 = vrot.slane %v13607_v7, 1  ;;  %v2669_v18 = vsel %vm2601_vm11, %v13852_v31, %v2369_v4  ;;  %v14066_v4 = vpop.permute.xlu0 %2478 }
 0x3a1   : > { %v8218_v62 = vmax.f32 %v8026_v39, %v8122_v61  ;;  %v8314_v20 = vld [vmem:[#allocation4 + $0x14a] sm:$0xff]  ;;  %7736 = vmatmul.bf16.gmra.mxu3 %v9907_v44  ;;  %v3535_v39 = vpack.c.b16 %v3439_v51, %v3439_v51  ;;  %v4646_v61 = vshll.u32 %v3970_v1, 16  ;;  %v4650_v25 = vshrl.u32 %v3970_v1, 16 }
 0x3a2   : > { %v14034_v44 = vsel %vm2504_vm5, %v14023_v52, 0  ;;  %v9815_v27 = vor.u32 %v10320_v29, %v9814_v43  ;;  %v4656_v42 = vshll.u32 %v3971_v5, 16  ;;  %v4660_v46 = vshrl.u32 %v3971_v5, 16  ;;  %3726 = vst [vmem:[#allocation3 + $0x2e8] sm:$0xf] %v3534_v24  ;;  %v7413_v5 = vpop.f32.mrf.mxu2 }
 0x3a3   : > { %v8410_v22 = vmax.f32 %v8218_v62, %v8314_v20  ;;  %7452 = vmatmul.bf16.gmra.mxu2 %v9819_v48  ;;  %v7835_v10 = vmax.f32 %v7660_v53, 0.0  ;;  %v1011_v62 = vadd.f32 %v13786_v0, %v1010_v63  ;;  %v4644_v48 = vrot.slane %v4643_v17, 4  ;;  %3727 = vst [vmem:[#allocation3 + $0x2f4] sm:$0xf] %v3535_v39  ;;  %v14049_v63 = vld [vmem:[%s15248_s4] ss:$0 sm:$0xff]  ;;  %v2176_v17 = vpop.permute.xlu1 %2175 }
 0x3a4   : > { %2492 = vrot.lane.b32.xlu1 %v14023_v52, %s10522_s25  ;;  %v4648_v40 = vrot.slane %v4646_v61, 5  ;;  %v4652_v33 = vrot.slane %v4650_v25, 4  ;;  %v2064_v51 = vsel %vm1716_vm4, %v2059_v32, %v14028_v12  ;;  %v7165_v43 = vadd.f32 %v14049_v63, %v7164_v21 }
 0x3a5   : > { %8506 = vst.msk [vmem:[#allocation5 + $0x148] sm:$0xff] %vm2601_vm11, %v8410_v22  ;;  %7203 = vmatmul.bf16.gmra.mxu1 %v9815_v27  ;;  %v1138_v22 = vmax.f32 %v1011_v62, 0.0  ;;  %2189 = vrot.lane.b32.xlu2 %v2064_v51, %s10521_s16  ;;  %v5291_v56 = vunpack.c.l.b16 %v14034_v44  ;;  %v8672_v32 = vmax.f32 %v13649_v45, %v13915_v35  ;;  %v2766_v1 = vsel %vm2698_vm12, %v2669_v18, %v13882_v58  ;;  %v10490_v45 = vld [vmem:[#allocation2 + $0x118] sm:$0xff]  ;;  %v10345_v62 = vld [vmem:[#allocation3 + $0x3a0] sm:$0xf0] }
 0x3a6   : > { %v4649_v29 = vsel %vm11055_vm15, %v4644_v48, %v4648_v40  ;;  %v4653_v20 = vor.u32 %v4652_v33, %v4648_v40  ;;  %7931 = vst.msk [vmem:[#allocation4 + $0x158] sm:$0xff] %vm2601_vm11, %v7835_v10  ;;  %v4658_v53 = vrot.slane %v4656_v42, 5  ;;  %v4662_v24 = vrot.slane %v4660_v46, 4  ;;  %v14073_v48 = vpop.f32.mrf.mxu3  ;;  %v1013_v51 = vpop.f32.mrf.mxu0 }
 0x3a7   : > { %5129 = vst [vmem:[#allocation3 + $0x2f8] sm:$0xf] %v4649_v29  ;;  %v1243_v39 = vpack.c.bf16 %v1138_v22, %v1138_v22  ;;  %v3442_v21 = vunpack.c.l.b16 %v2766_v1  ;;  %v5644_v31 = vrot.slane %v14003_v37, 5  ;;  %v3443_v25 = vunpack.c.h.b16 %v2766_v1  ;;  %v9918_v29 = vld [vmem:[#allocation3 + $0x398] sm:$0xf] }
 0x3a8   : > { %v4654_v61 = vrot.slane %v4653_v20, 4  ;;  %v14064_v35 = vsel %vm2504_vm5, %v10490_v45, %v2176_v17  ;;  %v15341_v27 = vrot.slane %v13947_v9, 5  ;;  %v14071_v58 = vpack.c.b16 %v5291_v56, %v5291_v56 }
 0x3a9   : > { %1349 = vst.msk [vmem:[#allocation2 + $0x16c] sm:$0xf] %vm1257_vm3, %v1243_v39  ;;  %v3538_v42 = vpack.c.b16 %v3442_v21, %v3442_v21  ;;  %v7414_v46 = vadd.f32 %v7413_v5, %v7165_v43  ;;  %v3539_v33 = vpack.c.b16 %v3443_v25, %v3443_v25  ;;  %v3190_v9 = vsel %vm2601_vm11, %v14064_v35, %v13942_v50  ;;  %v8027_v21 = vld [vmem:[#allocation4 + $0x150] sm:$0xff] }
 0x3aa   : > { %v5643_v10 = vrot.slane %v15341_v27, 4  ;;  %v4659_v40 = vsel %vm11055_vm15, %v4654_v61, %v4658_v53  ;;  %v15342_v22 = vrot.slane %v13966_v8, 1  ;;  %v4663_v18 = vor.u32 %v4662_v24, %v4658_v53 }
 0x3ab   : > { %5130 = vst [vmem:[#allocation3 + $0x304] sm:$0xf] %v4659_v40  ;;  %v7663_v17 = vadd.f32 %v13601_v3, %v7414_v46  ;;  %v3254_v20 = vsel %vm2698_vm12, %v3190_v9, %v14066_v4  ;;  %v9919_v1 = vor.u32 %v10345_v62, %v9918_v29  ;;  %v1014_v39 = vadd.f32 %v13786_v0, %v1013_v51  ;;  %v7166_v40 = vpop.f32.mrf.mxu1  ;;  %v2367_v9 = vpop.permute.xlu1 %2366 }
 0x3ac   : > { %v14075_v37 = vld [vmem:[#allocation5 + $0x140] ss:$2 sm:$0xff]  ;;  %v2285_v43 = vsel %vm2204_vm9, %v15342_v22, %v2284_v6  ;;  %3730 = vst [vmem:[#allocation3 + $0x318] sm:$0xf] %v3538_v42  ;;  %v3875_v50 = vunpack.c.l.b16 %v3254_v20  ;;  %v3876_v5 = vunpack.c.h.b16 %v3254_v20  ;;  %v2286_v3 = vrot.slane %v13717_v11, 1 }
 0x3ad   : > { %v8716_v56 = vmax.f32 %v8672_v32, %v14075_v37  ;;  %v8123_v8 = vld [vmem:[#allocation4 + $0x151] sm:$0xff]  ;;  %v5647_v32 = vrot.slane %v14071_v58, 5  ;;  %v7836_v53 = vmax.f32 %v7663_v17, 0.0  ;;  %2380 = vrot.lane.b32.xlu2 %v2285_v43, %s10523_s26  ;;  %3731 = vst [vmem:[#allocation3 + $0x324] sm:$0xf] %v3539_v33  ;;  %v1139_v45 = vmax.f32 %v1014_v39, 0.0  ;;  %v7415_v17 = vpop.f32.mrf.mxu2 }
 0x3ae   : > { %v8219_v24 = vmax.f32 %v8027_v21, %v8123_v8  ;;  %v3972_v61 = vpack.c.b16 %v3875_v50, %v3875_v50  ;;  %v14096_v25 = vpack.c.b16 %v3876_v5, %v3876_v5  ;;  %v5646_v27 = vrot.slane %v5644_v31, 4  ;;  %v8315_v46 = vld [vmem:[#allocation4 + $0x152] sm:$0xff]  ;;  %v1015_v21 = vpop.f32.mrf.mxu0 }
 0x3af   : > { %8760 = vst.msk [vmem:[#allocation6 + $0x80] sm:$0xff] %vm2601_vm11, %v8716_v56  ;;  %v4664_v42 = vrot.slane %v4663_v18, 4  ;;  %v2073_v62 = vshrl.u32 %v14023_v52, 16  ;;  %v5645_v51 = vsel %vm10688_vm8, %v5643_v10, %v5644_v31  ;;  %v2069_v56 = vshll.u32 %v14023_v52, 16 }
 0x3b0   : > { %7932 = vst.msk [vmem:[#allocation4 + $0x160] sm:$0xff] %vm2601_vm11, %v7836_v53  ;;  %v8411_v22 = vmax.f32 %v8219_v24, %v8315_v46  ;;  %v4666_v43 = vshll.u32 %v3972_v61, 16  ;;  %v4670_v33 = vshrl.u32 %v3972_v61, 16  ;;  %v1244_v29 = vpack.c.bf16 %v1139_v45, %v1139_v45  ;;  %v14108_v50 = vld [vmem:[#allocation2 + $0x168] sm:$0xff]  ;;  %v14129_v45 = vpop.f32.mrf.mxu3 }
 0x3b1   : > { %7741 = vmatmul.bf16.gmra.mxu3 %v9919_v1  ;;  %v14105_v18 = vrot.slane %v2073_v62, 7  ;;  %v7167_v20 = vadd.f32 %v14049_v63, %v7166_v40  ;;  %v5648_v31 = vsel %vm10688_vm8, %v5646_v27, %v5647_v32  ;;  %5871 = vst [vmem:[#allocation3 + $0x3b0] sm:$0xf] %v5645_v51  ;;  %v4676_v5 = vshll.u32 %v14096_v25, 16 }
 0x3b2   : > { %8507 = vst.msk [vmem:[#allocation5 + $0x150] sm:$0xff] %vm2601_vm11, %v8411_v22  ;;  %v4668_v10 = vrot.slane %v4666_v43, 5  ;;  %v4672_v1 = vrot.slane %v4670_v33, 4  ;;  %v2667_v39 = vsel %vm2601_vm11, %v13764_v55, %v2367_v9  ;;  %v14127_v61 = vsel %vm2204_vm9, %v2284_v6, %v2286_v3  ;;  %v8028_v22 = vld [vmem:[#allocation4 + $0x158] sm:$0xff] }
 0x3b3   : > { %1350 = vst.msk [vmem:[#allocation2 + $0x170] sm:$0xf] %vm1257_vm3, %v1244_v29  ;;  %v2973_v8 = vor.u32 %v14105_v18, %v2069_v56  ;;  %v2764_v53 = vsel %vm2698_vm12, %v2667_v39, %v13766_v26  ;;  %v7416_v24 = vadd.f32 %v7415_v17, %v7167_v20  ;;  %v5292_v51 = vunpack.c.h.b16 %v14034_v44  ;;  %v10322_v44 = vld [vmem:[#allocation3 + $0x2ec] sm:$0xf]  ;;  %v9828_v20 = vld [vmem:[#allocation3 + $0x2f4] sm:$0xf0] }
 0x3b4   : > { %v4669_v55 = vsel %vm11055_vm15, %v4664_v42, %v4668_v10  ;;  %v4673_v46 = vor.u32 %v4672_v1, %v4668_v10  ;;  %v3440_v40 = vunpack.c.l.b16 %v2764_v53  ;;  %v3441_v9 = vunpack.c.h.b16 %v2764_v53  ;;  %5872 = vst [vmem:[#allocation3 + $0x3bc] sm:$0xf] %v5648_v31  ;;  %v7169_v1 = vpop.f32.mrf.mxu1  ;;  %v10323_v39 = vld [vmem:[#allocation3 + $0x2f0] sm:$0xf0] }
 0x3b5   : > { %5131 = vst [vmem:[#allocation3 + $0x310] sm:$0xf] %v4669_v55  ;;  %v2974_v7 = vsel %vm2852_vm10, %v13982_v57, %v2973_v8  ;;  %v7665_v6 = vadd.f32 %v13636_v2, %v7416_v24  ;;  %2494 = vrot.lane.b32.xlu2 %v14108_v50, %s10522_s25  ;;  %v14142_v33 = vrot.slane %v4676_v5, 5  ;;  %v1016_v29 = vadd.f32 %v13786_v0, %v1015_v21  ;;  %v9826_v5 = vld [vmem:[#allocation3 + $0x2e8] sm:$0xf] }
 0x3b6   : > { %v14131_v27 = vld [vmem:[#allocation6 + $0x80] sm:$0xff]  ;;  %v4674_v42 = vrot.slane %v4673_v46, 4  ;;  %3086 = vrot.lane.b32.xlu0 %v2974_v7, %s10523_s26  ;;  %v3536_v17 = vpack.c.b16 %v3440_v40, %v3440_v40  ;;  %v4680_v31 = vshrl.u32 %v14096_v25, 16  ;;  %v3537_v10 = vpack.c.b16 %v3441_v9, %v3441_v9  ;;  %v7418_v46 = vpop.f32.mrf.mxu2  ;;  %v10491_v7 = vld [vmem:[#allocation2 + $0x120] sm:$0xff] }
 0x3b7   : > { %v15282_v26 = vrot.slane %v14131_v27, 4  ;;  %v8124_v43 = vld [vmem:[#allocation4 + $0x159] sm:$0xff]  ;;  %v7837_v24 = vmax.f32 %v7665_v6, 0.0  ;;  %v1140_v55 = vmax.f32 %v1016_v29, 0.0  ;;  %v7170_v25 = vadd.f32 %v14049_v63, %v7169_v1  ;;  %v1018_v29 = vpop.f32.mrf.mxu0 }
 0x3b8   : > { %v8220_v57 = vmax.f32 %v8028_v22, %v8124_v43  ;;  %v8316_v53 = vld [vmem:[#allocation4 + $0x15a] sm:$0xff]  ;;  %v4679_v21 = vsel %vm11055_vm15, %v4674_v42, %v14142_v33  ;;  %3728 = vst [vmem:[#allocation3 + $0x300] sm:$0xf] %v3536_v17  ;;  %v9831_v9 = vor.u32 %v10322_v44, %v9828_v20  ;;  %v14161_v22 = vsel %vm2504_vm5, %v10491_v7, %v14001_v23  ;;  %v9930_v44 = vld [vmem:[#allocation3 + $0x3b0] sm:$0xf] }
 0x3b9   : > { %v8884_v2 = vsel %vm767_vm0, %v13848_v59, %v15282_v26  ;;  %5132 = vst [vmem:[#allocation3 + $0x31c] sm:$0xf] %v4679_v21  ;;  %v14154_v59 = vrot.slane %v2069_v56, 1  ;;  %v5389_v43 = vpack.c.b16 %v5292_v51, %v5292_v51  ;;  %v1245_v42 = vpack.c.bf16 %v1140_v55, %v1140_v55  ;;  %v14180_v55 = vpop.permute.xlu1 %2480 }
 0x3ba   : > { %v8895_v8 = vpack.c.bf16 %v8884_v2, %v8884_v2  ;;  %v8412_v40 = vmax.f32 %v8220_v57, %v8316_v53  ;;  %v15343_v6 = vshrl.u32 %v13913_v54, 16  ;;  %v3075_v2 = vpop.permute.xlu0 %3074  ;;  %7457 = vmatmul.bf16.gmra.mxu2 %v9831_v9  ;;  %v14169_v56 = vsel %vm2504_vm5, %v14108_v50, 0  ;;  %3729 = vst [vmem:[#allocation3 + $0x30c] sm:$0xf] %v3537_v10 }
 0x3bb   : > { %v10348_v20 = vld [vmem:[#allocation3 + $0x3b8] sm:$0xf0]  ;;  %v9827_v57 = vor.u32 %v10323_v39, %v9826_v5  ;;  %v7419_v23 = vadd.f32 %v7418_v46, %v7170_v25  ;;  %v1019_v51 = vadd.f32 %v13786_v0, %v1018_v29  ;;  %v5649_v1 = vrot.slane %v5647_v32, 4  ;;  %7933 = vst.msk [vmem:[#allocation4 + $0x168] sm:$0xff] %vm2601_vm11, %v7837_v24  ;;  %v14185_v32 = vpop.f32.mrf.mxu3 }
 0x3bc   : > { %8912 = vst.msk [vmem:[%s12430_s12 + $0x14] sm:$0xf] %vm8906_vm7, %v8895_v8  ;;  %v2067_v17 = vor.u32 %v15343_v6, %v14028_v12  ;;  %v4682_v54 = vrot.slane %v4680_v31, 4  ;;  %v14174_v12 = vpop.permute.xlu2 %2482  ;;  %v9931_v8 = vor.u32 %v10348_v20, %v9930_v44  ;;  %v2081_v53 = vshrl.u32 %v14108_v50, 16  ;;  %v7171_v25 = vpop.f32.mrf.mxu1 }
 0x3bd   : > { %8508 = vst.msk [vmem:[#allocation5 + $0x158] sm:$0xff] %vm2601_vm11, %v8412_v40  ;;  %7208 = vmatmul.bf16.gmra.mxu1 %v9827_v57  ;;  %v7668_v5 = vadd.f32 %v13698_v13, %v7419_v23  ;;  %v1141_v39 = vmax.f32 %v1019_v51, 0.0  ;;  %v3192_v58 = vsel %vm2601_vm11, %v14161_v22, %v3075_v2  ;;  %v5293_v31 = vunpack.c.l.b16 %v14169_v56 }
 0x3be   : > { %v2072_v21 = vsel %vm1716_vm4, %v2067_v17, %v14154_v59  ;;  %1351 = vst.msk [vmem:[#allocation2 + $0x174] sm:$0xf] %vm1257_vm3, %v1245_v42  ;;  %v2077_v10 = vshll.u32 %v14108_v50, 16  ;;  %v14193_v24 = vrot.slane %v2081_v53, 7  ;;  %v3255_v13 = vsel %vm2698_vm12, %v3192_v58, %v14180_v55  ;;  %v7420_v2 = vpop.f32.mrf.mxu2  ;;  %v8029_v58 = vld [vmem:[#allocation4 + $0x160] sm:$0xff] }
 0x3bf   : > { %2191 = vrot.lane.b32.xlu0 %v2072_v21, %s10521_s16  ;;  %v7838_v46 = vmax.f32 %v7668_v5, 0.0  ;;  %v1246_v40 = vpack.c.bf16 %v1141_v39, %v1141_v39  ;;  %v3877_v9 = vunpack.c.l.b16 %v3255_v13  ;;  %v3878_v7 = vunpack.c.h.b16 %v3255_v13 }
 0x3c0   : > { %v5650_v6 = vrot.slane %v5389_v43, 5  ;;  %v4683_v42 = vor.u32 %v4682_v54, %v14142_v33  ;;  %v2976_v17 = vor.u32 %v14193_v24, %v2077_v10  ;;  %v7172_v29 = vadd.f32 %v14049_v63, %v7171_v25 }
 0x3c1   : > { %7746 = vmatmul.bf16.gmra.mxu3 %v9931_v8  ;;  %v8673_v44 = vmax.f32 %v13779_v38, %v14013_v15  ;;  %7934 = vst.msk [vmem:[#allocation4 + $0x170] sm:$0xff] %vm2601_vm11, %v7838_v46  ;;  %v3974_v20 = vpack.c.b16 %v3877_v9, %v3877_v9  ;;  %v14203_v57 = vpack.c.b16 %v3878_v7, %v3878_v7  ;;  %v15284_v23 = vrot.slane %v13815_v14, 1  ;;  %v1020_v8 = vpop.f32.mrf.mxu0 }
 0x3c2   : > { %v5294_v33 = vunpack.c.h.b16 %v14169_v56  ;;  %1352 = vst.msk [vmem:[#allocation2 + $0x178] sm:$0xf] %vm1257_vm3, %v1246_v40  ;;  %v2977_v43 = vsel %vm2852_vm10, %v14105_v18, %v2976_v17  ;;  %v7421_v54 = vadd.f32 %v7420_v2, %v7172_v29  ;;  %v5651_v38 = vsel %vm10688_vm8, %v5649_v1, %v5650_v6  ;;  %v8125_v46 = vld [vmem:[#allocation4 + $0x161] sm:$0xff]  ;;  %v2180_v1 = vpop.permute.xlu0 %2179  ;;  %v9840_v29 = vld [vmem:[#allocation3 + $0x30c] sm:$0xf0] }
 0x3c3   : > { %v14215_v21 = vpack.c.b16 %v5293_v31, %v5293_v31  ;;  %3088 = vrot.lane.b32.xlu1 %v2977_v43, %s10523_s26  ;;  %v4686_v5 = vshll.u32 %v3974_v20, 16  ;;  %v4690_v39 = vshrl.u32 %v3974_v20, 16  ;;  %5873 = vst [vmem:[#allocation3 + $0x3c8] sm:$0xf] %v5651_v38  ;;  %v5652_v56 = vrot.slane %v5650_v6, 4  ;;  %v8317_v2 = vld [vmem:[#allocation4 + $0x162] sm:$0xff] }
 0x3c4   : > { %v14206_v51 = vld [vmem:[#allocation5 + $0x150] ss:$2 sm:$0xff]  ;;  %v4684_v13 = vrot.slane %v4683_v42, 4  ;;  %v7670_v18 = vadd.f32 %v13741_v30, %v7421_v54  ;;  %v1021_v40 = vadd.f32 %v13786_v0, %v1020_v8  ;;  %v14220_v25 = vpop.permute.xlu2 %3078  ;;  %v8221_v31 = vmax.f32 %v8029_v58, %v8125_v46  ;;  %v7174_v38 = vpop.f32.mrf.mxu1 }
 0x3c5   : > { %v8717_v15 = vmax.f32 %v8673_v44, %v14206_v51  ;;  %v4688_v9 = vrot.slane %v4686_v5, 5  ;;  %v4692_v7 = vrot.slane %v4690_v39, 4  ;;  %v4696_v17 = vshll.u32 %v14203_v57, 16  ;;  %v10325_v44 = vld [vmem:[#allocation3 + $0x304] sm:$0xf]  ;;  %v8030_v39 = vld [vmem:[#allocation4 + $0x168] sm:$0xff] }
 0x3c6   : > { %v14224_v6 = vpack.c.b16 %v5294_v33, %v5294_v33  ;;  %v7839_v30 = vmax.f32 %v7670_v18, 0.0  ;;  %v1142_v42 = vmax.f32 %v1021_v40, 0.0  ;;  %v14228_v0 = vrot.slane %v2077_v10, 1  ;;  %v10326_v5 = vld [vmem:[#allocation3 + $0x308] sm:$0xf0]  ;;  %v14233_v33 = vpop.f32.mrf.mxu3 }
 0x3c7   : > { %8761 = vst.msk [vmem:[#allocation6 + $0x88] sm:$0xff] %vm2601_vm11, %v8717_v15  ;;  %2382 = vrot.lane.b32.xlu0 %v14127_v61, %s10523_s26  ;;  %v8413_v20 = vmax.f32 %v8221_v31, %v8317_v2  ;;  %v5653_v43 = vrot.slane %v14215_v21, 5  ;;  %v4689_v54 = vsel %vm11055_vm15, %v4684_v13, %v4688_v9  ;;  %v4693_v8 = vor.u32 %v4692_v7, %v4688_v9  ;;  %v9838_v15 = vld [vmem:[#allocation3 + $0x300] sm:$0xf]  ;;  %v14239_v18 = vld [vmem:[#allocation2 + $0x170] sm:$0xff]  ;;  %v7423_v13 = vpop.f32.mrf.mxu2 }
 0x3c8   : > { %v8126_v58 = vld [vmem:[#allocation4 + $0x169] sm:$0xff]  ;;  %5133 = vst [vmem:[#allocation3 + $0x328] sm:$0xf] %v4689_v54  ;;  %v1247_v61 = vpack.c.bf16 %v1142_v42, %v1142_v42  ;;  %v2075_v10 = vor.u32 %v2073_v62, %v14154_v59  ;;  %v7175_v46 = vadd.f32 %v14049_v63, %v7174_v38  ;;  %v9843_v21 = vor.u32 %v10325_v44, %v9840_v29 }
 0x3c9   : > { %8509 = vst.msk [vmem:[#allocation5 + $0x160] sm:$0xff] %vm2601_vm11, %v8413_v20  ;;  %v8222_v40 = vmax.f32 %v8030_v39, %v8126_v58  ;;  %v4694_v31 = vrot.slane %v4693_v8, 4  ;;  %v14242_v9 = vrot.slane %v4696_v17, 5  ;;  %v4700_v7 = vshrl.u32 %v14203_v57, 16  ;;  %v8318_v2 = vld [vmem:[#allocation4 + $0x16a] sm:$0xff]  ;;  %v1023_v29 = vpop.f32.mrf.mxu0 }
 0x3ca   : > { %7935 = vst.msk [vmem:[#allocation4 + $0x178] sm:$0xff] %vm2601_vm11, %v7839_v30  ;;  %v2080_v52 = vsel %vm1716_vm4, %v2075_v10, %v14228_v0  ;;  %v9839_v62 = vor.u32 %v10326_v5, %v9838_v15  ;;  %v7424_v59 = vadd.f32 %v7423_v13, %v7175_v46  ;;  %v2289_v42 = vsel %vm2204_vm9, %v2286_v3, %v15284_v23  ;;  %v3077_v30 = vpop.permute.xlu1 %3076  ;;  %v14268_v20 = vld [vmem:[%s15246_s2] ss:$0 sm:$0xff]  ;;  %v10493_v38 = vld [vmem:[#allocation2 + $0x128] sm:$0xff]  ;;  %v2371_v46 = vpop.permute.xlu0 %2370 }
 0x3cb   : > { %v8414_v44 = vmax.f32 %v8222_v40, %v8318_v2  ;;  %v4699_v57 = vsel %vm11055_vm15, %v4694_v31, %v14242_v9  ;;  %1353 = vst.msk [vmem:[#allocation2 + $0x17c] sm:$0xf] %vm1257_vm3, %v1247_v61  ;;  %2193 = vrot.lane.b32.xlu1 %v2080_v52, %s10521_s16  ;;  %7462 = vmatmul.bf16.gmra.mxu2 %v9843_v21  ;;  %v14262_v11 = vsel %vm2504_vm5, %v14239_v18, 0  ;;  %v15285_v8 = vrot.slane %v14224_v6, 5 }
 0x3cc   : > { %v5654_v17 = vsel %vm10688_vm8, %v5652_v56, %v5653_v43  ;;  %5134 = vst [vmem:[#allocation3 + $0x334] sm:$0xf] %v4699_v57  ;;  %v7673_v3 = vadd.f32 %v13803_v60, %v7424_v59  ;;  %v1024_v54 = vadd.f32 %v14268_v20, %v1023_v29  ;;  %v4702_v56 = vrot.slane %v4700_v7, 4  ;;  %v14281_v61 = vpop.permute.xlu2 %2183  ;;  %v7176_v13 = vpop.f32.mrf.mxu1  ;;  %v8031_v29 = vld [vmem:[#allocation4 + $0x170] sm:$0xff] }
 0x3cd   : > { %8510 = vst.msk [vmem:[#allocation5 + $0x168] sm:$0xff] %vm2601_vm11, %v8414_v44  ;;  %v14274_v15 = vsel %vm2504_vm5, %v10493_v38, %v2180_v1  ;;  %7213 = vmatmul.bf16.gmra.mxu1 %v9839_v62  ;;  %v15283_v5 = vshrl.u32 %v14239_v18, 16  ;;  %v14277_v60 = vrot.slane %v5653_v43, 4  ;;  %v5295_v1 = vunpack.c.l.b16 %v14262_v11 }
 0x3ce   : > { %v7840_v39 = vmax.f32 %v7673_v3, 0.0  ;;  %5874 = vst [vmem:[#allocation3 + $0x3d4] sm:$0xf] %v5654_v17  ;;  %v1143_v58 = vmax.f32 %v1024_v54, 0.0  ;;  %v3194_v10 = vsel %vm2601_vm11, %v14274_v15, %v3077_v30  ;;  %v2085_v21 = vshll.u32 %v14239_v18, 16  ;;  %v14303_v3 = vpop.f32.mrf.mxu3 }
 0x3cf   : > { %2496 = vrot.lane.b32.xlu0 %v14239_v18, %s10522_s25  ;;  %v14289_v43 = vrot.slane %v15283_v5, 7  ;;  %v3256_v40 = vsel %vm2698_vm12, %v3194_v10, %v14174_v12  ;;  %v7177_v7 = vadd.f32 %v14049_v63, %v7176_v13  ;;  %v7425_v62 = vpop.f32.mrf.mxu2  ;;  %v14297_v59 = vrot.slane %v15285_v8, 4 }
 0x3d0   : > { %7936 = vst.msk [vmem:[#allocation4 + $0x180] sm:$0xff] %vm2601_vm11, %v7840_v39  ;;  %v1248_v31 = vpack.c.bf16 %v1143_v58, %v1143_v58  ;;  %v3879_v2 = vunpack.c.l.b16 %v3256_v40  ;;  %v3880_v52 = vunpack.c.h.b16 %v3256_v40  ;;  %v4703_v44 = vor.u32 %v4702_v56, %v14242_v9 }
 0x3d1   : > { %v8127_v57 = vld [vmem:[#allocation4 + $0x171] sm:$0xff]  ;;  %v2979_v17 = vor.u32 %v14289_v43, %v2085_v21  ;;  %v2671_v30 = vsel %vm2601_vm11, %v13997_v16, %v2371_v46  ;;  %v7426_v16 = vadd.f32 %v7425_v62, %v7177_v7  ;;  %v14323_v5 = vrot.slane %v2085_v21, 1 }
 0x3d2   : > { %v8223_v54 = vmax.f32 %v8031_v29, %v8127_v57  ;;  %1354 = vst.msk [vmem:[#allocation2 + $0x180] sm:$0xf] %vm1257_vm3, %v1248_v31  ;;  %v3976_v38 = vpack.c.b16 %v3879_v2, %v3879_v2  ;;  %v14306_v39 = vpack.c.b16 %v3880_v52, %v3880_v52  ;;  %v2768_v58 = vsel %vm2698_vm12, %v2671_v30, %v13894_v19  ;;  %v8319_v10 = vld [vmem:[#allocation4 + $0x172] sm:$0xff]  ;;  %v1025_v52 = vpop.f32.mrf.mxu0  ;;  %v9942_v57 = vld [vmem:[#allocation3 + $0x3c8] sm:$0xf] }
 0x3d3   : > { %v2980_v9 = vsel %vm2852_vm10, %v14193_v24, %v2979_v17  ;;  %2384 = vrot.lane.b32.xlu1 %v2289_v42, %s10523_s26  ;;  %v3444_v56 = vunpack.c.l.b16 %v2768_v58  ;;  %v3445_v13 = vunpack.c.h.b16 %v2768_v58  ;;  %v14315_v29 = vpack.c.b16 %v5295_v1, %v5295_v1  ;;  %v9852_v1 = vld [vmem:[#allocation3 + $0x324] sm:$0xf0]  ;;  %v8032_v58 = vld [vmem:[#allocation4 + $0x178] sm:$0xff] }
 0x3d4   : > { %v14313_v46 = vld [vmem:[#allocation5 + $0x160] ss:$2 sm:$0xff]  ;;  %v8415_v40 = vmax.f32 %v8223_v54, %v8319_v10  ;;  %3090 = vrot.lane.b32.xlu2 %v2980_v9, %s10523_s26  ;;  %v4706_v31 = vshll.u32 %v3976_v38, 16  ;;  %v4710_v2 = vshrl.u32 %v3976_v38, 16  ;;  %v4716_v24 = vshll.u32 %v14306_v39, 16  ;;  %v7179_v23 = vpop.f32.mrf.mxu1 }
 0x3d5   : > { %v10351_v30 = vld [vmem:[#allocation3 + $0x3d0] sm:$0xf0]  ;;  %v3540_v42 = vpack.c.b16 %v3444_v56, %v3444_v56  ;;  %v4704_v17 = vrot.slane %v4703_v44, 4  ;;  %v3541_v9 = vpack.c.b16 %v3445_v13, %v3445_v13  ;;  %v7675_v38 = vadd.f32 %v13857_v36, %v7426_v16  ;;  %v9850_v56 = vld [vmem:[#allocation3 + $0x318] sm:$0xf]  ;;  %v2375_v36 = vpop.permute.xlu2 %2374 }
 0x3d6   : > { %8511 = vst.msk [vmem:[#allocation5 + $0x170] sm:$0xff] %vm2601_vm11, %v8415_v40  ;;  %v9943_v7 = vor.u32 %v10351_v30, %v9942_v57  ;;  %v4708_v62 = vrot.slane %v4706_v31, 5  ;;  %v4712_v54 = vrot.slane %v4710_v2, 4  ;;  %v1026_v26 = vadd.f32 %v14268_v20, %v1025_v52  ;;  %v14325_v19 = vld [vmem:[#allocation2 + $0x178] sm:$0xff]  ;;  %v10329_v44 = vld [vmem:[#allocation3 + $0x320] sm:$0xf0] }
 0x3d7   : > { %v8128_v10 = vld [vmem:[#allocation4 + $0x179] sm:$0xff]  ;;  %v5659_v40 = vrot.slane %v14315_v29, 5  ;;  %3732 = vst [vmem:[#allocation3 + $0x330] sm:$0xf] %v3540_v42  ;;  %v14330_v52 = vrot.slane %v4716_v24, 5  ;;  %v7841_v21 = vmax.f32 %v7675_v38, 0.0  ;;  %v2083_v8 = vor.u32 %v2081_v53, %v14228_v0  ;;  %v14344_v53 = vpop.f32.mrf.mxu3  ;;  %v2182_v38 = vpop.permute.xlu1 %2181 }
 0x3d8   : > { %v8224_v57 = vmax.f32 %v8032_v58, %v8128_v10  ;;  %7751 = vmatmul.bf16.gmra.mxu3 %v9943_v7  ;;  %v4709_v31 = vsel %vm11055_vm15, %v4704_v17, %v4708_v62  ;;  %v4713_v2 = vor.u32 %v4712_v54, %v4708_v62  ;;  %v10328_v13 = vld [vmem:[#allocation3 + $0x31c] sm:$0xf]  ;;  %v1144_v30 = vmax.f32 %v1026_v26, 0.0  ;;  %3733 = vst [vmem:[#allocation3 + $0x33c] sm:$0xf] %v3541_v9  ;;  %v7428_v62 = vpop.f32.mrf.mxu2 }
 0x3d9   : > { %v8320_v16 = vld [vmem:[#allocation4 + $0x17a] sm:$0xff]  ;;  %5135 = vst [vmem:[#allocation3 + $0x340] sm:$0xf] %v4709_v31  ;;  %v7180_v7 = vadd.f32 %v14049_v63, %v7179_v23  ;;  %v9855_v17 = vor.u32 %v10328_v13, %v9852_v1  ;;  %v4720_v42 = vshrl.u32 %v14306_v39, 16  ;;  %v2088_v54 = vsel %vm1716_vm4, %v2083_v8, %v14323_v5 }
 0x3da   : > { %v8416_v29 = vmax.f32 %v8224_v57, %v8320_v16  ;;  %v4714_v58 = vrot.slane %v4713_v2, 4  ;;  %7937 = vst.msk [vmem:[#allocation4 + $0x188] sm:$0xff] %vm2601_vm11, %v7841_v21  ;;  %v1249_v24 = vpack.c.bf16 %v1144_v30, %v1144_v30  ;;  %v2675_v26 = vsel %vm2601_vm11, %v14161_v22, %v2375_v36 }
 0x3db   : > { %2498 = vrot.lane.b32.xlu1 %v14325_v19, %s10522_s25  ;;  %7467 = vmatmul.bf16.gmra.mxu2 %v9855_v17  ;;  %v2772_v0 = vsel %vm2698_vm12, %v2675_v26, %v14180_v55  ;;  %v9851_v8 = vor.u32 %v10329_v44, %v9850_v56  ;;  %v7429_v10 = vadd.f32 %v7428_v62, %v7180_v7  ;;  %v15344_v22 = vrot.slane %v14224_v6, 5  ;;  %v14362_v55 = vld [vmem:[#allocation2 + $0x158] sm:$0xff]  ;;  %v10495_v7 = vld [vmem:[#allocation2 + $0x130] sm:$0xff] }
 0x3dc   : > { %8512 = vst.msk [vmem:[#allocation5 + $0x178] sm:$0xff] %vm2601_vm11, %v8416_v29  ;;  %v4719_v23 = vsel %vm11055_vm15, %v4714_v58, %v14330_v52  ;;  %2195 = vrot.lane.b32.xlu2 %v2088_v54, %s10521_s16  ;;  %v3448_v39 = vunpack.c.l.b16 %v2772_v0  ;;  %v3449_v1 = vunpack.c.h.b16 %v2772_v0  ;;  %v5660_v57 = vsel %vm10688_vm8, %v14297_v59, %v5659_v40  ;;  %v8033_v59 = vld [vmem:[#allocation4 + $0x180] sm:$0xff]  ;;  %v14390_v54 = vpop.permute.xlu0 %2484 }
 0x3dd   : > { %5136 = vst [vmem:[#allocation3 + $0x34c] sm:$0xf] %v4719_v23  ;;  %v5657_v9 = vsel %vm10688_vm8, %v14277_v60, %v15344_v22  ;;  %7218 = vmatmul.bf16.gmra.mxu1 %v9851_v8  ;;  %v2290_v56 = vrot.slane %v14362_v55, 1  ;;  %v4722_v44 = vrot.slane %v4720_v42, 4  ;;  %v7678_v6 = vadd.f32 %v13923_v34, %v7429_v10  ;;  %v7181_v10 = vpop.f32.mrf.mxu1 }
 0x3de   : > { %1355 = vst.msk [vmem:[#allocation2 + $0x184] sm:$0xf] %vm1257_vm3, %v1249_v24  ;;  %v3544_v31 = vpack.c.b16 %v3448_v39, %v3448_v39  ;;  %v3545_v2 = vpack.c.b16 %v3449_v1, %v3449_v1  ;;  %v15345_v60 = vunpack.c.h.b16 %v14262_v11  ;;  %v5661_v16 = vrot.slane %v5659_v40, 4  ;;  %v1028_v1 = vpop.f32.mrf.mxu0 }
 0x3df   : > { %5875 = vst [vmem:[#allocation3 + $0x3e0] sm:$0xf] %v5657_v9  ;;  %v7842_v36 = vmax.f32 %v7678_v6, 0.0  ;;  %v4723_v29 = vor.u32 %v4722_v44, %v14330_v52  ;;  %v14375_v34 = vsel %vm2504_vm5, %v10495_v7, %v2182_v38  ;;  %v15346_v11 = vrot.slane %v13815_v14, 1  ;;  %v14385_v52 = vpop.f32.mrf.mxu3  ;;  %v2373_v44 = vpop.permute.xlu1 %2372 }
 0x3e0   : > { %5876 = vst [vmem:[#allocation3 + $0x3ec] sm:$0xf] %v5660_v57  ;;  %v14369_v13 = vpack.c.b16 %v15345_v60, %v15345_v60  ;;  %v3196_v24 = vsel %vm2601_vm11, %v14375_v34, %v14220_v25  ;;  %v2097_v26 = vshrl.u32 %v14325_v19, 16  ;;  %v8676_v14 = vmax.f32 %v14075_v37, %v14313_v46 }
 0x3e1   : > { %3736 = vst [vmem:[#allocation3 + $0x360] sm:$0xf] %v3544_v31  ;;  %v8129_v21 = vld [vmem:[#allocation4 + $0x181] sm:$0xff]  ;;  %v2291_v40 = vsel %vm2204_vm9, %v15346_v11, %v2290_v56  ;;  %v4724_v23 = vrot.slane %v4723_v29, 4  ;;  %v3257_v39 = vsel %vm2698_vm12, %v3196_v24, %v14390_v54  ;;  %v1029_v57 = vadd.f32 %v14268_v20, %v1028_v1 }
 0x3e2   : > { %3737 = vst [vmem:[#allocation3 + $0x36c] sm:$0xf] %v3545_v2  ;;  %v8225_v58 = vmax.f32 %v8033_v59, %v8129_v21  ;;  %v8321_v17 = vld [vmem:[#allocation4 + $0x182] sm:$0xff]  ;;  %v5662_v62 = vrot.slane %v14369_v13, 5  ;;  %v3881_v9 = vunpack.c.l.b16 %v3257_v39  ;;  %v3882_v38 = vunpack.c.h.b16 %v3257_v39 }
 0x3e3   : > { %v14371_v30 = vld [vmem:[#allocation5 + $0x170] ss:$2 sm:$0xff]  ;;  %7938 = vst.msk [vmem:[#allocation4 + $0x190] sm:$0xff] %vm2601_vm11, %v7842_v36  ;;  %v2093_v2 = vshll.u32 %v14325_v19, 16  ;;  %v14408_v6 = vrot.slane %v2097_v26, 7  ;;  %v7182_v60 = vadd.f32 %v14049_v63, %v7181_v10  ;;  %v2673_v36 = vsel %vm2601_vm11, %v14064_v35, %v2373_v44  ;;  %v8034_v59 = vld [vmem:[#allocation4 + $0x188] sm:$0xff] }
 0x3e4   : > { %2386 = vrot.lane.b32.xlu2 %v2291_v40, %s10523_s26  ;;  %v8417_v42 = vmax.f32 %v8225_v58, %v8321_v17  ;;  %v5663_v25 = vsel %vm10688_vm8, %v5661_v16, %v5662_v62  ;;  %v7430_v16 = vpop.f32.mrf.mxu2  ;;  %v3978_v29 = vpack.c.b16 %v3881_v9, %v3881_v9  ;;  %v14413_v58 = vpack.c.b16 %v3882_v38, %v3882_v38 }
 0x3e5   : > { %v14403_v31 = vld [vmem:[#allocation2 + $0x180] sm:$0xff]  ;;  %5877 = vst [vmem:[#allocation3 + $0x3f8] sm:$0xf] %v5663_v25  ;;  %v1145_v7 = vmax.f32 %v1029_v57, 0.0  ;;  %v2770_v11 = vsel %vm2698_vm12, %v2673_v36, %v14066_v4  ;;  %v2982_v17 = vor.u32 %v14408_v6, %v2093_v2  ;;  %v15347_v1 = vshrl.u32 %v14239_v18, 16 }
 0x3e6   : > { %8513 = vst.msk [vmem:[#allocation5 + $0x180] sm:$0xff] %vm2601_vm11, %v8417_v42  ;;  %v9954_v0 = vld [vmem:[#allocation3 + $0x3e0] sm:$0xf]  ;;  %v3446_v42 = vunpack.c.l.b16 %v2770_v11  ;;  %v3447_v24 = vunpack.c.h.b16 %v2770_v11  ;;  %v4730_v39 = vshrl.u32 %v3978_v29, 16  ;;  %v4736_v35 = vshll.u32 %v14413_v58, 16  ;;  %v1030_v11 = vpop.f32.mrf.mxu0 }
 0x3e7   : > { %v10354_v8 = vld [vmem:[#allocation3 + $0x3e8] sm:$0xf0]  ;;  %v2091_v10 = vor.u32 %v15347_v1, %v14323_v5  ;;  %v9864_v25 = vld [vmem:[#allocation3 + $0x33c] sm:$0xf0]  ;;  %v1250_v4 = vpack.c.bf16 %v1145_v7, %v1145_v7  ;;  %v2983_v9 = vsel %vm2852_vm10, %v14289_v43, %v2982_v17  ;;  %v3321_v38 = vsel %vm2504_vm5, %v14325_v19, 0 }
 0x3e8   : > { %v9955_v22 = vor.u32 %v10354_v8, %v9954_v0  ;;  %v4726_v8 = vshll.u32 %v3978_v29, 16  ;;  %v4732_v44 = vrot.slane %v4730_v39, 4  ;;  %3092 = vrot.lane.b32.xlu0 %v2983_v9, %s10523_s26  ;;  %v3542_v36 = vpack.c.b16 %v3446_v42, %v3446_v42  ;;  %v10331_v5 = vld [vmem:[#allocation3 + $0x334] sm:$0xf]  ;;  %v9862_v42 = vld [vmem:[#allocation3 + $0x330] sm:$0xf]  ;;  %v14439_v39 = vpop.f32.mrf.mxu3 }
 0x3e9   : > { %v3543_v29 = vpack.c.b16 %v3447_v24, %v3447_v24  ;;  %v7431_v7 = vadd.f32 %v7430_v16, %v7182_v60  ;;  %v9867_v43 = vor.u32 %v10331_v5, %v9864_v25  ;;  %1356 = vst.msk [vmem:[#allocation2 + $0x188] sm:$0xf] %vm1257_vm3, %v1250_v4  ;;  %v3322_v16 = vsel %vm2504_vm5, %v14403_v31, 0  ;;  %v10332_v24 = vld [vmem:[#allocation3 + $0x338] sm:$0xf0] }
 0x3ea   : > { %v8130_v21 = vld [vmem:[#allocation4 + $0x189] sm:$0xff]  ;;  %7756 = vmatmul.bf16.gmra.mxu3 %v9955_v22  ;;  %v4728_v57 = vrot.slane %v4726_v8, 5  ;;  %v14435_v8 = vrot.slane %v4736_v35, 5  ;;  %3734 = vst [vmem:[#allocation3 + $0x348] sm:$0xf] %v3542_v36  ;;  %v9863_v36 = vor.u32 %v10332_v24, %v9862_v42  ;;  %v14469_v42 = vld [vmem:[#allocation2 + $0x198] sm:$0xff] }
 0x3eb   : > { %v8226_v40 = vmax.f32 %v8034_v59, %v8130_v21  ;;  %v8322_v0 = vld [vmem:[#allocation4 + $0x18a] sm:$0xff]  ;;  %v14429_v59 = vrot.slane %v2093_v2, 1  ;;  %v4740_v21 = vshrl.u32 %v14413_v58, 16  ;;  %v1031_v2 = vadd.f32 %v14268_v20, %v1030_v11  ;;  %7472 = vmatmul.bf16.gmra.mxu2 %v9867_v43  ;;  %3735 = vst [vmem:[#allocation3 + $0x354] sm:$0xf] %v3543_v29 }
 0x3ec   : > { %2500 = vrot.lane.b32.xlu2 %v14403_v31, %s10522_s25  ;;  %v4729_v17 = vsel %vm11055_vm15, %v4724_v23, %v4728_v57  ;;  %v7680_v58 = vadd.f32 %v13969_v49, %v7431_v7  ;;  %v5297_v23 = vunpack.c.l.b16 %v3321_v38  ;;  %v7433_v4 = vpop.f32.mrf.mxu2  ;;  %v5300_v49 = vunpack.c.h.b16 %v3322_v16 }
 0x3ed   : > { %v8418_v22 = vmax.f32 %v8226_v40, %v8322_v0  ;;  %v7184_v40 = vpop.f32.mrf.mxu1  ;;  %v4733_v0 = vor.u32 %v4732_v44, %v4728_v57  ;;  %5137 = vst [vmem:[#allocation3 + $0x358] sm:$0xf] %v4729_v17  ;;  %v1146_v1 = vmax.f32 %v1031_v2, 0.0  ;;  %v2096_v25 = vsel %vm1716_vm4, %v2091_v10, %v14429_v59  ;;  %7223 = vmatmul.bf16.gmra.mxu1 %v9863_v36 }
 0x3ee   : > { %v7185_v60 = vadd.f32 %v14049_v63, %v7184_v40  ;;  %v7843_v9 = vmax.f32 %v7680_v58, 0.0  ;;  %v5299_v57 = vunpack.c.l.b16 %v3322_v16  ;;  %v14447_v44 = vpack.c.b16 %v5297_v23, %v5297_v23  ;;  %v14481_v23 = vld [vmem:[#allocation2 + $0x160] sm:$0xff] }
 0x3ef   : > { %8514 = vst.msk [vmem:[#allocation5 + $0x188] sm:$0xff] %vm2601_vm11, %v8418_v22  ;;  %v4734_v35 = vrot.slane %v4733_v0, 4  ;;  %v5298_v22 = vunpack.c.h.b16 %v3321_v38  ;;  %v1251_v5 = vpack.c.bf16 %v1146_v1, %v1146_v1  ;;  %v14454_v40 = vpack.c.b16 %v5300_v49, %v5300_v49  ;;  %v8035_v49 = vld [vmem:[#allocation4 + $0x190] sm:$0xff] }
 0x3f0   : > { %v5396_v11 = vpack.c.b16 %v5299_v57, %v5299_v57  ;;  %v15290_v10 = vrot.slane %v14447_v44, 5  ;;  %v7434_v38 = vadd.f32 %v7433_v4, %v7185_v60  ;;  %v5664_v29 = vrot.slane %v5662_v62, 4  ;;  %7939 = vst.msk [vmem:[#allocation4 + $0x198] sm:$0xff] %vm2601_vm11, %v7843_v9  ;;  %2197 = vrot.lane.b32.xlu0 %v2096_v25, %s10521_s16  ;;  %v8797_v62 = vld [vmem:[#allocation6 + $0x88] sm:$0x7]  ;;  %v14488_v4 = vpop.permute.xlu2 %2488 }
 0x3f1   : > { %v4739_v63 = vsel %vm11055_vm15, %v4734_v35, %v14435_v8  ;;  %v14452_v7 = vpack.c.b16 %v5298_v22, %v5298_v22  ;;  %1357 = vst.msk [vmem:[#allocation2 + $0x18c] sm:$0xf] %vm1257_vm3, %v1251_v5  ;;  %v2999_v13 = vshrl.u32 %v14469_v42, 16  ;;  %v4742_v37 = vrot.slane %v4740_v21, 4  ;;  %v14486_v22 = vpop.f32.mrf.mxu3 }
 0x3f2   : > { %5138 = vst [vmem:[#allocation3 + $0x364] sm:$0xf] %v4739_v63  ;;  %v5671_v2 = vrot.slane %v5396_v11, 5  ;;  %v5666_v60 = vsel %vm10688_vm8, %v5664_v29, %v15290_v10  ;;  %v7683_v16 = vadd.f32 %v14025_v28, %v7434_v38  ;;  %v2292_v24 = vrot.slane %v14481_v23, 1 }
 0x3f3   : > { %v15289_v17 = vrot.slane %v14452_v7, 5  ;;  %15348 = vst [vmem:[#allocation9_spill] sm:$0xff] %v14481_v23  ;;  %v8838_v25 = vrot.slane %v8797_v62, 4  ;;  %v14494_v21 = vrot.slane %v2999_v13, 7  ;;  %v3002_v9 = vshll.u32 %v14469_v42, 16 }
 0x3f4   : > { %v5673_v46 = vrot.slane %v5671_v2, 4  ;;  %5878 = vst [vmem:[#allocation3 + $0x404] sm:$0xf] %v5666_v60  ;;  %v7844_v1 = vmax.f32 %v7683_v16, 0.0  ;;  %v15287_v57 = vrot.slane %v14108_v50, 1  ;;  %v4743_v63 = vor.u32 %v4742_v37, %v14435_v8  ;;  %v1033_v60 = vpop.f32.mrf.mxu0 }
 0x3f5   : > { %v5670_v58 = vrot.slane %v15289_v17, 4  ;;  %15349 = vst [vmem:[#allocation10_spill] sm:$0xff] %v14486_v22  ;;  %v2293_v36 = vsel %vm2204_vm9, %v2290_v56, %v2292_v24  ;;  %v15350_v38 = vrot.slane %v14131_v27, 4  ;;  %v14512_v13 = vor.u32 %v3002_v9, %v14494_v21 }
 0x3f6   : > { %v14459_v43 = vld [vmem:[#allocation5 + $0x180] ss:$2 sm:$0xff]  ;;  %7940 = vst.msk [vmem:[#allocation4 + $0x1a0] sm:$0xff] %vm2601_vm11, %v7844_v1  ;;  %v15286_v27 = vshrl.u32 %v14403_v31, 16  ;;  %v14522_v16 = vsel %vm2204_vm9, %v2292_v24, %v15287_v57  ;;  %v14525_v37 = vrot.slane %v4743_v63, 4  ;;  %v2810_v1 = vshll.u32 %v14403_v31, 16 }
 0x3f7   : > { %v8720_v0 = vmax.f32 %v8676_v14, %v14459_v43  ;;  %v15291_v14 = vrot.slane %v14454_v40, 5  ;;  %v5672_v35 = vsel %vm10688_vm8, %v5670_v58, %v5671_v2  ;;  %v8131_v5 = vld [vmem:[#allocation4 + $0x191] sm:$0xff]  ;;  %v8839_v29 = vsel %vm767_vm0, %v15350_v38, %v8838_v25  ;;  %v7186_v25 = vpop.f32.mrf.mxu1  ;;  %v14539_v63 = vld [vmem:[%s15248_s4] ss:$0 sm:$0xff] }
 0x3f8   : > { %5880 = vst [vmem:[#allocation3 + $0x41c] sm:$0xf] %v5672_v35  ;;  %v8227_v11 = vmax.f32 %v8035_v49, %v8131_v5  ;;  %2388 = vrot.lane.b32.xlu0 %v2293_v36, %s10523_s26  ;;  %v8323_v8 = vld [vmem:[#allocation4 + $0x192] sm:$0xff]  ;;  %v1034_v35 = vadd.f32 %v14268_v20, %v1033_v60  ;;  %v14530_v49 = vpop.permute.xlu1 %2486  ;;  %v14534_v24 = vrot.slane %v15286_v27, 7  ;;  %v7187_v5 = vadd.f32 %v14539_v63, %v7186_v25  ;;  %v14551_v60 = vpop.permute.xlu2 %3084 }
 0x3f9   : > { %8764 = vst.msk [vmem:[#allocation6 + $0xa0] sm:$0xff] %vm2601_vm11, %v8720_v0  ;;  %v5675_v28 = vsel %vm10688_vm8, %v5673_v46, %v15291_v14  ;;  %v10498_v0 = vld [vmem:[#allocation2 + $0x138] sm:$0xff]  ;;  %v14560_v10 = vor.u32 %v2097_v26, %v14429_v59  ;;  %v10334_v14 = vld [vmem:[#allocation3 + $0x34c] sm:$0xf]  ;;  %v14569_v19 = vrot.slane %v2810_v1, 1  ;;  %vm8853_vm0 = vcmask 1041408  }
 0x3fa   : > { %5881 = vst [vmem:[#allocation3 + $0x428] sm:$0xf] %v5675_v28  ;;  %v14509_v2 = vsel %vm2504_vm5, %v10498_v0, %v14281_v61  ;;  %v8419_v62 = vmax.f32 %v8227_v11, %v8323_v8  ;;  %v9966_v58 = vld [vmem:[#allocation3 + $0x3f8] sm:$0xf]  ;;  %v3081_v28 = vpop.permute.xlu0 %3080  ;;  %v7435_v11 = vpop.f32.mrf.mxu2  ;;  %v1147_v0 = vmax.f32 %v1034_v35, 0.0  ;;  %v2985_v57 = vor.u32 %v14534_v24, %v2810_v1 }
 0x3fb   : > { %v10357_v46 = vld [vmem:[#allocation3 + $0x400] sm:$0xf0]  ;;  %v3198_v36 = vsel %vm2601_vm11, %v14509_v2, %v3081_v28  ;;  %v8036_v27 = vld [vmem:[#allocation4 + $0x198] sm:$0xff]  ;;  %v14555_v35 = vpop.f32.mrf.mxu3  ;;  %v7436_v17 = vadd.f32 %v7435_v11, %v7187_v5 }
 0x3fc   : > { %8515 = vst.msk [vmem:[#allocation5 + $0x190] sm:$0xff] %vm2601_vm11, %v8419_v62  ;;  %v9967_v9 = vor.u32 %v10357_v46, %v9966_v58  ;;  %v3258_v8 = vsel %vm2698_vm12, %v3198_v36, %v14530_v49  ;;  %v9876_v62 = vld [vmem:[#allocation3 + $0x354] sm:$0xf0]  ;;  %v14549_v58 = vld [vmem:[#allocation2 + $0x188] sm:$0xff]  ;;  %v1252_v36 = vpack.c.bf16 %v1147_v0, %v1147_v0 }
 0x3fd   : > { %v8132_v28 = vld [vmem:[#allocation4 + $0x199] sm:$0xff]  ;;  %v3883_v55 = vunpack.c.l.b16 %v3258_v8  ;;  %v3323_v26 = vsel %vm2504_vm5, %v14549_v58, 0  ;;  %v9874_v0 = vld [vmem:[#allocation3 + $0x348] sm:$0xf] }
 0x3fe   : > { %7761 = vmatmul.bf16.gmra.mxu3 %v9967_v9  ;;  %v2986_v9 = vsel %vm2852_vm10, %v14408_v6, %v2985_v57  ;;  %1358 = vst.msk [vmem:[#allocation2 + $0x190] sm:$0xf] %vm1257_vm3, %v1252_v36  ;;  %v5302_v1 = vunpack.c.h.b16 %v3323_v26 }
 0x3ff   : > { %v3980_v46 = vpack.c.b16 %v3883_v55, %v3883_v55  ;;  %3094 = vrot.lane.b32.xlu1 %v2986_v9, %s10523_s26  ;;  %v15351_v9 = vrot.slane %v14454_v40, 5 }
 0x400   : > { %v14516_v56 = vld [vmem:[#allocation6 + $0xa0] sm:$0xff]  ;;  %2502 = vrot.lane.b32.xlu0 %v14549_v58, %s10522_s25  ;;  %v3083_v40 = vpop.permute.xlu1 %3082 }
 0x401   : > { %v15288_v61 = vrot.slane %v14516_v56, 1  ;;  %v4746_v59 = vshll.u32 %v3980_v46, 16  ;;  %v4750_v6 = vshrl.u32 %v3980_v46, 16  ;;  %v10335_v46 = vld [vmem:[#allocation3 + $0x350] sm:$0xf0] }
 0x402   : > { %v2186_v11 = vpop.permute.xlu0 %2185 }
 0x403   : > { %v8885_v38 = vsel %vm2204_vm9, %v8839_v29, %v15288_v61  ;;  %v3884_v29 = vunpack.c.h.b16 %v3258_v8  ;;  %v8228_v61 = vmax.f32 %v8036_v27, %v8132_v28  ;;  %v9879_v8 = vor.u32 %v10334_v14, %v9876_v62  ;;  %v1035_v14 = vpop.f32.mrf.mxu0 }
 0x404   : > { %v8896_v25 = vpack.c.bf16 %v8885_v38, %v8885_v38  ;;  %v8324_v38 = vld [vmem:[#allocation4 + $0x19a] sm:$0xff]  ;;  %v7685_v27 = vadd.f32 %v14073_v48, %v7436_v17  ;;  %v1036_v5 = vadd.f32 %v14268_v20, %v1035_v14  ;;  %v7189_v48 = vpop.f32.mrf.mxu1  ;;  %v5301_v17 = vunpack.c.l.b16 %v3323_v26 }
 0x405   : > { %v3981_v23 = vpack.c.b16 %v3884_v29, %v3884_v29  ;;  %v8420_v22 = vmax.f32 %v8228_v61, %v8324_v38  ;;  %7477 = vmatmul.bf16.gmra.mxu2 %v9879_v8  ;;  %v4748_v62 = vrot.slane %v4746_v59, 5  ;;  %v14583_v20 = vpack.c.b16 %v5302_v1, %v5302_v1 }
 0x406   : > { %8913 = vst.msk [vmem:[%s12430_s12 + $0x18] sm:$0xf] %vm8906_vm7, %v8896_v25  ;;  %v7845_v61 = vmax.f32 %v7685_v27, 0.0  ;;  %v4752_v25 = vrot.slane %v4750_v6, 4  ;;  %v1148_v36 = vmax.f32 %v1036_v5, 0.0  ;;  %v5398_v38 = vpack.c.b16 %v5301_v17, %v5301_v17  ;;  %v14595_v5 = vpop.permute.xlu2 %2189 }
 0x407   : > { %v4756_v57 = vshll.u32 %v3981_v23, 16  ;;  %v4760_v55 = vshrl.u32 %v3981_v23, 16  ;;  %8516 = vst.msk [vmem:[#allocation5 + $0x198] sm:$0xff] %vm2601_vm11, %v8420_v22  ;;  %v7438_v23 = vpop.f32.mrf.mxu2  ;;  %v7190_v22 = vadd.f32 %v14539_v63, %v7189_v48  ;;  %v5676_v8 = vrot.slane %v15351_v9, 4 }
 0x408   : > { %7941 = vst.msk [vmem:[#allocation4 + $0x1a8] sm:$0xff] %vm2601_vm11, %v7845_v61  ;;  %v4749_v27 = vsel %vm11055_vm15, %v14525_v37, %v4748_v62  ;;  %v4753_v26 = vor.u32 %v4752_v25, %v4748_v62  ;;  %v15352_v59 = vrot.slane %v14447_v44, 5  ;;  %v5677_v14 = vrot.slane %v5398_v38, 5  ;;  %v10500_v37 = vld [vmem:[#allocation2 + $0x140] sm:$0xff]  ;;  %v14602_v62 = vpop.f32.mrf.mxu3 }
 0x409   : > { %v14577_v28 = vrot.slane %v4756_v57, 5  ;;  %v14579_v29 = vrot.slane %v4760_v55, 4  ;;  %5139 = vst [vmem:[#allocation3 + $0x370] sm:$0xf] %v4749_v27  ;;  %v1253_v57 = vpack.c.bf16 %v1148_v36, %v1148_v36  ;;  %v2813_v55 = vsel %vm1716_vm4, %v14560_v10, %v14569_v19 }
 0x40a   : > { %v5667_v6 = vrot.slane %v15352_v59, 4  ;;  %v9875_v61 = vor.u32 %v10335_v46, %v9874_v0  ;;  %v4754_v48 = vrot.slane %v4753_v26, 4  ;;  %v14600_v1 = vsel %vm2504_vm5, %v10500_v37, %v2186_v11  ;;  %2834 = vrot.lane.b32.xlu1 %v2813_v55, %s10521_s16  ;;  %v2377_v59 = vpop.permute.xlu0 %2376 }
 0x40b   : > { %v4763_v17 = vor.u32 %v14579_v29, %v14577_v28  ;;  %v7439_v44 = vadd.f32 %v7438_v23, %v7190_v22  ;;  %1359 = vst.msk [vmem:[#allocation2 + $0x194] sm:$0xf] %vm1257_vm3, %v1253_v57  ;;  %v5678_v0 = vsel %vm10688_vm8, %v5676_v8, %v5677_v14  ;;  %v5679_v25 = vrot.slane %v5677_v14, 4 }
 0x40c   : > { %v5680_v46 = vrot.slane %v14583_v20, 5  ;;  %7228 = vmatmul.bf16.gmra.mxu1 %v9875_v61  ;;  %v2822_v29 = vshrl.u32 %v14549_v58, 16  ;;  %v4759_v11 = vsel %vm11055_vm15, %v4754_v48, %v14577_v28  ;;  %5882 = vst [vmem:[#allocation3 + $0x434] sm:$0xf] %v5678_v0  ;;  %v15353_v22 = vrot.slane %v14452_v7, 5  ;;  %v7191_v26 = vpop.f32.mrf.mxu1 }
 0x40d   : > { %v7688_v23 = vadd.f32 %v14129_v45, %v7439_v44  ;;  %v3200_v9 = vsel %vm2601_vm11, %v14600_v1, %v3083_v40  ;;  %v15354_v8 = vmax.f32 %v14206_v51, %v14371_v30  ;;  %5140 = vst [vmem:[#allocation3 + $0x37c] sm:$0xf] %v4759_v11  ;;  %v2818_v45 = vshll.u32 %v14549_v58, 16 }
 0x40e   : > { %v14610_v36 = vld [vmem:[#allocation5 + $0x190] ss:$2 sm:$0xff]  ;;  %v5669_v38 = vsel %vm10688_vm8, %v5667_v6, %v15353_v22  ;;  %v5681_v28 = vsel %vm10688_vm8, %v5679_v25, %v5680_v46  ;;  %v14633_v7 = vrot.slane %v2822_v29, 7  ;;  %v7192_v51 = vadd.f32 %v14539_v63, %v7191_v26 }
 0x40f   : > { %v8721_v27 = vmax.f32 %v15354_v8, %v14610_v36  ;;  %v8037_v6 = vld [vmem:[#allocation4 + $0x1a0] sm:$0xff]  ;;  %5883 = vst [vmem:[#allocation3 + $0x440] sm:$0xf] %v5681_v28  ;;  %v7846_v55 = vmax.f32 %v7688_v23, 0.0  ;;  %v3259_v30 = vsel %vm2698_vm12, %v3200_v9, %v14488_v4  ;;  %v2677_v14 = vsel %vm2601_vm11, %v14274_v15, %v2377_v59  ;;  %v7440_v61 = vpop.f32.mrf.mxu2 }
 0x410   : > { %v8133_v57 = vld [vmem:[#allocation4 + $0x1a1] sm:$0xff]  ;;  %v2988_v48 = vor.u32 %v14633_v7, %v2818_v45  ;;  %v3885_v37 = vunpack.c.l.b16 %v3259_v30  ;;  %v3886_v44 = vunpack.c.h.b16 %v3259_v30  ;;  %v2774_v25 = vsel %vm2698_vm12, %v2677_v14, %v14174_v12  ;;  %5879 = vst [vmem:[#allocation3 + $0x410] sm:$0xf] %v5669_v38  ;;  %v9888_v26 = vld [vmem:[#allocation3 + $0x36c] sm:$0xf0]  ;;  %v2381_v14 = vpop.permute.xlu2 %2380 }
 0x411   : > { %8765 = vst.msk [vmem:[#allocation6 + $0xa8] sm:$0xff] %vm2601_vm11, %v8721_v27  ;;  %v8229_v40 = vmax.f32 %v8037_v6, %v8133_v57  ;;  %v8325_v0 = vld [vmem:[#allocation4 + $0x1a2] sm:$0xff]  ;;  %v7441_v11 = vadd.f32 %v7440_v61, %v7192_v51  ;;  %v15355_v23 = vrot.slane %v14239_v18, 1  ;;  %v15356_v22 = vrot.slane %v14108_v50, 1 }
 0x412   : > { %7942 = vst.msk [vmem:[#allocation4 + $0x1b0] sm:$0xff] %vm2601_vm11, %v7846_v55  ;;  %v2989_v8 = vsel %vm2852_vm10, %v14534_v24, %v2988_v48  ;;  %v3982_v27 = vpack.c.b16 %v3885_v37, %v3885_v37  ;;  %v3983_v28 = vpack.c.b16 %v3886_v44, %v3886_v44  ;;  %v3450_v59 = vunpack.c.l.b16 %v2774_v25  ;;  %v10337_v50 = vld [vmem:[#allocation3 + $0x364] sm:$0xf]  ;;  %v14658_v55 = vld [vmem:[#allocation2 + $0x190] sm:$0xff]  ;;  %2390 = vrot.lane.b32.xlu1 %v14522_v16, %s10523_s26  ;;  %v2188_v37 = vpop.permute.xlu1 %2187  ;;  %v14666_v44 = vpop.f32.mrf.mxu3 }
 0x413   : > { %v14650_v15 = vsel %vm2204_vm9, %v15356_v22, %v15355_v23  ;;  %v8421_v9 = vmax.f32 %v8229_v40, %v8325_v0  ;;  %3096 = vrot.lane.b32.xlu2 %v2989_v8, %s10523_s26  ;;  %v3451_v12 = vunpack.c.h.b16 %v2774_v25  ;;  %v7690_v6 = vadd.f32 %v14185_v32, %v7441_v11 }
 0x414   : > { %v14656_v57 = vrot.slane %v2818_v45, 1  ;;  %v4764_v51 = vrot.slane %v4763_v17, 4  ;;  %v4766_v24 = vshll.u32 %v3982_v27, 16  ;;  %v4770_v38 = vshrl.u32 %v3982_v27, 16  ;;  %v10360_v17 = vld [vmem:[#allocation3 + $0x418] sm:$0xf0]  ;;  %v7194_v16 = vpop.f32.mrf.mxu1 }
 0x415   : > { %8517 = vst.msk [vmem:[#allocation5 + $0x1a0] sm:$0xff] %vm2601_vm11, %v8421_v9  ;;  %v4776_v30 = vshll.u32 %v3983_v28, 16  ;;  %v3546_v61 = vpack.c.b16 %v3450_v59, %v3450_v59  ;;  %v3547_v40 = vpack.c.b16 %v3451_v12, %v3451_v12  ;;  %v15357_v32 = vshrl.u32 %v14403_v31, 16 }
 0x416   : > { %v9891_v48 = vor.u32 %v10337_v50, %v9888_v26  ;;  %v4768_v0 = vrot.slane %v4766_v24, 5  ;;  %v4772_v25 = vrot.slane %v4770_v38, 4  ;;  %v4780_v11 = vshrl.u32 %v3983_v28, 16  ;;  %v8038_v26 = vld [vmem:[#allocation4 + $0x1a8] sm:$0xff] }
 0x417   : > { %v2816_v45 = vor.u32 %v15357_v32, %v14569_v19  ;;  %v7847_v23 = vmax.f32 %v7690_v6, 0.0  ;;  %v14670_v9 = vrot.slane %v4776_v30, 5  ;;  %3738 = vst [vmem:[#allocation3 + $0x378] sm:$0xf] %v3546_v61  ;;  %v3324_v31 = vsel %vm2504_vm5, %v14658_v55, 0  ;;  %v7443_v27 = vpop.f32.mrf.mxu2 }
 0x418   : > { %v14668_v22 = vld [vmem:[#allocation6 + $0xa8] sm:$0x7]  ;;  %7482 = vmatmul.bf16.gmra.mxu2 %v9891_v48  ;;  %v2681_v19 = vsel %vm2601_vm11, %v14509_v2, %v2381_v14  ;;  %v4769_v12 = vsel %vm11055_vm15, %v4764_v51, %v4768_v0  ;;  %v4773_v6 = vor.u32 %v4772_v25, %v4768_v0  ;;  %3739 = vst [vmem:[#allocation3 + $0x384] sm:$0xf] %v3547_v40  ;;  %v5303_v30 = vunpack.c.l.b16 %v3324_v31  ;;  %v9886_v14 = vld [vmem:[#allocation3 + $0x360] sm:$0xf] }
 0x419   : > { %v2821_v8 = vsel %vm1716_vm4, %v2816_v45, %v14656_v57  ;;  %v8846_v28 = vrot.slane %v14668_v22, 1  ;;  %v8134_v59 = vld [vmem:[#allocation4 + $0x1a9] sm:$0xff]  ;;  %v7195_v50 = vadd.f32 %v14539_v63, %v7194_v16  ;;  %5141 = vst [vmem:[#allocation3 + $0x388] sm:$0xf] %v4769_v12  ;;  %v5304_v61 = vunpack.c.h.b16 %v3324_v31 }
 0x41a   : > { %v8230_v24 = vmax.f32 %v8038_v26, %v8134_v59  ;;  %v9978_v38 = vld [vmem:[#allocation3 + $0x410] sm:$0xf]  ;;  %v2778_v2 = vsel %vm2698_vm12, %v2681_v19, %v14530_v49  ;;  %v15358_v32 = vrot.slane %v14516_v56, 1  ;;  %v4774_v40 = vrot.slane %v4773_v6, 4  ;;  %7943 = vst.msk [vmem:[#allocation4 + $0x1b8] sm:$0xff] %vm2601_vm11, %v7847_v23  ;;  %3107 = vrot.lane.b32.xlu1 %v14658_v55, %s10522_s25  ;;  %v10501_v26 = vld [vmem:[#allocation2 + $0x148] sm:$0xff] }
 0x41b   : > { %v8326_v51 = vld [vmem:[#allocation4 + $0x1aa] sm:$0xff]  ;;  %v9979_v48 = vor.u32 %v10360_v17, %v9978_v38  ;;  %v14689_v0 = vrot.slane %v4780_v11, 4  ;;  %2836 = vrot.lane.b32.xlu2 %v2821_v8, %s10521_s16  ;;  %v5400_v49 = vpack.c.b16 %v5303_v30, %v5303_v30  ;;  %v14693_v19 = vpack.c.b16 %v5304_v61, %v5304_v61 }
 0x41c   : > { %v8847_v45 = vsel %vm2204_vm9, %v15358_v32, %v8846_v28  ;;  %v10338_v25 = vld [vmem:[#allocation3 + $0x368] sm:$0xf0]  ;;  %v8422_v31 = vmax.f32 %v8230_v24, %v8326_v51  ;;  %v4779_v56 = vsel %vm11055_vm15, %v4774_v40, %v14670_v9  ;;  %v3454_v17 = vunpack.c.l.b16 %v2778_v2  ;;  %v14707_v24 = vpop.permute.xlu0 %2490 }
 0x41d   : > { %v8897_v16 = vpack.c.bf16 %v8847_v45, %v8847_v45  ;;  %7766 = vmatmul.bf16.gmra.mxu3 %v9979_v48  ;;  %v3455_v11 = vunpack.c.h.b16 %v2778_v2  ;;  %v14701_v23 = vsel %vm2504_vm5, %v10501_v26, %v2188_v37  ;;  %v5682_v8 = vrot.slane %v5680_v46, 4  ;;  %v7196_v2 = vpop.f32.mrf.mxu1  ;;  %5142 = vst [vmem:[#allocation3 + $0x394] sm:$0xf] %v4779_v56  ;;  %v1465_v40 = vld [vmem:[#allocation2 + $0x190] sm:$0x1] }
 0x41e   : > { %v5683_v59 = vrot.slane %v5400_v49, 5  ;;  %v9887_v12 = vor.u32 %v10338_v25, %v9886_v14  ;;  %v7444_v6 = vadd.f32 %v7443_v27, %v7195_v50  ;;  %8518 = vst.msk [vmem:[#allocation5 + $0x1a8] sm:$0xff] %vm2601_vm11, %v8422_v31  ;;  %v4783_v38 = vor.u32 %v14689_v0, %v14670_v9  ;;  %v2379_v14 = vpop.permute.xlu1 %2378  ;;  %v14719_v9 = vpop.f32.mrf.mxu3  ;;  %v8039_v0 = vld [vmem:[#allocation4 + $0x1b0] sm:$0xff] }
 0x41f   : > { %8914 = vst.msk [vmem:[%s12430_s12 + $0x1c] sm:$0xf] %vm8906_vm7, %v8897_v16  ;;  %v5686_v30 = vrot.slane %v14693_v19, 5  ;;  %v3550_v61 = vpack.c.b16 %v3454_v17, %v3454_v17  ;;  %v3202_v37 = vsel %vm2601_vm11, %v14701_v23, %v14551_v60  ;;  %v3551_v27 = vpack.c.b16 %v3455_v11, %v3455_v11  ;;  %v7445_v32 = vpop.f32.mrf.mxu2 }
 0x420   : > { %v5684_v20 = vsel %vm10688_vm8, %v5682_v8, %v5683_v59  ;;  %v5685_v46 = vrot.slane %v5683_v59, 4  ;;  %7233 = vmatmul.bf16.gmra.mxu1 %v9887_v12  ;;  %v7693_v50 = vadd.f32 %v14233_v33, %v7444_v6  ;;  %v3260_v45 = vsel %vm2698_vm12, %v3202_v37, %v14707_v24 }
 0x421   : > { %5884 = vst [vmem:[#allocation3 + $0x44c] sm:$0xf] %v5684_v20  ;;  %v2991_v60 = vshrl.u32 %v14658_v55, 16  ;;  %v2994_v51 = vshll.u32 %v14658_v55, 16  ;;  %v7197_v48 = vadd.f32 %v14539_v63, %v7196_v2  ;;  %v8135_v25 = vld [vmem:[#allocation4 + $0x1b1] sm:$0xff]  ;;  %v3887_v31 = vunpack.c.l.b16 %v3260_v45 }
 0x422   : > { %v5687_v33 = vsel %vm10688_vm8, %v5685_v46, %v5686_v30  ;;  %3742 = vst [vmem:[#allocation3 + $0x3a8] sm:$0xf] %v3550_v61  ;;  %v7848_v16 = vmax.f32 %v7693_v50, 0.0  ;;  %v3888_v49 = vunpack.c.h.b16 %v3260_v45  ;;  %v8231_v56 = vmax.f32 %v8039_v0, %v8135_v25  ;;  %v8327_v26 = vld [vmem:[#allocation4 + $0x1b2] sm:$0xff] }
 0x423   : > { %5885 = vst [vmem:[#allocation3 + $0x458] sm:$0xf] %v5687_v33  ;;  %v2993_v17 = vrot.slane %v2991_v60, 7  ;;  %v2679_v55 = vsel %vm2601_vm11, %v14375_v34, %v2379_v14  ;;  %v7446_v11 = vadd.f32 %v7445_v32, %v7197_v48  ;;  %v3984_v8 = vpack.c.b16 %v3887_v31, %v3887_v31  ;;  %2392 = vrot.lane.b32.xlu2 %v14650_v15, %s10523_s26  ;;  %v10363_v46 = vld [vmem:[#allocation3 + $0x430] sm:$0xf0] }
 0x424   : > { %3743 = vst [vmem:[#allocation3 + $0x3b4] sm:$0xf] %v3551_v27  ;;  %v14732_v59 = vpack.c.b16 %v3888_v49, %v3888_v49  ;;  %v2776_v12 = vsel %vm2698_vm12, %v2679_v55, %v14390_v54  ;;  %v2796_v6 = vunpack.c.l.b16 %v1465_v40  ;;  %v8423_v61 = vmax.f32 %v8231_v56, %v8327_v26  ;;  %v9990_v15 = vld [vmem:[#allocation3 + $0x428] sm:$0xf]  ;;  %v9898_v49 = vld [vmem:[#allocation3 + $0x378] sm:$0xf] }
 0x425   : > { %7944 = vst.msk [vmem:[#allocation4 + $0x1c0] sm:$0xff] %vm2601_vm11, %v7848_v16  ;;  %v2996_v37 = vor.u32 %v2994_v51, %v2993_v17  ;;  %v3005_v34 = vsel %vm2852_vm10, %v2993_v17, %v14512_v13  ;;  %v3452_v2 = vunpack.c.l.b16 %v2776_v12  ;;  %v14741_v20 = vld [vmem:[#allocation5 + $0x1a0] ss:$2 sm:$0xff]  ;;  %v4786_v27 = vshll.u32 %v3984_v8, 16  ;;  %v7199_v51 = vpop.f32.mrf.mxu1  ;;  %v1459_v56 = vld [vmem:[#allocation2 + $0x180] sm:$0x1] }
 0x426   : > { %v4790_v50 = vshrl.u32 %v3984_v8, 16  ;;  %3100 = vrot.lane.b32.xlu1 %v3005_v34, %s10523_s26  ;;  %8519 = vst.msk [vmem:[#allocation5 + $0x1b0] sm:$0xff] %vm2601_vm11, %v8423_v61  ;;  %v3453_v14 = vunpack.c.h.b16 %v2776_v12  ;;  %v4784_v32 = vrot.slane %v4783_v38, 4  ;;  %v4796_v13 = vshll.u32 %v14732_v59, 16  ;;  %v9900_v48 = vld [vmem:[#allocation3 + $0x384] sm:$0xf0]  ;;  %v14754_v17 = vpop.f32.mrf.mxu3 }
 0x427   : > { %v2997_v54 = vsel %vm2852_vm10, %v14633_v7, %v2996_v37  ;;  %v4788_v45 = vrot.slane %v4786_v27, 5  ;;  %v9991_v40 = vor.u32 %v10363_v46, %v9990_v15  ;;  %v3548_v0 = vpack.c.b16 %v3452_v2, %v3452_v2  ;;  %v10340_v38 = vld [vmem:[#allocation3 + $0x37c] sm:$0xf]  ;;  %v10341_v12 = vld [vmem:[#allocation3 + $0x380] sm:$0xf0] }
 0x428   : > { %v4792_v60 = vrot.slane %v4790_v50, 4  ;;  %3098 = vrot.lane.b32.xlu0 %v2997_v54, %s10523_s26  ;;  %v7695_v25 = vadd.f32 %v14303_v3, %v7446_v11  ;;  %v14750_v33 = vpack.c.b16 %v2796_v6, %v2796_v6  ;;  %v3549_v31 = vpack.c.b16 %v3453_v14, %v3453_v14  ;;  %v7448_v3 = vpop.f32.mrf.mxu2  ;;  %v8040_v11 = vld [vmem:[#allocation4 + $0x1b8] sm:$0xff] }
 0x429   : > { %v4789_v16 = vsel %vm11055_vm15, %v4784_v32, %v4788_v45  ;;  %v7200_v26 = vadd.f32 %v14539_v63, %v7199_v51  ;;  %v9903_v8 = vor.u32 %v10340_v38, %v9900_v48  ;;  %v14758_v37 = vrot.slane %v4796_v13, 5  ;;  %3740 = vst [vmem:[#allocation3 + $0x390] sm:$0xf] %v3548_v0  ;;  %v14777_v48 = vld [vmem:[#allocation2 + $0x178] sm:$0xff] }
 0x42a   : > { %v4793_v7 = vor.u32 %v4792_v60, %v4788_v45  ;;  %5143 = vst [vmem:[#allocation3 + $0x3a0] sm:$0xf] %v4789_v16  ;;  %v2826_v55 = vshll.u32 %v14750_v33, 16  ;;  %v7849_v34 = vmax.f32 %v7695_v25, 0.0  ;;  %v2830_v2 = vshrl.u32 %v14750_v33, 16 }
 0x42b   : > { %3109 = vrot.lane.b32.xlu2 %v14469_v42, %s10522_s25  ;;  %v2824_v27 = vor.u32 %v2822_v29, %v14656_v57  ;;  %7487 = vmatmul.bf16.gmra.mxu2 %v9903_v8  ;;  %v1714_v15 = vunpack.c.l.b16 %v1459_v56  ;;  %3741 = vst [vmem:[#allocation3 + $0x39c] sm:$0xf] %v3549_v31  ;;  %v9899_v42 = vor.u32 %v10341_v12, %v9898_v49  ;;  %v5688_v51 = vrot.slane %v5686_v30, 4  ;;  %v14789_v30 = vpop.permute.xlu2 %2494  ;;  %v10503_v8 = vld [vmem:[#allocation2 + $0x150] sm:$0xff] }
 0x42c   : > { %v8136_v6 = vld [vmem:[#allocation4 + $0x1b9] sm:$0xff]  ;;  %v4794_v61 = vrot.slane %v4793_v7, 4  ;;  %v2828_v50 = vrot.slane %v2826_v55, 1  ;;  %v7449_v32 = vadd.f32 %v7448_v3, %v7200_v26  ;;  %7945 = vst.msk [vmem:[#allocation4 + $0x1c8] sm:$0xff] %vm2601_vm11, %v7849_v34  ;;  %v10366_v7 = vld [vmem:[#allocation3 + $0x448] sm:$0xf0] }
 0x42d   : > { %v8232_v46 = vmax.f32 %v8040_v11, %v8136_v6  ;;  %7771 = vmatmul.bf16.gmra.mxu3 %v9991_v40  ;;  %v8328_v54 = vld [vmem:[#allocation4 + $0x1ba] sm:$0xff]  ;;  %v1715_v13 = vpack.c.b16 %v1714_v15, %v1714_v15  ;;  %v2298_v40 = vrot.slane %v14777_v48, 1  ;;  %v15359_v38 = vrot.slane %v14239_v18, 1  ;;  %v7201_v56 = vpop.f32.mrf.mxu1  ;;  %v15360_v55 = vld [vmem:[#allocation8_spill] sm:$0xff]  ;;  %v3087_v6 = vpop.permute.xlu0 %3086 }
 0x42e   : > { %v4799_v14 = vsel %vm11055_vm15, %v4794_v61, %v14758_v37  ;;  %2840 = vrot.lane.b32.xlu1 %v2830_v2, %s10521_s16  ;;  %v2829_v60 = vsel %vm1716_vm4, %v2824_v27, %v2828_v50  ;;  %v7698_v58 = vadd.f32 %v14344_v53, %v7449_v32  ;;  %v14783_v25 = vpop.f32.mrf.mxu3  ;;  %v4800_v53 = vshrl.u32 %v14732_v59, 16  ;;  %v8041_v19 = vld [vmem:[#allocation4 + $0x1c0] sm:$0xff] }
 0x42f   : > { %v8424_v45 = vmax.f32 %v8232_v46, %v8328_v54  ;;  %5144 = vst [vmem:[#allocation3 + $0x3ac] sm:$0xf] %v4799_v14  ;;  %v2101_v29 = vshll.u32 %v1715_v13, 16  ;;  %v2299_v49 = vsel %vm2204_vm9, %v15359_v38, %v2298_v40  ;;  %v15361_v26 = vrot.slane %v15360_v55, 5  ;;  %v10002_v11 = vld [vmem:[#allocation3 + $0x440] sm:$0xf]  ;;  %v14806_v46 = vpop.permute.xlu1 %2492 }
 0x430   : > { %2838 = vrot.lane.b32.xlu0 %v2829_v60, %s10521_s16  ;;  %7238 = vmatmul.bf16.gmra.mxu1 %v9899_v42  ;;  %v7850_v57 = vmax.f32 %v7698_v58, 0.0  ;;  %v7202_v18 = vadd.f32 %v14539_v63, %v7201_v56  ;;  %v7450_v61 = vpop.f32.mrf.mxu2  ;;  %v4802_v34 = vrot.slane %v4800_v53, 4  ;;  %v10003_v47 = vor.u32 %v10366_v7, %v10002_v11  ;;  %v10343_v42 = vld [vmem:[#allocation3 + $0x394] sm:$0xf] }
 0x431   : > { %8520 = vst.msk [vmem:[#allocation5 + $0x1b8] sm:$0xff] %vm2601_vm11, %v8424_v45  ;;  %v2103_v0 = vrot.slane %v2101_v29, 1  ;;  %v5690_v59 = vsel %vm10688_vm8, %v5688_v51, %v15361_v26  ;;  %v9912_v27 = vld [vmem:[#allocation3 + $0x39c] sm:$0xf0]  ;;  %v9910_v29 = vld [vmem:[#allocation3 + $0x390] sm:$0xf] }
 0x432   : > { %7946 = vst.msk [vmem:[#allocation4 + $0x1d0] sm:$0xff] %vm2601_vm11, %v7850_v57  ;;  %v7451_v14 = vadd.f32 %v7450_v61, %v7202_v18  ;;  %v9915_v58 = vor.u32 %v10343_v42, %v9912_v27  ;;  %v10344_v57 = vld [vmem:[#allocation3 + $0x398] sm:$0xf0]  ;;  %v4803_v53 = vor.u32 %v4802_v34, %v14758_v37 }
 0x433   : > { %3102 = vrot.lane.b32.xlu2 %v14494_v21, %s10523_s26  ;;  %v2104_v16 = vsel %vm1716_vm4, %v14560_v10, %v2103_v0  ;;  %v8137_v31 = vld [vmem:[#allocation4 + $0x1c1] sm:$0xff]  ;;  %v2300_v21 = vrot.slane %v1715_v13, 1  ;;  %v14800_v10 = vsel %vm2504_vm5, %v10503_v8, %v14595_v5  ;;  %5886 = vst [vmem:[#allocation3 + $0x464] sm:$0xf] %v5690_v59  ;;  %v14823_v26 = vpop.permute.xlu2 %3090 }
 0x434   : > { %v8233_v3 = vmax.f32 %v8041_v19, %v8137_v31  ;;  %v8329_v2 = vld [vmem:[#allocation4 + $0x1c2] sm:$0xff]  ;;  %v3204_v5 = vsel %vm2601_vm11, %v14800_v10, %v3087_v6  ;;  %v7700_v0 = vadd.f32 %v14385_v52, %v7451_v14  ;;  %v4804_v8 = vrot.slane %v4803_v53, 4 }
 0x435   : > { %v8042_v50 = vld [vmem:[#allocation4 + $0x1c8] sm:$0xff]  ;;  %v3261_v54 = vsel %vm2698_vm12, %v3204_v5, %v14806_v46  ;;  %v2301_v13 = vsel %vm2204_vm9, %v2298_v40, %v2300_v21  ;;  %v9911_v40 = vor.u32 %v10344_v57, %v9910_v29  ;;  %v7204_v55 = vpop.f32.mrf.mxu1  ;;  %v2192_v6 = vpop.permute.xlu0 %2191  ;;  %v10014_v29 = vld [vmem:[#allocation3 + $0x458] sm:$0xf] }
 0x436   : > { %2199 = vrot.lane.b32.xlu1 %v2104_v16, %s10521_s16  ;;  %v8425_v15 = vmax.f32 %v8233_v3, %v8329_v2  ;;  %v3889_v45 = vunpack.c.l.b16 %v3261_v54  ;;  %v3890_v60 = vunpack.c.h.b16 %v3261_v54  ;;  %v7851_v38 = vmax.f32 %v7700_v0, 0.0  ;;  %v15362_v52 = vld [vmem:[#allocation7_spill] sm:$0xff] }
 0x437   : > { %v7205_v37 = vadd.f32 %v14539_v63, %v7204_v55 }
 0x438   : > { %v14802_v12 = vld [vmem:[#allocation5 + $0x1b0] ss:$2 sm:$0xff]  ;;  %2394 = vrot.lane.b32.xlu0 %v2299_v49, %s10523_s26  ;;  %8521 = vst.msk [vmem:[#allocation5 + $0x1c0] sm:$0xff] %vm2601_vm11, %v8425_v15  ;;  %v3986_v7 = vpack.c.b16 %v3889_v45, %v3889_v45  ;;  %v3987_v19 = vpack.c.b16 %v3890_v60, %v3890_v60  ;;  %v14817_v49 = vpop.f32.mrf.mxu3  ;;  %v7453_v59 = vpop.f32.mrf.mxu2  ;;  %v8680_v15 = vmax.f32 %v14459_v43, %v14741_v20 }
 0x439   : > { %v8138_v32 = vld [vmem:[#allocation4 + $0x1c9] sm:$0xff]  ;;  %7947 = vst.msk [vmem:[#allocation4 + $0x1d8] sm:$0xff] %vm2601_vm11, %v7851_v38  ;;  %v7454_v61 = vadd.f32 %v7453_v59, %v7205_v37  ;;  %v10347_v37 = vld [vmem:[#allocation3 + $0x3b0] sm:$0xf0] }
 0x43a   : > { %v8234_v51 = vmax.f32 %v8042_v50, %v8138_v32  ;;  %v8330_v16 = vld [vmem:[#allocation4 + $0x1ca] sm:$0xff]  ;;  %v4806_v56 = vshll.u32 %v3986_v7, 16  ;;  %v4810_v21 = vshrl.u32 %v3986_v7, 16  ;;  %v4816_v18 = vshll.u32 %v3987_v19, 16  ;;  %v10369_v43 = vld [vmem:[#allocation3 + $0x460] sm:$0xf0]  ;;  %v3089_v7 = vpop.permute.xlu1 %3088 }
 0x43b   : > { %2396 = vrot.lane.b32.xlu2 %v2301_v13, %s10523_s26  ;;  %7492 = vmatmul.bf16.gmra.mxu2 %v9915_v58  ;;  %v4820_v50 = vshrl.u32 %v3987_v19, 16  ;;  %v8043_v32 = vld [vmem:[#allocation4 + $0x1d0] sm:$0xff]  ;;  %v10346_v19 = vld [vmem:[#allocation3 + $0x3ac] sm:$0xf]  ;;  %v10015_v38 = vor.u32 %v10369_v43, %v10014_v29 }
 0x43c   : > { %v8426_v31 = vmax.f32 %v8234_v51, %v8330_v16  ;;  %v4808_v3 = vrot.slane %v4806_v56, 5  ;;  %v4812_v11 = vrot.slane %v4810_v21, 4  ;;  %v14829_v27 = vrot.slane %v4816_v18, 5  ;;  %v10504_v51 = vld [vmem:[#allocation2 + $0x158] sm:$0xff]  ;;  %v14847_v16 = vpop.permute.xlu2 %2195 }
 0x43d   : > { %7776 = vmatmul.bf16.gmra.mxu3 %v10003_v47  ;;  %v7703_v47 = vadd.f32 %v14439_v39, %v7454_v61  ;;  %v4822_v13 = vrot.slane %v4820_v50, 4  ;;  %v7206_v20 = vpop.f32.mrf.mxu1  ;;  %v14844_v0 = vsel %vm2504_vm5, %v10504_v51, %v2192_v6  ;;  %v2383_v56 = vpop.permute.xlu0 %2382 }
 0x43e   : > { %8522 = vst.msk [vmem:[#allocation5 + $0x1c8] sm:$0xff] %vm2601_vm11, %v8426_v31  ;;  %v4809_v34 = vsel %vm11055_vm15, %v4804_v8, %v4808_v3  ;;  %v4813_v2 = vor.u32 %v4812_v11, %v4808_v3  ;;  %v7207_v53 = vadd.f32 %v14539_v63, %v7206_v20  ;;  %v2683_v8 = vsel %vm2601_vm11, %v14600_v1, %v2383_v56 }
 0x43f   : > { %5145 = vst [vmem:[#allocation3 + $0x3b8] sm:$0xf] %v4809_v34  ;;  %v7852_v54 = vmax.f32 %v7703_v47, 0.0  ;;  %v4823_v18 = vor.u32 %v4822_v13, %v14829_v27  ;;  %v2780_v34 = vsel %vm2698_vm12, %v2683_v8, %v14488_v4  ;;  %v15364_v8 = vld [vmem:[#allocation9_spill] sm:$0xff] }
 0x440   : > { %3111 = vrot.lane.b32.xlu0 %v15362_v52, %s10522_s25  ;;  %7243 = vmatmul.bf16.gmra.mxu1 %v9911_v40  ;;  %v4814_v5 = vrot.slane %v4813_v2, 4  ;;  %v8139_v60 = vld [vmem:[#allocation4 + $0x1d1] sm:$0xff]  ;;  %v14839_v39 = vpop.f32.mrf.mxu3  ;;  %v3206_v40 = vsel %vm2601_vm11, %v14844_v0, %v3089_v7  ;;  %v7455_v21 = vpop.f32.mrf.mxu2  ;;  %v9922_v52 = vld [vmem:[#allocation3 + $0x3a8] sm:$0xf]  ;;  %v3456_v2 = vunpack.c.l.b16 %v2780_v34  ;;  %v3457_v47 = vunpack.c.h.b16 %v2780_v34 }
 0x441   : > { %v8235_v58 = vmax.f32 %v8043_v32, %v8139_v60  ;;  %7948 = vst.msk [vmem:[#allocation4 + $0x1e0] sm:$0xff] %vm2601_vm11, %v7852_v54  ;;  %v8331_v57 = vld [vmem:[#allocation4 + $0x1d2] sm:$0xff]  ;;  %v3262_v59 = vsel %vm2698_vm12, %v3206_v40, %v14789_v30  ;;  %v7456_v3 = vadd.f32 %v7455_v21, %v7207_v53 }
 0x442   : > { %v4819_v42 = vsel %vm11055_vm15, %v4814_v5, %v14829_v27  ;;  %v3891_v6 = vunpack.c.l.b16 %v3262_v59  ;;  %v3892_v61 = vunpack.c.h.b16 %v3262_v59  ;;  %v15363_v5 = vld [vmem:[#allocation10_spill] sm:$0xff]  ;;  %v3553_v27 = vpack.c.b16 %v3457_v47, %v3457_v47 }
 0x443   : > { %5146 = vst [vmem:[#allocation3 + $0x3c4] sm:$0xf] %v4819_v42  ;;  %v8427_v31 = vmax.f32 %v8235_v58, %v8331_v57  ;;  %v7705_v50 = vadd.f32 %v15363_v5, %v7456_v3  ;;  %v8044_v42 = vld [vmem:[#allocation4 + $0x1d8] sm:$0xff]  ;;  %v4824_v57 = vrot.slane %v4823_v18, 4 }
 0x444   : > { %v3988_v54 = vpack.c.b16 %v3891_v6, %v3891_v6  ;;  %v3989_v1 = vpack.c.b16 %v3892_v61, %v3892_v61  ;;  %3745 = vst [vmem:[#allocation3 + $0x3cc] sm:$0xf] %v3553_v27 }
 0x445   : > { %v14833_v14 = vld [vmem:[#allocation5 + $0x1c0] ss:$2 sm:$0xff]  ;;  %8523 = vst.msk [vmem:[#allocation5 + $0x1d0] sm:$0xff] %vm2601_vm11, %v8427_v31  ;;  %v7853_v60 = vmax.f32 %v7705_v50, 0.0  ;;  %v7209_v43 = vpop.f32.mrf.mxu1  ;;  %v2194_v31 = vpop.permute.xlu1 %2193 }
 0x446   : > { %v8724_v45 = vmax.f32 %v8680_v15, %v14833_v14  ;;  %v9924_v55 = vld [vmem:[#allocation3 + $0x3b4] sm:$0xf0]  ;;  %v9923_v15 = vor.u32 %v10347_v37, %v9922_v52  ;;  %v4826_v29 = vshll.u32 %v3988_v54, 16  ;;  %v4830_v4 = vshrl.u32 %v3988_v54, 16  ;;  %v14883_v47 = vpop.permute.xlu0 %2496 }
 0x447   : > { %v9927_v11 = vor.u32 %v10346_v19, %v9924_v55  ;;  %v4836_v53 = vshll.u32 %v3989_v1, 16  ;;  %v7210_v7 = vadd.f32 %v14539_v63, %v7209_v43  ;;  %v2387_v19 = vpop.permute.xlu2 %2386  ;;  %v4840_v55 = vshrl.u32 %v3989_v1, 16  ;;  %7949 = vst.msk [vmem:[#allocation4 + $0x1e8] sm:$0xff] %vm2601_vm11, %v7853_v60 }
 0x448   : > { %8768 = vst.msk [vmem:[#allocation6 + $0xc0] sm:$0xff] %vm2601_vm11, %v8724_v45  ;;  %v8140_v32 = vld [vmem:[#allocation4 + $0x1d9] sm:$0xff]  ;;  %v3552_v45 = vpack.c.b16 %v3456_v2, %v3456_v2  ;;  %v4828_v56 = vrot.slane %v4826_v29, 5  ;;  %v4832_v21 = vrot.slane %v4830_v4, 4  ;;  %v7458_v52 = vpop.f32.mrf.mxu2  ;;  %v2687_v59 = vsel %vm2601_vm11, %v14800_v10, %v2387_v19  ;;  %v10026_v2 = vld [vmem:[#allocation3 + $0x470] sm:$0xf] }
 0x449   : > { %v8236_v58 = vmax.f32 %v8044_v42, %v8140_v32  ;;  %v8332_v51 = vld [vmem:[#allocation4 + $0x1da] sm:$0xff]  ;;  %v14876_v3 = vsel %vm2504_vm5, %v15364_v8, %v2194_v31  ;;  %v2784_v22 = vsel %vm2698_vm12, %v2687_v59, %v14806_v46  ;;  %v7459_v34 = vadd.f32 %v7458_v52, %v7210_v7 }
 0x44a   : > { %3744 = vst [vmem:[#allocation3 + $0x3c0] sm:$0xf] %v3552_v45  ;;  %v4829_v18 = vsel %vm11055_vm15, %v4824_v57, %v4828_v56  ;;  %v4833_v6 = vor.u32 %v4832_v21, %v4828_v56  ;;  %v3461_v61 = vunpack.c.h.b16 %v2784_v22  ;;  %v10372_v10 = vld [vmem:[#allocation3 + $0x478] sm:$0xf0]  ;;  %v4838_v50 = vrot.slane %v4836_v53, 5  ;;  %v8045_v53 = vld [vmem:[#allocation4 + $0x1e0] sm:$0xff] }
 0x44b   : > { %7497 = vmatmul.bf16.gmra.mxu2 %v9927_v11  ;;  %v8428_v40 = vmax.f32 %v8236_v58, %v8332_v51  ;;  %5147 = vst [vmem:[#allocation3 + $0x3d0] sm:$0xf] %v4829_v18  ;;  %v3208_v54 = vsel %vm2601_vm11, %v14876_v3, %v14823_v26  ;;  %v7708_v46 = vadd.f32 %v14555_v35, %v7459_v34  ;;  %v10350_v51 = vld [vmem:[#allocation3 + $0x3c8] sm:$0xf0]  ;;  %v10505_v35 = vld [vmem:[#allocation2 + $0x168] sm:$0xff] }
 0x44c   : > { %v4834_v5 = vrot.slane %v4833_v6, 4  ;;  %v3557_v42 = vpack.c.b16 %v3461_v61, %v3461_v61  ;;  %v10027_v45 = vor.u32 %v10372_v10, %v10026_v2  ;;  %v3263_v27 = vsel %vm2698_vm12, %v3208_v54, %v14883_v47 }
 0x44d   : > { %7781 = vmatmul.bf16.gmra.mxu3 %v10015_v38  ;;  %v14864_v38 = vpop.f32.mrf.mxu3  ;;  %8524 = vst.msk [vmem:[#allocation5 + $0x1d8] sm:$0xff] %vm2601_vm11, %v8428_v40  ;;  %v7211_v60 = vpop.f32.mrf.mxu1  ;;  %v8681_v29 = vmax.f32 %v14610_v36, %v14802_v12  ;;  %v7854_v4 = vmax.f32 %v7708_v46, 0.0  ;;  %v3893_v43 = vunpack.c.l.b16 %v3263_v27  ;;  %v3894_v26 = vunpack.c.h.b16 %v3263_v27 }
 0x44e   : > { %v4839_v32 = vsel %vm11055_vm15, %v4834_v5, %v4838_v50  ;;  %v2385_v57 = vpop.permute.xlu1 %2384  ;;  %v14899_v7 = vsel %vm2504_vm5, %v10505_v35, %v14847_v16  ;;  %v8141_v31 = vld [vmem:[#allocation4 + $0x1e1] sm:$0xff]  ;;  %v7212_v40 = vadd.f32 %v14539_v63, %v7211_v60  ;;  %3749 = vst [vmem:[#allocation3 + $0x3fc] sm:$0xf] %v3557_v42 }
 0x44f   : > { %v14860_v13 = vld [vmem:[#allocation6 + $0xc0] sm:$0xff]  ;;  %5148 = vst [vmem:[#allocation3 + $0x3dc] sm:$0xf] %v4839_v32  ;;  %v2685_v36 = vsel %vm2601_vm11, %v14701_v23, %v2385_v57  ;;  %v8237_v21 = vmax.f32 %v8045_v53, %v8141_v31  ;;  %v3991_v52 = vpack.c.b16 %v3894_v26, %v3894_v26  ;;  %v10349_v5 = vld [vmem:[#allocation3 + $0x3c4] sm:$0xf] }
 0x450   : > { %7248 = vmatmul.bf16.gmra.mxu1 %v9923_v15  ;;  %v8854_v20 = vrot.slane %v14860_v13, 6  ;;  %v4842_v15 = vrot.slane %v4840_v55, 4  ;;  %v7460_v12 = vpop.f32.mrf.mxu2  ;;  %v3990_v55 = vpack.c.b16 %v3893_v43, %v3893_v43  ;;  %v8333_v8 = vld [vmem:[#allocation4 + $0x1e2] sm:$0xff]  ;;  %7950 = vst.msk [vmem:[#allocation4 + $0x1f0] sm:$0xff] %vm2601_vm11, %v7854_v4  ;;  %v14922_v4 = vld [vmem:[%s15248_s4] ss:$0 sm:$0xff]  ;;  %v14944_v13 = vpop.permute.xlu2 %2500 }
 0x451   : > { %v9934_v58 = vld [vmem:[#allocation3 + $0x3c0] sm:$0xf]  ;;  %v8429_v6 = vmax.f32 %v8237_v21, %v8333_v8  ;;  %v4856_v61 = vshll.u32 %v3991_v52, 16  ;;  %v4860_v34 = vshrl.u32 %v3991_v52, 16  ;;  %v7461_v10 = vadd.f32 %v7460_v12, %v7212_v40  ;;  %v8046_v53 = vld [vmem:[#allocation4 + $0x1e8] sm:$0xff] }
 0x452   : > { %v8886_v37 = vsel %vm8853_vm0, %v8846_v28, %v8854_v20  ;;  %v3460_v28 = vunpack.c.l.b16 %v2784_v22  ;;  %v4843_v19 = vor.u32 %v4842_v15, %v4838_v50  ;;  %v9935_v18 = vor.u32 %v10350_v51, %v9934_v58 }
 0x453   : > { %v8898_v11 = vpack.c.bf16 %v8886_v37, %v8886_v37  ;;  %v2782_v37 = vsel %vm2698_vm12, %v2685_v36, %v14707_v24  ;;  %v4846_v22 = vshll.u32 %v3990_v55, 16  ;;  %8525 = vst.msk [vmem:[#allocation5 + $0x1e0] sm:$0xff] %vm2601_vm11, %v8429_v6  ;;  %v4858_v46 = vrot.slane %v4856_v61, 5 }
 0x454   : > { %v3556_v1 = vpack.c.b16 %v3460_v28, %v3460_v28  ;;  %v14904_v56 = vld [vmem:[#allocation5 + $0x1d0] ss:$2 sm:$0xff]  ;;  %v3458_v63 = vunpack.c.l.b16 %v2782_v37  ;;  %v3459_v23 = vunpack.c.h.b16 %v2782_v37  ;;  %v4850_v28 = vshrl.u32 %v3990_v55, 16 }
 0x455   : > { %8915 = vst.msk [vmem:[%s12430_s12 + $0x20] sm:$0xf] %vm8906_vm7, %v8898_v11  ;;  %v14908_v16 = vpop.f32.mrf.mxu3  ;;  %v8725_v59 = vmax.f32 %v8681_v29, %v14904_v56  ;;  %v9936_v11 = vld [vmem:[#allocation3 + $0x3cc] sm:$0xf0]  ;;  %v4844_v50 = vrot.slane %v4843_v19, 4  ;;  %v4848_v15 = vrot.slane %v4846_v22, 5  ;;  %v7214_v27 = vpop.f32.mrf.mxu1 }
 0x456   : > { %3748 = vst [vmem:[#allocation3 + $0x3f0] sm:$0xf] %v3556_v1  ;;  %v3554_v24 = vpack.c.b16 %v3458_v63, %v3458_v63  ;;  %v3555_v2 = vpack.c.b16 %v3459_v23, %v3459_v23  ;;  %v4852_v54 = vrot.slane %v4850_v28, 4  ;;  %v9939_v1 = vor.u32 %v10349_v5, %v9936_v11  ;;  %v14925_v26 = vpop.permute.xlu1 %2498 }
 0x457   : > { %8769 = vst.msk [vmem:[#allocation6 + $0xc8] sm:$0xff] %vm2601_vm11, %v8725_v59  ;;  %v4862_v32 = vrot.slane %v4860_v34, 4  ;;  %v4849_v58 = vsel %vm11055_vm15, %v4844_v50, %v4848_v15  ;;  %v7215_v43 = vadd.f32 %v14922_v4, %v7214_v27  ;;  %v8142_v35 = vld [vmem:[#allocation4 + $0x1e9] sm:$0xff] }
 0x458   : > { %3746 = vst [vmem:[#allocation3 + $0x3d8] sm:$0xf] %v3554_v24  ;;  %v4853_v29 = vor.u32 %v4852_v54, %v4848_v15  ;;  %v7463_v57 = vpop.f32.mrf.mxu2  ;;  %v8238_v12 = vmax.f32 %v8046_v53, %v8142_v35  ;;  %v8334_v52 = vld [vmem:[#allocation4 + $0x1ea] sm:$0xff] }
 0x459   : > { %3747 = vst [vmem:[#allocation3 + $0x3e4] sm:$0xf] %v3555_v2  ;;  %v7464_v31 = vadd.f32 %v7463_v57, %v7215_v43  ;;  %v4863_v21 = vor.u32 %v4862_v32, %v4858_v46  ;;  %v8047_v54 = vld [vmem:[#allocation4 + $0x1f0] sm:$0xff]  ;;  %v10352_v57 = vld [vmem:[#allocation3 + $0x3dc] sm:$0xf] }
 0x45a   : > { %v3093_v42 = vpop.permute.xlu0 %3092  ;;  %5149 = vst [vmem:[#allocation3 + $0x3e8] sm:$0xf] %v4849_v58  ;;  %v4854_v19 = vrot.slane %v4853_v29, 4  ;;  %v8430_v11 = vmax.f32 %v8238_v12, %v8334_v52 }
 0x45b   : > { %v3210_v60 = vsel %vm2601_vm11, %v14899_v7, %v3093_v42  ;;  %7502 = vmatmul.bf16.gmra.mxu2 %v9939_v1  ;;  %v7713_v59 = vadd.f32 %v14666_v44, %v7464_v31  ;;  %v4864_v61 = vrot.slane %v4863_v21, 4 }
 0x45c   : > { %v3264_v51 = vsel %vm2698_vm12, %v3210_v60, %v14925_v26  ;;  %v4859_v37 = vsel %vm11055_vm15, %v4854_v19, %v4858_v46  ;;  %8526 = vst.msk [vmem:[#allocation5 + $0x1e8] sm:$0xff] %vm2601_vm11, %v8430_v11 }
 0x45d   : > { %7786 = vmatmul.bf16.gmra.mxu3 %v10027_v45  ;;  %v7710_v45 = vadd.f32 %v14602_v62, %v7461_v10  ;;  %v3895_v40 = vunpack.c.l.b16 %v3264_v51  ;;  %v3896_v36 = vunpack.c.h.b16 %v3264_v51  ;;  %5150 = vst [vmem:[#allocation3 + $0x3f4] sm:$0xf] %v4859_v37  ;;  %v7216_v34 = vpop.f32.mrf.mxu1 }
 0x45e   : > { %v8801_v55 = vld [vmem:[#allocation6 + $0xc8] sm:$0x7]  ;;  %v7217_v44 = vadd.f32 %v14922_v4, %v7216_v34 }
 0x45f   : > { %v7855_v62 = vmax.f32 %v7710_v45, 0.0  ;;  %v3992_v8 = vpack.c.b16 %v3895_v40, %v3895_v40  ;;  %v14933_v63 = vpack.c.b16 %v3896_v36, %v3896_v36  ;;  %v8855_v23 = vrot.slane %v8801_v55, 6  ;;  %v9946_v50 = vld [vmem:[#allocation3 + $0x3d8] sm:$0xf] }
 0x460   : > { %7253 = vmatmul.bf16.gmra.mxu1 %v9935_v18  ;;  %v7856_v18 = vmax.f32 %v7713_v59, 0.0  ;;  %v7465_v5 = vpop.f32.mrf.mxu2  ;;  %v10353_v15 = vld [vmem:[#allocation3 + $0x3e0] sm:$0xf0] }
 0x461   : > { %7951 = vst.msk [vmem:[#allocation4 + $0x1f8] sm:$0xff] %vm2601_vm11, %v7855_v62  ;;  %v4866_v6 = vshll.u32 %v3992_v8, 16  ;;  %v4870_v22 = vshrl.u32 %v3992_v8, 16  ;;  %v14938_v28 = vsel %vm8853_vm0, %v8854_v20, %v8855_v23  ;;  %v4876_v10 = vshll.u32 %v14933_v63, 16  ;;  %v9948_v45 = vld [vmem:[#allocation3 + $0x3e4] sm:$0xf0] }
 0x462   : > { %7952 = vst.msk [vmem:[#allocation4 + $0x200] sm:$0xff] %vm2601_vm11, %v7856_v18  ;;  %v7466_v46 = vadd.f32 %v7465_v5, %v7217_v44  ;;  %v9947_v43 = vor.u32 %v10353_v15, %v9946_v50  ;;  %v9951_v19 = vor.u32 %v10352_v57, %v9948_v45  ;;  %v2198_v8 = vpop.permute.xlu0 %2197  ;;  %v10507_v5 = vld [vmem:[#allocation2 + $0x170] sm:$0xff] }
 0x463   : > { %v4868_v24 = vrot.slane %v4866_v6, 5  ;;  %v4872_v2 = vrot.slane %v4870_v22, 4  ;;  %v14948_v58 = vrot.slane %v4876_v10, 5  ;;  %v14951_v51 = vld [vmem:[#allocation5 + $0x1e0] ss:$2 sm:$0xff]  ;;  %v4880_v6 = vshrl.u32 %v14933_v63, 16 }
 0x464   : > { %v7715_v29 = vadd.f32 %v14719_v9, %v7466_v46  ;;  %v14968_v50 = vsel %vm2504_vm5, %v10507_v5, %v2198_v8  ;;  %v10356_v63 = vld [vmem:[#allocation3 + $0x3f8] sm:$0xf0] }
 0x465   : > { %v4869_v1 = vsel %vm11055_vm15, %v4864_v61, %v4868_v24  ;;  %v4873_v42 = vor.u32 %v4872_v2, %v4868_v24  ;;  %v7219_v36 = vpop.f32.mrf.mxu1 }
 0x466   : > { %5151 = vst [vmem:[#allocation3 + $0x400] sm:$0xf] %v4869_v1  ;;  %v7857_v35 = vmax.f32 %v7715_v29, 0.0  ;;  %v7220_v9 = vadd.f32 %v14922_v4, %v7219_v36  ;;  %v9958_v1 = vld [vmem:[#allocation3 + $0x3f0] sm:$0xf] }
 0x467   : > { %v4874_v60 = vrot.slane %v4873_v42, 4  ;;  %v4882_v42 = vrot.slane %v4880_v6, 4 }
 0x468   : > { %v8143_v20 = vld [vmem:[#allocation4 + $0x1f1] sm:$0xff]  ;;  %v7468_v55 = vpop.f32.mrf.mxu2  ;;  %7953 = vst.msk [vmem:[#allocation4 + $0x208] sm:$0xff] %vm2601_vm11, %v7857_v35 }
 0x469   : > { %v8239_v32 = vmax.f32 %v8047_v54, %v8143_v20  ;;  %v8335_v27 = vld [vmem:[#allocation4 + $0x1f2] sm:$0xff]  ;;  %v4879_v53 = vsel %vm11055_vm15, %v4874_v60, %v14948_v58  ;;  %v8336_v21 = vld [vmem:[#allocation4 + $0x1fa] sm:$0xff]  ;;  %v7469_v59 = vadd.f32 %v7468_v55, %v7220_v9  ;;  %v9959_v60 = vor.u32 %v10356_v63, %v9958_v1 }
 0x46a   : > { %v8048_v31 = vld [vmem:[#allocation4 + $0x1f8] sm:$0xff]  ;;  %5152 = vst [vmem:[#allocation3 + $0x40c] sm:$0xf] %v4879_v53  ;;  %v8049_v18 = vld [vmem:[#allocation4 + $0x200] sm:$0xff]  ;;  %v10355_v20 = vld [vmem:[#allocation3 + $0x3f4] sm:$0xf] }
 0x46b   : > { %v8431_v62 = vmax.f32 %v8239_v32, %v8335_v27  ;;  %v8144_v40 = vld [vmem:[#allocation4 + $0x1f9] sm:$0xff]  ;;  %7507 = vmatmul.bf16.gmra.mxu2 %v9951_v19  ;;  %v7718_v23 = vadd.f32 %v14754_v17, %v7469_v59  ;;  %v2389_v32 = vpop.permute.xlu0 %2388 }
 0x46c   : > { %v8240_v12 = vmax.f32 %v8048_v31, %v8144_v40 }
 0x46d   : > { %8527 = vst.msk [vmem:[#allocation5 + $0x1f0] sm:$0xff] %vm2601_vm11, %v8431_v62  ;;  %v14959_v37 = vpop.permute.xlu2 %3096  ;;  %v7858_v11 = vmax.f32 %v7718_v23, 0.0  ;;  %v7221_v24 = vpop.f32.mrf.mxu1  ;;  %v9960_v2 = vld [vmem:[#allocation3 + $0x3fc] sm:$0xf0] }
 0x46e   : > { %v8432_v52 = vmax.f32 %v8240_v12, %v8336_v21  ;;  %v7222_v17 = vadd.f32 %v14922_v4, %v7221_v24  ;;  %v9963_v27 = vor.u32 %v10355_v20, %v9960_v2  ;;  %v4883_v21 = vor.u32 %v4882_v42, %v14948_v58 }
 0x46f   : > { %7954 = vst.msk [vmem:[#allocation4 + $0x210] sm:$0xff] %vm2601_vm11, %v7858_v11  ;;  %v8145_v22 = vld [vmem:[#allocation4 + $0x201] sm:$0xff] }
 0x470   : > { %7258 = vmatmul.bf16.gmra.mxu1 %v9947_v43  ;;  %8528 = vst.msk [vmem:[#allocation5 + $0x1f8] sm:$0xff] %vm2601_vm11, %v8432_v52  ;;  %v8241_v61 = vmax.f32 %v8049_v18, %v8145_v22  ;;  %v8337_v44 = vld [vmem:[#allocation4 + $0x202] sm:$0xff]  ;;  %v7470_v45 = vpop.f32.mrf.mxu2  ;;  %v2689_v43 = vsel %vm2601_vm11, %v14844_v0, %v2389_v32 }
 0x471   : > { %v3095_v54 = vpop.permute.xlu1 %3094  ;;  %v7471_v62 = vadd.f32 %v7470_v45, %v7222_v17  ;;  %v8050_v57 = vld [vmem:[#allocation4 + $0x208] sm:$0xff]  ;;  %v2786_v31 = vsel %vm2698_vm12, %v2689_v43, %v14789_v30 }
 0x472   : > { %v8433_v10 = vmax.f32 %v8241_v61, %v8337_v44  ;;  %v3212_v46 = vsel %vm2601_vm11, %v14968_v50, %v3095_v54  ;;  %v3462_v36 = vunpack.c.l.b16 %v2786_v31  ;;  %v3463_v12 = vunpack.c.h.b16 %v2786_v31 }
 0x473   : > { %v3265_v29 = vsel %vm2698_vm12, %v3212_v46, %v14944_v13  ;;  %v7720_v9 = vadd.f32 %v14783_v25, %v7471_v62  ;;  %v4884_v44 = vrot.slane %v4883_v21, 4 }
 0x474   : > { %8529 = vst.msk [vmem:[#allocation5 + $0x200] sm:$0xff] %vm2601_vm11, %v8433_v10  ;;  %v3897_v35 = vunpack.c.l.b16 %v3265_v29  ;;  %v3898_v19 = vunpack.c.h.b16 %v3265_v29  ;;  %v3558_v8 = vpack.c.b16 %v3462_v36, %v3462_v36  ;;  %v3559_v23 = vpack.c.b16 %v3463_v12, %v3463_v12  ;;  %v15013_v12 = vpop.permute.xlu0 %2502 }
 0x475   : > { %v14971_v15 = vpop.permute.xlu2 %2836  ;;  %v7859_v6 = vmax.f32 %v7720_v9, 0.0  ;;  %v7224_v22 = vpop.f32.mrf.mxu1  ;;  %v10358_v9 = vld [vmem:[#allocation3 + $0x40c] sm:$0xf] }
 0x476   : > { %v8146_v53 = vld [vmem:[#allocation4 + $0x209] sm:$0xff]  ;;  %v3994_v55 = vpack.c.b16 %v3897_v35, %v3897_v35  ;;  %v3995_v52 = vpack.c.b16 %v3898_v19, %v3898_v19  ;;  %v7225_v30 = vadd.f32 %v14922_v4, %v7224_v22  ;;  %3750 = vst [vmem:[#allocation3 + $0x408] sm:$0xf] %v3558_v8 }
 0x477   : > { %v14965_v34 = vld [vmem:[#allocation5 + $0x1f0] ss:$2 sm:$0xff]  ;;  %v8242_v40 = vmax.f32 %v8050_v57, %v8146_v53  ;;  %v8338_v0 = vld [vmem:[#allocation4 + $0x20a] sm:$0xff]  ;;  %3751 = vst [vmem:[#allocation3 + $0x414] sm:$0xf] %v3559_v23 }
 0x478   : > { %v4886_v11 = vshll.u32 %v3994_v55, 16  ;;  %v4890_v18 = vshrl.u32 %v3994_v55, 16  ;;  %v4896_v2 = vshll.u32 %v3995_v52, 16  ;;  %v7473_v58 = vpop.f32.mrf.mxu2  ;;  %7955 = vst.msk [vmem:[#allocation4 + $0x218] sm:$0xff] %vm2601_vm11, %v7859_v6  ;;  %v8051_v57 = vld [vmem:[#allocation4 + $0x210] sm:$0xff] }
 0x479   : > { %v8434_v59 = vmax.f32 %v8242_v40, %v8338_v0  ;;  %v7474_v5 = vadd.f32 %v7473_v58, %v7225_v30 }
 0x47a   : > { %v4888_v25 = vrot.slane %v4886_v11, 5  ;;  %v4892_v24 = vrot.slane %v4890_v18, 4  ;;  %v14994_v32 = vrot.slane %v4896_v2, 5 }
 0x47b   : > { %7512 = vmatmul.bf16.gmra.mxu2 %v9963_v27  ;;  %8530 = vst.msk [vmem:[#allocation5 + $0x208] sm:$0xff] %vm2601_vm11, %v8434_v59  ;;  %v7723_v42 = vadd.f32 %v14817_v49, %v7474_v5  ;;  %v15004_v49 = vpop.f32.mrf.mxu3 }
 0x47c   : > { %v4889_v17 = vsel %vm11055_vm15, %v4884_v44, %v4888_v25  ;;  %v4893_v54 = vor.u32 %v4892_v24, %v4888_v25 }
 0x47d   : > { %v2393_v61 = vpop.permute.xlu2 %2392  ;;  %5153 = vst [vmem:[#allocation3 + $0x418] sm:$0xf] %v4889_v17  ;;  %v7860_v62 = vmax.f32 %v7723_v42, 0.0  ;;  %v7226_v55 = vpop.f32.mrf.mxu1  ;;  %v9970_v59 = vld [vmem:[#allocation3 + $0x408] sm:$0xf] }
 0x47e   : > { %v2693_v10 = vsel %vm2601_vm11, %v14899_v7, %v2393_v61  ;;  %v4894_v46 = vrot.slane %v4893_v54, 4  ;;  %v8684_v7 = vmax.f32 %v14833_v14, %v14951_v51  ;;  %v4900_v14 = vshrl.u32 %v3995_v52, 16  ;;  %v10508_v61 = vld [vmem:[#allocation2 + $0x180] sm:$0xff] }
 0x47f   : > { %v2790_v20 = vsel %vm2698_vm12, %v2693_v10, %v14925_v26  ;;  %v2835_v26 = vpop.permute.xlu1 %2834  ;;  %v8147_v51 = vld [vmem:[#allocation4 + $0x211] sm:$0xff]  ;;  %7956 = vst.msk [vmem:[#allocation4 + $0x220] sm:$0xff] %vm2601_vm11, %v7860_v62  ;;  %v7227_v18 = vadd.f32 %v14922_v4, %v7226_v55  ;;  %v3118_v44 = vsel %vm2504_vm5, %v10508_v61, %v14971_v15 }
 0x480   : > { %7263 = vmatmul.bf16.gmra.mxu1 %v9959_v60  ;;  %v3466_v1 = vunpack.c.l.b16 %v2790_v20  ;;  %v3467_v63 = vunpack.c.h.b16 %v2790_v20  ;;  %v4899_v60 = vsel %vm11055_vm15, %v4894_v46, %v14994_v32  ;;  %v8243_v53 = vmax.f32 %v8051_v57, %v8147_v51  ;;  %v8339_v35 = vld [vmem:[#allocation4 + $0x212] sm:$0xff]  ;;  %v7475_v22 = vpop.f32.mrf.mxu2 }
 0x481   : > { %5154 = vst [vmem:[#allocation3 + $0x424] sm:$0xf] %v4899_v60  ;;  %v3116_v19 = vsel %vm2504_vm5, %v14777_v48, %v2835_v26  ;;  %v4902_v40 = vrot.slane %v4900_v14, 4  ;;  %v10359_v48 = vld [vmem:[#allocation3 + $0x410] sm:$0xf0]  ;;  %v8052_v58 = vld [vmem:[#allocation4 + $0x218] sm:$0xff]  ;;  %v7476_v20 = vadd.f32 %v7475_v22, %v7227_v18 }
 0x482   : > { %v3562_v45 = vpack.c.b16 %v3466_v1, %v3466_v1  ;;  %v14998_v27 = vld [vmem:[#allocation5 + $0x200] ss:$2 sm:$0xff]  ;;  %v3563_v29 = vpack.c.b16 %v3467_v63, %v3467_v63  ;;  %v8435_v31 = vmax.f32 %v8243_v53, %v8339_v35  ;;  %v3214_v36 = vsel %vm2601_vm11, %v3116_v19, %v14959_v37 }
 0x483   : > { %v8728_v43 = vmax.f32 %v8684_v7, %v14998_v27  ;;  %v3266_v0 = vsel %vm2698_vm12, %v3214_v36, %v15013_v12  ;;  %v9971_v37 = vor.u32 %v10359_v48, %v9970_v59  ;;  %v4903_v25 = vor.u32 %v4902_v40, %v14994_v32  ;;  %v15026_v2 = vpop.f32.mrf.mxu3 }
 0x484   : > { %3754 = vst [vmem:[#allocation3 + $0x438] sm:$0xf] %v3562_v45  ;;  %v9972_v21 = vld [vmem:[#allocation3 + $0x414] sm:$0xf0]  ;;  %v3899_v23 = vunpack.c.l.b16 %v3266_v0  ;;  %v3900_v11 = vunpack.c.h.b16 %v3266_v0  ;;  %v7725_v14 = vadd.f32 %v14839_v39, %v7476_v20 }
 0x485   : > { %8772 = vst.msk [vmem:[#allocation6 + $0xe0] sm:$0xff] %vm2601_vm11, %v8728_v43  ;;  %v9975_v52 = vor.u32 %v10358_v9, %v9972_v21  ;;  %v4904_v60 = vrot.slane %v4903_v25, 4 }
 0x486   : > { %3755 = vst [vmem:[#allocation3 + $0x444] sm:$0xf] %v3563_v29  ;;  %v8148_v10 = vld [vmem:[#allocation4 + $0x219] sm:$0xff]  ;;  %v3996_v5 = vpack.c.b16 %v3899_v23, %v3899_v23  ;;  %v3997_v17 = vpack.c.b16 %v3900_v11, %v3900_v11  ;;  %v7861_v36 = vmax.f32 %v7725_v14, 0.0 }
 0x487   : > { %8531 = vst.msk [vmem:[#allocation5 + $0x210] sm:$0xff] %vm2601_vm11, %v8435_v31  ;;  %v2391_v6 = vpop.permute.xlu1 %2390  ;;  %v8244_v1 = vmax.f32 %v8052_v58, %v8148_v10  ;;  %v8340_v46 = vld [vmem:[#allocation4 + $0x21a] sm:$0xff] }
 0x488   : > { %v2691_v24 = vsel %vm2601_vm11, %v14876_v3, %v2391_v6  ;;  %v4906_v32 = vshll.u32 %v3996_v5, 16  ;;  %v4910_v7 = vshrl.u32 %v3996_v5, 16  ;;  %v4916_v45 = vshll.u32 %v3997_v17, 16  ;;  %v7478_v0 = vpop.f32.mrf.mxu2  ;;  %7957 = vst.msk [vmem:[#allocation4 + $0x228] sm:$0xff] %vm2601_vm11, %v7861_v36  ;;  %v3110_v6 = vpop.permute.xlu2 %3109 }
 0x489   : > { %v2788_v54 = vsel %vm2698_vm12, %v2691_v24, %v14883_v47  ;;  %v8436_v29 = vmax.f32 %v8244_v1, %v8340_v46  ;;  %v4920_v26 = vshrl.u32 %v3997_v17, 16  ;;  %v7229_v35 = vpop.f32.mrf.mxu1 }
 0x48a   : > { %v3464_v3 = vunpack.c.l.b16 %v2788_v54  ;;  %v3465_v63 = vunpack.c.h.b16 %v2788_v54  ;;  %v4908_v43 = vrot.slane %v4906_v32, 5  ;;  %v4912_v62 = vrot.slane %v4910_v7, 4 }
 0x48b   : > { %7517 = vmatmul.bf16.gmra.mxu2 %v9975_v52  ;;  %8532 = vst.msk [vmem:[#allocation5 + $0x218] sm:$0xff] %vm2601_vm11, %v8436_v29  ;;  %v4918_v51 = vrot.slane %v4916_v45, 5  ;;  %v4922_v53 = vrot.slane %v4920_v26, 4  ;;  %v7230_v9 = vadd.f32 %v14922_v4, %v7229_v35  ;;  %v15044_v11 = vpop.f32.mrf.mxu3 }
 0x48c   : > { %v15017_v8 = vld [vmem:[#allocation6 + $0xe0] sm:$0xff]  ;;  %v3560_v47 = vpack.c.b16 %v3464_v3, %v3464_v3  ;;  %v3561_v57 = vpack.c.b16 %v3465_v63, %v3465_v63  ;;  %v4909_v31 = vsel %vm11055_vm15, %v4904_v60, %v4908_v43  ;;  %v4913_v40 = vor.u32 %v4912_v62, %v4908_v43  ;;  %v10361_v3 = vld [vmem:[#allocation3 + $0x424] sm:$0xf] }
 0x48d   : > { %v8861_v30 = vrot.slane %v15017_v8, 3  ;;  %5155 = vst [vmem:[#allocation3 + $0x430] sm:$0xf] %v4909_v31  ;;  %v7479_v52 = vadd.f32 %v7478_v0, %v7230_v9  ;;  %v4923_v23 = vor.u32 %v4922_v53, %v4918_v51  ;;  %v8053_v62 = vld [vmem:[#allocation4 + $0x220] sm:$0xff] }
 0x48e   : > { %3752 = vst [vmem:[#allocation3 + $0x420] sm:$0xf] %v3560_v47  ;;  %v4914_v55 = vrot.slane %v4913_v40, 4 }
 0x48f   : > { %v8887_v15 = vsel %vm768_vm1, %v14938_v28, %v8861_v30  ;;  %v3108_v21 = vpop.permute.xlu1 %3107  ;;  %3753 = vst [vmem:[#allocation3 + $0x42c] sm:$0xf] %v3561_v57  ;;  %v7728_v22 = vadd.f32 %v14864_v38, %v7479_v52  ;;  %v4924_v20 = vrot.slane %v4923_v23, 4  ;;  %v10509_v38 = vld [vmem:[#allocation2 + $0x188] sm:$0xff] }
 0x490   : > { %7268 = vmatmul.bf16.gmra.mxu1 %v9971_v37  ;;  %v8899_v42 = vpack.c.bf16 %v8887_v15, %v8887_v15  ;;  %v4919_v18 = vsel %vm11055_vm15, %v4914_v55, %v4918_v51  ;;  %v7480_v7 = vpop.f32.mrf.mxu2  ;;  %v8149_v57 = vld [vmem:[#allocation4 + $0x221] sm:$0xff] }
 0x491   : > { %5156 = vst [vmem:[#allocation3 + $0x43c] sm:$0xf] %v4919_v18  ;;  %v7862_v24 = vmax.f32 %v7728_v22, 0.0  ;;  %v7231_v15 = vpop.f32.mrf.mxu1  ;;  %v8245_v35 = vmax.f32 %v8053_v62, %v8149_v57  ;;  %v8341_v40 = vld [vmem:[#allocation4 + $0x222] sm:$0xff] }
 0x492   : > { %8916 = vst.msk [vmem:[%s12430_s12 + $0x24] sm:$0xf] %vm8906_vm7, %v8899_v42  ;;  %v15051_v25 = vld [vmem:[#allocation5 + $0x210] ss:$2 sm:$0xff] }
 0x493   : > { %7958 = vst.msk [vmem:[#allocation4 + $0x230] sm:$0xff] %vm2601_vm11, %v7862_v24 }
 0x494   : > { %v9984_v45 = vld [vmem:[#allocation3 + $0x42c] sm:$0xf0] }
 0x495   : > { %v9987_v29 = vor.u32 %v10361_v3, %v9984_v45  ;;  %v9982_v47 = vld [vmem:[#allocation3 + $0x420] sm:$0xf] }
 0x496   : > { %v10362_v43 = vld [vmem:[#allocation3 + $0x428] sm:$0xf0] }
 0x497   : > { %v9983_v0 = vor.u32 %v10362_v43, %v9982_v47 }
 0x498   : > { %v3101_v32 = vpop.permute.xlu1 %3100  ;;  %v10364_v57 = vld [vmem:[#allocation3 + $0x43c] sm:$0xf] }
 0x49a   : > { %v3099_v28 = vpop.permute.xlu0 %3098  ;;  %v8150_v22 = vld [vmem:[#allocation4 + $0x229] sm:$0xff] }
 0x49b   : > { %v3216_v19 = vsel %vm2601_vm11, %v3118_v44, %v3099_v28  ;;  %v8685_v44 = vmax.f32 %v14904_v56, %v14965_v34  ;;  %v7232_v56 = vadd.f32 %v14922_v4, %v7231_v15  ;;  %7522 = vmatmul.bf16.gmra.mxu2 %v9987_v29  ;;  %v8342_v15 = vld [vmem:[#allocation4 + $0x22a] sm:$0xff] }
 0x49c   : > { %v3268_v39 = vsel %vm2698_vm12, %v3216_v19, %v3108_v21 }
 0x49d   : > { %v3901_v59 = vunpack.c.l.b16 %v3268_v39  ;;  %v3902_v48 = vunpack.c.h.b16 %v3268_v39  ;;  %v8729_v54 = vmax.f32 %v8685_v44, %v15051_v25  ;;  %v7481_v51 = vadd.f32 %v7480_v7, %v7232_v56 }
 0x49e   : > { %v8437_v39 = vmax.f32 %v8245_v35, %v8341_v40 }
 0x49f   : > { %v3998_v37 = vpack.c.b16 %v3901_v59, %v3901_v59  ;;  %v3999_v61 = vpack.c.b16 %v3902_v48, %v3902_v48  ;;  %8773 = vst.msk [vmem:[#allocation6 + $0xe8] sm:$0xff] %vm2601_vm11, %v8729_v54  ;;  %v7730_v21 = vadd.f32 %v14908_v16, %v7481_v51  ;;  %v15063_v59 = vpop.f32.mrf.mxu3  ;;  %v3103_v48 = vpop.permute.xlu2 %3102 }
 0x4a0   : > { %7273 = vmatmul.bf16.gmra.mxu1 %v9983_v0  ;;  %8533 = vst.msk [vmem:[#allocation5 + $0x220] sm:$0xff] %vm2601_vm11, %v8437_v39  ;;  %v7483_v54 = vpop.f32.mrf.mxu2 }
 0x4a1   : > { %v4926_v58 = vshll.u32 %v3998_v37, 16  ;;  %v4930_v10 = vshrl.u32 %v3998_v37, 16  ;;  %v4936_v5 = vshll.u32 %v3999_v61, 16  ;;  %v4940_v1 = vshrl.u32 %v3999_v61, 16  ;;  %v7234_v37 = vpop.f32.mrf.mxu1 }
 0x4a2   : > { %v2839_v17 = vpop.permute.xlu0 %2838  ;;  %v7863_v18 = vmax.f32 %v7730_v21, 0.0 }
 0x4a3   : > { %v3120_v63 = vsel %vm2504_vm5, %v10509_v38, %v2839_v17  ;;  %v4928_v34 = vrot.slane %v4926_v58, 5  ;;  %v4932_v42 = vrot.slane %v4930_v10, 4  ;;  %v4938_v46 = vrot.slane %v4936_v5, 5  ;;  %v2841_v17 = vpop.permute.xlu1 %2840 }
 0x4a4   : > { %v4942_v60 = vrot.slane %v4940_v1, 4  ;;  %v3218_v26 = vsel %vm2601_vm11, %v3120_v63, %v3101_v32  ;;  %v7235_v5 = vadd.f32 %v14922_v4, %v7234_v37  ;;  %7959 = vst.msk [vmem:[#allocation4 + $0x238] sm:$0xff] %vm2601_vm11, %v7863_v18  ;;  %v3122_v29 = vsel %vm2504_vm5, %v14750_v33, %v2841_v17  ;;  %v9994_v18 = vld [vmem:[#allocation3 + $0x438] sm:$0xf] }
 0x4a5   : > { %v4929_v14 = vsel %vm11055_vm15, %v4924_v20, %v4928_v34  ;;  %v4933_v28 = vor.u32 %v4932_v42, %v4928_v34  ;;  %v3270_v53 = vsel %vm2698_vm12, %v3218_v26, %v3110_v6  ;;  %v8054_v6 = vld [vmem:[#allocation4 + $0x228] sm:$0xff]  ;;  %v3220_v35 = vsel %vm2601_vm11, %v3122_v29, %v3103_v48 }
 0x4a6   : > { %5157 = vst [vmem:[#allocation3 + $0x448] sm:$0xf] %v4929_v14  ;;  %v3903_v19 = vunpack.c.l.b16 %v3270_v53  ;;  %v3904_v31 = vunpack.c.h.b16 %v3270_v53  ;;  %v4943_v9 = vor.u32 %v4942_v60, %v4938_v46  ;;  %v8803_v24 = vld [vmem:[#allocation6 + $0xe8] sm:$0x7]  ;;  %v8246_v58 = vmax.f32 %v8054_v6, %v8150_v22  ;;  %v10365_v6 = vld [vmem:[#allocation3 + $0x440] sm:$0xf0] }
 0x4a7   : > { %v4934_v36 = vrot.slane %v4933_v28, 4  ;;  %v8862_v20 = vrot.slane %v8803_v24, 3  ;;  %v7484_v34 = vadd.f32 %v7483_v54, %v7235_v5  ;;  %v15090_v0 = vpop.f32.mrf.mxu3  ;;  %v2397_v39 = vpop.permute.xlu2 %2396  ;;  %v9995_v54 = vor.u32 %v10365_v6, %v9994_v18 }
 0x4a8   : > { %v4000_v55 = vpack.c.b16 %v3903_v19, %v3903_v19  ;;  %v4001_v52 = vpack.c.b16 %v3904_v31, %v3904_v31  ;;  %v4944_v10 = vrot.slane %v4943_v9, 4  ;;  %v8438_v63 = vmax.f32 %v8246_v58, %v8342_v15  ;;  %v8055_v19 = vld [vmem:[#allocation4 + $0x230] sm:$0xff]  ;;  %v7485_v9 = vpop.f32.mrf.mxu2 }
 0x4a9   : > { %v4939_v23 = vsel %vm11055_vm15, %v4934_v36, %v4938_v46  ;;  %v8863_v42 = vsel %vm768_vm1, %v8861_v30, %v8862_v20  ;;  %v7733_v26 = vadd.f32 %v15004_v49, %v7484_v34  ;;  %v7236_v33 = vpop.f32.mrf.mxu1  ;;  %vm8922_vm1 = vcmask 516096  }
 0x4aa   : > { %v4946_v61 = vshll.u32 %v4000_v55, 16  ;;  %v4950_v44 = vshrl.u32 %v4000_v55, 16  ;;  %v2395_v16 = vpop.permute.xlu0 %2394  ;;  %5158 = vst [vmem:[#allocation3 + $0x454] sm:$0xf] %v4939_v23  ;;  %v4956_v38 = vshll.u32 %v4001_v52, 16  ;;  %v4960_v56 = vshrl.u32 %v4001_v52, 16  ;;  %vm8923_vm2 = vmand %vm8922_vm1, %vm2852_vm10 }
 0x4ab   : > { %v2695_v7 = vsel %vm2601_vm11, %v14968_v50, %v2395_v16  ;;  %v8900_v60 = vpack.c.bf16 %v8863_v42, %v8863_v42  ;;  %8534 = vst.msk [vmem:[#allocation5 + $0x228] sm:$0xff] %vm2601_vm11, %v8438_v63  ;;  %v7864_v14 = vmax.f32 %v7733_v26, 0.0  ;;  %v8151_v31 = vld [vmem:[#allocation4 + $0x231] sm:$0xff]  ;;  %v7237_v40 = vadd.f32 %v14922_v4, %v7236_v33  ;;  %v2200_v36 = vpop.permute.xlu1 %2199 }
 0x4ac   : > { %v4948_v1 = vrot.slane %v4946_v61, 5  ;;  %v4952_v3 = vrot.slane %v4950_v44, 4  ;;  %v2792_v8 = vsel %vm2698_vm12, %v2695_v7, %v14944_v13  ;;  %v4958_v47 = vrot.slane %v4956_v38, 5  ;;  %v10510_v52 = vld [vmem:[#allocation2 + $0x178] sm:$0xff] }
 0x4ad   : > { %v9996_v45 = vld [vmem:[#allocation3 + $0x444] sm:$0xf0]  ;;  %v3468_v43 = vunpack.c.l.b16 %v2792_v8  ;;  %v3469_v62 = vunpack.c.h.b16 %v2792_v8  ;;  %8917 = vst.msk [vmem:[%s12430_s12 + $0x28] sm:$0xf] %vm8906_vm7, %v8900_v60  ;;  %v4962_v50 = vrot.slane %v4960_v56, 4  ;;  %v8247_v55 = vmax.f32 %v8055_v19, %v8151_v31  ;;  %v8343_v22 = vld [vmem:[#allocation4 + $0x232] sm:$0xff] }
 0x4ae   : > { %v4949_v46 = vsel %vm11055_vm15, %v4944_v10, %v4948_v1  ;;  %v4953_v32 = vor.u32 %v4952_v3, %v4948_v1  ;;  %v9999_v28 = vor.u32 %v10364_v57, %v9996_v45  ;;  %7960 = vst.msk [vmem:[#allocation4 + $0x240] sm:$0xff] %vm2601_vm11, %v7864_v14  ;;  %v2600_v23 = vsel %vm2504_vm5, %v10510_v52, %v2200_v36  ;;  %v8056_v42 = vld [vmem:[#allocation4 + $0x238] sm:$0xff] }
 0x4af   : > { %5159 = vst [vmem:[#allocation3 + $0x460] sm:$0xf] %v4949_v46  ;;  %v3564_v53 = vpack.c.b16 %v3468_v43, %v3468_v43  ;;  %v3565_v49 = vpack.c.b16 %v3469_v62, %v3469_v62  ;;  %v4963_v37 = vor.u32 %v4962_v50, %v4958_v47  ;;  %v2697_v61 = vsel %vm2601_vm11, %v2600_v23, %v2397_v39  ;;  %v15105_v29 = vpop.f32.mrf.mxu3 }
 0x4b0   : > { %v4954_v30 = vrot.slane %v4953_v32, 4  ;;  %v7486_v44 = vadd.f32 %v7485_v9, %v7237_v40  ;;  %v8439_v24 = vmax.f32 %v8247_v55, %v8343_v22  ;;  %v2794_v58 = vsel %vm2698_vm12, %v2697_v61, %v15013_v12  ;;  %7527 = vmatmul.bf16.gmra.mxu2 %v9999_v28  ;;  %7278 = vmatmul.bf16.gmra.mxu1 %v9995_v54  ;;  %v7488_v32 = vpop.f32.mrf.mxu2 }
 0x4b1   : > { %3756 = vst [vmem:[#allocation3 + $0x450] sm:$0xf] %v3564_v53  ;;  %v3470_v5 = vunpack.c.l.b16 %v2794_v58  ;;  %v3471_v17 = vunpack.c.h.b16 %v2794_v58  ;;  %v7239_v63 = vpop.f32.mrf.mxu1  ;;  %v4964_v56 = vrot.slane %v4963_v37, 4  ;;  %v10367_v43 = vld [vmem:[#allocation3 + $0x454] sm:$0xf] }
 0x4b2   : > { %v4959_v51 = vsel %vm11055_vm15, %v4954_v30, %v4958_v47  ;;  %v3112_v13 = vpop.permute.xlu0 %3111  ;;  %v15095_v16 = vld [vmem:[#allocation5 + $0x220] ss:$2 sm:$0xff]  ;;  %3757 = vst [vmem:[#allocation3 + $0x45c] sm:$0xf] %v3565_v49  ;;  %v7735_v20 = vadd.f32 %v15026_v2, %v7486_v44  ;;  %v7240_v12 = vadd.f32 %v14922_v4, %v7239_v63 }
 0x4b3   : > { %5160 = vst [vmem:[#allocation3 + $0x46c] sm:$0xf] %v4959_v51  ;;  %v3272_v21 = vsel %vm2698_vm12, %v3220_v35, %v3112_v13  ;;  %v3566_v1 = vpack.c.b16 %v3470_v5, %v3470_v5  ;;  %v3567_v3 = vpack.c.b16 %v3471_v17, %v3471_v17 }
 0x4b4   : > { %v3905_v48 = vunpack.c.l.b16 %v3272_v21  ;;  %8535 = vst.msk [vmem:[#allocation5 + $0x230] sm:$0xff] %vm2601_vm11, %v8439_v24  ;;  %v7865_v38 = vmax.f32 %v7735_v20, 0.0  ;;  %v7489_v60 = vadd.f32 %v7488_v32, %v7240_v12 }
 0x4b5   : > { %v8152_v46 = vld [vmem:[#allocation4 + $0x239] sm:$0xff]  ;;  %3758 = vst [vmem:[#allocation3 + $0x468] sm:$0xf] %v3566_v1 }
 0x4b6   : > { %v4002_v10 = vpack.c.b16 %v3905_v48, %v3905_v48  ;;  %v8248_v7 = vmax.f32 %v8056_v42, %v8152_v46  ;;  %3759 = vst [vmem:[#allocation3 + $0x474] sm:$0xf] %v3567_v3  ;;  %v8344_v2 = vld [vmem:[#allocation4 + $0x23a] sm:$0xff]  ;;  %v7738_v8 = vadd.f32 %v15044_v11, %v7489_v60  ;;  %v8688_v3 = vmax.f32 %v14998_v27, %v15095_v16 }
 0x4b7   : > { %7961 = vst.msk [vmem:[#allocation4 + $0x248] sm:$0xff] %vm2601_vm11, %v7865_v38  ;;  %v10008_v62 = vld [vmem:[#allocation3 + $0x45c] sm:$0xf0]  ;;  %v7747_v31 = vpop.f32.mrf.mxu3 }
 0x4b8   : > { %v4966_v15 = vshll.u32 %v4002_v10, 16  ;;  %v8440_v26 = vmax.f32 %v8248_v7, %v8344_v2  ;;  %v7866_v30 = vmax.f32 %v7738_v8, 0.0  ;;  %v8057_v41 = vld [vmem:[#allocation4 + $0x240] sm:$0xff]  ;;  %v7490_v14 = vpop.f32.mrf.mxu2  ;;  %v10011_v28 = vor.u32 %v10367_v43, %v10008_v62  ;;  %v10006_v33 = vld [vmem:[#allocation3 + $0x450] sm:$0xf] }
 0x4b9   : > { %v7241_v47 = vpop.f32.mrf.mxu1  ;;  %v10368_v53 = vld [vmem:[#allocation3 + $0x458] sm:$0xf0] }
 0x4ba   : > { %v4968_v34 = vrot.slane %v4966_v15, 5  ;;  %8536 = vst.msk [vmem:[#allocation5 + $0x238] sm:$0xff] %vm2601_vm11, %v8440_v26  ;;  %v7242_v50 = vadd.f32 %v14922_v4, %v7241_v47  ;;  %v10007_v19 = vor.u32 %v10368_v53, %v10006_v33  ;;  %v10370_v10 = vld [vmem:[#allocation3 + $0x46c] sm:$0xf] }
 0x4bb   : > { %7962 = vst.msk [vmem:[#allocation4 + $0x250] sm:$0xff] %vm2601_vm11, %v7866_v30 }
 0x4bc   : > { %v4969_v45 = vsel %vm11055_vm15, %v4964_v56, %v4968_v34  ;;  %v7491_v35 = vadd.f32 %v7490_v14, %v7242_v50  ;;  %v10018_v15 = vld [vmem:[#allocation3 + $0x468] sm:$0xf] }
 0x4bd   : > { %5161 = vst [vmem:[#allocation3 + $0x478] sm:$0xf] %v4969_v45  ;;  %v10371_v1 = vld [vmem:[#allocation3 + $0x470] sm:$0xf0] }
 0x4be   : > { %v8153_v57 = vld [vmem:[#allocation4 + $0x241] sm:$0xff]  ;;  %v7740_v40 = vadd.f32 %v15063_v59, %v7491_v35  ;;  %v10019_v42 = vor.u32 %v10371_v1, %v10018_v15 }
 0x4bf   : > { %v8249_v51 = vmax.f32 %v8057_v41, %v8153_v57  ;;  %v8345_v49 = vld [vmem:[#allocation4 + $0x242] sm:$0xff]  ;;  %v7749_v37 = vpop.f32.mrf.mxu3 }
 0x4c0   : > { %7532 = vmatmul.bf16.gmra.mxu2 %v10011_v28  ;;  %7283 = vmatmul.bf16.gmra.mxu1 %v10007_v19  ;;  %v8058_v36 = vld [vmem:[#allocation4 + $0x248] sm:$0xff]  ;;  %v7867_v21 = vmax.f32 %v7740_v40, 0.0  ;;  %v7493_v48 = vpop.f32.mrf.mxu2 }
 0x4c1   : > { %v15111_v11 = vld [vmem:[#allocation5 + $0x230] ss:$2 sm:$0xff]  ;;  %v8441_v13 = vmax.f32 %v8249_v51, %v8345_v49  ;;  %v7244_v55 = vpop.f32.mrf.mxu1 }
 0x4c2   : > { %v8154_v9 = vld [vmem:[#allocation4 + $0x249] sm:$0xff]  ;;  %7963 = vst.msk [vmem:[#allocation4 + $0x258] sm:$0xff] %vm2601_vm11, %v7867_v21  ;;  %v7245_v23 = vadd.f32 %v14922_v4, %v7244_v55  ;;  %v8689_v49 = vmax.f32 %v15051_v25, %v15111_v11  ;;  %v15147_v25 = vld [vmem:[%s15248_s4] ss:$0 sm:$0xff] }
 0x4c3   : > { %8537 = vst.msk [vmem:[#allocation5 + $0x240] sm:$0xff] %vm2601_vm11, %v8441_v13  ;;  %v8250_v39 = vmax.f32 %v8058_v36, %v8154_v9  ;;  %v8346_v52 = vld [vmem:[#allocation4 + $0x24a] sm:$0xff] }
 0x4c4   : > { %v7494_v6 = vadd.f32 %v7493_v48, %v7245_v23  ;;  %v10020_v22 = vld [vmem:[#allocation3 + $0x474] sm:$0xf0]  ;;  %v8059_v44 = vld [vmem:[#allocation4 + $0x250] sm:$0xff] }
 0x4c5   : > { %v8442_v18 = vmax.f32 %v8250_v39, %v8346_v52  ;;  %v10023_v20 = vor.u32 %v10370_v10, %v10020_v22 }
 0x4c6   : > { %v7743_v59 = vadd.f32 %v15090_v0, %v7494_v6 }
 0x4c7   : > { %8538 = vst.msk [vmem:[#allocation5 + $0x248] sm:$0xff] %vm2601_vm11, %v8442_v18  ;;  %v7752_v7 = vpop.f32.mrf.mxu3 }
 0x4c8   : > { %v7868_v61 = vmax.f32 %v7743_v59, 0.0  ;;  %v7495_v54 = vpop.f32.mrf.mxu2 }
 0x4c9   : > { %v8155_v24 = vld [vmem:[#allocation4 + $0x251] sm:$0xff]  ;;  %v7246_v58 = vpop.f32.mrf.mxu1 }
 0x4ca   : > { %v8251_v5 = vmax.f32 %v8059_v44, %v8155_v24  ;;  %7964 = vst.msk [vmem:[#allocation4 + $0x260] sm:$0xff] %vm2601_vm11, %v7868_v61  ;;  %v7247_v17 = vadd.f32 %v14922_v4, %v7246_v58  ;;  %v8347_v0 = vld [vmem:[#allocation4 + $0x252] sm:$0xff] }
 0x4cb   : > { %v8060_v32 = vld [vmem:[#allocation4 + $0x258] sm:$0xff] }
 0x4cc   : > { %v8443_v63 = vmax.f32 %v8251_v5, %v8347_v0  ;;  %v7496_v56 = vadd.f32 %v7495_v54, %v7247_v17 }
 0x4ce   : > { %v15123_v38 = vld [vmem:[#allocation5 + $0x240] ss:$2 sm:$0xff]  ;;  %8539 = vst.msk [vmem:[#allocation5 + $0x250] sm:$0xff] %vm2601_vm11, %v8443_v63  ;;  %v7745_v46 = vadd.f32 %v15105_v29, %v7496_v56 }
 0x4cf   : > { %v8732_v34 = vmax.f32 %v8688_v3, %v15123_v38  ;;  %v7754_v53 = vpop.f32.mrf.mxu3 }
 0x4d0   : > { %7537 = vmatmul.bf16.gmra.mxu2 %v10023_v20  ;;  %7288 = vmatmul.bf16.gmra.mxu1 %v10019_v42  ;;  %v7869_v12 = vmax.f32 %v7745_v46, 0.0  ;;  %v7498_v60 = vpop.f32.mrf.mxu2 }
 0x4d1   : > { %8776 = vst.msk [vmem:[#allocation6 + $0x100] sm:$0xff] %vm2601_vm11, %v8732_v34  ;;  %v8156_v27 = vld [vmem:[#allocation4 + $0x259] sm:$0xff]  ;;  %v7249_v16 = vpop.f32.mrf.mxu1 }
 0x4d2   : > { %v8252_v45 = vmax.f32 %v8060_v32, %v8156_v27  ;;  %7965 = vst.msk [vmem:[#allocation4 + $0x268] sm:$0xff] %vm2601_vm11, %v7869_v12  ;;  %v7250_v2 = vadd.f32 %v14922_v4, %v7249_v16  ;;  %v8348_v26 = vld [vmem:[#allocation4 + $0x25a] sm:$0xff] }
 0x4d3   : > { %v8061_v41 = vld [vmem:[#allocation4 + $0x260] sm:$0xff] }
 0x4d4   : > { %v8444_v8 = vmax.f32 %v8252_v45, %v8348_v26  ;;  %v7499_v30 = vadd.f32 %v7498_v60, %v7250_v2 }
 0x4d6   : > { %8540 = vst.msk [vmem:[#allocation5 + $0x258] sm:$0xff] %vm2601_vm11, %v8444_v8  ;;  %v7748_v29 = vadd.f32 %v7747_v31, %v7499_v30 }
 0x4d7   : > { %v7757_v18 = vpop.f32.mrf.mxu3 }
 0x4d8   : > { %v8804_v47 = vld [vmem:[#allocation6 + $0x100] sm:$0xff]  ;;  %v7870_v62 = vmax.f32 %v7748_v29, 0.0  ;;  %v7500_v51 = vpop.f32.mrf.mxu2 }
 0x4d9   : > { %v8901_v43 = vpack.c.bf16 %v8804_v47, %v8804_v47  ;;  %v8157_v57 = vld [vmem:[#allocation4 + $0x261] sm:$0xff]  ;;  %v7251_v50 = vpop.f32.mrf.mxu1 }
 0x4da   : > { %v8253_v14 = vmax.f32 %v8061_v41, %v8157_v57  ;;  %7966 = vst.msk [vmem:[#allocation4 + $0x270] sm:$0xff] %vm2601_vm11, %v7870_v62  ;;  %v7252_v28 = vadd.f32 %v14922_v4, %v7251_v50  ;;  %v8349_v33 = vld [vmem:[#allocation4 + $0x262] sm:$0xff] }
 0x4db   : > { %8918 = vst.msk [vmem:[%s12430_s12 + $0x2c] sm:$0xf] %vm8906_vm7, %v8901_v43  ;;  %v8062_v9 = vld [vmem:[#allocation4 + $0x268] sm:$0xff] }
 0x4dc   : > { %v8445_v35 = vmax.f32 %v8253_v14, %v8349_v33  ;;  %v7501_v13 = vadd.f32 %v7500_v51, %v7252_v28 }
 0x4dd   : > { %v15138_v19 = vld [vmem:[#allocation5 + $0x250] ss:$2 sm:$0xff] }
 0x4de   : > { %v8733_v31 = vmax.f32 %v8689_v49, %v15138_v19  ;;  %8541 = vst.msk [vmem:[#allocation5 + $0x260] sm:$0xff] %vm2601_vm11, %v8445_v35  ;;  %v7750_v40 = vadd.f32 %v7749_v37, %v7501_v13 }
 0x4df   : > { %v7759_v15 = vpop.f32.mrf.mxu3 }
 0x4e0   : > { %8777 = vst.msk [vmem:[#allocation6 + $0x108] sm:$0xff] %vm2601_vm11, %v8733_v31  ;;  %v7871_v36 = vmax.f32 %v7750_v40, 0.0  ;;  %v7503_v55 = vpop.f32.mrf.mxu2 }
 0x4e1   : > { %v8158_v4 = vld [vmem:[#allocation4 + $0x269] sm:$0xff]  ;;  %v7254_v21 = vpop.f32.mrf.mxu1 }
 0x4e2   : > { %v8254_v39 = vmax.f32 %v8062_v9, %v8158_v4  ;;  %7967 = vst.msk [vmem:[#allocation4 + $0x278] sm:$0xff] %vm2601_vm11, %v7871_v36  ;;  %v7255_v11 = vadd.f32 %v15147_v25, %v7254_v21  ;;  %v8350_v52 = vld [vmem:[#allocation4 + $0x26a] sm:$0xff] }
 0x4e3   : > { %v8063_v22 = vld [vmem:[#allocation4 + $0x270] sm:$0xff] }
 0x4e4   : > { %v8446_v23 = vmax.f32 %v8254_v39, %v8350_v52  ;;  %v7504_v48 = vadd.f32 %v7503_v55, %v7255_v11 }
 0x4e6   : > { %8542 = vst.msk [vmem:[#allocation5 + $0x268] sm:$0xff] %vm2601_vm11, %v8446_v23  ;;  %v7753_v6 = vadd.f32 %v7752_v7, %v7504_v48 }
 0x4e7   : > { %v7762_v2 = vpop.f32.mrf.mxu3 }
 0x4e8   : > { %v7872_v59 = vmax.f32 %v7753_v6, 0.0  ;;  %v7505_v58 = vpop.f32.mrf.mxu2 }
 0x4e9   : > { %v8159_v37 = vld [vmem:[#allocation4 + $0x271] sm:$0xff]  ;;  %v7256_v61 = vpop.f32.mrf.mxu1 }
 0x4ea   : > { %v8255_v44 = vmax.f32 %v8063_v22, %v8159_v37  ;;  %7968 = vst.msk [vmem:[#allocation4 + $0x280] sm:$0xff] %vm2601_vm11, %v7872_v59  ;;  %v7257_v24 = vadd.f32 %v15147_v25, %v7256_v61  ;;  %v8351_v10 = vld [vmem:[#allocation4 + $0x272] sm:$0xff] }
 0x4eb   : > { %v8064_v3 = vld [vmem:[#allocation4 + $0x278] sm:$0xff] }
 0x4ec   : > { %v8447_v5 = vmax.f32 %v8255_v44, %v8351_v10  ;;  %v7506_v17 = vadd.f32 %v7505_v58, %v7257_v24 }
 0x4ed   : > { %v8637_v54 = vld [vmem:[#allocation5 + $0x260] ss:$2 sm:$0xff] }
 0x4ee   : > { %8543 = vst.msk [vmem:[#allocation5 + $0x270] sm:$0xff] %vm2601_vm11, %v8447_v5  ;;  %v7755_v20 = vadd.f32 %v7754_v53, %v7506_v17  ;;  %v8692_v36 = vmax.f32 %v15123_v38, %v8637_v54 }
 0x4ef   : > { %v7764_v51 = vpop.f32.mrf.mxu3 }
 0x4f0   : > { %v7873_v1 = vmax.f32 %v7755_v20, 0.0  ;;  %v7508_v42 = vpop.f32.mrf.mxu2 }
 0x4f1   : > { %v8160_v0 = vld [vmem:[#allocation4 + $0x279] sm:$0xff]  ;;  %v7259_v63 = vpop.f32.mrf.mxu1 }
 0x4f2   : > { %v8256_v56 = vmax.f32 %v8064_v3, %v8160_v0  ;;  %7969 = vst.msk [vmem:[#allocation4 + $0x288] sm:$0xff] %vm2601_vm11, %v7873_v1  ;;  %v7260_v34 = vadd.f32 %v15147_v25, %v7259_v63  ;;  %v8352_v46 = vld [vmem:[#allocation4 + $0x27a] sm:$0xff]  ;;  %v8805_v3 = vld [vmem:[#allocation6 + $0x108] sm:$0x7] }
 0x4f3   : > { %v8065_v7 = vld [vmem:[#allocation4 + $0x280] sm:$0xff] }
 0x4f4   : > { %v8448_v12 = vmax.f32 %v8256_v56, %v8352_v46  ;;  %v7509_v32 = vadd.f32 %v7508_v42, %v7260_v34 }
 0x4f6   : > { %8544 = vst.msk [vmem:[#allocation5 + $0x278] sm:$0xff] %vm2601_vm11, %v8448_v12  ;;  %v7758_v27 = vadd.f32 %v7757_v18, %v7509_v32 }
 0x4f7   : > { %v7767_v23 = vpop.f32.mrf.mxu3 }
 0x4f8   : > { %v7874_v16 = vmax.f32 %v7758_v27, 0.0  ;;  %v7510_v29 = vpop.f32.mrf.mxu2 }
 0x4f9   : > { %v8161_v45 = vld [vmem:[#allocation4 + $0x281] sm:$0xff]  ;;  %v7261_v47 = vpop.f32.mrf.mxu1 }
 0x4fa   : > { %v8257_v60 = vmax.f32 %v8065_v7, %v8161_v45  ;;  %7970 = vst.msk [vmem:[#allocation4 + $0x290] sm:$0xff] %vm2601_vm11, %v7874_v16  ;;  %v8353_v26 = vld [vmem:[#allocation4 + $0x282] sm:$0xff]  ;;  %v7262_v43 = vadd.f32 %v15147_v25, %v7261_v47 }
 0x4fb   : > { %v8066_v41 = vld [vmem:[#allocation4 + $0x288] sm:$0xff] }
 0x4fc   : > { %v8449_v8 = vmax.f32 %v8257_v60, %v8353_v26  ;;  %v7511_v62 = vadd.f32 %v7510_v29, %v7262_v43 }
 0x4fd   : > { %v15158_v30 = vld [vmem:[#allocation5 + $0x270] ss:$2 sm:$0xff] }
 0x4fe   : > { %8545 = vst.msk [vmem:[#allocation5 + $0x280] sm:$0xff] %vm2601_vm11, %v8449_v8  ;;  %v7760_v14 = vadd.f32 %v7759_v15, %v7511_v62  ;;  %v8693_v45 = vmax.f32 %v15138_v19, %v15158_v30 }
 0x4ff   : > { %v7769_v1 = vpop.f32.mrf.mxu3 }
 0x500   : > { %v7875_v53 = vmax.f32 %v7760_v14, 0.0  ;;  %v7513_v35 = vpop.f32.mrf.mxu2 }
 0x501   : > { %v8162_v57 = vld [vmem:[#allocation4 + $0x289] sm:$0xff]  ;;  %v7264_v49 = vpop.f32.mrf.mxu1 }
 0x502   : > { %v8258_v50 = vmax.f32 %v8066_v41, %v8162_v57  ;;  %v8354_v28 = vld [vmem:[#allocation4 + $0x28a] sm:$0xff]  ;;  %v7265_v13 = vadd.f32 %v15147_v25, %v7264_v49  ;;  %7971 = vst.msk [vmem:[#allocation4 + $0x298] sm:$0xff] %vm2601_vm11, %v7875_v53 }
 0x503   : > { %v8067_v21 = vld [vmem:[#allocation4 + $0x290] sm:$0xff] }
 0x504   : > { %v8450_v33 = vmax.f32 %v8258_v50, %v8354_v28  ;;  %v7514_v31 = vadd.f32 %v7513_v35, %v7265_v13 }
 0x506   : > { %8546 = vst.msk [vmem:[#allocation5 + $0x288] sm:$0xff] %vm2601_vm11, %v8450_v33  ;;  %v7763_v40 = vadd.f32 %v7762_v2, %v7514_v31 }
 0x507   : > { %v7772_v29 = vpop.f32.mrf.mxu3 }
 0x508   : > { %v7876_v9 = vmax.f32 %v7763_v40, 0.0  ;;  %v7515_v52 = vpop.f32.mrf.mxu2 }
 0x509   : > { %v8163_v11 = vld [vmem:[#allocation4 + $0x291] sm:$0xff]  ;;  %v7266_v55 = vpop.f32.mrf.mxu1 }
 0x50a   : > { %7972 = vst.msk [vmem:[#allocation4 + $0x2a0] sm:$0xff] %vm2601_vm11, %v7876_v9  ;;  %v8259_v48 = vmax.f32 %v8067_v21, %v8163_v11  ;;  %v7267_v18 = vadd.f32 %v15147_v25, %v7266_v55  ;;  %v8355_v6 = vld [vmem:[#allocation4 + $0x292] sm:$0xff] }
 0x50b   : > { %v8068_v37 = vld [vmem:[#allocation4 + $0x298] sm:$0xff] }
 0x50c   : > { %v8451_v59 = vmax.f32 %v8259_v48, %v8355_v6  ;;  %v7516_v38 = vadd.f32 %v7515_v52, %v7267_v18 }
 0x50d   : > { %v15166_v4 = vld [vmem:[#allocation5 + $0x280] ss:$2 sm:$0xff] }
 0x50e   : > { %v8736_v39 = vmax.f32 %v8692_v36, %v15166_v4  ;;  %8547 = vst.msk [vmem:[#allocation5 + $0x290] sm:$0xff] %vm2601_vm11, %v8451_v59  ;;  %v7765_v22 = vadd.f32 %v7764_v51, %v7516_v38 }
 0x50f   : > { %v7774_v49 = vpop.f32.mrf.mxu3 }
 0x510   : > { %8780 = vst.msk [vmem:[#allocation6 + $0x120] sm:$0xff] %vm2601_vm11, %v8736_v39  ;;  %v7877_v44 = vmax.f32 %v7765_v22, 0.0  ;;  %v7518_v10 = vpop.f32.mrf.mxu2 }
 0x511   : > { %v8164_v61 = vld [vmem:[#allocation4 + $0x299] sm:$0xff]  ;;  %v7269_v58 = vpop.f32.mrf.mxu1 }
 0x512   : > { %v8260_v24 = vmax.f32 %v8068_v37, %v8164_v61  ;;  %v8356_v17 = vld [vmem:[#allocation4 + $0x29a] sm:$0xff]  ;;  %7973 = vst.msk [vmem:[#allocation4 + $0x2a8] sm:$0xff] %vm2601_vm11, %v7877_v44  ;;  %v7270_v54 = vadd.f32 %v15147_v25, %v7269_v58 }
 0x513   : > { %v8069_v46 = vld [vmem:[#allocation4 + $0x2a0] sm:$0xff] }
 0x514   : > { %v8452_v15 = vmax.f32 %v8260_v24, %v8356_v17  ;;  %v7519_v0 = vadd.f32 %v7518_v10, %v7270_v54 }
 0x516   : > { %8548 = vst.msk [vmem:[#allocation5 + $0x298] sm:$0xff] %vm2601_vm11, %v8452_v15  ;;  %v7768_v34 = vadd.f32 %v7767_v23, %v7519_v0 }
 0x517   : > { %v15173_v5 = vld [vmem:[#allocation6 + $0x120] sm:$0xff]  ;;  %v7777_v22 = vpop.f32.mrf.mxu3 }
 0x518   : > { %v8868_v20 = vrot.slane %v15173_v5, 5  ;;  %v7878_v42 = vmax.f32 %v7768_v34, 0.0  ;;  %v7520_v27 = vpop.f32.mrf.mxu2 }
 0x519   : > { %v8165_v12 = vld [vmem:[#allocation4 + $0x2a1] sm:$0xff]  ;;  %v7271_v32 = vpop.f32.mrf.mxu1 }
 0x51a   : > { %v8888_v63 = vsel %vm5405_vm6, %v8805_v3, %v8868_v20  ;;  %v8261_v16 = vmax.f32 %v8069_v46, %v8165_v12  ;;  %7974 = vst.msk [vmem:[#allocation4 + $0x2b0] sm:$0xff] %vm2601_vm11, %v7878_v42  ;;  %v7272_v7 = vadd.f32 %v15147_v25, %v7271_v32  ;;  %v8357_v2 = vld [vmem:[#allocation4 + $0x2a2] sm:$0xff] }
 0x51b   : > { %v8902_v56 = vpack.c.bf16 %v8888_v63, %v8888_v63  ;;  %v8070_v41 = vld [vmem:[#allocation4 + $0x2a8] sm:$0xff] }
 0x51c   : > { %v8453_v26 = vmax.f32 %v8261_v16, %v8357_v2  ;;  %v7521_v8 = vadd.f32 %v7520_v27, %v7272_v7 }
 0x51d   : > { %8919 = vst.msk [vmem:[%s12430_s12 + $0x30] sm:$0xf] %vm8906_vm7, %v8902_v56  ;;  %v15188_v60 = vld [vmem:[#allocation5 + $0x290] ss:$2 sm:$0xff] }
 0x51e   : > { %v8737_v47 = vmax.f32 %v8693_v45, %v15188_v60  ;;  %8549 = vst.msk [vmem:[#allocation5 + $0x2a0] sm:$0xff] %vm2601_vm11, %v8453_v26  ;;  %v7770_v43 = vadd.f32 %v7769_v1, %v7521_v8 }
 0x51f   : > { %v7779_v0 = vpop.f32.mrf.mxu3 }
 0x520   : > { %8781 = vst.msk [vmem:[#allocation6 + $0x128] sm:$0xff] %vm2601_vm11, %v8737_v47  ;;  %v7879_v62 = vmax.f32 %v7770_v43, 0.0  ;;  %v7523_v14 = vpop.f32.mrf.mxu2 }
 0x521   : > { %v8166_v57 = vld [vmem:[#allocation4 + $0x2a9] sm:$0xff]  ;;  %v7274_v50 = vpop.f32.mrf.mxu1 }
 0x522   : > { %v8262_v28 = vmax.f32 %v8070_v41, %v8166_v57  ;;  %7975 = vst.msk [vmem:[#allocation4 + $0x2b8] sm:$0xff] %vm2601_vm11, %v7879_v62  ;;  %v7275_v19 = vadd.f32 %v15147_v25, %v7274_v50  ;;  %v8358_v30 = vld [vmem:[#allocation4 + $0x2aa] sm:$0xff] }
 0x523   : > { %v8071_v13 = vld [vmem:[#allocation4 + $0x2b0] sm:$0xff] }
 0x524   : > { %v8454_v51 = vmax.f32 %v8262_v28, %v8358_v30  ;;  %v7524_v33 = vadd.f32 %v7523_v14, %v7275_v19 }
 0x526   : > { %8550 = vst.msk [vmem:[#allocation5 + $0x2a8] sm:$0xff] %vm2601_vm11, %v8454_v51  ;;  %v7773_v53 = vadd.f32 %v7772_v29, %v7524_v33 }
 0x527   : > { %v7782_v43 = vpop.f32.mrf.mxu3 }
 0x528   : > { %v7880_v35 = vmax.f32 %v7773_v53, 0.0  ;;  %v7525_v36 = vpop.f32.mrf.mxu2 }
 0x529   : > { %v8167_v31 = vld [vmem:[#allocation4 + $0x2b1] sm:$0xff]  ;;  %v7276_v40 = vpop.f32.mrf.mxu1 }
 0x52a   : > { %v8263_v9 = vmax.f32 %v8071_v13, %v8167_v31  ;;  %7976 = vst.msk [vmem:[#allocation4 + $0x2c0] sm:$0xff] %vm2601_vm11, %v7880_v35  ;;  %v7277_v21 = vadd.f32 %v15147_v25, %v7276_v40  ;;  %v8359_v39 = vld [vmem:[#allocation4 + $0x2b2] sm:$0xff] }
 0x52b   : > { %v8072_v18 = vld [vmem:[#allocation4 + $0x2b8] sm:$0xff]  ;;  %v8807_v35 = vld [vmem:[#allocation6 + $0x128] sm:$0x7] }
 0x52c   : > { %v8455_v11 = vmax.f32 %v8263_v9, %v8359_v39  ;;  %v7526_v55 = vadd.f32 %v7525_v36, %v7277_v21  ;;  %v8869_v40 = vrot.slane %v8807_v35, 5 }
 0x52d   : > { %v8645_v52 = vld [vmem:[#allocation5 + $0x2a0] ss:$2 sm:$0xff] }
 0x52e   : > { %8551 = vst.msk [vmem:[#allocation5 + $0x2b0] sm:$0xff] %vm2601_vm11, %v8455_v11  ;;  %v7775_v23 = vadd.f32 %v7774_v49, %v7526_v55  ;;  %v8696_v57 = vmax.f32 %v15166_v4, %v8645_v52 }
 0x52f   : > { %v7784_v53 = vpop.f32.mrf.mxu3 }
 0x530   : > { %v7881_v48 = vmax.f32 %v7775_v23, 0.0 }
 0x531   : > { %v8168_v6 = vld [vmem:[#allocation4 + $0x2b9] sm:$0xff]  ;;  %v7279_v59 = vpop.f32.mrf.mxu1 }
 0x532   : > { %v8264_v37 = vmax.f32 %v8072_v18, %v8168_v6  ;;  %7977 = vst.msk [vmem:[#allocation4 + $0x2c8] sm:$0xff] %vm2601_vm11, %v7881_v48  ;;  %v7280_v61 = vadd.f32 %v15147_v25, %v7279_v59  ;;  %v8360_v44 = vld [vmem:[#allocation4 + $0x2ba] sm:$0xff]  ;;  %v8870_v18 = vsel %vm5405_vm6, %v8868_v20, %v8869_v40 }
 0x533   : > { %v7528_v38 = vpop.f32.mrf.mxu2  ;;  %v8073_v54 = vld [vmem:[#allocation4 + $0x2c0] sm:$0xff] }
 0x534   : > { %v8456_v24 = vmax.f32 %v8264_v37, %v8360_v44  ;;  %v7529_v58 = vadd.f32 %v7528_v38, %v7280_v61 }
 0x536   : > { %8552 = vst.msk [vmem:[#allocation5 + $0x2b8] sm:$0xff] %vm2601_vm11, %v8456_v24  ;;  %v7778_v10 = vadd.f32 %v7777_v22, %v7529_v58  ;;  %v10524_v24 = vmov 0.0  }
 0x537   : > { %v7787_v44 = vpop.f32.mrf.mxu3  ;;  %7984 = vst.msk [vmem:[#allocation4 + $0x300] sm:$0xff] %vm2601_vm11, %v10524_v24 }
 0x538   : > { %v7882_v17 = vmax.f32 %v7778_v10, 0.0 }
 0x539   : > { %v8169_v15 = vld [vmem:[#allocation4 + $0x2c1] sm:$0xff]  ;;  %v7281_v34 = vpop.f32.mrf.mxu1 }
 0x53a   : > { %v8265_v1 = vmax.f32 %v8073_v54, %v8169_v15  ;;  %7978 = vst.msk [vmem:[#allocation4 + $0x2d0] sm:$0xff] %vm2601_vm11, %v7882_v17  ;;  %v8361_v3 = vld [vmem:[#allocation4 + $0x2c2] sm:$0xff]  ;;  %v7282_v46 = vadd.f32 %v15147_v25, %v7281_v34 }
 0x53b   : > { %v7530_v42 = vpop.f32.mrf.mxu2  ;;  %v8074_v32 = vld [vmem:[#allocation4 + $0x2c8] sm:$0xff] }
 0x53c   : > { %v8457_v63 = vmax.f32 %v8265_v1, %v8361_v3  ;;  %v7531_v12 = vadd.f32 %v7530_v42, %v7282_v46 }
 0x53d   : > { %v15203_v56 = vld [vmem:[#allocation5 + $0x2b0] ss:$2 sm:$0xff] }
 0x53e   : > { %8553 = vst.msk [vmem:[#allocation5 + $0x2c0] sm:$0xff] %vm2601_vm11, %v8457_v63  ;;  %v7780_v7 = vadd.f32 %v7779_v0, %v7531_v12  ;;  %v8697_v58 = vmax.f32 %v15188_v60, %v15203_v56 }
 0x540   : > { %v7883_v26 = vmax.f32 %v7780_v7, 0.0 }
 0x541   : > { %v8170_v27 = vld [vmem:[#allocation4 + $0x2c9] sm:$0xff]  ;;  %v7284_v8 = vpop.f32.mrf.mxu1 }
 0x542   : > { %v8266_v16 = vmax.f32 %v8074_v32, %v8170_v27  ;;  %v8362_v45 = vld [vmem:[#allocation4 + $0x2ca] sm:$0xff]  ;;  %v7285_v29 = vadd.f32 %v15147_v25, %v7284_v8  ;;  %7979 = vst.msk [vmem:[#allocation4 + $0x2d8] sm:$0xff] %vm2601_vm11, %v7883_v26  ;;  %v7789_v32 = vpop.f32.mrf.mxu3  ;;  %v8924_v26 = vld [vmem:[%s12430_s12 + $0x3c] sm:$0x1] }
 0x543   : > { %v7533_v47 = vpop.f32.mrf.mxu2  ;;  %v8075_v28 = vld [vmem:[#allocation4 + $0x2d0] sm:$0xff] }
 0x544   : > { %v8458_v2 = vmax.f32 %v8266_v16, %v8362_v45  ;;  %v7534_v62 = vadd.f32 %v7533_v47, %v7285_v29 }
 0x546   : > { %8554 = vst.msk [vmem:[#allocation5 + $0x2c8] sm:$0xff] %vm2601_vm11, %v8458_v2  ;;  %v7783_v41 = vadd.f32 %v7782_v43, %v7534_v62 }
 0x548   : > { %v7884_v50 = vmax.f32 %v7783_v41, 0.0 }
 0x549   : > { %v8171_v30 = vld [vmem:[#allocation4 + $0x2d1] sm:$0xff]  ;;  %v7286_v13 = vpop.f32.mrf.mxu1 }
 0x54a   : > { %7980 = vst.msk [vmem:[#allocation4 + $0x2e0] sm:$0xff] %vm2601_vm11, %v7884_v50  ;;  %v8267_v51 = vmax.f32 %v8075_v28, %v8171_v30  ;;  %v8363_v33 = vld [vmem:[#allocation4 + $0x2d2] sm:$0xff]  ;;  %v7287_v4 = vadd.f32 %v15147_v25, %v7286_v13 }
 0x54b   : > { %v7535_v31 = vpop.f32.mrf.mxu2  ;;  %v8076_v36 = vld [vmem:[#allocation4 + $0x2d8] sm:$0xff] }
 0x54c   : > { %v8459_v49 = vmax.f32 %v8267_v51, %v8363_v33  ;;  %v7536_v21 = vadd.f32 %v7535_v31, %v7287_v4 }
 0x54d   : > { %v8649_v14 = vld [vmem:[#allocation5 + $0x2c0] ss:$2 sm:$0xff] }
 0x54e   : > { %v8740_v19 = vmax.f32 %v8696_v57, %v8649_v14  ;;  %8555 = vst.msk [vmem:[#allocation5 + $0x2d0] sm:$0xff] %vm2601_vm11, %v8459_v49  ;;  %v7785_v52 = vadd.f32 %v7784_v53, %v7536_v21 }
 0x550   : > { %8784 = vst.msk [vmem:[#allocation6 + $0x140] sm:$0xff] %vm2601_vm11, %v8740_v19  ;;  %v7885_v6 = vmax.f32 %v7785_v52, 0.0 }
 0x551   : > { %v8172_v9 = vld [vmem:[#allocation4 + $0x2d9] sm:$0xff]  ;;  %v7289_v38 = vpop.f32.mrf.mxu1 }
 0x552   : > { %v8268_v39 = vmax.f32 %v8076_v36, %v8172_v9  ;;  %v8364_v55 = vld [vmem:[#allocation4 + $0x2da] sm:$0xff]  ;;  %7981 = vst.msk [vmem:[#allocation4 + $0x2e8] sm:$0xff] %vm2601_vm11, %v7885_v6  ;;  %v7290_v61 = vadd.f32 %v15147_v25, %v7289_v38 }
 0x553   : > { %v7538_v22 = vpop.f32.mrf.mxu2  ;;  %v8077_v54 = vld [vmem:[#allocation4 + $0x2e0] sm:$0xff] }
 0x554   : > { %v8460_v48 = vmax.f32 %v8268_v39, %v8364_v55  ;;  %v7539_v5 = vadd.f32 %v7538_v22, %v7290_v61 }
 0x556   : > { %8556 = vst.msk [vmem:[#allocation5 + $0x2d8] sm:$0xff] %vm2601_vm11, %v8460_v48  ;;  %v7788_v20 = vadd.f32 %v7787_v44, %v7539_v5 }
 0x557   : > { %v8808_v11 = vld [vmem:[#allocation6 + $0x140] sm:$0xff] }
 0x558   : > { %v8875_v23 = vrot.slane %v8808_v11, 2  ;;  %v7886_v17 = vmax.f32 %v7788_v20, 0.0 }
 0x559   : > { %v8173_v1 = vld [vmem:[#allocation4 + $0x2e1] sm:$0xff]  ;;  %v7291_v3 = vpop.f32.mrf.mxu1 }
 0x55a   : > { %v8889_v59 = vsel %vm8820_vm13, %v8870_v18, %v8875_v23  ;;  %v8269_v63 = vmax.f32 %v8077_v54, %v8173_v1  ;;  %7982 = vst.msk [vmem:[#allocation4 + $0x2f0] sm:$0xff] %vm2601_vm11, %v7886_v17  ;;  %v7292_v34 = vadd.f32 %v15147_v25, %v7291_v3  ;;  %v8365_v42 = vld [vmem:[#allocation4 + $0x2e2] sm:$0xff] }
 0x55b   : > { %v8903_v37 = vpack.c.bf16 %v8889_v59, %v8889_v59  ;;  %v7540_v0 = vpop.f32.mrf.mxu2  ;;  %v8078_v27 = vld [vmem:[#allocation4 + $0x2e8] sm:$0xff] }
 0x55c   : > { %v8461_v46 = vmax.f32 %v8269_v63, %v8365_v42  ;;  %v7541_v12 = vadd.f32 %v7540_v0, %v7292_v34 }
 0x55d   : > { %8920 = vst.msk [vmem:[%s12430_s12 + $0x34] sm:$0xf] %vm8906_vm7, %v8903_v37  ;;  %v8651_v10 = vld [vmem:[#allocation5 + $0x2d0] ss:$2 sm:$0xff] }
 0x55e   : > { %v8741_v15 = vmax.f32 %v8697_v58, %v8651_v10  ;;  %8557 = vst.msk [vmem:[#allocation5 + $0x2e0] sm:$0xff] %vm2601_vm11, %v8461_v46  ;;  %v7790_v60 = vadd.f32 %v7789_v32, %v7541_v12 }
 0x560   : > { %8785 = vst.msk [vmem:[#allocation6 + $0x148] sm:$0xff] %vm2601_vm11, %v8741_v15  ;;  %v7887_v56 = vmax.f32 %v7790_v60, 0.0 }
 0x561   : > { %v8174_v16 = vld [vmem:[#allocation4 + $0x2e9] sm:$0xff] }
 0x562   : > { %v8270_v45 = vmax.f32 %v8078_v27, %v8174_v16  ;;  %7983 = vst.msk [vmem:[#allocation4 + $0x2f8] sm:$0xff] %vm2601_vm11, %v7887_v56  ;;  %v8366_v2 = vld [vmem:[#allocation4 + $0x2ea] sm:$0xff] }
 0x563   : > { %v8079_v41 = vld [vmem:[#allocation4 + $0x2f0] sm:$0xff] }
 0x564   : > { %v8462_v8 = vmax.f32 %v8270_v45, %v8366_v2 }
 0x566   : > { %8558 = vst.msk [vmem:[#allocation5 + $0x2e8] sm:$0xff] %vm2601_vm11, %v8462_v8 }
 0x567   : > { %v8809_v7 = vld [vmem:[#allocation6 + $0x148] sm:$0x7] }
 0x568   : > { %v8876_v25 = vrot.slane %v8809_v7, 2 }
 0x569   : > { %v8080_v57 = vld [vmem:[#allocation4 + $0x2f8] sm:$0xff] }
 0x56a   : > { %v8877_v47 = vsel %vm8820_vm13, %v8875_v23, %v8876_v25  ;;  %v8905_v29 = vpack.c.bf16 %v8876_v25, %v8876_v25  ;;  %v8175_v50 = vld [vmem:[#allocation4 + $0x2f1] sm:$0xff]  ;;  %v8176_v14 = vld [vmem:[#allocation4 + $0x2f9] sm:$0xff] }
 0x56b   : > { %v8904_v43 = vpack.c.bf16 %v8877_v47, %v8877_v47  ;;  %v8271_v28 = vmax.f32 %v8079_v41, %v8175_v50  ;;  %v8272_v19 = vmax.f32 %v8080_v57, %v8176_v14  ;;  %v8367_v30 = vld [vmem:[#allocation4 + $0x2f2] sm:$0xff]  ;;  %v8368_v51 = vld [vmem:[#allocation4 + $0x2fa] sm:$0xff] }
 0x56c   : > { %v8925_v62 = vsel %vm8923_vm2, %v8905_v29, %v8924_v26 }
 0x56d   : > { %8921 = vst.msk [vmem:[%s12430_s12 + $0x38] sm:$0xf] %vm8906_vm7, %v8904_v43  ;;  %v8463_v33 = vmax.f32 %v8271_v28, %v8367_v30  ;;  %v8464_v53 = vmax.f32 %v8272_v19, %v8368_v51 }
 0x56e   : > { %8926 = vst [vmem:[%s12430_s12 + $0x3c] sm:$0x1] %v8925_v62 }
 0x56f   : > { %8559 = vst.msk [vmem:[#allocation5 + $0x2f0] sm:$0xff] %vm2601_vm11, %v8463_v33 }
 0x570   : > { %8560 = vst.msk [vmem:[#allocation5 + $0x2f8] sm:$0xff] %vm2601_vm11, %v8464_v53 }
 0x571 PF: > { %s15_s18 = sadd.s32 1, %s10518_s18  }
 0x572   : > { %p12_p5 = scmp.ge.s32.totalorder %s15_s18, 4  }
 0x574   :  { %14 = sbr.rel (!%p12_p5) target bundleno = 1 (0x1), region = 117 }

</bundles_post_ra>
